<compile_context>
chip_gen: v7x
topology: tpu7x:2x2x1
jax: 0.10.0
libtpu: 0.0.40
codegen_flags: <defaults>
</compile_context>

<pallas_src>
import functools

import jax
import jax.numpy as jnp
from jax.experimental import pallas as pl
from jax.experimental.pallas import tpu as pltpu

NUM_CLASSES = 36
MAX_LENGTH = 10
NCP1 = NUM_CLASSES + 1          # 37 real classes per sequence position
GROUP_WIDTH = 128               # classes padded to a full lane group
STEM_CH_RAW = 24                # real stem channels
STEM_CH = 128                   # padded to a full lane group
EXP_CH = 1280                   # EfficientNetV2-S final feature width


# ----------------------------------------------------------------------------
# Kernel 1: stem matmul + SiLU + 1x1 expansion + SiLU + global-avg-pool accum.
# ----------------------------------------------------------------------------
def _backbone_kernel(p_ref, ws_ref, bs_ref, we_ref, be_ref, pooled_ref,
                     acc_ref, *, inv_hw):
    t = pl.program_id(1)

    @pl.when(t == 0)
    def _():
        acc_ref[...] = jnp.zeros_like(acc_ref)

    x = p_ref[0]                                          # (tile, Kp) bf16
    h1 = jnp.dot(x, ws_ref[...],
                 preferred_element_type=jnp.float32) + bs_ref[...]
    h1 = h1 * jax.nn.sigmoid(h1)                          # SiLU (f32)
    h2 = jnp.dot(h1.astype(jnp.bfloat16), we_ref[...],
                 preferred_element_type=jnp.float32) + be_ref[...]
    h2 = h2 * jax.nn.sigmoid(h2)                          # SiLU (f32)
    acc_ref[...] += jnp.sum(h2, axis=0, keepdims=True)    # pool accumulation

    @pl.when(t == pl.num_programs(1) - 1)
    def _():
        pooled_ref[0] = (acc_ref[...] * inv_hw).astype(pooled_ref.dtype)


def _pick_tile_rows(hw, cap=512):
    """Largest multiple-of-8 divisor of hw that is <= cap (fallback: hw)."""
    best = None
    t = 8
    while t <= min(hw, cap):
        if hw % t == 0:
            best = t
        t += 8
    return best if best is not None else hw


def backbone_fused(patches, params):
    """patches: (B, HW, Kp) bf16 -> pooled features (B, 1, EXP_CH) bf16."""
    B, HW, Kp = patches.shape
    CS = params["w_stem"].shape[1]
    CE = params["w_exp"].shape[1]
    tile = _pick_tile_rows(HW)
    n_tiles = HW // tile if HW % tile == 0 else 1
    kernel = functools.partial(_backbone_kernel, inv_hw=1.0 / HW)
    return pl.pallas_call(
        kernel,
        out_shape=jax.ShapeDtypeStruct((B, 1, CE), jnp.bfloat16),
        grid=(B, n_tiles),
        in_specs=[
            pl.BlockSpec((1, tile, Kp), lambda b, t: (b, t, 0)),
            pl.BlockSpec((Kp, CS), lambda b, t: (0, 0)),
            pl.BlockSpec((1, CS), lambda b, t: (0, 0)),
            pl.BlockSpec((CS, CE), lambda b, t: (0, 0)),
            pl.BlockSpec((1, CE), lambda b, t: (0, 0)),
        ],
        out_specs=pl.BlockSpec((1, 1, CE), lambda b, t: (b, 0, 0)),
        scratch_shapes=[pltpu.VMEM((1, CE), jnp.float32)],
        compiler_params=pltpu.CompilerParams(
            dimension_semantics=("parallel", "arbitrary")),
    )(patches, params["w_stem"], params["b_stem"],
      params["w_exp"], params["b_exp"])


# ----------------------------------------------------------------------------
# Kernel 2: FC head (1280 -> 10*128 padded) fused with per-position softmax.
# ----------------------------------------------------------------------------
def _fc_softmax_kernel(x_ref, w_ref, b_ref, o_ref):
    logits = jnp.dot(x_ref[...], w_ref[...],
                     preferred_element_type=jnp.float32) + b_ref[...]
    m = jnp.max(logits, axis=-1, keepdims=True)
    e = jnp.exp(logits - m)                     # padded lanes: exp(-1e30-m)=0
    o_ref[...] = e / jnp.sum(e, axis=-1, keepdims=True)


def fc_softmax_fused(pooled, params):
    """pooled: (B, EXP_CH) bf16 -> padded probs (B, MAX_LENGTH*GROUP_WIDTH) f32."""
    B, CE = pooled.shape
    NGW = params["w_fc"].shape[1]               # MAX_LENGTH * GROUP_WIDTH
    GW = NGW // MAX_LENGTH
    return pl.pallas_call(
        _fc_softmax_kernel,
        out_shape=jax.ShapeDtypeStruct((B, NGW), jnp.float32),
        grid=(MAX_LENGTH,),
        in_specs=[
            pl.BlockSpec((B, CE), lambda g: (0, 0)),
            pl.BlockSpec((CE, GW), lambda g: (0, g)),
            pl.BlockSpec((1, GW), lambda g: (0, g)),
        ],
        out_specs=pl.BlockSpec((B, GW), lambda g: (0, g)),
        compiler_params=pltpu.CompilerParams(
            dimension_semantics=("parallel",)),
    )(pooled, params["w_fc"], params["b_fc"])


# ----------------------------------------------------------------------------
# Parameters (pre-padded / pre-cast once at init, not per forward call)
# ----------------------------------------------------------------------------
def init_params(key, cin=3):
    k1, k2, k3 = jax.random.split(key, 3)
    k_raw = 9 * cin
    k_pad = max(8, ((k_raw + 7) // 8) * 8)      # im2col K padded to sublanes

    # stem conv 3x3/s2: 9*cin -> 24, padded to (k_pad, 128)
    w_stem = 0.1 * jax.random.normal(k1, (k_raw, STEM_CH_RAW), jnp.float32)
    w_stem_p = jnp.zeros((k_pad, STEM_CH), jnp.float32)
    w_stem_p = w_stem_p.at[:k_raw, :STEM_CH_RAW].set(w_stem)
    b_stem_p = jnp.zeros((1, STEM_CH), jnp.float32)

    # 1x1 expansion conv: 24 -> 1280, padded to (128, 1280)
    w_exp = 0.05 * jax.random.normal(k2, (STEM_CH_RAW, EXP_CH), jnp.float32)
    w_exp_p = jnp.zeros((STEM_CH, EXP_CH), jnp.float32)
    w_exp_p = w_exp_p.at[:STEM_CH_RAW, :].set(w_exp)
    b_exp_p = jnp.zeros((1, EXP_CH), jnp.float32)

    # fc head: 1280 -> 10*37, each 37-class group padded to 128 lanes.
    w_fc = 0.02 * jax.random.normal(
        k3, (EXP_CH, MAX_LENGTH * NCP1), jnp.float32)
    w_fc_p = jnp.pad(
        w_fc.reshape(EXP_CH, MAX_LENGTH, NCP1),
        ((0, 0), (0, 0), (0, GROUP_WIDTH - NCP1)),
    ).reshape(EXP_CH, MAX_LENGTH * GROUP_WIDTH)
    b_fc = jnp.zeros((MAX_LENGTH, NCP1), jnp.float32)
    b_fc_p = jnp.pad(
        b_fc, ((0, 0), (0, GROUP_WIDTH - NCP1)), constant_values=-1e30,
    ).reshape(1, MAX_LENGTH * GROUP_WIDTH)

    return {
        "w_stem": w_stem_p.astype(jnp.bfloat16),
        "b_stem": b_stem_p,
        "w_exp": w_exp_p.astype(jnp.bfloat16),
        "b_exp": b_exp_p,
        "w_fc": w_fc_p.astype(jnp.bfloat16),
        "b_fc": b_fc_p,
        "k_pad": k_pad,
    }


# ----------------------------------------------------------------------------
# Forward pass
# ----------------------------------------------------------------------------
def cnn_model_forward(x_nchw, params):
    B, Cin, H, W = x_nchw.shape
    x = jnp.transpose(x_nchw, (0, 2, 3, 1))               # NCHW -> NHWC

    # --- im2col for the 3x3/stride-2/pad-1 stem (kept in XLA; tiny here) ---
    Ho, Wo = H // 2, W // 2
    HW = Ho * Wo
    xp = jnp.pad(x, ((0, 0), (1, 1), (1, 1), (0, 0)))
    cols = []
    for dh in range(3):
        for dw in range(3):
            cols.append(xp[:, dh:dh + 2 * Ho:2, dw:dw + 2 * Wo:2, :])
    patches = jnp.concatenate(cols, axis=-1).reshape(B, HW, 9 * Cin)
    k_pad = params["w_stem"].shape[0]
    if k_pad > 9 * Cin:
        patches = jnp.pad(patches, ((0, 0), (0, 0), (0, k_pad - 9 * Cin)))
    patches = patches.astype(jnp.bfloat16)

    # --- fused stem + expansion + global-avg-pool: (B, 1, 1280) ---
    feats_seq = backbone_fused(patches, params)

    # --- fused FC head + softmax (group-padded to 128 lanes) ---
    probs_pad = fc_softmax_fused(feats_seq.reshape(B, EXP_CH), params)
    probs = probs_pad.reshape(B, MAX_LENGTH, GROUP_WIDTH)[:, :, :NCP1]
    return probs                                          # (B, 10, 37)


if __name__ == "__main__":
    key = jax.random.PRNGKey(0)
    kx, kp = jax.random.split(key)

    B, Cin, H, W = 2, 3, 32, 32
    x = jax.random.normal(kx, (B, Cin, H, W), jnp.float32)  # NCHW like PyTorch
    params = init_params(kp, cin=Cin)

    fwd = jax.jit(cnn_model_forward)
    probs = jax.block_until_ready(fwd(x, params))

    assert probs.shape == (B, MAX_LENGTH, NCP1), probs.shape
    assert bool(jnp.all(jnp.isfinite(probs)))
    row_sums = jnp.sum(probs, axis=-1)
    assert bool(jnp.all(jnp.abs(row_sums - 1.0) < 1e-4))
    print("KERNEL_OK")
</pallas_src>

<mosaic_0001>
module attributes {stable_mosaic.version = 11 : i64} {
  func.func @_backbone_kernel(%arg0: i32, %arg1: i32, %arg2: memref<1x256x32xbf16, #tpu.memory_space<vmem>>, %arg3: memref<32x128xbf16, #tpu.memory_space<vmem>>, %arg4: memref<1x128xf32, #tpu.memory_space<vmem>>, %arg5: memref<128x1280xbf16, #tpu.memory_space<vmem>>, %arg6: memref<1x1280xf32, #tpu.memory_space<vmem>>, %arg7: memref<1x1x1280xbf16, #tpu.memory_space<vmem>>, %arg8: memref<1x1280xf32, #tpu.memory_space<vmem>>) attributes {dimension_semantics = [#tpu.dimension_semantics<parallel>, #tpu.dimension_semantics<arbitrary>], iteration_bounds = array<i64: 2, 1>, scalar_prefetch = 0 : i64, scratch_operands = 1 : i64, tpu.core_type = #tpu.core_type<tc>, window_params = [{transform_indices = @transform_0, window_bounds = array<i64: 1, 256, 32>}, {pipeline_mode = #tpu.pipeline_mode<synchronous>, transform_indices = @transform_1, window_bounds = array<i64: 32, 128>}, {pipeline_mode = #tpu.pipeline_mode<synchronous>, transform_indices = @transform_2, window_bounds = array<i64: 1, 128>}, {pipeline_mode = #tpu.pipeline_mode<synchronous>, transform_indices = @transform_3, window_bounds = array<i64: 128, 1280>}, {pipeline_mode = #tpu.pipeline_mode<synchronous>, transform_indices = @transform_4, window_bounds = array<i64: 1, 1280>}, {transform_indices = @transform_5, window_bounds = array<i64: 1, 1, 1280>}]} {
    %c0_i32 = arith.constant 0 : i32
    %0 = arith.cmpi eq, %arg1, %c0_i32 : i32
    %1 = arith.extui %0 : i1 to i32
    %c0_i32_0 = arith.constant 0 : i32
    %2 = arith.cmpi ne, %1, %c0_i32_0 : i32
    scf.if %2 {
      %cst_21 = arith.constant 0.000000e+00 : f32
      %36 = vector.broadcast %cst_21 : f32 to vector<1x1280xf32>
      %c0_22 = arith.constant 0 : index
      %c0_23 = arith.constant 0 : index
      %37 = vector.load %arg8[%c0_22, %c0_23] : memref<1x1280xf32, #tpu.memory_space<vmem>>, vector<1x1280xf32>
      tpu.vector_store %arg8[%c0_22, %c0_23], %36 {strides = array<i32>} : memref<1x1280xf32, #tpu.memory_space<vmem>>, vector<1x1280xf32>,
    } else {
    }
    %c0 = arith.constant 0 : index
    %c0_1 = arith.constant 0 : index
    %c0_2 = arith.constant 0 : index
    %3 = vector.load %arg2[%c0, %c0_1, %c0_2] : memref<1x256x32xbf16, #tpu.memory_space<vmem>>, vector<1x256x32xbf16>
    %4 = vector.shape_cast %3 : vector<1x256x32xbf16> to vector<256x32xbf16>
    %c0_3 = arith.constant 0 : index
    %c0_4 = arith.constant 0 : index
    %5 = vector.load %arg3[%c0_3, %c0_4] : memref<32x128xbf16, #tpu.memory_space<vmem>>, vector<32x128xbf16>
    %cst = arith.constant dense<0.000000e+00> : vector<256x128xf32>
    %6 = tpu.matmul %4, %5, %cst {dimension_numbers = #tpu.dot_dimension_numbers<[1], [0], [0], [1], [0, 0, 1, 1], [], []>} : vector<256x32xbf16>, vector<32x128xbf16>, vector<256x128xf32> -> vector<256x128xf32>
    %c0_5 = arith.constant 0 : index
    %c0_6 = arith.constant 0 : index
    %7 = vector.load %arg4[%c0_5, %c0_6] : memref<1x128xf32, #tpu.memory_space<vmem>>, vector<1x128xf32>
    %8 = vector.broadcast %7 : vector<1x128xf32> to vector<256x128xf32>
    %9 = arith.addf %6, %8 : vector<256x128xf32>
    %10 = arith.negf %9 : vector<256x128xf32>
    %11 = math.exp %10 : vector<256x128xf32>
    %cst_7 = arith.constant 1.000000e+00 : f32
    %12 = vector.broadcast %cst_7 : f32 to vector<256x128xf32>
    %13 = arith.addf %12, %11 : vector<256x128xf32>
    %14 = arith.divf %12, %13 : vector<256x128xf32>
    %15 = arith.mulf %9, %14 : vector<256x128xf32>
    %16 = arith.truncf %15 : vector<256x128xf32> to vector<256x128xbf16>
    %c0_8 = arith.constant 0 : index
    %c0_9 = arith.constant 0 : index
    %17 = vector.load %arg5[%c0_8, %c0_9] : memref<128x1280xbf16, #tpu.memory_space<vmem>>, vector<128x1280xbf16>
    %cst_10 = arith.constant dense<0.000000e+00> : vector<256x1280xf32>
    %18 = tpu.matmul %16, %17, %cst_10 {dimension_numbers = #tpu.dot_dimension_numbers<[1], [0], [0], [1], [0, 0, 1, 1], [], []>} : vector<256x128xbf16>, vector<128x1280xbf16>, vector<256x1280xf32> -> vector<256x1280xf32>
    %c0_11 = arith.constant 0 : index
    %c0_12 = arith.constant 0 : index
    %19 = vector.load %arg6[%c0_11, %c0_12] : memref<1x1280xf32, #tpu.memory_space<vmem>>, vector<1x1280xf32>
    %20 = vector.broadcast %19 : vector<1x1280xf32> to vector<256x1280xf32>
    %21 = arith.addf %18, %20 : vector<256x1280xf32>
    %22 = arith.negf %21 : vector<256x1280xf32>
    %23 = math.exp %22 : vector<256x1280xf32>
    %cst_13 = arith.constant 1.000000e+00 : f32
    %24 = vector.broadcast %cst_13 : f32 to vector<256x1280xf32>
    %25 = arith.addf %24, %23 : vector<256x1280xf32>
    %26 = arith.divf %24, %25 : vector<256x1280xf32>
    %27 = arith.mulf %21, %26 : vector<256x1280xf32>
    %c0_14 = arith.constant 0 : index
    %c0_15 = arith.constant 0 : index
    %28 = vector.load %arg8[%c0_14, %c0_15] : memref<1x1280xf32, #tpu.memory_space<vmem>>, vector<1x1280xf32>
    %cst_16 = arith.constant dense<0.000000e+00> : vector<1280xf32>
    %29 = vector.multi_reduction <add>, %27, %cst_16 [0] : vector<256x1280xf32> to vector<1280xf32>
    %30 = vector.shape_cast %29 : vector<1280xf32> to vector<1x1280xf32>
    %31 = arith.addf %28, %30 : vector<1x1280xf32>
    %c0_17 = arith.constant 0 : index
    %c0_18 = arith.constant 0 : index
    %32 = vector.load %arg8[%c0_17, %c0_18] : memref<1x1280xf32, #tpu.memory_space<vmem>>, vector<1x1280xf32>
    tpu.vector_store %arg8[%c0_17, %c0_18], %31 {strides = array<i32>} : memref<1x1280xf32, #tpu.memory_space<vmem>>, vector<1x1280xf32>,
    %c0_i32_19 = arith.constant 0 : i32
    %33 = arith.cmpi eq, %arg1, %c0_i32_19 : i32
    %34 = arith.extui %33 : i1 to i32
    %c0_i32_20 = arith.constant 0 : i32
    %35 = arith.cmpi ne, %34, %c0_i32_20 : i32
    scf.if %35 {
      %c0_21 = arith.constant 0 : index
      %c0_22 = arith.constant 0 : index
      %36 = vector.load %arg8[%c0_21, %c0_22] : memref<1x1280xf32, #tpu.memory_space<vmem>>, vector<1x1280xf32>
      %cst_23 = arith.constant 3.906250e-03 : f32
      %37 = vector.broadcast %cst_23 : f32 to vector<1x1280xf32>
      %38 = arith.mulf %36, %37 : vector<1x1280xf32>
      %39 = arith.truncf %38 : vector<1x1280xf32> to vector<1x1280xbf16>
      %c0_24 = arith.constant 0 : index
      %c0_25 = arith.constant 0 : index
      %c0_26 = arith.constant 0 : index
      %40 = vector.load %arg7[%c0_24, %c0_25, %c0_26] : memref<1x1x1280xbf16, #tpu.memory_space<vmem>>, vector<1x1x1280xbf16>
      %41 = vector.shape_cast %40 : vector<1x1x1280xbf16> to vector<1x1280xbf16>
      %42 = vector.shape_cast %39 : vector<1x1280xbf16> to vector<1x1x1280xbf16>
      tpu.vector_store %arg7[%c0_24, %c0_25, %c0_26], %42 {strides = array<i32>} : memref<1x1x1280xbf16, #tpu.memory_space<vmem>>, vector<1x1x1280xbf16>,
    } else {
    }
    return
  }
  func.func @transform_0(%arg0: i32, %arg1: i32) -> (i32, i32, i32) {
    %c0_i32 = arith.constant 0 : i32
    %c0_i32_0 = arith.constant 0 : i32
    return %arg0, %arg1, %c0_i32 : i32, i32, i32
  }
  func.func @transform_1(%arg0: i32, %arg1: i32) -> (i32, i32) {
    %c0_i32 = arith.constant 0 : i32
    %c0_i32_0 = arith.constant 0 : i32
    %c0_i32_1 = arith.constant 0 : i32
    return %c0_i32, %c0_i32_0 : i32, i32
  }
  func.func @transform_2(%arg0: i32, %arg1: i32) -> (i32, i32) {
    %c0_i32 = arith.constant 0 : i32
    %c0_i32_0 = arith.constant 0 : i32
    %c0_i32_1 = arith.constant 0 : i32
    return %c0_i32, %c0_i32_0 : i32, i32
  }
  func.func @transform_3(%arg0: i32, %arg1: i32) -> (i32, i32) {
    %c0_i32 = arith.constant 0 : i32
    %c0_i32_0 = arith.constant 0 : i32
    %c0_i32_1 = arith.constant 0 : i32
    return %c0_i32, %c0_i32_0 : i32, i32
  }
  func.func @transform_4(%arg0: i32, %arg1: i32) -> (i32, i32) {
    %c0_i32 = arith.constant 0 : i32
    %c0_i32_0 = arith.constant 0 : i32
    %c0_i32_1 = arith.constant 0 : i32
    return %c0_i32, %c0_i32_0 : i32, i32
  }
  func.func @transform_5(%arg0: i32, %arg1: i32) -> (i32, i32, i32) {
    %c0_i32 = arith.constant 0 : i32
    %c0_i32_0 = arith.constant 0 : i32
    %c0_i32_1 = arith.constant 0 : i32
    return %arg0, %c0_i32, %c0_i32_0 : i32, i32, i32
  }
}

module attributes {stable_mosaic.version = 11 : i64} {
  func.func @_fc_softmax_kernel(%arg0: i32, %arg1: memref<2x1280xbf16, #tpu.memory_space<vmem>>, %arg2: memref<1280x128xbf16, #tpu.memory_space<vmem>>, %arg3: memref<1x128xf32, #tpu.memory_space<vmem>>, %arg4: memref<2x128xf32, #tpu.memory_space<vmem>>) attributes {dimension_semantics = [#tpu.dimension_semantics<parallel>], iteration_bounds = array<i64: 10>, scalar_prefetch = 0 : i64, scratch_operands = 0 : i64, tpu.core_type = #tpu.core_type<tc>, window_params = [{pipeline_mode = #tpu.pipeline_mode<synchronous>, transform_indices = @transform_0, window_bounds = array<i64: 2, 1280>}, {transform_indices = @transform_1, window_bounds = array<i64: 1280, 128>}, {transform_indices = @transform_2, window_bounds = array<i64: 1, 128>}, {transform_indices = @transform_3, window_bounds = array<i64: 2, 128>}]} {
    %c0 = arith.constant 0 : index
    %c0_0 = arith.constant 0 : index
    %0 = vector.load %arg1[%c0, %c0_0] : memref<2x1280xbf16, #tpu.memory_space<vmem>>, vector<2x1280xbf16>
    %c0_1 = arith.constant 0 : index
    %c0_2 = arith.constant 0 : index
    %1 = vector.load %arg2[%c0_1, %c0_2] : memref<1280x128xbf16, #tpu.memory_space<vmem>>, vector<1280x128xbf16>
    %cst = arith.constant dense<0.000000e+00> : vector<2x128xf32>
    %2 = tpu.matmul %0, %1, %cst {dimension_numbers = #tpu.dot_dimension_numbers<[1], [0], [0], [1], [0, 0, 1, 1], [], []>} : vector<2x1280xbf16>, vector<1280x128xbf16>, vector<2x128xf32> -> vector<2x128xf32>
    %c0_3 = arith.constant 0 : index
    %c0_4 = arith.constant 0 : index
    %3 = vector.load %arg3[%c0_3, %c0_4] : memref<1x128xf32, #tpu.memory_space<vmem>>, vector<1x128xf32>
    %4 = vector.broadcast %3 : vector<1x128xf32> to vector<2x128xf32>
    %5 = arith.addf %2, %4 : vector<2x128xf32>
    %cst_5 = arith.constant dense<0xFF800000> : vector<2xf32>
    %6 = vector.multi_reduction <maximumf>, %5, %cst_5 [1] : vector<2x128xf32> to vector<2xf32>
    %7 = vector.shape_cast %6 : vector<2xf32> to vector<2x1xf32>
    %8 = vector.broadcast %7 : vector<2x1xf32> to vector<2x128xf32>
    %9 = arith.subf %5, %8 : vector<2x128xf32>
    %10 = math.exp %9 : vector<2x128xf32>
    %cst_6 = arith.constant dense<0.000000e+00> : vector<2xf32>
    %11 = vector.multi_reduction <add>, %10, %cst_6 [1] : vector<2x128xf32> to vector<2xf32>
    %12 = vector.shape_cast %11 : vector<2xf32> to vector<2x1xf32>
    %13 = vector.broadcast %12 : vector<2x1xf32> to vector<2x128xf32>
    %14 = arith.divf %10, %13 : vector<2x128xf32>
    %c0_7 = arith.constant 0 : index
    %c0_8 = arith.constant 0 : index
    %15 = vector.load %arg4[%c0_7, %c0_8] : memref<2x128xf32, #tpu.memory_space<vmem>>, vector<2x128xf32>
    tpu.vector_store %arg4[%c0_7, %c0_8], %14 {strides = array<i32>} : memref<2x128xf32, #tpu.memory_space<vmem>>, vector<2x128xf32>,
    return
  }
  func.func @transform_0(%arg0: i32) -> (i32, i32) {
    %c0_i32 = arith.constant 0 : i32
    %c0_i32_0 = arith.constant 0 : i32
    %c0_i32_1 = arith.constant 0 : i32
    return %c0_i32, %c0_i32_0 : i32, i32
  }
  func.func @transform_1(%arg0: i32) -> (i32, i32) {
    %c0_i32 = arith.constant 0 : i32
    %c0_i32_0 = arith.constant 0 : i32
    return %c0_i32, %arg0 : i32, i32
  }
  func.func @transform_2(%arg0: i32) -> (i32, i32) {
    %c0_i32 = arith.constant 0 : i32
    %c0_i32_0 = arith.constant 0 : i32
    return %c0_i32, %arg0 : i32, i32
  }
  func.func @transform_3(%arg0: i32) -> (i32, i32) {
    %c0_i32 = arith.constant 0 : i32
    %c0_i32_0 = arith.constant 0 : i32
    return %c0_i32, %arg0 : i32, i32
  }
}

</mosaic_0001>

<bundles_post_ra>
// kernel: cnn_model_forward.3
= control target key start
LH: loop header
LB: loop body
LE: loop exit
PB: predicated region body
PF: predicated region fallthrough
CT: control target
= control target key end

     0   :  { %8 = vsyncpa [#allocation3], 0  ;;  %s1972_s0 = inlined_call_operand.vmem [shape: bf16[2,1280], index: 0, kind: input, shape index: {}]   ;;  %s1973_s1 = inlined_call_operand.hbm [shape: bf16[1280,1280], index: 1, kind: input, shape index: {}]   ;;  %s1974_s2 = inlined_call_operand.hbm [shape: f32[1,1280], index: 2, kind: input, shape index: {}]   ;;  %s1975_s3 = inlined_call_operand.vmem [shape: f32[2,1280], index: 3, kind: output, shape index: {}]  }
   0x1   :  { %10 = vsyncpa [#allocation3 + $0x1], 0 }
   0x2   :  { %11 = vsyncpa [#allocation5], 0 }
   0x3   :  { %13 = vsyncpa [#allocation5 + $0x1], 0  ;;  %s1715_s12 = smov 0   ;;  %s1717_s13 = smov 0  }
   0x4   :  { %s1719_s14 = smov 0   ;;  %s1721_s15 = smov 0  }
   0x5 LB: > { %s1734_s16 = sadd.s32 4294967295, %s1687_s15   ;;  %s1737_s17 = sadd.s32 1, %s1687_s15   ;;  %s1687_s15 = sphi %s1721_s15, %s1985_s15   ;;  %s1683_s14 = sphi %s1719_s14, %s1984_s14   ;;  %s1679_s13 = sphi %s1717_s13, %s1983_s13   ;;  %s1675_s12 = sphi %s1715_s12, %s1982_s12  }
   0x6   : > { %s44_s18 = ssub.s32 %s1687_s15, %s1737_s17  ;;  %s47_s19 = sadd.s32 1, %s1683_s14 }
   0x7   : > { %p45_p0 = scmp.eq.s32.totalorder %s44_s18, 0  ;;  %p54_p1 = scmp.ne.s32.totalorder %s1683_s14, %s1679_s13 }
   0x8   : > { %p55_p2 = scmp.eq.s32.totalorder %s1687_s15, 0  ;;  %p60_p3 = scmp.ne.s32.totalorder %s1679_s13, %s1675_s12 }
   0x9   : > { %s1747_s20 = scalar_select %p45_p0, %s1683_s14, %s47_s19  }
   0xa   : > { %p56_p4 = por %p55_p2, %p54_p1  ;;  %p61_p5 = scmp.eq.s32.totalorder %s1734_s16, 0 }
   0xb   : > { %p1467_p6 = scmp.lt.s32.totalorder %s1687_s15, 10  ;;  %s1756_s22 = sand.u32 1, %s1683_s14  }
   0xc   : > { %p1751_p7 = por %p61_p5, %p60_p3  ;;  %s1454_s23 = smul.u32 640, %s1756_s22 }
   0xd   : > { %s1256_s24 = sshll.u32 %s1687_s15, 6  ;;  %p1760_p8 = pnand %p1467_p6, %p56_p4 }
   0xe   : > { %s1977_s21 = scalar_select %p1751_p7, 1, 0 }
   0xf   : > { %s1767_s28 = scalar_lea.hbm %s1973_s1, %s1256_s24  ;;  %s143_s29 = scalar_lea.vmem [#allocation2], %s1454_s23 }
  0x10   : > { %s149_s30 = sshll.u32 %s143_s29, 4  ;;  %s140_s4 = scalar_lea.sflag [#allocation3], %s1756_s22  ;;  %s1769_s30 = int_to_ptr.vmem [resolvable:$true] %s149_s30 }
  0x11   : > { %s1589_s5 = scalar_lea.hbm %s1767_s28, 10240  ;;  %p1591_p10 = pneg %p1760_p8 }
  0x12   : > { %p1590_p9 = scmp.ne.s32.totalorder %s1767_s28, %s1589_s5  ;;  %s1594_s8 = scalar_lea.hbm %s1973_s1, 102400 }
  0x13   : > { %p1595_p13 = scmp.lt.u32.totalorder %s1767_s28, %s1973_s1  ;;  %p1596_p0 = scmp.lt.u32.totalorder %s1594_s8, %s1589_s5 }
  0x14   : > { %p1592_p11 = pnand %p1591_p10, %p1590_p9  ;;  %p1598_p2 = scmp.lt.u32.totalorder %s1589_s5, %s1767_s28 }
  0x15   : > { %p1597_p1 = por %p1596_p0, %p1595_p13 }
  0x16   : > { %p1593_p12 = pneg %p1592_p11 }
  0x17   : > { %p1599_p3 = por %p1598_p2, %p1597_p1 }
  0x19   : > { %p1600_p4 = pnand %p1599_p3, %p1593_p12 }
  0x1b   : > { %1603 = shalt.err (!%p1600_p4)
}
  0x1c   : > { %s1604_s11 = scalar_lea.vmem %s1769_s30, 10240  ;;  %s1689_s12 = smov [#allocation2]  }
  0x1d   : > { %p1605_p5 = scmp.ne.s32.totalorder %s1769_s30, %s1604_s11  ;;  %s1609_s18 = sshll.u32 %s1689_s12, 4  ;;  %s1610_s18 = int_to_ptr.vmem [resolvable:$false] %s1609_s18 }
  0x1e   : > { %s1611_s19 = scalar_lea.vmem %s1610_s18, 20480  ;;  %p1612_p11 = scmp.lt.s32.totalorder %s1769_s30, %s1610_s18 }
  0x1f   : > { %p1607_p6 = pnand %p1605_p5, %p1591_p10  ;;  %p1613_p13 = scmp.lt.s32.totalorder %s1611_s19, %s1604_s11 }
  0x21   : > { %p1608_p9 = pneg %p1607_p6  ;;  %p1614_p0 = por %p1613_p13, %p1612_p11 }
  0x23   : > { %p1615_p1 = pnand %p1614_p0, %p1608_p9 }
  0x25   : > { %1618 = shalt.err (!%p1615_p1)
}
  0x26   : > { %s1690_s23 = smov 640   ;;  %s1691_s24 = smov 64  }
  0x27   : > { %s1692_s26 = smov 4   ;;  %p1258_p12 = scmp.ge.s32.totalorder %s1687_s15, 1 }
  0x28   : > { %1463 = dma.hbm_to_vmem [thread:$0]  (!%p1760_p8), %s1767_s28, 10240, %s1769_s30, %s140_s4, %s1690_s23, %s1691_s24, %s1692_s26  }
  0x29   : > { %p174_p2 = scmp.lt.s32.totalorder %s1687_s15, 11  ;;  %s1257_s29 = sshll.u32 %s1687_s15, 4 }
  0x2a   : > { %s1809_s7 = scalar_lea.hbm %s1974_s2, %s1257_s29  ;;  %s162_s8 = scalar_lea.vmem [#allocation4], %s1756_s22 }
  0x2b   : > { %p1801_p3 = pnand %p1258_p12, %p174_p2  ;;  %s169_s9 = sshll.u32 %s162_s8, 4  ;;  %s170_s9 = int_to_ptr.vmem [resolvable:$true] %s169_s9 }
  0x2c   : > { %s160_s28 = scalar_lea.sflag [#allocation5], %s1756_s22  ;;  %s1619_s30 = scalar_lea.hbm %s1809_s7, 16 }
  0x2d   : > { %s1979_s27 = scalar_select %p1801_p3, 1, 0 }
  0x2e   : > { %p1620_p4 = scmp.ne.s32.totalorder %s1809_s7, %s1619_s30  ;;  %s1624_s10 = scalar_lea.hbm %s1974_s2, 160 }
  0x2f   : > { %p1625_p9 = scmp.lt.u32.totalorder %s1809_s7, %s1974_s2  ;;  %p1626_p11 = scmp.lt.u32.totalorder %s1624_s10, %s1619_s30 }
  0x30   : > { %p1622_p5 = pnand %p1620_p4, %p1591_p10  ;;  %p1628_p0 = scmp.lt.u32.totalorder %s1619_s30, %s1809_s7 }
  0x31   : > { %p1627_p13 = por %p1626_p11, %p1625_p9 }
  0x32   : > { %p1623_p6 = pneg %p1622_p5 }
  0x33   : > { %p1629_p1 = por %p1628_p0, %p1627_p13 }
  0x35   : > { %p1630_p12 = pnand %p1629_p1, %p1623_p6 }
  0x37   : > { %1633 = shalt.err (!%p1630_p12)
}
  0x38   : > { %s1634_s22 = scalar_lea.vmem %s170_s9, 16  ;;  %s1693_s18 = smov [#allocation4]  }
  0x39   : > { %p1635_p2 = scmp.ne.s32.totalorder %s170_s9, %s1634_s22  ;;  %s1639_s19 = sshll.u32 %s1693_s18, 4  ;;  %s1640_s19 = int_to_ptr.vmem [resolvable:$false] %s1639_s19 }
  0x3a   : > { %s1641_s23 = scalar_lea.vmem %s1640_s19, 32  ;;  %p1642_p7 = scmp.lt.s32.totalorder %s170_s9, %s1640_s19 }
  0x3b   : > { %p1637_p4 = pnand %p1635_p2, %p1591_p10  ;;  %p1643_p3 = scmp.lt.s32.totalorder %s1641_s23, %s1634_s22 }
  0x3d   : > { %p1638_p5 = pneg %p1637_p4  ;;  %p1644_p9 = por %p1643_p3, %p1642_p7 }
  0x3f   : > { %p1645_p11 = pnand %p1644_p9, %p1638_p5 }
  0x41   : > { %1648 = shalt.err (!%p1645_p11)
}
  0x42   : > { %1466 = dma.hbm_to_vmem [thread:$0]  (!%p1760_p8), %s1809_s7, 16, %s170_s9, %s160_s28  }
  0x43   : > { %p1980_p6 = scmp.ne.s32.totalorder %s1979_s27, 0 }
  0x44   : > { %s1835_s24 = sand.u32 (!%p1980_p6), 1, %s1679_s13   ;;  %p1981_p7 = scmp.ne.s32.totalorder (!%p1980_p6), %s1977_s21, 0 }
  0x45   : > { %178 = sbr.rel (%p1980_p6) target bundleno = 708 (0x2c4), region = 32  ;;  %s181_s29 = scalar_lea.sflag (!%p1980_p6), [#allocation3], %s1835_s24 }
  0x46   : > { %s1455_s26 = smul.u32 (!%p1980_p6), 640, %s1835_s24 }
  0x48   : > { %s1839_s5 = scalar_lea.vmem (!%p1980_p6), [#allocation2], %s1455_s26 }
  0x4c   : > { %1666 = dma.done.wait (%p1981_p7), %s181_s29, 10240  }
  0x4d   : > { %1668 = vsyncadd (%p1981_p7), %s181_s29, 4294957056  ;;  %s190_s25 = scalar_lea.sflag [#allocation5], %s1835_s24  ;;  %s192_s27 = scalar_lea.vmem [#allocation4], %s1835_s24 }
  0x4e   : > { %1670 = dma.done.wait (%p1981_p7), %s190_s25, 16  }
  0x4f   : > { %1672 = vsyncadd (%p1981_p7), %s190_s25, 4294967280  ;;  %v1504_v0 = vld [vmem:[%s1839_s5 + $0x40] sm:$0xff]   ;;  %v1508_v4 = vld [vmem:[%s1839_s5 + $0x48] sm:$0xff]   ;;  %v1694_v21 = vmov 1966171168   ;;  %v398_v23 = vlaneseq  ;;  %vm1155_vm0 = vcmask 1041408  }
  0x50   : > { %v1505_v1 = vld [vmem:[%s1839_s5] sm:$0xff]   ;;  %1344 = vmatprep.subr.bf16.mxu0 %v1504_v0  ;;  %v1509_v5 = vld [vmem:[%s1839_s5 + $0x8] sm:$0xff]   ;;  %v1512_v8 = vld [vmem:[%s1839_s5 + $0x50] sm:$0xff]   ;;  %v396_v22 = vunpack.c.l.s4 %v1694_v21  ;;  %p218_p8 = scmp.lt.s32.totalorder %s1734_s16, 9 }
  0x51   : > { %v1506_v2 = vld [vmem:[%s1839_s5 + $0xc0] sm:$0xff]   ;;  %1345 = vmatpush3.bf16.msra.mxu0 %v1505_v1  ;;  %v1510_v6 = vld [vmem:[%s1839_s5 + $0xc8] sm:$0xff]   ;;  %v1513_v9 = vld [vmem:[%s1839_s5 + $0x10] sm:$0xff]   ;;  %v399_v29 = vshrl.u32 %v398_v23, 7 }
  0x52   : > { %v1507_v3 = vld [vmem:[%s1839_s5 + $0x80] sm:$0xff]   ;;  %1366 = vmatprep.subr.bf16.mxu1 %v1506_v2  ;;  %1346 = vmatprep.subr.bf16.mxu0 %v1508_v4  ;;  %v1511_v7 = vld [vmem:[%s1839_s5 + $0x88] sm:$0xff]   ;;  %v1514_v10 = vld [vmem:[%s1839_s5 + $0xd0] sm:$0xff]   ;;  %v397_v28 = vunpack.c.0.s8 %v396_v22  ;;  %s1987_s16 = smov (!%p218_p8, %s1734_s16), 9 }
  0x53   : > { %1367 = vmatpush3.bf16.msra.mxu1 %v1507_v3  ;;  %v1515_v11 = vld [vmem:[%s1839_s5 + $0x90] sm:$0xff]   ;;  %v1516_v12 = vld [vmem:[%s1839_s5 + $0x58] sm:$0xff]   ;;  %v1520_v16 = vld [vmem:[%s1839_s5 + $0x60] sm:$0xff]   ;;  %s1259_s9 = sshll.u32 %s1987_s16, 1 }
  0x54   : > { %1368 = vmatprep.subr.bf16.mxu1 %v1510_v6  ;;  %v1517_v13 = vld [vmem:[%s1839_s5 + $0x18] sm:$0xff]   ;;  %v1521_v17 = vld [vmem:[%s1839_s5 + $0x20] sm:$0xff]   ;;  %v1524_v20 = vld [vmem:[%s1839_s5 + $0x68] sm:$0xff]   ;;  %v1880_v34 = vsub.s32 %v397_v28, %v399_v29  ;;  %s221_s15 = scalar_lea.vmem %s1975_s3, %s1259_s9 }
  0x55   : > { %1347 = vmatpush3.bf16.msra.mxu0 %v1509_v5  ;;  %v1518_v14 = vld [vmem:[%s1839_s5 + $0xd8] sm:$0xff]   ;;  %v1522_v18 = vld [vmem:[%s1839_s5 + $0xe0] sm:$0xff]   ;;  %v1525_v24 = vld [vmem:[%s1839_s5 + $0x28] sm:$0xff]  }
  0x56   : > { %1348 = vmatprep.subr.bf16.mxu0 %v1512_v8  ;;  %v1519_v15 = vld [vmem:[%s1839_s5 + $0x98] sm:$0xff]   ;;  %v1523_v19 = vld [vmem:[%s1839_s5 + $0xa0] sm:$0xff]   ;;  %v1526_v25 = vld [vmem:[%s1839_s5 + $0xe8] sm:$0xff]  }
  0x57   : > { %1369 = vmatpush3.bf16.msra.mxu1 %v1511_v7  ;;  %v1527_v26 = vld [vmem:[%s1839_s5 + $0xa8] sm:$0xff]   ;;  %v1528_v27 = vld [vmem:[%s1839_s5 + $0x70] sm:$0xff]   ;;  %v1532_v33 = vld [vmem:[%s1839_s5 + $0x78] sm:$0xff]  }
  0x58   : > { %1370 = vmatprep.subr.bf16.mxu1 %v1514_v10  ;;  %v1529_v30 = vld [vmem:[%s1839_s5 + $0x30] sm:$0xff]   ;;  %v1533_v35 = vld [vmem:[%s1839_s5 + $0x38] sm:$0xff]   ;;  %v223_v37 = vld [vmem:[%s1972_s0] sm:$0xff] }
  0x59   : > { %1349 = vmatpush3.bf16.msra.mxu0 %v1513_v9  ;;  %v1530_v31 = vld [vmem:[%s1839_s5 + $0xf0] sm:$0xff]   ;;  %v1534_v36 = vld [vmem:[%s1839_s5 + $0xf8] sm:$0xff]   ;;  %v394_v38 = vcombine.high %v223_v37, %v223_v37  ;;  %v401_v39 = vrot.slane %v223_v37, %v1880_v34  ;;  %v1537_v41 = vld [vmem:[%s1839_s5 + $0x140] sm:$0xff]  }
  0x5a   : > { %1350 = vmatprep.subr.bf16.mxu0 %v1516_v12  ;;  %v1531_v32 = vld [vmem:[%s1839_s5 + $0xb0] sm:$0xff]   ;;  %v1536_v40 = vld [vmem:[%s1839_s5 + $0xb8] sm:$0xff]   ;;  %v1539_v45 = vld [vmem:[%s1839_s5 + $0x1c0] sm:$0xff]  }
  0x5b   : > { %1371 = vmatpush3.bf16.msra.mxu1 %v1515_v11  ;;  %v409_v42 = vcombine.high %v401_v39, %v401_v39  ;;  %v417_v43 = vrot.slane %v401_v39, %v1880_v34  ;;  %v1892_v44 = vrot.slane %v394_v38, %v1880_v34  ;;  %v1538_v47 = vld [vmem:[%s1839_s5 + $0x100] sm:$0xff]   ;;  %v1541_v50 = vld [vmem:[%s1839_s5 + $0x148] sm:$0xff]   ;;  %v1545_v57 = vld [vmem:[%s1839_s5 + $0x150] sm:$0xff]  }
  0x5c   : > { %1372 = vmatprep.subr.bf16.mxu1 %v1518_v14  ;;  %v1540_v52 = vld [vmem:[%s1839_s5 + $0x180] sm:$0xff]   ;;  %v1543_v54 = vld [vmem:[%s1839_s5 + $0x1c8] sm:$0xff]   ;;  %v1547_v59 = vld [vmem:[%s1839_s5 + $0x1d0] sm:$0xff]  }
  0x5d   : > { %1351 = vmatpush3.bf16.msra.mxu0 %v1517_v13  ;;  %v431_v46 = vrot.slane %v409_v42, %v1880_v34  ;;  %v410_v48 = vcombine.high %v1892_v44, %v1892_v44  ;;  %v439_v49 = vcombine.high %v417_v43, %v417_v43  ;;  %v1542_v55 = vld [vmem:[%s1839_s5 + $0x108] sm:$0xff]   ;;  %v1546_v60 = vld [vmem:[%s1839_s5 + $0x110] sm:$0xff]   ;;  %v1549_v61 = vld [vmem:[%s1839_s5 + $0x158] sm:$0xff]  }
  0x5e   : > { %1352 = vmatprep.subr.bf16.mxu0 %v1520_v16  ;;  %v1544_v58 = vld [vmem:[%s1839_s5 + $0x188] sm:$0xff]   ;;  %v1548_v62 = vld [vmem:[%s1839_s5 + $0x190] sm:$0xff]   ;;  %v1551_v63 = vld [vmem:[%s1839_s5 + $0x1d8] sm:$0xff]  }
  0x5f   : > { %1373 = vmatpush3.bf16.msra.mxu1 %v1519_v15  ;;  %987 = vmatprep.mubr.bf16.mxu0 %v431_v46  ;;  %v441_v51 = vcombine.high %v431_v46, %v431_v46  ;;  %v438_v53 = vrot.slane %v410_v48, %v1880_v34  ;;  %v1550_v0 = vld [vmem:[%s1839_s5 + $0x118] sm:$0xff]   ;;  %v1553_v1 = vld [vmem:[%s1839_s5 + $0x160] sm:$0xff]   ;;  %v1557_v5 = vld [vmem:[%s1839_s5 + $0x168] sm:$0xff]  }
  0x60   : > { %1374 = vmatprep.subr.bf16.mxu1 %v1522_v18  ;;  %v1552_v2 = vld [vmem:[%s1839_s5 + $0x198] sm:$0xff]   ;;  %v1555_v3 = vld [vmem:[%s1839_s5 + $0x1e0] sm:$0xff]   ;;  %v1559_v7 = vld [vmem:[%s1839_s5 + $0x1e8] sm:$0xff]  }
  0x61   : > { %1353 = vmatpush3.bf16.msra.mxu0 %v1521_v17  ;;  %1027 = vmatprep.mubr.bf16.mxu1 %v441_v51  ;;  %v442_v56 = vcombine.high %v438_v53, %v438_v53  ;;  %v1554_v4 = vld [vmem:[%s1839_s5 + $0x120] sm:$0xff]   ;;  %v1558_v8 = vld [vmem:[%s1839_s5 + $0x128] sm:$0xff]   ;;  %v1561_v9 = vld [vmem:[%s1839_s5 + $0x170] sm:$0xff]   ;;  %v424_v17 = vrot.slane %v1892_v44, %v1880_v34 }
  0x62   : > { %1354 = vmatprep.subr.bf16.mxu0 %v1524_v20  ;;  %v1556_v6 = vld [vmem:[%s1839_s5 + $0x1a0] sm:$0xff]   ;;  %v1560_v10 = vld [vmem:[%s1839_s5 + $0x1a8] sm:$0xff]   ;;  %v1563_v11 = vld [vmem:[%s1839_s5 + $0x1f0] sm:$0xff]  }
  0x63   : > { %1375 = vmatpush3.bf16.msra.mxu1 %v1523_v19  ;;  %v1562_v12 = vld [vmem:[%s1839_s5 + $0x130] sm:$0xff]   ;;  %v1565_v13 = vld [vmem:[%s1839_s5 + $0x178] sm:$0xff]   ;;  %v1569_v18 = vld [vmem:[%s1839_s5 + $0x240] sm:$0xff]   ;;  %v440_v21 = vcombine.high %v424_v17, %v424_v17 }
  0x64   : > { %1376 = vmatprep.subr.bf16.mxu1 %v1526_v25  ;;  %v1564_v14 = vld [vmem:[%s1839_s5 + $0x1b0] sm:$0xff]   ;;  %v1567_v15 = vld [vmem:[%s1839_s5 + $0x1f8] sm:$0xff]   ;;  %v1570_v20 = vld [vmem:[%s1839_s5 + $0x200] sm:$0xff]  }
  0x65   : > { %1355 = vmatpush3.bf16.msra.mxu0 %v1525_v24  ;;  %v1566_v16 = vld [vmem:[%s1839_s5 + $0x138] sm:$0xff]   ;;  %v1571_v22 = vld [vmem:[%s1839_s5 + $0x248] sm:$0xff]   ;;  %v1573_v24 = vld [vmem:[%s1839_s5 + $0x250] sm:$0xff]  }
  0x66   : > { %1356 = vmatprep.subr.bf16.mxu0 %v1528_v27  ;;  %v1568_v19 = vld [vmem:[%s1839_s5 + $0x1b8] sm:$0xff]   ;;  %v1572_v23 = vld [vmem:[%s1839_s5 + $0x208] sm:$0xff]   ;;  %v1574_v25 = vld [vmem:[%s1839_s5 + $0x210] sm:$0xff]  }
  0x67   : > { %1377 = vmatpush3.bf16.msra.mxu1 %v1527_v26  ;;  %v1575_v26 = vld [vmem:[%s1839_s5 + $0x258] sm:$0xff]   ;;  %v1261_v28 = vld.sshfl [vmem:[%s1972_s0 + $0x8] sm:$0x11 pattern:$0x75316420]  ;;  %v1577_v29 = vld [vmem:[%s1839_s5 + $0x260] sm:$0xff]  }
  0x68   : > { %1378 = vmatprep.subr.bf16.mxu1 %v1530_v31  ;;  %v1576_v27 = vld [vmem:[%s1839_s5 + $0x218] sm:$0xff]   ;;  %v1582_v37 = vld [vmem:[%s1839_s5 + $0x230] sm:$0xff]   ;;  %v1260_v42 = vld [vmem:[%s192_s27] ss:$0 sm:$0xff] }
  0x69   : > { %1357 = vmatpush3.bf16.msra.mxu0 %v1529_v30  ;;  %v450_v30 = vcombine.high %v1261_v28, %v1261_v28  ;;  %v1583_v38 = vld [vmem:[%s1839_s5 + $0x278] sm:$0xff]  }
  0x6a   : > { %1358 = vmatprep.subr.bf16.mxu0 %v1532_v33  ;;  %v1579_v33 = vld [vmem:[%s1839_s5 + $0x268] sm:$0xff]   ;;  %v1584_v39 = vld [vmem:[%s1839_s5 + $0x238] sm:$0xff]  }
  0x6b   : > { %1379 = vmatpush3.bf16.msra.mxu1 %v1531_v32  ;;  %v464_v31 = vrot.slane %v450_v30, %v1880_v34  ;;  %v1578_v32 = vld [vmem:[%s1839_s5 + $0x220] sm:$0xff]  }
  0x6c   : > { %1380 = vmatprep.subr.bf16.mxu1 %v1534_v36  ;;  %v1581_v36 = vld [vmem:[%s1839_s5 + $0x270] sm:$0xff]  }
  0x6d   : > { %1359 = vmatpush3.bf16.msra.mxu0 %v1533_v35  ;;  %v1580_v35 = vld [vmem:[%s1839_s5 + $0x228] sm:$0xff]  }
  0x6e   : > { %1388 = vmatprep.subr.bf16.mxu0 %v1537_v41 }
  0x6f   : > { %1381 = vmatpush3.bf16.msra.mxu1 %v1536_v40  ;;  %v457_v40 = vrot.slane %v1261_v28, %v1880_v34 }
  0x70   : > { %1410 = vmatprep.subr.bf16.mxu1 %v1539_v45  ;;  %988 = vmatmul.mubr.bf16.vlgmr.msra.gmra.mrb[0].mxu0 %v417_v43 }
  0x71   : > { %1389 = vmatpush3.bf16.msra.mxu0 %v1538_v47  ;;  %1067 = vmatprep.mubr.bf16.mxu0 %v438_v53 }
  0x72   : > { %1028 = vmatmul.mubr.bf16.vlgmr.msra.gmra.mrb[0].mxu1 %v439_v49  ;;  %1390 = vmatprep.subr.bf16.mxu0 %v1541_v50 }
  0x73   : > { %1411 = vmatpush3.bf16.msra.mxu1 %v1540_v52  ;;  %1107 = vmatprep.mubr.bf16.mxu1 %v442_v56 }
  0x74   : > { %1412 = vmatprep.subr.bf16.mxu1 %v1543_v54 }
  0x75   : > { %1391 = vmatpush3.bf16.msra.mxu0 %v1542_v55 }
  0x76   : > { %1392 = vmatprep.subr.bf16.mxu0 %v1545_v57 }
  0x77   : > { %1413 = vmatpush3.bf16.msra.mxu1 %v1544_v58 }
  0x78   : > { %1414 = vmatprep.subr.bf16.mxu1 %v1547_v59 }
  0x79   : > { %1393 = vmatpush3.bf16.msra.mxu0 %v1546_v60 }
  0x7a   : > { %1394 = vmatprep.subr.bf16.mxu0 %v1549_v61 }
  0x7b   : > { %1415 = vmatpush3.bf16.msra.mxu1 %v1548_v62 }
  0x7c   : > { %1416 = vmatprep.subr.bf16.mxu1 %v1551_v63 }
  0x7d   : > { %1395 = vmatpush3.bf16.msra.mxu0 %v1550_v0 }
  0x7e   : > { %1396 = vmatprep.subr.bf16.mxu0 %v1553_v1 }
  0x7f   : > { %1417 = vmatpush3.bf16.msra.mxu1 %v1552_v2 }
  0x80   : > { %1418 = vmatprep.subr.bf16.mxu1 %v1555_v3 }
  0x81   : > { %1397 = vmatpush3.bf16.msra.mxu0 %v1554_v4 }
  0x82   : > { %1398 = vmatprep.subr.bf16.mxu0 %v1557_v5 }
  0x83   : > { %1419 = vmatpush3.bf16.msra.mxu1 %v1556_v6 }
  0x84   : > { %1420 = vmatprep.subr.bf16.mxu1 %v1559_v7 }
  0x85   : > { %1399 = vmatpush3.bf16.msra.mxu0 %v1558_v8 }
  0x86   : > { %1400 = vmatprep.subr.bf16.mxu0 %v1561_v9 }
  0x87   : > { %1421 = vmatpush3.bf16.msra.mxu1 %v1560_v10 }
  0x88   : > { %1422 = vmatprep.subr.bf16.mxu1 %v1563_v11 }
  0x89   : > { %1401 = vmatpush3.bf16.msra.mxu0 %v1562_v12 }
  0x8a   : > { %1402 = vmatprep.subr.bf16.mxu0 %v1565_v13 }
  0x8b   : > { %1423 = vmatpush3.bf16.msra.mxu1 %v1564_v14 }
  0x8c   : > { %1424 = vmatprep.subr.bf16.mxu1 %v1567_v15 }
  0x8d   : > { %1403 = vmatpush3.bf16.msra.mxu0 %v1566_v16 }
  0x8e   : > { %1432 = vmatprep.subr.bf16.mxu0 %v1569_v18 }
  0x8f   : > { %1425 = vmatpush3.bf16.msra.mxu1 %v1568_v19 }
  0x90   : > { %1068 = vmatmul.mubr.bf16.vlgmr.msra.gmra.mrb[4].mxu0 %v424_v17 }
  0x91   : > { %1433 = vmatpush3.bf16.msra.mxu0 %v1570_v20  ;;  %1147 = vmatprep.mubr.bf16.mxu0 %v464_v31 }
  0x92   : > { %1108 = vmatmul.mubr.bf16.vlgmr.msra.gmra.mrb[4].mxu1 %v440_v21  ;;  %1434 = vmatprep.subr.bf16.mxu0 %v1571_v22 }
  0x95   : > { %1435 = vmatpush3.bf16.msra.mxu0 %v1572_v23 }
  0x96   : > { %1436 = vmatprep.subr.bf16.mxu0 %v1573_v24 }
  0x99   : > { %1437 = vmatpush3.bf16.msra.mxu0 %v1574_v25 }
  0x9a   : > { %1438 = vmatprep.subr.bf16.mxu0 %v1575_v26 }
  0x9d   : > { %1439 = vmatpush3.bf16.msra.mxu0 %v1576_v27 }
  0x9e   : > { %1440 = vmatprep.subr.bf16.mxu0 %v1577_v29 }
  0xa1   : > { %1441 = vmatpush3.bf16.msra.mxu0 %v1578_v32 }
  0xa2   : > { %1442 = vmatprep.subr.bf16.mxu0 %v1579_v33 }
  0xa5   : > { %1443 = vmatpush3.bf16.msra.mxu0 %v1580_v35 }
  0xa6   : > { %1444 = vmatprep.subr.bf16.mxu0 %v1581_v36 }
  0xa9   : > { %1445 = vmatpush3.bf16.msra.mxu0 %v1582_v37 }
  0xaa   : > { %1446 = vmatprep.subr.bf16.mxu0 %v1583_v38 }
  0xad   : > { %1447 = vmatpush3.bf16.msra.mxu0 %v1584_v39 }
  0xb0   : > { %1148 = vmatmul.mubr.bf16.vlgmr.msra.gmra.mrb[8].mxu0 %v457_v40 }
 0x143   : > { %v1360_v41 = vpop.f32.mrb[0].mxu0 }
 0x144   : > { %v1361_v43 = vpop.f32.mrb[1].mxu0 }
 0x145   : > { %v1362_v44 = vadd.f32 %v1361_v43, %v1360_v41  ;;  %v1363_v45 = vpop.f32.mrb[2].mxu0  ;;  %v1382_v46 = vpop.f32.mrb[0].mxu1 }
 0x146   : > { %v1364_v47 = vpop.f32.mrb[3].mxu0  ;;  %v1383_v48 = vpop.f32.mrb[1].mxu1 }
 0x147   : > { %v990_v49 = vadd.f32 %v1362_v44, %v1260_v42  ;;  %v1384_v50 = vadd.f32 %v1383_v48, %v1382_v46  ;;  %v1385_v51 = vpop.f32.mrb[2].mxu1 }
 0x148   : > { %v1386_v52 = vpop.f32.mrb[3].mxu1 }
 0x149   : > { %v1030_v53 = vadd.f32 %v1384_v50, %v990_v49 }
 0x163   : > { %v1404_v54 = vpop.f32.mrb[4].mxu0 }
 0x164   : > { %v1405_v55 = vpop.f32.mrb[5].mxu0 }
 0x165   : > { %v1406_v56 = vadd.f32 %v1405_v55, %v1404_v54  ;;  %v1407_v34 = vpop.f32.mrb[6].mxu0  ;;  %v1426_v57 = vpop.f32.mrb[4].mxu1 }
 0x166   : > { %v1408_v58 = vpop.f32.mrb[7].mxu0  ;;  %v1427_v59 = vpop.f32.mrb[5].mxu1 }
 0x167   : > { %v1070_v60 = vadd.f32 %v1406_v56, %v1030_v53  ;;  %v1428_v61 = vadd.f32 %v1427_v59, %v1426_v57  ;;  %v1429_v62 = vpop.f32.mrb[6].mxu1 }
 0x168   : > { %v1430_v63 = vpop.f32.mrb[7].mxu1 }
 0x169   : > { %v1110_v0 = vadd.f32 %v1428_v61, %v1070_v60 }
 0x183   : > { %v1448_v1 = vpop.f32.mrb[8].mxu0 }
 0x184   : > { %v1449_v2 = vpop.f32.mrb[9].mxu0 }
 0x185   : > { %v1450_v3 = vadd.f32 %v1449_v2, %v1448_v1  ;;  %v1451_v4 = vpop.f32.mrb[10].mxu0 }
 0x186   : > { %v1452_v5 = vpop.f32.mrb[11].mxu0 }
 0x187   : > { %v1150_v6 = vadd.f32 %v1450_v3, %v1110_v0 }
 0x189   : > { %v1156_v7 = vsel %vm1155_vm0, %v1150_v6, -inf }
 0x18a   : > { %1157 = vmax.xlane.f32.xlu0 %v1156_v7 }
 0x217   : > { %v1158_v8 = vpop.xlane.xlu0 %1157 }
 0x218   : > { %v1159_v9 = vsub.f32 %v1150_v6, %v1158_v8 }
 0x21a   : > { %v1160_v10 = vmul.f32 1.442695, %v1159_v9 }
 0x21c   : > { %1585 = vpow2.f32 %v1160_v10 }
 0x226   : > { %v1586_v11 = vpop.eup %1585 }
 0x227   : > { %v1162_v12 = vsel %vm1155_vm0, %v1586_v11, 0.0 }
 0x228   : > { %1163 = vadd.xlane.f32.xlu0 %v1162_v12 }
 0x2b5   : > { %v1164_v13 = vpop.xlane.xlu0 %1163 }
 0x2b6   : > { %1587 = vrcp.f32 %v1164_v13 }
 0x2c0   : > { %v1588_v14 = vpop.eup %1587 }
 0x2c1   : > { %v1166_v15 = vmul.f32 %v1588_v14, %v1586_v11 }
 0x2c3   : > { %1167 = vst [vmem:[%s221_s15] sm:$0x3] %v1166_v15 }
 0x2c4 PF: > { %p16_p10 = scmp.ge.s32.totalorder %s1737_s17, 12   ;;  %s1982_s12 = smov %s1679_s13 }
 0x2c5   : > { %s1983_s13 = smov %s1683_s14  ;;  %s1984_s14 = smov %s1747_s20 }
 0x2c6   : > { %s1985_s15 = smov %s1737_s17  ;;  %18 = sbr.rel (!%p16_p10) target bundleno = 5 (0x5), region = 85 }
 0x2cd   :  { %1187 = vsyncpa [#allocation3], 1 }
 0x2ce   :  { %1189 = vsyncpa [#allocation3 + $0x1], 1 }
 0x2cf   :  { %1190 = vsyncpa [#allocation5], 1 }
 0x2d0   :  { %1192 = vsyncpa [#allocation5 + $0x1], 1 }

// kernel: cnn_model_forward.2
= control target key start
LH: loop header
LB: loop body
LE: loop exit
PB: predicated region body
PF: predicated region fallthrough
CT: control target
= control target key end

     0   :  { %10 = vsyncpa [#allocation4], 0  ;;  %s11270_s0 = inlined_call_operand.vmem [shape: bf16[2,256,32], index: 0, kind: input, shape index: {}]   ;;  %s11271_s1 = inlined_call_operand.hbm [shape: bf16[32,128], index: 1, kind: input, shape index: {}]   ;;  %s11272_s2 = inlined_call_operand.hbm [shape: f32[1,128], index: 2, kind: input, shape index: {}]   ;;  %s11273_s3 = inlined_call_operand.hbm [shape: bf16[128,1280], index: 3, kind: input, shape index: {}]   ;;  %s11274_s4 = inlined_call_operand.hbm [shape: f32[1,1280], index: 4, kind: input, shape index: {}]   ;;  %s11275_s5 = inlined_call_operand.vmem [shape: bf16[2,1,1280], index: 5, kind: output, shape index: {}]  }
   0x1   :  { %11 = vsyncpa [#allocation6], 0 }
   0x2   :  { %12 = vsyncpa [#allocation9], 0  ;;  %s7758_s18 = smov 0   ;;  %s7760_s19 = smov 0  }
   0x3   :  { %s7762_s20 = smov 0  }
   0x4 LB: > { %s7717_s21 = smov [#allocation5]   ;;  %s5388_s23 = sadd.s32 4294967295, %s7715_s20   ;;  %s7715_s20 = sphi %s7762_s20, %s18_s20   ;;  %s7711_s19 = sphi %s7760_s19, %s11801_s19   ;;  %s7707_s18 = sphi %s7758_s18, %s11800_s18  }
   0x5   : > { %s199_s22 = sshll.u32 %s7717_s21, 4  ;;  %p5390_p0 = scmp.ge.s32.totalorder %s7715_s20, 1  ;;  %s200_s22 = int_to_ptr.vmem [resolvable:$true] %s199_s22 }
   0x6   : > { %p173_p1 = scmp.lt.s32.totalorder %s7715_s20, 3  ;;  %p7776_p2 = scmp.eq.s32.totalorder %s5388_s23, 0 }
   0x7   : > { %s30_s26 = sadd.s32 1, %s7711_s19  ;;  %s7718_s29 = smov [#allocation3]  }
   0x8   : > { %s11316_s24 = scalar_select %p7776_p2, 1, 0 }
   0x9   : > { %p7780_p3 = pnand %p5390_p0, %p173_p1  ;;  %p7793_p6 = scmp.ge.s32.totalorder %s30_s26, 2 }
   0xa   : > { %s185_s30 = sshll.u32 %s7718_s29, 4  ;;  %s7569_s8 = scalar_lea.hbm %s11272_s2, 16  ;;  %s7797_s30 = int_to_ptr.vmem [resolvable:$true] %s185_s30 }
   0xb   : > { %s11317_s25 = scalar_select %p7780_p3, 1, 0 }
   0xc   : > { %p5965_p4 = pneg %p7780_p3  ;;  %p7570_p7 = scmp.ne.s32.totalorder %s11272_s2, %s7569_s8 }
   0xd   : > { %s11319_s28 = scalar_select %p7793_p6, 1, 0 }
   0xe   : > { %p7789_p5 = pnand %p7776_p2, %p5965_p4  ;;  %p7576_p11 = scmp.lt.u32.totalorder %s7569_s8, %s11272_s2 }
  0x10   : > { %p7807_p8 = pneg %p7789_p5 }
  0x12   : > { %p7572_p9 = pnand %p7807_p8, %p7570_p7 }
  0x14   : > { %p7573_p10 = pneg %p7572_p9 }
  0x16   : > { %p7578_p12 = pnand %p7576_p11, %p7573_p10 }
  0x18   : > { %7581 = shalt.err (!%p7578_p12)
}
  0x19   : > { %s7582_s14 = scalar_lea.vmem %s200_s22, 16  ;;  %s7589_s15 = scalar_lea.vmem %s200_s22, 32 }
  0x1a   : > { %p7583_p13 = scmp.ne.s32.totalorder %s200_s22, %s7582_s14  ;;  %p7590_p4 = scmp.lt.s32.totalorder %s200_s22, %s200_s22 }
  0x1b   : > { %p7591_p2 = scmp.lt.s32.totalorder %s7589_s15, %s7582_s14 }
  0x1c   : > { %p7585_p0 = pnand %p7583_p13, %p7807_p8 }
  0x1d   : > { %p7592_p3 = por %p7591_p2, %p7590_p4 }
  0x1e   : > { %p7586_p1 = pneg %p7585_p0 }
  0x20   : > { %p7593_p6 = pnand %p7592_p3, %p7586_p1 }
  0x22   : > { %7596 = shalt.err (!%p7593_p6)
}
  0x23   : > { %5971 = dma.hbm_to_vmem [thread:$0]  (!%p7789_p5), %s11272_s2, 16, %s200_s22, [#allocation6]  }
  0x24   : > { %p11321_p7 = scmp.ne.s32.totalorder %s11319_s28, 0  ;;  %s7597_s29 = scalar_lea.hbm %s11271_s1, 256 }
  0x25   : > { %p7598_p2 = scmp.ne.s32.totalorder %s11271_s1, %s7597_s29  ;;  %p7604_p9 = scmp.lt.u32.totalorder %s7597_s29, %s11271_s1 }
  0x26   : > { %s11803_s26 = smov (%p11321_p7, %s30_s26), 0 }
  0x27   : > { %p7600_p3 = pnand %p7598_p2, %p7807_p8 }
  0x29   : > { %p7601_p6 = pneg %p7600_p3 }
  0x2b   : > { %p7606_p10 = pnand %p7604_p9, %p7601_p6 }
  0x2d   : > { %7609 = shalt.err (!%p7606_p10)
}
  0x2e   : > { %s7610_s22 = scalar_lea.vmem %s7797_s30, 256  ;;  %p7618_p0 = scmp.lt.s32.totalorder %s7797_s30, %s7797_s30 }
  0x2f   : > { %p7611_p11 = scmp.ne.s32.totalorder %s7797_s30, %s7610_s22  ;;  %p7619_p1 = scmp.lt.s32.totalorder %s7610_s22, %s7610_s22 }
  0x31   : > { %p7613_p12 = pnand %p7611_p11, %p7807_p8  ;;  %p7620_p4 = por %p7619_p1, %p7618_p0 }
  0x33   : > { %p7614_p13 = pneg %p7613_p12 }
  0x35   : > { %p7621_p7 = pnand %p7620_p4, %p7614_p13 }
  0x37   : > { %7624 = shalt.err (!%p7621_p7)
}
  0x38   : > { %s7719_s28 = smov 64   ;;  %s7720_s10 = smov 4  }
  0x39   : > { %5968 = dma.hbm_to_vmem [thread:$0]  (!%p7789_p5), %s11271_s1, 256, %s7797_s30, [#allocation4], %s7719_s28, %s7719_s28, %s7720_s10  }
  0x3a   : > { %s7721_s14 = smov [#allocation7]   ;;  %s7625_s21 = scalar_lea.hbm %s11273_s3, 10240 }
  0x3b   : > { %s209_s15 = sshll.u32 %s7721_s14, 4  ;;  %p7626_p2 = scmp.ne.s32.totalorder %s11273_s3, %s7625_s21  ;;  %s210_s15 = int_to_ptr.vmem [resolvable:$true] %s209_s15 }
  0x3c   : > { %p7632_p9 = scmp.lt.u32.totalorder %s7625_s21, %s11273_s3 }
  0x3d   : > { %p7628_p3 = pnand %p7626_p2, %p7807_p8 }
  0x3f   : > { %p7629_p6 = pneg %p7628_p3 }
  0x41   : > { %p7634_p10 = pnand %p7632_p9, %p7629_p6 }
  0x43   : > { %7637 = shalt.err (!%p7634_p10)
}
  0x44   : > { %s7638_s30 = scalar_lea.vmem %s210_s15, 10240  ;;  %p7646_p0 = scmp.lt.s32.totalorder %s210_s15, %s210_s15 }
  0x45   : > { %p7639_p11 = scmp.ne.s32.totalorder %s210_s15, %s7638_s30  ;;  %p7647_p1 = scmp.lt.s32.totalorder %s7638_s30, %s7638_s30 }
  0x47   : > { %p7641_p12 = pnand %p7639_p11, %p7807_p8  ;;  %p7648_p4 = por %p7647_p1, %p7646_p0 }
  0x49   : > { %p7642_p13 = pneg %p7641_p12 }
  0x4b   : > { %p7649_p7 = pnand %p7648_p4, %p7642_p13 }
  0x4d   : > { %7652 = shalt.err (!%p7649_p7)
}
  0x4e   : > { %s7722_s8 = smov 640   ;;  %s7723_s9 = smov 40  }
  0x4f   : > { %5974 = dma.hbm_to_vmem [thread:$0]  (!%p7789_p5), %s11273_s3, 10240, %s210_s15, [#allocation6], %s7722_s8, %s7722_s8, %s7723_s9  }
  0x50   : > { %s7724_s10 = smov [#allocation8]   ;;  %s7653_s16 = scalar_lea.hbm %s11274_s4, 160 }
  0x51   : > { %s223_s12 = sshll.u32 %s7724_s10, 4  ;;  %p7654_p2 = scmp.ne.s32.totalorder %s11274_s4, %s7653_s16  ;;  %s224_s12 = int_to_ptr.vmem [resolvable:$true] %s223_s12 }
  0x52   : > { %p7660_p9 = scmp.lt.u32.totalorder %s7653_s16, %s11274_s4 }
  0x53   : > { %p7656_p3 = pnand %p7654_p2, %p7807_p8 }
  0x55   : > { %p7657_p6 = pneg %p7656_p3 }
  0x57   : > { %p7662_p10 = pnand %p7660_p9, %p7657_p6 }
  0x59   : > { %7665 = shalt.err (!%p7662_p10)
}
  0x5a   : > { %s7666_s15 = scalar_lea.vmem %s224_s12, 160  ;;  %p7674_p0 = scmp.lt.s32.totalorder %s224_s12, %s224_s12 }
  0x5b   : > { %p7667_p11 = scmp.ne.s32.totalorder %s224_s12, %s7666_s15  ;;  %p7675_p1 = scmp.lt.s32.totalorder %s7666_s15, %s7666_s15 }
  0x5d   : > { %p7669_p12 = pnand %p7667_p11, %p7807_p8  ;;  %p7676_p4 = por %p7675_p1, %p7674_p0 }
  0x5f   : > { %p7670_p13 = pneg %p7669_p12 }
  0x61   : > { %p7677_p7 = pnand %p7676_p4, %p7670_p13 }
  0x63   : > { %7680 = shalt.err (!%p7677_p7)
}
  0x64   : > { %5977 = dma.hbm_to_vmem [thread:$0]  (!%p7789_p5), %s11274_s4, 160, %s224_s12, [#allocation9]  }
  0x65   : > { %p11322_p2 = scmp.ne.s32.totalorder %s11317_s25, 0 }
  0x67   : > { %249 = sbr.rel (%p11322_p2) target bundleno = 1307 (0x51b), region = 40 }
  0x6e   : > { %p11323_p3 = scmp.ne.s32.totalorder %s11316_s24, 0 }
  0x70   : > { %7694 = dma.done.wait (%p11323_p3), [#allocation4], 256  }
  0x71   : > { %7696 = vsyncadd (%p11323_p3), [#allocation4], 4294967040 }
  0x72   : > { %7698 = dma.done.wait (%p11323_p3), [#allocation6], 10256  }
  0x73   : > { %7700 = vsyncadd (%p11323_p3), [#allocation6], 4294957040 }
  0x74   : > { %7702 = dma.done.wait (%p11323_p3), [#allocation9], 160  }
  0x75   : > { %7704 = vsyncadd (%p11323_p3), [#allocation9], 4294967136  ;;  %p293_p5 = scmp.lt.s32.totalorder %s7707_s18, 1  ;;  %v6021_v0 = vld [vmem:[#allocation3] sm:$0xff]   ;;  %v6022_v1 = vld [vmem:[#allocation3 + $0x8] sm:$0xff]   ;;  %vm452_vm0 = vcmask 261120  }
  0x76   : > { %5896 = vmatprep.subr.bf16.mxu0 %v6021_v0  ;;  %v6041_v18 = vld [vmem:[#allocation7 + $0x4] ss:$40 sps:$4 sm:$0xff]   ;;  %v6039_v19 = vld [vmem:[#allocation7] ss:$40 sps:$4 sm:$0xff]   ;;  %v6044_v20 = vld [vmem:[#allocation7 + $0x54] ss:$40 sps:$4 sm:$0xff]  }
  0x77   : > { %s11805_s18 = smov (!%p293_p5, %s7707_s18), 1  ;;  %5897 = vmatpush3.bf16.msra.mxu0 %v6021_v0  ;;  %5932 = vmatprep.subr.bf16.mxu1 %v6041_v18  ;;  %v6042_v21 = vld [vmem:[#allocation7 + $0x50] ss:$40 sps:$4 sm:$0xff]   ;;  %v6047_v22 = vld [vmem:[#allocation7 + $0xa4] ss:$40 sps:$4 sm:$0xff]   ;;  %v11286_v34 = vmov 0  }
  0x78   : > { %s5877_s25 = sshll.u32 %s11805_s18, 7  ;;  %5898 = vmatprep.subr.bf16.mxu0 %v6022_v1  ;;  %5940 = vmatpush1.bf16.msra.mxu1 %v6039_v19  ;;  %v6045_v23 = vld [vmem:[#allocation7 + $0xa0] ss:$40 sps:$4 sm:$0xff]   ;;  %v6050_v24 = vld [vmem:[#allocation7 + $0xf4] ss:$40 sps:$4 sm:$0xff]   ;;  %vm5242_vm2 = vcmask 1040384  }
  0x79   : > { %s7908_s30 = scalar_lea.vmem %s11270_s0, %s5877_s25  ;;  %5933 = vmatprep.subr.bf16.mxu1 %v6044_v20  ;;  %v6048_v25 = vld [vmem:[#allocation7 + $0xf0] ss:$40 sps:$4 sm:$0xff]   ;;  %v6053_v26 = vld [vmem:[#allocation7 + $0x144] ss:$40 sps:$4 sm:$0xff]   ;;  %v6051_v27 = vld [vmem:[#allocation7 + $0x140] ss:$40 sps:$4 sm:$0xff]   ;;  %1518 = vmatprep.mubr.bf16.mxu1 %v11286_v34 }
  0x7a   : > { %v6023_v2 = vld [vmem:[%s7908_s30] sm:$0xff]   ;;  %v6024_v3 = vld [vmem:[%s7908_s30 + $0x8] sm:$0xff]   ;;  %v6025_v4 = vld [vmem:[%s7908_s30 + $0x10] sm:$0xff]   ;;  %vm5243_vm3 = vsmask.f32 256  ;;  %vm5245_vm4 = vcmask 1041409  }
  0x7b   : > { %5900 = vmatprep.mubr.msk.bf16.mxu0 %vm452_vm0, %v6023_v2  ;;  %5899 = vmatpush3.bf16.msra.mxu0 %v6022_v1  ;;  %v6026_v5 = vld [vmem:[%s7908_s30 + $0x18] sm:$0xff]   ;;  %v6027_v6 = vld [vmem:[%s7908_s30 + $0x20] sm:$0xff]   ;;  %v6028_v7 = vld [vmem:[%s7908_s30 + $0x28] sm:$0xff]   ;;  %vm5246_vm5 = vsmask.f32 1280  ;;  %vm5249_vm8 = vcmask 1042434  }
  0x7c   : > { %v6029_v8 = vld [vmem:[%s7908_s30 + $0x30] sm:$0xff]   ;;  %v6030_v9 = vld [vmem:[%s7908_s30 + $0x38] sm:$0xff]   ;;  %v6031_v10 = vld [vmem:[%s7908_s30 + $0x40] sm:$0xff]   ;;  %1436 = vmatprep.subr.bf16.mxu0 %v6041_v18  ;;  %5941 = vmatpush1.bf16.msra.mxu1 %v6042_v21  ;;  %vm5250_vm9 = vsmask.f32 2304  ;;  %vm5253_vm11 = vcmask 1043459  }
  0x7d   : > { %v6032_v11 = vld [vmem:[%s7908_s30 + $0x48] sm:$0xff]   ;;  %v6033_v12 = vld [vmem:[%s7908_s30 + $0x50] sm:$0xff]   ;;  %v6034_v13 = vld [vmem:[%s7908_s30 + $0x58] sm:$0xff]   ;;  %5934 = vmatprep.subr.bf16.mxu1 %v6047_v22  ;;  %vm5254_vm12 = vsmask.f32 3328  ;;  %vm5257_vm14 = vcmask 1044484  }
  0x7e   : > { %5901 = vmatmul.mubr.msk.bf16.vlgmr.msra.gmra.mrb[0].mxu0 %vm452_vm0, %v6024_v3  ;;  %v6035_v14 = vld [vmem:[%s7908_s30 + $0x60] sm:$0xff]   ;;  %v6036_v15 = vld [vmem:[%s7908_s30 + $0x68] sm:$0xff]   ;;  %v6037_v16 = vld [vmem:[%s7908_s30 + $0x70] sm:$0xff]   ;;  %s5948_s24 = smul.u32 10, %s11805_s18 }
  0x7f   : > { %5904 = vmatprep.mubr.msk.bf16.mxu0 %vm452_vm0, %v6025_v4  ;;  %v6038_v17 = vld [vmem:[%s7908_s30 + $0x78] sm:$0xff]   ;;  %1437 = vmatpush1.bf16.msra.mxu0 %v6039_v19  ;;  %v6054_v29 = vld [vmem:[#allocation7 + $0x190] ss:$40 sps:$4 sm:$0xff]   ;;  %v6059_v30 = vld [vmem:[#allocation7 + $0x1e4] ss:$40 sps:$4 sm:$0xff]  }
  0x80   : > { %1438 = vmatprep.subr.bf16.mxu0 %v6044_v20  ;;  %5942 = vmatpush1.bf16.msra.mxu1 %v6045_v23  ;;  %v6056_v28 = vld [vmem:[#allocation7 + $0x194] ss:$40 sps:$4 sm:$0xff]   ;;  %v6057_v31 = vld [vmem:[#allocation7 + $0x1e0] ss:$40 sps:$4 sm:$0xff]   ;;  %v6060_v33 = vld [vmem:[#allocation7 + $0x230] ss:$40 sps:$4 sm:$0xff]   ;;  %s11187_s9 = scalar_lea.vmem %s11275_s5, %s5948_s24 }
  0x81   : > { %5935 = vmatprep.subr.bf16.mxu1 %v6050_v24  ;;  %v6062_v32 = vld [vmem:[#allocation7 + $0x234] ss:$40 sps:$4 sm:$0xff]   ;;  %vm11030_vm6 = vmand %vm5242_vm2, %vm5243_vm3  ;;  %vm5261_vm3 = vcmask 1045509  }
  0x82   : > { %v6065_v35 = vld [vmem:[#allocation7 + $0xc] ss:$40 sps:$4 sm:$0xff]   ;;  %v7944_v37 = vld [vmem:[#allocation5] ss:$0 sm:$0xff]  ;;  %vm11039_vm7 = vmand %vm5245_vm4, %vm5246_vm5  ;;  %vm5262_vm4 = vsmask.f32 5376 }
  0x83   : > { %1439 = vmatpush1.bf16.msra.mxu0 %v6042_v21  ;;  %v6071_v36 = vld [vmem:[#allocation7 + $0x14] ss:$40 sps:$4 sm:$0xff]   ;;  %vm5248_vm10 = vmor %vm11039_vm7, %vm11030_vm6 }
  0x84   : > { %1440 = vmatprep.subr.bf16.mxu0 %v6047_v22  ;;  %5943 = vmatpush1.bf16.msra.mxu1 %v6048_v25  ;;  %vm11062_vm13 = vmand %vm5249_vm8, %vm5250_vm9  ;;  %vm5265_vm8 = vcmask 1046534   ;;  %vm5266_vm9 = vsmask.f32 6400 }
  0x85   : > { %5936 = vmatprep.subr.bf16.mxu1 %v6053_v26  ;;  %vm11080_vm15 = vmor %vm11062_vm13, %vm5248_vm10 }
  0x86   : > { %5905 = vmatmul.mubr.msk.bf16.gmra.mrb[4].mxu0 %vm452_vm0, %v6026_v5  ;;  %vm11089_vm2 = vmand %vm5253_vm11, %vm5254_vm12  ;;  %vm5269_vm12 = vcmask 1047559  }
  0x87   : > { %5908 = vmatprep.mubr.msk.bf16.mxu0 %vm452_vm0, %v6027_v6  ;;  %1441 = vmatpush1.bf16.msra.mxu0 %v6045_v23  ;;  %vm5256_vm5 = vmor %vm11089_vm2, %vm11080_vm15 }
  0x88   : > { %1442 = vmatprep.subr.bf16.mxu0 %v6050_v24  ;;  %5944 = vmatpush1.bf16.msra.mxu1 %v6051_v27  ;;  %vm11138_vm15 = vmand %vm5261_vm3, %vm5262_vm4 }
  0x89   : > { %5937 = vmatprep.subr.bf16.mxu1 %v6056_v28  ;;  %vm11157_vm2 = vmand %vm5265_vm8, %vm5266_vm9 }
  0x8b   : > { %1443 = vmatpush1.bf16.msra.mxu0 %v6048_v25 }
  0x8c   : > { %1444 = vmatprep.subr.bf16.mxu0 %v6053_v26  ;;  %5945 = vmatpush1.bf16.msra.mxu1 %v6054_v29 }
  0x8d   : > { %5938 = vmatprep.subr.bf16.mxu1 %v6059_v30 }
  0x8e   : > { %5909 = vmatmul.mubr.msk.bf16.gmra.mrb[8].mxu0 %vm452_vm0, %v6028_v7 }
  0x8f   : > { %5912 = vmatprep.mubr.msk.bf16.mxu0 %vm452_vm0, %v6029_v8  ;;  %1445 = vmatpush1.bf16.msra.mxu0 %v6051_v27 }
  0x90   : > { %1446 = vmatprep.subr.bf16.mxu0 %v6056_v28  ;;  %5946 = vmatpush1.bf16.msra.mxu1 %v6057_v31 }
  0x91   : > { %5939 = vmatprep.subr.bf16.mxu1 %v6062_v32 }
  0x93   : > { %1447 = vmatpush1.bf16.msra.mxu0 %v6054_v29 }
  0x94   : > { %1448 = vmatprep.subr.bf16.mxu0 %v6059_v30  ;;  %5947 = vmatpush1.bf16.msra.mxu1 %v6060_v33 }
  0x95   : > { %1822 = vmatprep.subr.bf16.mxu1 %v6071_v36 }
  0x96   : > { %5913 = vmatmul.mubr.msk.bf16.gmra.mrb[12].mxu0 %vm452_vm0, %v6030_v9 }
  0x97   : > { %5916 = vmatprep.mubr.msk.bf16.mxu0 %vm452_vm0, %v6031_v10  ;;  %1449 = vmatpush1.bf16.msra.mxu0 %v6057_v31 }
  0x98   : > { %1450 = vmatprep.subr.bf16.mxu0 %v6062_v32 }
  0x9b   : > { %1451 = vmatpush1.bf16.msra.mxu0 %v6060_v33 }
  0x9c   : > { %1629 = vmatprep.subr.bf16.mxu0 %v6065_v35 }
  0x9e   : > { %5917 = vmatmul.mubr.msk.bf16.gmra.mrb[16].mxu0 %vm452_vm0, %v6032_v11 }
  0x9f   : > { %5920 = vmatprep.mubr.msk.bf16.mxu0 %vm452_vm0, %v6033_v12 }
  0xa6   : > { %5921 = vmatmul.mubr.msk.bf16.gmra.mrb[20].mxu0 %vm452_vm0, %v6034_v13 }
  0xa7   : > { %5924 = vmatprep.mubr.msk.bf16.mxu0 %vm452_vm0, %v6035_v14 }
  0xae   : > { %5925 = vmatmul.mubr.msk.bf16.gmra.mrb[24].mxu0 %vm452_vm0, %v6036_v15 }
  0xaf   : > { %5928 = vmatprep.mubr.msk.bf16.mxu0 %vm452_vm0, %v6037_v16 }
  0xb6   : > { %5929 = vmatmul.mubr.msk.bf16.gmra.mrb[28].mxu0 %vm452_vm0, %v6038_v17  ;;  %vm5258_vm0 = vsmask.f32 4352 }
  0xb7   : > { %1468 = vmatprep.mubr.bf16.mxu0 %v11286_v34  ;;  %vm11107_vm11 = vmand %vm5257_vm14, %vm5258_vm0  ;;  %vm5270_vm14 = vsmask.f32 7424 }
  0xb8   : > { %vm11126_vm13 = vmor %vm11107_vm11, %vm5256_vm5 }
  0xb9   : > { %vm5264_vm0 = vmor %vm11138_vm15, %vm11126_vm13 }
  0xba   : > { %vm11176_vm3 = vmor %vm11157_vm2, %vm5264_vm0 }
  0xbb   : > { %vm11191_vm4 = vmand %vm5269_vm12, %vm5270_vm14 }
  0xbc   : > { %vm5272_vm5 = vmor %vm11191_vm4, %vm11176_vm3 }
 0x151   : > { %v5902_v38 = vpop.f32.mrb[0].mxu0 }
 0x152   : > { %v7947_v39 = vadd.f32 %v5902_v38, %v7944_v37  ;;  %v535_v40 = vpop.f32.mrb[1].mxu0 }
 0x153   : > { %v7950_v41 = vadd.f32 %v7944_v37, %v535_v40  ;;  %v5903_v42 = vpop.f32.mrb[2].mxu0 }
 0x154   : > { %v5440_v43 = vmul.f32 -1.442695, %v7947_v39  ;;  %v7954_v44 = vadd.f32 %v5903_v42, %v7944_v37  ;;  %v538_v45 = vpop.f32.mrb[3].mxu0 }
 0x155   : > { %v5438_v46 = vmul.f32 -1.442695, %v7950_v41  ;;  %v7958_v47 = vadd.f32 %v7944_v37, %v538_v45 }
 0x156   : > { %6159 = vpow2.f32 %v5440_v43  ;;  %v5441_v48 = vmul.f32 -1.442695, %v7954_v44 }
 0x157   : > { %6161 = vpow2.f32 %v5438_v46  ;;  %v5439_v49 = vmul.f32 -1.442695, %v7958_v47 }
 0x158   : > { %6163 = vpow2.f32 %v5441_v48 }
 0x159   : > { %6165 = vpow2.f32 %v5439_v49  ;;  %v5906_v50 = vpop.f32.mrb[4].mxu0 }
 0x15a   : > { %v7963_v51 = vadd.f32 %v5906_v50, %v7944_v37  ;;  %v551_v52 = vpop.f32.mrb[5].mxu0 }
 0x15b   : > { %v7966_v53 = vadd.f32 %v7944_v37, %v551_v52  ;;  %v5907_v54 = vpop.f32.mrb[6].mxu0 }
 0x15c   : > { %v5444_v55 = vmul.f32 -1.442695, %v7963_v51  ;;  %v7970_v56 = vadd.f32 %v5907_v54, %v7944_v37  ;;  %v554_v57 = vpop.f32.mrb[7].mxu0 }
 0x15d   : > { %v5442_v58 = vmul.f32 -1.442695, %v7966_v53  ;;  %v7974_v59 = vadd.f32 %v7944_v37, %v554_v57 }
 0x15e   : > { %6167 = vpow2.f32 %v5444_v55  ;;  %v5445_v60 = vmul.f32 -1.442695, %v7970_v56 }
 0x15f   : > { %6169 = vpow2.f32 %v5442_v58  ;;  %v5443_v61 = vmul.f32 -1.442695, %v7974_v59 }
 0x160   : > { %v6160_v62 = vpop.eup %6159  ;;  %6171 = vpow2.f32 %v5445_v60 }
 0x161   : > { %v6162_v63 = vpop.eup %6161  ;;  %v760_v0 = vadd.f32 1.0, %v6160_v62  ;;  %6173 = vpow2.f32 %v5443_v61  ;;  %v5910_v1 = vpop.f32.mrb[8].mxu0 }
 0x162   : > { %v6164_v2 = vpop.eup %6163  ;;  %v758_v3 = vadd.f32 1.0, %v6162_v63  ;;  %v7979_v4 = vadd.f32 %v5910_v1, %v7944_v37  ;;  %v567_v5 = vpop.f32.mrb[9].mxu0  ;;  %v6068_v1 = vld [vmem:[#allocation7 + $0x5c] ss:$40 sps:$4 sm:$0xff]  }
 0x163   : > { %v6166_v6 = vpop.eup %6165  ;;  %6175 = vrcp.f32 %v760_v0  ;;  %v761_v7 = vadd.f32 1.0, %v6164_v2  ;;  %v7982_v8 = vadd.f32 %v7944_v37, %v567_v5  ;;  %v5911_v9 = vpop.f32.mrb[10].mxu0 }
 0x164   : > { %6177 = vrcp.f32 %v758_v3  ;;  %v759_v10 = vadd.f32 1.0, %v6166_v6  ;;  %v5448_v11 = vmul.f32 -1.442695, %v7979_v4  ;;  %v7986_v12 = vadd.f32 %v5911_v9, %v7944_v37  ;;  %v570_v13 = vpop.f32.mrb[11].mxu0 }
 0x165   : > { %6179 = vrcp.f32 %v761_v7  ;;  %v5446_v14 = vmul.f32 -1.442695, %v7982_v8  ;;  %v7990_v15 = vadd.f32 %v7944_v37, %v570_v13 }
 0x166   : > { %6181 = vrcp.f32 %v759_v10  ;;  %v5449_v16 = vmul.f32 -1.442695, %v7986_v12 }
 0x167   : > { %6183 = vpow2.f32 %v5448_v11  ;;  %v5447_v17 = vmul.f32 -1.442695, %v7990_v15 }
 0x168   : > { %v6168_v18 = vpop.eup %6167  ;;  %6185 = vpow2.f32 %v5446_v14 }
 0x169   : > { %v6170_v19 = vpop.eup %6169  ;;  %v764_v20 = vadd.f32 1.0, %v6168_v18  ;;  %6187 = vpow2.f32 %v5449_v16  ;;  %v5914_v21 = vpop.f32.mrb[12].mxu0 }
 0x16a   : > { %v6172_v22 = vpop.eup %6171  ;;  %v762_v23 = vadd.f32 1.0, %v6170_v19  ;;  %6189 = vpow2.f32 %v5447_v17  ;;  %v7995_v24 = vadd.f32 %v5914_v21, %v7944_v37  ;;  %v583_v25 = vpop.f32.mrb[13].mxu0  ;;  %v6066_v17 = vld [vmem:[#allocation7 + $0x58] ss:$40 sps:$4 sm:$0xff]  }
 0x16b   : > { %v6174_v26 = vpop.eup %6173  ;;  %6191 = vrcp.f32 %v764_v20  ;;  %v765_v27 = vadd.f32 1.0, %v6172_v22  ;;  %v7998_v28 = vadd.f32 %v7944_v37, %v583_v25  ;;  %v5915_v29 = vpop.f32.mrb[14].mxu0  ;;  %v6074_v20 = vld [vmem:[#allocation7 + $0xac] ss:$40 sps:$4 sm:$0xff]  }
 0x16c   : > { %6193 = vrcp.f32 %v762_v23  ;;  %v763_v30 = vadd.f32 1.0, %v6174_v26  ;;  %v5452_v31 = vmul.f32 -1.442695, %v7995_v24  ;;  %v8002_v32 = vadd.f32 %v5915_v29, %v7944_v37  ;;  %v586_v33 = vpop.f32.mrb[15].mxu0 }
 0x16d   : > { %v6176_v35 = vpop.eup %6175  ;;  %6195 = vrcp.f32 %v765_v27  ;;  %v5450_v36 = vmul.f32 -1.442695, %v7998_v28  ;;  %v8006_v38 = vadd.f32 %v7944_v37, %v586_v33 }
 0x16e   : > { %v6178_v40 = vpop.eup %6177  ;;  %6197 = vrcp.f32 %v763_v30  ;;  %v5453_v42 = vmul.f32 -1.442695, %v8002_v32  ;;  %v856_v48 = vmul.f32 %v6176_v35, %v7947_v39  ;;  %v6063_v39 = vld [vmem:[#allocation7 + $0x8] ss:$40 sps:$4 sm:$0xff]  }
 0x16f   : > { %v6180_v43 = vpop.eup %6179  ;;  %6199 = vpow2.f32 %v5452_v31  ;;  %v5451_v45 = vmul.f32 -1.442695, %v8006_v38  ;;  %v854_v52 = vmul.f32 %v6178_v40, %v7950_v41 }
 0x170   : > { %v6182_v46 = vpop.eup %6181  ;;  %v857_v49 = vmul.f32 %v6180_v43, %v7954_v44  ;;  %6201 = vpow2.f32 %v5450_v36  ;;  %v6077_v43 = vld [vmem:[#allocation7 + $0xfc] ss:$40 sps:$4 sm:$0xff]  }
 0x171   : > { %v6184_v50 = vpop.eup %6183  ;;  %v855_v54 = vmul.f32 %v6182_v46, %v7958_v47  ;;  %6203 = vpow2.f32 %v5453_v42  ;;  %v5918_v55 = vpop.f32.mrb[16].mxu0 }
 0x172   : > { %v6186_v57 = vpop.eup %6185  ;;  %v8014_v58 = vpack.c.bf16 %v857_v49, %v856_v48  ;;  %v768_v60 = vadd.f32 1.0, %v6184_v50  ;;  %6205 = vpow2.f32 %v5451_v45  ;;  %v8017_v61 = vadd.f32 %v5918_v55, %v7944_v37  ;;  %v599_v62 = vpop.f32.mrb[17].mxu0 }
 0x173   : > { %v6188_v63 = vpop.eup %6187  ;;  %v8019_v44 = vpack.c.bf16 %v855_v54, %v854_v52  ;;  %v766_v0 = vadd.f32 1.0, %v6186_v57  ;;  %v8022_v41 = vadd.f32 %v7944_v37, %v599_v62  ;;  %v5919_v47 = vpop.f32.mrb[18].mxu0  ;;  %v6075_v62 = vld [vmem:[#allocation7 + $0xf8] ss:$40 sps:$4 sm:$0xff]  }
 0x174   : > { %v6190_v2 = vpop.eup %6189  ;;  %6207 = vrcp.f32 %v768_v60  ;;  %v769_v3 = vadd.f32 1.0, %v6188_v63  ;;  %v5456_v5 = vmul.f32 -1.442695, %v8017_v61  ;;  %v8026_v6 = vadd.f32 %v5919_v47, %v7944_v37  ;;  %v602_v7 = vpop.f32.mrb[19].mxu0 }
 0x175   : > { %v6192_v9 = vpop.eup %6191  ;;  %6209 = vrcp.f32 %v766_v0  ;;  %v767_v10 = vadd.f32 1.0, %v6190_v2  ;;  %v5454_v11 = vmul.f32 -1.442695, %v8022_v41  ;;  %v8030_v13 = vadd.f32 %v7944_v37, %v602_v7  ;;  %1469 = vmatmul.mubr.bf16.vlgmr.msra.gmra.mrb[32].mxu0 %v8019_v44  ;;  %v6080_v0 = vld [vmem:[#allocation7 + $0x14c] ss:$40 sps:$4 sm:$0xff]  }
 0x176   : > { %v6194_v14 = vpop.eup %6193  ;;  %6211 = vrcp.f32 %v769_v3  ;;  %v5457_v16 = vmul.f32 -1.442695, %v8026_v6  ;;  %1478 = vmatprep.mubr.bf16.mxu0 %v11286_v34  ;;  %1630 = vmatpush1.bf16.msra.mxu0 %v6063_v39  ;;  %v860_v22 = vmul.f32 %v6192_v9, %v7963_v51  ;;  %v6072_v51 = vld [vmem:[#allocation7 + $0xa8] ss:$40 sps:$4 sm:$0xff]  }
 0x177   : > { %v6196_v18 = vpop.eup %6195  ;;  %6213 = vrcp.f32 %v767_v10  ;;  %v5455_v19 = vmul.f32 -1.442695, %v8030_v13  ;;  %1631 = vmatprep.subr.bf16.mxu0 %v6068_v1  ;;  %v858_v26 = vmul.f32 %v6194_v14, %v7966_v53 }
 0x178   : > { %v6198_v21 = vpop.eup %6197  ;;  %v861_v23 = vmul.f32 %v6196_v18, %v7970_v56  ;;  %6215 = vpow2.f32 %v5456_v5 }
 0x179   : > { %v6200_v25 = vpop.eup %6199  ;;  %v859_v27 = vmul.f32 %v6198_v21, %v7974_v59  ;;  %6217 = vpow2.f32 %v5454_v11  ;;  %v5922_v29 = vpop.f32.mrb[20].mxu0 }
 0x17a   : > { %v6202_v30 = vpop.eup %6201  ;;  %v8040_v31 = vpack.c.bf16 %v861_v23, %v860_v22  ;;  %v772_v33 = vadd.f32 1.0, %v6200_v25  ;;  %6219 = vpow2.f32 %v5457_v16  ;;  %v8043_v35 = vadd.f32 %v5922_v29, %v7944_v37  ;;  %v615_v36 = vpop.f32.mrb[21].mxu0  ;;  %1632 = vmatpush1.bf16.msra.mxu0 %v6066_v17  ;;  %v6069_v16 = vld [vmem:[#allocation7 + $0x10] ss:$40 sps:$4 sm:$0xff]   ;;  %v6083_v25 = vld [vmem:[#allocation7 + $0x64] ss:$40 sps:$4 sm:$0xff]  }
 0x17b   : > { %v6204_v56 = vpop.eup %6203  ;;  %v8045_v40 = vpack.c.bf16 %v859_v27, %v858_v26  ;;  %v770_v42 = vadd.f32 1.0, %v6202_v30  ;;  %6221 = vpow2.f32 %v5455_v19  ;;  %v8048_v53 = vadd.f32 %v7944_v37, %v615_v36  ;;  %v5923_v59 = vpop.f32.mrb[22].mxu0  ;;  %1633 = vmatprep.subr.bf16.mxu0 %v6074_v20  ;;  %v6078_v20 = vld [vmem:[#allocation7 + $0x148] ss:$40 sps:$4 sm:$0xff]   ;;  %v6086_v26 = vld [vmem:[#allocation7 + $0x19c] ss:$40 sps:$4 sm:$0xff]  }
 0x17c   : > { %v6206_v45 = vpop.eup %6205  ;;  %6223 = vrcp.f32 %v772_v33  ;;  %v773_v46 = vadd.f32 1.0, %v6204_v56  ;;  %v5460_v48 = vmul.f32 -1.442695, %v8043_v35  ;;  %v8052_v49 = vadd.f32 %v5923_v59, %v7944_v37  ;;  %v618_v50 = vpop.f32.mrb[23].mxu0 }
 0x17d   : > { %6225 = vrcp.f32 %v770_v42  ;;  %v771_v52 = vadd.f32 1.0, %v6206_v45  ;;  %v5458_v54 = vmul.f32 -1.442695, %v8048_v53  ;;  %v8056_v55 = vadd.f32 %v7944_v37, %v618_v50  ;;  %1479 = vmatmul.mubr.bf16.gmra.mrb[36].mxu0 %v8014_v58  ;;  %v6081_v42 = vld [vmem:[#allocation7 + $0x60] ss:$40 sps:$4 sm:$0xff]  }
 0x17e   : > { %v6208_v57 = vpop.eup %6207  ;;  %6227 = vrcp.f32 %v773_v46  ;;  %v5461_v60 = vmul.f32 -1.442695, %v8052_v49  ;;  %1488 = vmatprep.mubr.bf16.mxu0 %v11286_v34  ;;  %1634 = vmatpush1.bf16.msra.mxu0 %v6072_v51  ;;  %v6084_v45 = vld [vmem:[#allocation7 + $0x198] ss:$40 sps:$4 sm:$0xff]   ;;  %v6095_v46 = vld [vmem:[#allocation7 + $0xb4] ss:$40 sps:$4 sm:$0xff]  }
 0x17f   : > { %v6210_v39 = vpop.eup %6209  ;;  %6229 = vrcp.f32 %v771_v52  ;;  %v5459_v63 = vmul.f32 -1.442695, %v8056_v55  ;;  %1635 = vmatprep.subr.bf16.mxu0 %v6077_v43  ;;  %v864_v2 = vmul.f32 %v6208_v57, %v7979_v4  ;;  %v6089_v52 = vld [vmem:[#allocation7 + $0x1ec] ss:$40 sps:$4 sm:$0xff]  }
 0x180   : > { %v6212_v47 = vpop.eup %6211  ;;  %6231 = vpow2.f32 %v5460_v48  ;;  %v862_v9 = vmul.f32 %v6210_v39, %v7982_v8 }
 0x181   : > { %v6214_v1 = vpop.eup %6213  ;;  %v865_v3 = vmul.f32 %v6212_v47, %v7986_v12  ;;  %6233 = vpow2.f32 %v5458_v54  ;;  %v5926_v5 = vpop.f32.mrb[24].mxu0 }
 0x182   : > { %v6216_v7 = vpop.eup %6215  ;;  %v863_v10 = vmul.f32 %v6214_v1, %v7990_v15  ;;  %6235 = vpow2.f32 %v5461_v60  ;;  %v8067_v11 = vadd.f32 %v5926_v5, %v7944_v37  ;;  %v631_v14 = vpop.f32.mrb[25].mxu0  ;;  %1636 = vmatpush1.bf16.msra.mxu0 %v6075_v62 }
 0x183   : > { %v6218_v17 = vpop.eup %6217  ;;  %v8069_v18 = vpack.c.bf16 %v865_v3, %v864_v2  ;;  %v776_v4 = vadd.f32 1.0, %v6216_v7  ;;  %6237 = vpow2.f32 %v5459_v63  ;;  %v8072_v12 = vadd.f32 %v7944_v37, %v631_v14  ;;  %v5927_v19 = vpop.f32.mrb[26].mxu0  ;;  %1637 = vmatprep.subr.bf16.mxu0 %v6080_v0  ;;  %v6087_v7 = vld [vmem:[#allocation7 + $0x1e8] ss:$40 sps:$4 sm:$0xff]   ;;  %v6092_v14 = vld [vmem:[#allocation7 + $0x23c] ss:$40 sps:$4 sm:$0xff]  }
 0x184   : > { %v6220_v8 = vpop.eup %6219  ;;  %v8074_v15 = vpack.c.bf16 %v863_v10, %v862_v9  ;;  %v774_v21 = vadd.f32 1.0, %v6218_v17  ;;  %v8077_v22 = vadd.f32 %v5927_v19, %v7944_v37  ;;  %v634_v23 = vpop.f32.mrb[27].mxu0  ;;  %v5464_v30 = vmul.f32 -1.442695, %v8067_v11 }
 0x185   : > { %v6222_v27 = vpop.eup %6221  ;;  %6239 = vrcp.f32 %v776_v4  ;;  %v777_v29 = vadd.f32 1.0, %v6220_v8  ;;  %v8081_v33 = vadd.f32 %v7944_v37, %v634_v23  ;;  %1519 = vmatmul.mubr.bf16.vlgmr.msra.gmra.mrb[0].mxu1 %v8069_v18  ;;  %1489 = vmatmul.mubr.bf16.gmra.mrb[40].mxu0 %v8045_v40  ;;  %v5462_v56 = vmul.f32 -1.442695, %v8072_v12  ;;  %v6098_v8 = vld [vmem:[#allocation7 + $0x104] ss:$40 sps:$4 sm:$0xff]  }
 0x186   : > { %v6224_v36 = vpop.eup %6223  ;;  %6241 = vrcp.f32 %v774_v21  ;;  %v775_v51 = vadd.f32 1.0, %v6222_v27  ;;  %1823 = vmatpush1.bf16.msra.mxu1 %v6069_v16  ;;  %1498 = vmatprep.mubr.bf16.mxu0 %v11286_v34  ;;  %v5465_v43 = vmul.f32 -1.442695, %v8077_v22  ;;  %v6093_v16 = vld [vmem:[#allocation7 + $0xb0] ss:$40 sps:$4 sm:$0xff]  }
 0x187   : > { %v6226_v59 = vpop.eup %6225  ;;  %6243 = vrcp.f32 %v777_v29  ;;  %1528 = vmatprep.mubr.bf16.mxu1 %v11286_v34  ;;  %1638 = vmatpush1.bf16.msra.mxu0 %v6078_v20  ;;  %v5463_v50 = vmul.f32 -1.442695, %v8081_v33  ;;  %v868_v57 = vmul.f32 %v6224_v36, %v7995_v24  ;;  %v6090_v29 = vld [vmem:[#allocation7 + $0x238] ss:$40 sps:$4 sm:$0xff]  }
 0x188   : > { %v6228_v48 = vpop.eup %6227  ;;  %6245 = vrcp.f32 %v775_v51  ;;  %1824 = vmatprep.subr.bf16.mxu1 %v6083_v25  ;;  %1639 = vmatprep.subr.bf16.mxu0 %v6086_v26  ;;  %v866_v63 = vmul.f32 %v6226_v59, %v7998_v28  ;;  %v6096_v51 = vld [vmem:[#allocation7 + $0x100] ss:$40 sps:$4 sm:$0xff]  }
 0x189   : > { %v6230_v54 = vpop.eup %6229  ;;  %v869_v60 = vmul.f32 %v6228_v48, %v8002_v32  ;;  %6247 = vpow2.f32 %v5464_v30  ;;  %v5930_v62 = vpop.f32.mrb[28].mxu0 }
 0x18a   : > { %v6232_v39 = vpop.eup %6231  ;;  %v867_v0 = vmul.f32 %v6230_v54, %v8006_v38  ;;  %6249 = vpow2.f32 %v5462_v56  ;;  %v8095_v47 = vadd.f32 %v5930_v62, %v7944_v37  ;;  %v647_v1 = vpop.f32.mrb[29].mxu0  ;;  %1825 = vmatpush1.bf16.msra.mxu1 %v6081_v42  ;;  %v6113_v56 = vld [vmem:[#allocation7 + $0x1c] ss:$40 sps:$4 sm:$0xff]  }
 0x18b   : > { %v6234_v2 = vpop.eup %6233  ;;  %v8097_v3 = vpack.c.bf16 %v869_v60, %v868_v57  ;;  %v780_v5 = vadd.f32 1.0, %v6232_v39  ;;  %6251 = vpow2.f32 %v5465_v43  ;;  %v8100_v24 = vadd.f32 %v7944_v37, %v647_v1  ;;  %v5931_v32 = vpop.f32.mrb[30].mxu0  ;;  %1640 = vmatpush1.bf16.msra.mxu0 %v6084_v45  ;;  %1826 = vmatprep.subr.bf16.mxu1 %v6095_v46  ;;  %v6101_v42 = vld [vmem:[#allocation7 + $0x154] ss:$40 sps:$4 sm:$0xff]   ;;  %v6099_v60 = vld [vmem:[#allocation7 + $0x150] ss:$40 sps:$4 sm:$0xff]  }
 0x18c   : > { %v6236_v28 = vpop.eup %6235  ;;  %v8102_v38 = vpack.c.bf16 %v867_v0, %v866_v63  ;;  %v778_v9 = vadd.f32 1.0, %v6234_v2  ;;  %6253 = vpow2.f32 %v5463_v50  ;;  %v650_v10 = vpop.f32.mrb[31].mxu0  ;;  %1641 = vmatprep.subr.bf16.mxu0 %v6089_v52  ;;  %v5468_v19 = vmul.f32 -1.442695, %v8095_v47  ;;  %v6102_v2 = vld [vmem:[#allocation7 + $0x1a0] ss:$40 sps:$4 sm:$0xff]  }
 0x18d   : > { %v6238_v17 = vpop.eup %6237  ;;  %6255 = vrcp.f32 %v780_v5  ;;  %v781_v4 = vadd.f32 1.0, %v6236_v28  ;;  %1499 = vmatmul.mubr.bf16.gmra.mrb[44].mxu0 %v8040_v31  ;;  %v8107_v20 = vadd.f32 %v5931_v32, %v7944_v37  ;;  %v5466_v23 = vmul.f32 -1.442695, %v8100_v24  ;;  %v6107_v32 = vld [vmem:[#allocation7 + $0x1f4] ss:$40 sps:$4 sm:$0xff]  }
 0x18e   : > { %6257 = vrcp.f32 %v778_v9  ;;  %v779_v21 = vadd.f32 1.0, %v6238_v17  ;;  %1529 = vmatmul.mubr.bf16.gmra.mrb[4].mxu1 %v8102_v38  ;;  %v8112_v25 = vadd.f32 %v7944_v37, %v650_v10  ;;  %1508 = vmatprep.mubr.bf16.mxu0 %v11286_v34  ;;  %v6111_v17 = vld [vmem:[#allocation7 + $0x18] ss:$40 sps:$4 sm:$0xff]  }
 0x18f   : > { %v6240_v26 = vpop.eup %6239  ;;  %6259 = vrcp.f32 %v781_v4  ;;  %v5469_v27 = vmul.f32 -1.442695, %v8107_v20  ;;  %1538 = vmatprep.mubr.bf16.mxu1 %v11286_v34  ;;  %1642 = vmatpush1.bf16.msra.mxu0 %v6087_v7 }
 0x190   : > { %v6242_v30 = vpop.eup %6241  ;;  %6261 = vrcp.f32 %v779_v21  ;;  %v5467_v36 = vmul.f32 -1.442695, %v8112_v25  ;;  %1643 = vmatprep.subr.bf16.mxu0 %v6092_v14  ;;  %1827 = vmatpush1.bf16.msra.mxu1 %v6093_v16  ;;  %v872_v43 = vmul.f32 %v6240_v26, %v8017_v61  ;;  %v6105_v21 = vld [vmem:[#allocation7 + $0x1f0] ss:$40 sps:$4 sm:$0xff]  }
 0x191   : > { %v6244_v37 = vpop.eup %6243  ;;  %6263 = vpow2.f32 %v5468_v19  ;;  %1828 = vmatprep.subr.bf16.mxu1 %v6098_v8  ;;  %v870_v48 = vmul.f32 %v6242_v30, %v8022_v41  ;;  %v6104_v41 = vld [vmem:[#allocation7 + $0x1a4] ss:$40 sps:$4 sm:$0xff]   ;;  %v6117_v30 = vld [vmem:[#allocation7 + $0x68] ss:$40 sps:$4 sm:$0xff]  }
 0x192   : > { %v6246_v59 = vpop.eup %6245  ;;  %v873_v45 = vmul.f32 %v6244_v37, %v8026_v6  ;;  %6265 = vpow2.f32 %v5466_v23  ;;  %v6119_v23 = vld [vmem:[#allocation7 + $0x6c] ss:$40 sps:$4 sm:$0xff]  }
 0x193   : > { %v6248_v46 = vpop.eup %6247  ;;  %v871_v50 = vmul.f32 %v6246_v59, %v8030_v13  ;;  %6267 = vpow2.f32 %v5469_v27  ;;  %1644 = vmatpush1.bf16.msra.mxu0 %v6090_v29 }
 0x194   : > { %v6250_v52 = vpop.eup %6249  ;;  %v8122_v54 = vpack.c.bf16 %v873_v45, %v872_v43  ;;  %v784_v57 = vadd.f32 1.0, %v6248_v46  ;;  %6269 = vpow2.f32 %v5467_v36  ;;  %1829 = vmatpush1.bf16.msra.mxu1 %v6096_v51  ;;  %2015 = vmatprep.subr.bf16.mxu0 %v6113_v56  ;;  %v6108_v51 = vld [vmem:[#allocation7 + $0x240] ss:$40 sps:$4 sm:$0xff]   ;;  %v6125_v56 = vld [vmem:[#allocation7 + $0xbc] ss:$40 sps:$4 sm:$0xff]  }
 0x195   : > { %v6252_v62 = vpop.eup %6251  ;;  %v8124_v61 = vpack.c.bf16 %v871_v50, %v870_v48  ;;  %v782_v6 = vadd.f32 1.0, %v6250_v52  ;;  %1509 = vmatmul.mubr.bf16.gmra.mrb[48].mxu0 %v8074_v15  ;;  %1830 = vmatprep.subr.bf16.mxu1 %v6101_v42  ;;  %v6116_v42 = vld [vmem:[#allocation7 + $0x24] ss:$40 sps:$4 sm:$0xff]   ;;  %v6123_v48 = vld [vmem:[#allocation7 + $0xb8] ss:$40 sps:$4 sm:$0xff]  }
 0x196   : > { %11324 = vst [vmem:[#allocation13_spill] sm:$0xff] %v8122_v54  ;;  %v6254_v39 = vpop.eup %6253  ;;  %6271 = vrcp.f32 %v784_v57  ;;  %v785_v13 = vadd.f32 1.0, %v6252_v62  ;;  %1539 = vmatmul.mubr.bf16.gmra.mrb[8].mxu1 %v8097_v3  ;;  %1661 = vmatprep.mubr.bf16.mxu0 %v11286_v34  ;;  %v6131_v57 = vld [vmem:[#allocation7 + $0x10c] ss:$40 sps:$4 sm:$0xff]  }
 0x197   : > { %11325 = vst [vmem:[#allocation14_spill] sm:$0xff] %v8124_v61  ;;  %v6256_v63 = vpop.eup %6255  ;;  %6273 = vrcp.f32 %v782_v6  ;;  %v783_v0 = vadd.f32 1.0, %v6254_v39  ;;  %1548 = vmatprep.mubr.bf16.mxu1 %v11286_v34 }
 0x198   : > { %v6258_v1 = vpop.eup %6257  ;;  %6275 = vrcp.f32 %v785_v13  ;;  %1831 = vmatpush1.bf16.msra.mxu1 %v6099_v60  ;;  %v876_v28 = vmul.f32 %v6256_v63, %v8043_v35  ;;  %v6110_v35 = vld [vmem:[#allocation7 + $0x244] ss:$40 sps:$4 sm:$0xff]  }
 0x199   : > { %v6260_v5 = vpop.eup %6259  ;;  %6277 = vrcp.f32 %v783_v0  ;;  %1832 = vmatprep.subr.bf16.mxu1 %v6104_v41  ;;  %v874_v14 = vmul.f32 %v6258_v1, %v8048_v53  ;;  %v6135_v0 = vld [vmem:[#allocation7 + $0x158] ss:$40 sps:$4 sm:$0xff]  }
 0x19a   : > { %v6262_v7 = vpop.eup %6261  ;;  %v877_v9 = vmul.f32 %v6260_v5, %v8052_v49 }
 0x19b   : > { %v6264_v10 = vpop.eup %6263  ;;  %v875_v16 = vmul.f32 %v6262_v7, %v8056_v55  ;;  %v6144_v7 = vld [vmem:[#allocation7 + $0x248] ss:$40 sps:$4 sm:$0xff]  }
 0x19c   : > { %v6266_v4 = vpop.eup %6265  ;;  %v8134_v19 = vpack.c.bf16 %v877_v9, %v876_v28  ;;  %v788_v8 = vadd.f32 1.0, %v6264_v10  ;;  %1833 = vmatpush1.bf16.msra.mxu1 %v6102_v2  ;;  %v6140_v2 = vld [vmem:[#allocation7 + $0x1ac] ss:$40 sps:$4 sm:$0xff]   ;;  %v6114_v28 = vld [vmem:[#allocation7 + $0x20] ss:$40 sps:$4 sm:$0xff]  }
 0x19d   : > { %v6268_v26 = vpop.eup %6267  ;;  %v8136_v27 = vpack.c.bf16 %v875_v16, %v874_v14  ;;  %v786_v29 = vadd.f32 1.0, %v6266_v4  ;;  %1662 = vmatmul.mubr.bf16.vlgmr.msra.gmra.mrb[52].mxu0 %v8019_v44  ;;  %1834 = vmatprep.subr.bf16.mxu1 %v6107_v32  ;;  %v6122_v9 = vld [vmem:[#allocation7 + $0x74] ss:$40 sps:$4 sm:$0xff]   ;;  %v6120_v10 = vld [vmem:[#allocation7 + $0x70] ss:$40 sps:$4 sm:$0xff]  }
 0x19e   : > { %11326 = vst [vmem:[#allocation15_spill] sm:$0xff] %v8134_v19  ;;  %v6270_v49 = vpop.eup %6269  ;;  %6279 = vrcp.f32 %v788_v8  ;;  %v789_v53 = vadd.f32 1.0, %v6268_v26  ;;  %1549 = vmatmul.mubr.bf16.gmra.mrb[12].mxu1 %v8124_v61  ;;  %1671 = vmatprep.mubr.bf16.mxu0 %v11286_v34  ;;  %v6128_v14 = vld [vmem:[#allocation7 + $0xc4] ss:$40 sps:$4 sm:$0xff]   ;;  %v6126_v16 = vld [vmem:[#allocation7 + $0xc0] ss:$40 sps:$4 sm:$0xff]  }
 0x19f   : > { %11327 = vst [vmem:[#allocation16_spill] sm:$0xff] %v8136_v27  ;;  %6281 = vrcp.f32 %v786_v29  ;;  %v787_v55 = vadd.f32 1.0, %v6270_v49  ;;  %1558 = vmatprep.mubr.bf16.mxu1 %v11286_v34  ;;  %2016 = vmatpush1.bf16.msra.mxu0 %v6111_v17  ;;  %v6134_v17 = vld [vmem:[#allocation7 + $0x114] ss:$40 sps:$4 sm:$0xff]   ;;  %v6132_v4 = vld [vmem:[#allocation7 + $0x110] ss:$40 sps:$4 sm:$0xff]  }
 0x1a0   : > { %v6272_v36 = vpop.eup %6271  ;;  %6283 = vrcp.f32 %v789_v53  ;;  %1835 = vmatpush1.bf16.msra.mxu1 %v6105_v21  ;;  %2017 = vmatprep.subr.bf16.mxu0 %v6119_v23  ;;  %v6149_v8 = vld [vmem:[#allocation7 + $0x164] ss:$40 sps:$4 sm:$0xff]   ;;  %v6147_v21 = vld [vmem:[#allocation7 + $0x160] ss:$40 sps:$4 sm:$0xff]   ;;  %v6152_v23 = vld [vmem:[#allocation7 + $0x1b4] ss:$40 sps:$4 sm:$0xff]  }
 0x1a1   : > { %v6274_v37 = vpop.eup %6273  ;;  %6285 = vrcp.f32 %v787_v55  ;;  %1836 = vmatprep.subr.bf16.mxu1 %v6110_v35  ;;  %v880_v45 = vmul.f32 %v6272_v36, %v8067_v11  ;;  %v6129_v11 = vld [vmem:[#allocation7 + $0x108] ss:$40 sps:$4 sm:$0xff]   ;;  %v6155_v29 = vld [vmem:[#allocation7 + $0x204] ss:$40 sps:$4 sm:$0xff]   ;;  %v6158_v49 = vld [vmem:[#allocation7 + $0x254] ss:$40 sps:$4 sm:$0xff]   ;;  %v11279_v55 = vlaneseq }
 0x1a2   : > { %v6276_v59 = vpop.eup %6275  ;;  %v878_v50 = vmul.f32 %v6274_v37, %v8072_v12  ;;  %v6150_v26 = vld [vmem:[#allocation7 + $0x1b0] ss:$40 sps:$4 sm:$0xff]   ;;  %v6153_v35 = vld [vmem:[#allocation7 + $0x200] ss:$40 sps:$4 sm:$0xff]  }
 0x1a3   : > { %v6278_v43 = vpop.eup %6277  ;;  %v881_v46 = vmul.f32 %v6276_v59, %v8077_v22  ;;  %2018 = vmatpush1.bf16.msra.mxu0 %v6117_v30  ;;  %v6137_v22 = vld [vmem:[#allocation7 + $0x15c] ss:$40 sps:$4 sm:$0xff]   ;;  %v6156_v53 = vld [vmem:[#allocation7 + $0x250] ss:$40 sps:$4 sm:$0xff]   ;;  %v8236_v30 = vshrl.u32 %v11279_v55, 7 }
 0x1a4   : > { %v879_v52 = vmul.f32 %v6278_v43, %v8081_v33  ;;  %1837 = vmatpush1.bf16.msra.mxu1 %v6108_v51  ;;  %2019 = vmatprep.subr.bf16.mxu0 %v6125_v56  ;;  %v8244_v51 = vld [vmem:[#allocation8] sm:$0xff] }
 0x1a5   : > { %v8146_v60 = vpack.c.bf16 %v881_v46, %v880_v45  ;;  %1672 = vmatmul.mubr.bf16.gmra.mrb[56].mxu0 %v8014_v58  ;;  %2208 = vmatprep.subr.bf16.mxu1 %v6116_v42  ;;  %11332 = vst [vmem:[#allocation21_spill] sm:$0xff] %v8236_v30  ;;  %v8242_v36 = vsub.s32 0, %v8236_v30  ;;  %v8247_v56 = vsub.s32 1, %v8236_v30 }
 0x1a6   : > { %v8149_v62 = vpack.c.bf16 %v879_v52, %v878_v50  ;;  %1559 = vmatmul.mubr.bf16.gmra.mrb[16].mxu1 %v8122_v54  ;;  %1681 = vmatprep.mubr.bf16.mxu0 %v11286_v34 }
 0x1a7   : > { %11328 = vst [vmem:[#allocation17_spill] sm:$0xff] %v8146_v60  ;;  %1568 = vmatprep.mubr.bf16.mxu1 %v11286_v34  ;;  %2020 = vmatpush1.bf16.msra.mxu0 %v6123_v48  ;;  %11333 = vst [vmem:[#allocation22_spill] sm:$0xff] %v8242_v36  ;;  %v8252_v37 = vrot.slane %v8244_v51, %v8242_v36  ;;  %v8257_v42 = vrot.slane %v8244_v51, %v8247_v56 }
 0x1a8   : > { %11329 = vst [vmem:[#allocation18_spill] sm:$0xff] %v8149_v62  ;;  %v6280_v12 = vpop.eup %6279  ;;  %2021 = vmatprep.subr.bf16.mxu0 %v6131_v57  ;;  %11334 = vst [vmem:[#allocation23_spill] sm:$0xff] %v8247_v56 }
 0x1a9   : > { %v6282_v33 = vpop.eup %6281  ;;  %v884_v6 = vmul.f32 %v6280_v12, %v8095_v47  ;;  %v6138_v47 = vld [vmem:[#allocation7 + $0x1a8] ss:$40 sps:$4 sm:$0xff]  }
 0x1aa   : > { %v6284_v41 = vpop.eup %6283  ;;  %v882_v39 = vmul.f32 %v6282_v33, %v8100_v24  ;;  %v6143_v24 = vld [vmem:[#allocation7 + $0x1fc] ss:$40 sps:$4 sm:$0xff]  }
 0x1ab   : > { %v6286_v13 = vpop.eup %6285  ;;  %v885_v63 = vmul.f32 %v6284_v41, %v8107_v20  ;;  %2022 = vmatpush1.bf16.msra.mxu0 %v6129_v11  ;;  %v6141_v20 = vld [vmem:[#allocation7 + $0x1f8] ss:$40 sps:$4 sm:$0xff]  }
 0x1ac   : > { %v883_v1 = vmul.f32 %v6286_v13, %v8112_v25  ;;  %2023 = vmatprep.subr.bf16.mxu0 %v6137_v22  ;;  %v6146_v25 = vld [vmem:[#allocation7 + $0x24c] ss:$40 sps:$4 sm:$0xff]  }
 0x1ad   : > { %v8158_v5 = vpack.c.bf16 %v885_v63, %v884_v6  ;;  %1682 = vmatmul.mubr.bf16.gmra.mrb[60].mxu0 %v8045_v40 }
 0x1ae   : > { %v8161_v32 = vpack.c.bf16 %v883_v1, %v882_v39  ;;  %1569 = vmatmul.mubr.bf16.gmra.mrb[20].mxu1 %v8136_v27  ;;  %1691 = vmatprep.mubr.bf16.mxu0 %v11286_v34 }
 0x1af   : > { %11330 = vst [vmem:[#allocation19_spill] sm:$0xff] %v8158_v5  ;;  %1578 = vmatprep.mubr.bf16.mxu1 %v11286_v34  ;;  %2024 = vmatpush1.bf16.msra.mxu0 %v6135_v0 }
 0x1b0   : > { %11331 = vst [vmem:[#allocation20_spill] sm:$0xff] %v8161_v32  ;;  %2025 = vmatprep.subr.bf16.mxu0 %v6140_v2 }
 0x1b3   : > { %2026 = vmatpush1.bf16.msra.mxu0 %v6138_v47 }
 0x1b4   : > { %2027 = vmatprep.subr.bf16.mxu0 %v6143_v24 }
 0x1b5   : > { %1692 = vmatmul.mubr.bf16.gmra.mrb[64].mxu0 %v8040_v31 }
 0x1b6   : > { %1579 = vmatmul.mubr.bf16.gmra.mrb[24].mxu1 %v8134_v19  ;;  %1701 = vmatprep.mubr.bf16.mxu0 %v11286_v34 }
 0x1b7   : > { %1588 = vmatprep.mubr.bf16.mxu1 %v11286_v34  ;;  %2028 = vmatpush1.bf16.msra.mxu0 %v6141_v20 }
 0x1b8   : > { %2029 = vmatprep.subr.bf16.mxu0 %v6146_v25 }
 0x1bb   : > { %2030 = vmatpush1.bf16.msra.mxu0 %v6144_v7 }
 0x1bd   : > { %1702 = vmatmul.mubr.bf16.gmra.mrb[68].mxu0 %v8074_v15 }
 0x1be   : > { %1589 = vmatmul.mubr.bf16.gmra.mrb[28].mxu1 %v8149_v62  ;;  %1711 = vmatprep.mubr.bf16.mxu0 %v11286_v34 }
 0x1bf   : > { %1598 = vmatprep.mubr.bf16.mxu1 %v11286_v34 }
 0x1c5   : > { %1712 = vmatmul.mubr.bf16.gmra.mrb[72].mxu0 %v8069_v18 }
 0x1c6   : > { %1599 = vmatmul.mubr.bf16.gmra.mrb[32].mxu1 %v8146_v60  ;;  %1721 = vmatprep.mubr.bf16.mxu0 %v11286_v34 }
 0x1c7   : > { %1608 = vmatprep.mubr.bf16.mxu1 %v11286_v34 }
 0x1cd   : > { %1722 = vmatmul.mubr.bf16.gmra.mrb[76].mxu0 %v8102_v38 }
 0x1ce   : > { %1609 = vmatmul.mubr.bf16.gmra.mrb[36].mxu1 %v8161_v32  ;;  %1731 = vmatprep.mubr.bf16.mxu0 %v11286_v34 }
 0x1cf   : > { %1618 = vmatprep.mubr.bf16.mxu1 %v11286_v34 }
 0x1d5   : > { %1732 = vmatmul.mubr.bf16.gmra.mrb[80].mxu0 %v8097_v3 }
 0x1d6   : > { %1619 = vmatmul.mubr.bf16.gmra.mrb[40].mxu1 %v8158_v5  ;;  %1741 = vmatprep.mubr.bf16.mxu0 %v11286_v34 }
 0x1d7   : > { %1854 = vmatprep.mubr.bf16.mxu1 %v11286_v34 }
 0x1dd   : > { %1742 = vmatmul.mubr.bf16.gmra.mrb[84].mxu0 %v8124_v61 }
 0x1de   : > { %1855 = vmatmul.mubr.bf16.vlgmr.msra.gmra.mrb[44].mxu1 %v8019_v44  ;;  %1751 = vmatprep.mubr.bf16.mxu0 %v11286_v34 }
 0x1df   : > { %2209 = vmatpush1.bf16.msra.mxu1 %v6114_v28  ;;  %1864 = vmatprep.mubr.bf16.mxu1 %v11286_v34 }
 0x1e0   : > { %2210 = vmatprep.subr.bf16.mxu1 %v6122_v9 }
 0x1e3   : > { %2211 = vmatpush1.bf16.msra.mxu1 %v6120_v10 }
 0x1e4   : > { %2212 = vmatprep.subr.bf16.mxu1 %v6128_v14 }
 0x1e5   : > { %1752 = vmatmul.mubr.bf16.gmra.mrb[88].mxu0 %v8122_v54 }
 0x1e6   : > { %1865 = vmatmul.mubr.bf16.gmra.mrb[48].mxu1 %v8014_v58  ;;  %1761 = vmatprep.mubr.bf16.mxu0 %v11286_v34 }
 0x1e7   : > { %1874 = vmatprep.mubr.bf16.mxu1 %v11286_v34  ;;  %2213 = vmatpush1.bf16.msra.mxu1 %v6126_v16 }
 0x1e8   : > { %2214 = vmatprep.subr.bf16.mxu1 %v6134_v17 }
 0x1eb   : > { %2215 = vmatpush1.bf16.msra.mxu1 %v6132_v4 }
 0x1ec   : > { %2216 = vmatprep.subr.bf16.mxu1 %v6149_v8 }
 0x1ed   : > { %1762 = vmatmul.mubr.bf16.gmra.mrb[92].mxu0 %v8136_v27 }
 0x1ee   : > { %1875 = vmatmul.mubr.bf16.gmra.mrb[52].mxu1 %v8045_v40  ;;  %1771 = vmatprep.mubr.bf16.mxu0 %v11286_v34 }
 0x1ef   : > { %1884 = vmatprep.mubr.bf16.mxu1 %v11286_v34  ;;  %2217 = vmatpush1.bf16.msra.mxu1 %v6147_v21 }
 0x1f0   : > { %2218 = vmatprep.subr.bf16.mxu1 %v6152_v23 }
 0x1f3   : > { %2219 = vmatpush1.bf16.msra.mxu1 %v6150_v26 }
 0x1f4   : > { %2220 = vmatprep.subr.bf16.mxu1 %v6155_v29 }
 0x1f5   : > { %1772 = vmatmul.mubr.bf16.gmra.mrb[96].mxu0 %v8134_v19 }
 0x1f6   : > { %1885 = vmatmul.mubr.bf16.gmra.mrb[56].mxu1 %v8040_v31  ;;  %1781 = vmatprep.mubr.bf16.mxu0 %v11286_v34 }
 0x1f7   : > { %1894 = vmatprep.mubr.bf16.mxu1 %v11286_v34  ;;  %2221 = vmatpush1.bf16.msra.mxu1 %v6153_v35 }
 0x1f8   : > { %2222 = vmatprep.subr.bf16.mxu1 %v6158_v49 }
 0x1fb   : > { %2223 = vmatpush1.bf16.msra.mxu1 %v6156_v53 }
 0x1fd   : > { %1782 = vmatmul.mubr.bf16.gmra.mrb[100].mxu0 %v8149_v62 }
 0x1fe   : > { %1895 = vmatmul.mubr.bf16.gmra.mrb[60].mxu1 %v8074_v15  ;;  %1791 = vmatprep.mubr.bf16.mxu0 %v11286_v34 }
 0x1ff   : > { %1904 = vmatprep.mubr.bf16.mxu1 %v11286_v34 }
 0x205   : > { %1792 = vmatmul.mubr.bf16.gmra.mrb[104].mxu0 %v8146_v60 }
 0x206   : > { %1905 = vmatmul.mubr.bf16.gmra.mrb[64].mxu1 %v8069_v18  ;;  %1801 = vmatprep.mubr.bf16.mxu0 %v11286_v34 }
 0x207   : > { %1914 = vmatprep.mubr.bf16.mxu1 %v11286_v34 }
 0x20d   : > { %1802 = vmatmul.mubr.bf16.gmra.mrb[108].mxu0 %v8161_v32 }
 0x20e   : > { %1915 = vmatmul.mubr.bf16.gmra.mrb[68].mxu1 %v8102_v38  ;;  %1811 = vmatprep.mubr.bf16.mxu0 %v11286_v34 }
 0x20f   : > { %1924 = vmatprep.mubr.bf16.mxu1 %v11286_v34 }
 0x215   : > { %1812 = vmatmul.mubr.bf16.gmra.mrb[112].mxu0 %v8158_v5 }
 0x216   : > { %1925 = vmatmul.mubr.bf16.gmra.mrb[72].mxu1 %v8097_v3  ;;  %2047 = vmatprep.mubr.bf16.mxu0 %v11286_v34 }
 0x217   : > { %1934 = vmatprep.mubr.bf16.mxu1 %v11286_v34 }
 0x21d   : > { %2048 = vmatmul.mubr.bf16.vlgmr.msra.gmra.mrb[116].mxu0 %v8019_v44 }
 0x21e   : > { %1935 = vmatmul.mubr.bf16.gmra.mrb[76].mxu1 %v8124_v61  ;;  %2057 = vmatprep.mubr.bf16.mxu0 %v11286_v34 }
 0x21f   : > { %1944 = vmatprep.mubr.bf16.mxu1 %v11286_v34 }
 0x225   : > { %2058 = vmatmul.mubr.bf16.gmra.mrb[120].mxu0 %v8014_v58 }
 0x226   : > { %1945 = vmatmul.mubr.bf16.gmra.mrb[80].mxu1 %v8122_v54  ;;  %2067 = vmatprep.mubr.bf16.mxu0 %v11286_v34 }
 0x227   : > { %1954 = vmatprep.mubr.bf16.mxu1 %v11286_v34 }
 0x22d   : > { %2068 = vmatmul.mubr.bf16.gmra.mrb[124].mxu0 %v8045_v40 }
 0x22e   : > { %1955 = vmatmul.mubr.bf16.gmra.mrb[84].mxu1 %v8136_v27  ;;  %2077 = vmatprep.mubr.bf16.mxu0 %v11286_v34 }
 0x22f   : > { %1964 = vmatprep.mubr.bf16.mxu1 %v11286_v34 }
 0x235   : > { %2078 = vmatmul.mubr.bf16.gmra.mrb[128].mxu0 %v8040_v31 }
 0x236   : > { %1965 = vmatmul.mubr.bf16.gmra.mrb[88].mxu1 %v8134_v19  ;;  %2087 = vmatprep.mubr.bf16.mxu0 %v11286_v34 }
 0x237   : > { %1974 = vmatprep.mubr.bf16.mxu1 %v11286_v34 }
 0x23d   : > { %2088 = vmatmul.mubr.bf16.gmra.mrb[132].mxu0 %v8074_v15 }
 0x23e   : > { %1975 = vmatmul.mubr.bf16.gmra.mrb[92].mxu1 %v8149_v62  ;;  %2097 = vmatprep.mubr.bf16.mxu0 %v11286_v34 }
 0x23f   : > { %1984 = vmatprep.mubr.bf16.mxu1 %v11286_v34 }
 0x245   : > { %2098 = vmatmul.mubr.bf16.gmra.mrb[136].mxu0 %v8069_v18 }
 0x246   : > { %1985 = vmatmul.mubr.bf16.gmra.mrb[96].mxu1 %v8146_v60  ;;  %2107 = vmatprep.mubr.bf16.mxu0 %v11286_v34 }
 0x247   : > { %1994 = vmatprep.mubr.bf16.mxu1 %v11286_v34 }
 0x248   : > { %v1470_v59 = vpop.f32.mrb[32].mxu0 }
 0x249   : > { %v8262_v43 = vadd.f32 %v1470_v59, %v8252_v37  ;;  %v1472_v45 = vpop.f32.mrb[33].mxu0 }
 0x24a   : > { %v8265_v46 = vadd.f32 %v1472_v45, %v8257_v42  ;;  %v1474_v48 = vpop.f32.mrb[34].mxu0 }
 0x24b   : > { %v5550_v50 = vmul.f32 -1.442695, %v8262_v43  ;;  %v8269_v52 = vadd.f32 %v1474_v48, %v8252_v37  ;;  %v1476_v57 = vpop.f32.mrb[35].mxu0 }
 0x24c   : > { %v5551_v11 = vmul.f32 -1.442695, %v8265_v46  ;;  %v8273_v12 = vadd.f32 %v1476_v57, %v8257_v42 }
 0x24d   : > { %6287 = vpow2.f32 %v5550_v50  ;;  %v5560_v22 = vmul.f32 -1.442695, %v8269_v52  ;;  %2108 = vmatmul.mubr.bf16.gmra.mrb[140].mxu0 %v8102_v38 }
 0x24e   : > { %6289 = vpow2.f32 %v5551_v11  ;;  %v5561_v33 = vmul.f32 -1.442695, %v8273_v12  ;;  %1995 = vmatmul.mubr.bf16.gmra.mrb[100].mxu1 %v8161_v32  ;;  %2117 = vmatprep.mubr.bf16.mxu0 %v11286_v34 }
 0x24f   : > { %6291 = vpow2.f32 %v5560_v22  ;;  %2004 = vmatprep.mubr.bf16.mxu1 %v11286_v34 }
 0x250   : > { %6293 = vpow2.f32 %v5561_v33  ;;  %v1480_v6 = vpop.f32.mrb[36].mxu0 }
 0x251   : > { %v8282_v41 = vadd.f32 %v1480_v6, %v8252_v37  ;;  %v1482_v39 = vpop.f32.mrb[37].mxu0 }
 0x252   : > { %v8285_v13 = vadd.f32 %v1482_v39, %v8257_v42  ;;  %v1484_v63 = vpop.f32.mrb[38].mxu0 }
 0x253   : > { %v5570_v0 = vmul.f32 -1.442695, %v8282_v41  ;;  %v8289_v1 = vadd.f32 %v1484_v63, %v8252_v37  ;;  %v1486_v2 = vpop.f32.mrb[39].mxu0 }
 0x254   : > { %v5571_v47 = vmul.f32 -1.442695, %v8285_v13  ;;  %v8293_v24 = vadd.f32 %v1486_v2, %v8257_v42 }
 0x255   : > { %6295 = vpow2.f32 %v5570_v0  ;;  %v5580_v20 = vmul.f32 -1.442695, %v8289_v1  ;;  %2118 = vmatmul.mubr.bf16.gmra.mrb[144].mxu0 %v8097_v3 }
 0x256   : > { %6297 = vpow2.f32 %v5571_v47  ;;  %v5581_v25 = vmul.f32 -1.442695, %v8293_v24  ;;  %2005 = vmatmul.mubr.bf16.gmra.mrb[104].mxu1 %v8158_v5  ;;  %2127 = vmatprep.mubr.bf16.mxu0 %v11286_v34 }
 0x257   : > { %v6288_v7 = vpop.eup %6287  ;;  %6299 = vpow2.f32 %v5580_v20  ;;  %2240 = vmatprep.mubr.bf16.mxu1 %v11286_v34 }
 0x258   : > { %v6290_v28 = vpop.eup %6289  ;;  %v3361_v9 = vadd.f32 1.0, %v6288_v7  ;;  %6301 = vpow2.f32 %v5581_v25  ;;  %v1520_v10 = vpop.f32.mrb[0].mxu1 }
 0x259   : > { %v1490_v14 = vpop.f32.mrb[40].mxu0  ;;  %v6292_v16 = vpop.eup %6291  ;;  %v3362_v17 = vadd.f32 1.0, %v6290_v28  ;;  %v8302_v4 = vadd.f32 %v1520_v10, %v8252_v37 }
 0x25a   : > { %v8305_v8 = vadd.f32 %v1490_v14, %v8252_v37  ;;  %v1522_v21 = vpop.f32.mrb[1].mxu1  ;;  %v1492_v23 = vpop.f32.mrb[41].mxu0  ;;  %6303 = vrcp.f32 %v3361_v9  ;;  %v3371_v29 = vadd.f32 1.0, %v6292_v16 }
 0x25b   : > { %v6294_v26 = vpop.eup %6293  ;;  %v8308_v35 = vadd.f32 %v1522_v21, %v8257_v42  ;;  %v8311_v49 = vadd.f32 %v1492_v23, %v8257_v42  ;;  %v1524_v53 = vpop.f32.mrb[2].mxu1  ;;  %6305 = vrcp.f32 %v3362_v17  ;;  %v5650_v48 = vmul.f32 -1.442695, %v8302_v4 }
 0x25c   : > { %v1494_v59 = vpop.f32.mrb[42].mxu0  ;;  %v3372_v45 = vadd.f32 1.0, %v6294_v26  ;;  %v5590_v50 = vmul.f32 -1.442695, %v8305_v8  ;;  %v1526_v57 = vpop.f32.mrb[3].mxu1  ;;  %6307 = vrcp.f32 %v3371_v29  ;;  %v8319_v6 = vadd.f32 %v1524_v53, %v8252_v37 }
 0x25d   : > { %v5651_v11 = vmul.f32 -1.442695, %v8308_v35  ;;  %v1496_v22 = vpop.f32.mrb[43].mxu0  ;;  %v5591_v33 = vmul.f32 -1.442695, %v8311_v49  ;;  %2128 = vmatmul.mubr.bf16.gmra.mrb[148].mxu0 %v8124_v61  ;;  %v8324_v63 = vadd.f32 %v1494_v59, %v8252_v37  ;;  %v8328_v47 = vadd.f32 %v1526_v57, %v8257_v42 }
 0x25e   : > { %6309 = vrcp.f32 %v3372_v45  ;;  %2241 = vmatmul.mubr.bf16.vlgmr.msra.gmra.mrb[108].mxu1 %v8019_v44  ;;  %2137 = vmatprep.mubr.bf16.mxu0 %v11286_v34  ;;  %v8331_v44 = vadd.f32 %v1496_v22, %v8257_v42  ;;  %v5660_v16 = vmul.f32 -1.442695, %v8319_v6 }
 0x25f   : > { %6311 = vpow2.f32 %v5650_v48  ;;  %v6296_v39 = vpop.eup %6295  ;;  %2250 = vmatprep.mubr.bf16.mxu1 %v11286_v34  ;;  %v5600_v29 = vmul.f32 -1.442695, %v8324_v63  ;;  %v5661_v48 = vmul.f32 -1.442695, %v8328_v47 }
 0x260   : > { %6313 = vpow2.f32 %v5590_v50  ;;  %v6298_v0 = vpop.eup %6297  ;;  %v3381_v2 = vadd.f32 1.0, %v6296_v39  ;;  %v1500_v20 = vpop.f32.mrb[44].mxu0 }
 0x261   : > { %6315 = vpow2.f32 %v5651_v11  ;;  %v6300_v25 = vpop.eup %6299  ;;  %v3382_v7 = vadd.f32 1.0, %v6298_v0  ;;  %v1530_v28 = vpop.f32.mrb[4].mxu1  ;;  %v8335_v17 = vadd.f32 %v1500_v20, %v8252_v37  ;;  %v5601_v11 = vmul.f32 -1.442695, %v8331_v44 }
 0x262   : > { %6317 = vpow2.f32 %v5591_v33  ;;  %v1502_v9 = vpop.f32.mrb[45].mxu0  ;;  %v6302_v10 = vpop.eup %6301  ;;  %v3391_v14 = vadd.f32 1.0, %v6300_v25  ;;  %v8353_v20 = vadd.f32 %v1530_v28, %v8252_v37 }
 0x263   : > { %6319 = vrcp.f32 %v3381_v2  ;;  %v1532_v21 = vpop.f32.mrb[5].mxu1  ;;  %v1504_v23 = vpop.f32.mrb[46].mxu0  ;;  %v3392_v26 = vadd.f32 1.0, %v6302_v10  ;;  %v5610_v33 = vmul.f32 -1.442695, %v8335_v17 }
 0x264   : > { %6321 = vrcp.f32 %v3382_v7  ;;  %v8338_v53 = vpop.f32.mrb[6].mxu1  ;;  %v8340_v59 = vpop.f32.mrb[47].mxu0  ;;  %11335 = vst [vmem:[#allocation24_spill] sm:$0xff] %v8353_v20  ;;  %v8364_v28 = vadd.f32 %v1532_v21, %v8257_v42  ;;  %v5670_v21 = vmul.f32 -1.442695, %v8353_v20 }
 0x265   : > { %v6304_v45 = vpop.eup %6303  ;;  %6323 = vrcp.f32 %v3391_v14  ;;  %v8343_v50 = vpop.f32.mrb[7].mxu1  ;;  %2138 = vmatmul.mubr.bf16.gmra.mrb[152].mxu0 %v8122_v54 }
 0x266   : > { %v6306_v57 = vpop.eup %6305  ;;  %6325 = vrcp.f32 %v3392_v26  ;;  %2251 = vmatmul.mubr.bf16.gmra.mrb[112].mxu1 %v8014_v58  ;;  %2147 = vmatprep.mubr.bf16.mxu0 %v11286_v34  ;;  %v4321_v0 = vmul.f32 %v6304_v45, %v8262_v43  ;;  %v8359_v58 = vadd.f32 %v1502_v9, %v8257_v42  ;;  %11336 = vst [vmem:[#allocation25_spill] sm:$0xff] %v8364_v28 }
 0x267   : > { %v6308_v22 = vpop.eup %6307  ;;  %6327 = vpow2.f32 %v5660_v16  ;;  %2260 = vmatprep.mubr.bf16.mxu1 %v11286_v34  ;;  %v4322_v7 = vmul.f32 %v6306_v57, %v8265_v46  ;;  %v8371_v9 = vadd.f32 %v1504_v23, %v8252_v37 }
 0x268   : > { %v6310_v39 = vpop.eup %6309  ;;  %v4331_v2 = vmul.f32 %v6308_v22, %v8269_v52  ;;  %6329 = vpow2.f32 %v5600_v29  ;;  %v8361_v14 = vpop.f32.mrb[48].mxu0 }
 0x269   : > { %v6312_v25 = vpop.eup %6311  ;;  %v4332_v10 = vmul.f32 %v6310_v39, %v8273_v12  ;;  %6331 = vpow2.f32 %v5661_v48  ;;  %v8366_v26 = vpop.f32.mrb[8].mxu1  ;;  %v5620_v55 = vmul.f32 -1.442695, %v8371_v9 }
 0x26a   : > { %v6314_v43 = vpop.eup %6313  ;;  %v4643_v16 = vadd.f32 %v4331_v2, %v4321_v0  ;;  %v3461_v52 = vadd.f32 1.0, %v6312_v25  ;;  %6333 = vpow2.f32 %v5601_v11  ;;  %v8368_v29 = vpop.f32.mrb[49].mxu0 }
 0x26b   : > { %v6316_v46 = vpop.eup %6315  ;;  %v4680_v45 = vadd.f32 %v4332_v10, %v4322_v7  ;;  %v3401_v12 = vadd.f32 1.0, %v6314_v43  ;;  %6335 = vpow2.f32 %v5610_v33  ;;  %v8373_v48 = vpop.f32.mrb[9].mxu1  ;;  %v5611_v33 = vmul.f32 -1.442695, %v8359_v58 }
 0x26c   : > { %v8375_v57 = vpop.f32.mrb[50].mxu0  ;;  %v6318_v22 = vpop.eup %6317  ;;  %6337 = vrcp.f32 %v3461_v52  ;;  %v3462_v11 = vadd.f32 1.0, %v6316_v46  ;;  %v5671_v43 = vmul.f32 -1.442695, %v8364_v28 }
 0x26d   : > { %v8378_v39 = vpop.f32.mrb[10].mxu1  ;;  %v8380_v0 = vpop.f32.mrb[51].mxu0  ;;  %6339 = vrcp.f32 %v3401_v12  ;;  %v3402_v25 = vadd.f32 1.0, %v6318_v22  ;;  %2148 = vmatmul.mubr.bf16.gmra.mrb[156].mxu0 %v8136_v27 }
 0x26e   : > { %v6320_v2 = vpop.eup %6319  ;;  %v8383_v23 = vpop.f32.mrb[11].mxu1  ;;  %6341 = vrcp.f32 %v3462_v11  ;;  %2261 = vmatmul.mubr.bf16.gmra.mrb[116].mxu1 %v8045_v40  ;;  %2157 = vmatprep.mubr.bf16.mxu0 %v11286_v34 }
 0x26f   : > { %v6322_v7 = vpop.eup %6321  ;;  %v4341_v10 = vmul.f32 %v6320_v2, %v8282_v41  ;;  %6343 = vrcp.f32 %v3402_v25  ;;  %2270 = vmatprep.mubr.bf16.mxu1 %v11286_v34 }
 0x270   : > { %v6324_v52 = vpop.eup %6323  ;;  %v4342_v46 = vmul.f32 %v6322_v7, %v8285_v13  ;;  %6345 = vpow2.f32 %v5670_v21  ;;  %v8397_v13 = vadd.f32 %v8338_v53, %v8252_v37  ;;  %v8399_v25 = vpop.f32.mrb[52].mxu0  ;;  %v8411_v53 = vadd.f32 %v8343_v50, %v8257_v42 }
 0x271   : > { %v6326_v12 = vpop.eup %6325  ;;  %v4644_v22 = vadd.f32 %v4643_v16, %v4341_v10  ;;  %v4351_v56 = vmul.f32 %v6324_v52, %v8289_v1  ;;  %6347 = vpow2.f32 %v5611_v33  ;;  %v8403_v1 = vadd.f32 %v8340_v59, %v8257_v42  ;;  %v8405_v16 = vpop.f32.mrb[12].mxu1 }
 0x272   : > { %v6328_v41 = vpop.eup %6327  ;;  %v4681_v11 = vadd.f32 %v4680_v45, %v4342_v46  ;;  %v4352_v2 = vmul.f32 %v6326_v12, %v8293_v24  ;;  %11337 = vst [vmem:[#allocation26_spill] sm:$0xff] %v8397_v13  ;;  %6349 = vpow2.f32 %v5671_v43  ;;  %v8407_v45 = vpop.f32.mrb[53].mxu0  ;;  %11338 = vst [vmem:[#allocation27_spill] sm:$0xff] %v8411_v53  ;;  %v8419_v52 = vadd.f32 %v8361_v14, %v8252_v37 }
 0x273   : > { %v6330_v40 = vpop.eup %6329  ;;  %v4645_v7 = vadd.f32 %v4644_v22, %v4351_v56  ;;  %v3471_v36 = vadd.f32 1.0, %v6328_v41  ;;  %6351 = vpow2.f32 %v5620_v55  ;;  %v8413_v10 = vpop.f32.mrb[13].mxu1  ;;  %v5680_v50 = vmul.f32 -1.442695, %v8397_v13 }
 0x274   : > { %v6332_v24 = vpop.eup %6331  ;;  %v4682_v21 = vadd.f32 %v4681_v11, %v4352_v2  ;;  %v3411_v33 = vadd.f32 1.0, %v6330_v40  ;;  %v8415_v56 = vpop.f32.mrb[54].mxu0  ;;  %v5621_v2 = vmul.f32 -1.442695, %v8403_v1  ;;  %v5681_v40 = vmul.f32 -1.442695, %v8411_v53 }
 0x275   : > { %v6334_v43 = vpop.eup %6333  ;;  %6353 = vrcp.f32 %v3471_v36  ;;  %v3472_v59 = vadd.f32 1.0, %v6332_v24  ;;  %v8421_v46 = vpop.f32.mrb[14].mxu1  ;;  %2158 = vmatmul.mubr.bf16.gmra.mrb[160].mxu0 %v8134_v19 }
 0x276   : > { %v8423_v12 = vpop.f32.mrb[55].mxu0  ;;  %v6336_v55 = vpop.eup %6335  ;;  %6355 = vrcp.f32 %v3411_v33  ;;  %v3412_v22 = vadd.f32 1.0, %v6334_v43  ;;  %2271 = vmatmul.mubr.bf16.gmra.mrb[120].mxu1 %v8040_v31  ;;  %2167 = vmatprep.mubr.bf16.mxu0 %v11286_v34  ;;  %v5630_v43 = vmul.f32 -1.442695, %v8419_v52 }
 0x277   : > { %v8426_v41 = vpop.f32.mrb[15].mxu1  ;;  %v8428_v11 = vpop.eup %6337  ;;  %6357 = vrcp.f32 %v3472_v59  ;;  %v3421_v36 = vadd.f32 1.0, %v6336_v55  ;;  %2280 = vmatprep.mubr.bf16.mxu1 %v11286_v34  ;;  %v8442_v55 = vadd.f32 %v8366_v26, %v8252_v37  ;;  %v8457_v26 = vadd.f32 %v8373_v48, %v8257_v42 }
 0x278   : > { %v6340_v14 = vpop.eup %6339  ;;  %6359 = vrcp.f32 %v3412_v22  ;;  %v8444_v22 = vpop.f32.mrb[56].mxu0 }
 0x279   : > { %v8435_v24 = vpop.eup %6341  ;;  %v4361_v33 = vmul.f32 %v6340_v14, %v8305_v8  ;;  %6361 = vrcp.f32 %v3421_v36  ;;  %11339 = vst [vmem:[#allocation28_spill] sm:$0xff] %v8442_v55  ;;  %v8449_v8 = vadd.f32 %v8368_v29, %v8257_v42  ;;  %v8451_v36 = vpop.f32.mrb[16].mxu1  ;;  %11340 = vst [vmem:[#allocation29_spill] sm:$0xff] %v8457_v26  ;;  %v8464_v29 = vadd.f32 %v8375_v57, %v8252_v37 }
 0x27a   : > { %v6344_v59 = vpop.eup %6343  ;;  %6363 = vpow2.f32 %v5680_v50  ;;  %v8453_v14 = vpop.f32.mrb[57].mxu0  ;;  %v5690_v54 = vmul.f32 -1.442695, %v8442_v55 }
 0x27b   : > { %v6346_v31 = vpop.eup %6345  ;;  %v4646_v19 = vadd.f32 %v4645_v7, %v4361_v33  ;;  %v4362_v27 = vmul.f32 %v6344_v59, %v8311_v49  ;;  %6365 = vpow2.f32 %v5621_v2  ;;  %v8460_v33 = vpop.f32.mrb[17].mxu1  ;;  %v8473_v7 = vadd.f32 %v8378_v39, %v8252_v37 }
 0x27c   : > { %v6348_v50 = vpop.eup %6347  ;;  %v3481_v34 = vadd.f32 1.0, %v6346_v31  ;;  %6367 = vpow2.f32 %v5681_v40  ;;  %v8466_v53 = vpop.f32.mrb[18].mxu1  ;;  %v11342_v39 = vmov 0  }
 0x27d   : > { %v6350_v49 = vpop.eup %6349  ;;  %v4683_v2 = vadd.f32 %v4682_v21, %v4362_v27  ;;  %v3422_v59 = vadd.f32 1.0, %v6348_v50  ;;  %6369 = vpow2.f32 %v5630_v43  ;;  %v8468_v31 = vpop.f32.mrb[58].mxu0  ;;  %11341 = vst [vmem:[#allocation30_spill] sm:$0xff] %v8473_v7  ;;  %v5631_v50 = vmul.f32 -1.442695, %v8449_v8  ;;  %2168 = vmatmul.mubr.bf16.gmra.mrb[164].mxu0 %v8149_v62 }
 0x27e   : > { %v6352_v40 = vpop.eup %6351  ;;  %6371 = vrcp.f32 %v3481_v34  ;;  %v3482_v48 = vadd.f32 1.0, %v6350_v49  ;;  %v8475_v27 = vpop.f32.mrb[19].mxu1  ;;  %v5691_v49 = vmul.f32 -1.442695, %v8457_v26  ;;  %2281 = vmatmul.mubr.bf16.gmra.mrb[124].mxu1 %v8074_v15  ;;  %2177 = vmatprep.mubr.bf16.mxu0 %v11342_v39  ;;  %v5700_v62 = vmul.f32 -1.442695, %v8473_v7 }
 0x27f   : > { %v8477_v21 = vpop.f32.mrb[59].mxu0  ;;  %v8479_v43 = vpop.eup %6353  ;;  %6373 = vrcp.f32 %v3422_v59  ;;  %v3431_v57 = vadd.f32 1.0, %v6352_v40  ;;  %v5640_v59 = vmul.f32 -1.442695, %v8464_v29  ;;  %2290 = vmatprep.mubr.bf16.mxu1 %v11342_v39 }
 0x280   : > { %v6356_v34 = vpop.eup %6355  ;;  %6375 = vrcp.f32 %v3482_v48  ;;  %v11343_v48 = vsub.s32 2, %v8236_v30  ;;  %v8497_v15 = vpop.f32.mrb[60].mxu0 }
 0x281   : > { %v8486_v55 = vpop.eup %6357  ;;  %v4371_v28 = vmul.f32 %v6356_v34, %v8324_v63  ;;  %6377 = vrcp.f32 %v3431_v57  ;;  %11344 = vst [vmem:[#allocation31_spill] sm:$0xff] %v8497_v15  ;;  %v8502_v57 = vadd.f32 %v8380_v0, %v8257_v42  ;;  %v8504_v34 = vpop.f32.mrb[20].mxu1 }
 0x282   : > { %v6360_v40 = vpop.eup %6359  ;;  %6379 = vpow2.f32 %v5690_v54  ;;  %v8495_v26 = vrot.slane %v8244_v51, %v11343_v48  ;;  %v8506_v54 = vpop.f32.mrb[61].mxu0  ;;  %v8511_v48 = vadd.f32 %v8383_v23, %v8257_v42 }
 0x283   : > { %v6362_v13 = vpop.eup %6361  ;;  %v4647_v20 = vadd.f32 %v4646_v19, %v4371_v28  ;;  %v4372_v63 = vmul.f32 %v6360_v40, %v8331_v44  ;;  %6381 = vpow2.f32 %v5631_v50  ;;  %11345 = vst [vmem:[#allocation32_spill] sm:$0xff] %v8506_v54  ;;  %v8514_v44 = vpop.f32.mrb[21].mxu1  ;;  %v8520_v54 = vadd.f32 %v8405_v16, %v8252_v37 }
 0x284   : > { %v6364_v7 = vpop.eup %6363  ;;  %v4381_v61 = vmul.f32 %v6362_v13, %v8335_v17  ;;  %6383 = vpow2.f32 %v5691_v49  ;;  %v8516_v28 = vpop.f32.mrb[62].mxu0  ;;  %v8528_v19 = vadd.f32 %v8399_v25, %v8495_v26  ;;  %v5641_v16 = vmul.f32 -1.442695, %v8502_v57 }
 0x285   : > { %11346 = vst [vmem:[#allocation33_spill] sm:$0xff] %v8516_v28  ;;  %v6366_v0 = vpop.eup %6365  ;;  %v4684_v50 = vadd.f32 %v4683_v2, %v4372_v63  ;;  %v3491_v40 = vadd.f32 1.0, %v6364_v7  ;;  %6385 = vpow2.f32 %v5640_v59  ;;  %v8522_v17 = vpop.f32.mrb[22].mxu1  ;;  %2178 = vmatmul.mubr.bf16.gmra.mrb[168].mxu0 %v8146_v60  ;;  %v11348_v25 = vsub.s32 3, %v8236_v30 }
 0x286   : > { %v8524_v13 = vpop.f32.mrb[63].mxu0  ;;  %v6368_v23 = vpop.eup %6367  ;;  %v4648_v49 = vadd.f32 %v4647_v20, %v4381_v61  ;;  %v3432_v15 = vadd.f32 1.0, %v6366_v0  ;;  %6387 = vpow2.f32 %v5700_v62  ;;  %v5701_v61 = vmul.f32 -1.442695, %v8511_v48  ;;  %2291 = vmatmul.mubr.bf16.gmra.mrb[128].mxu1 %v8069_v18  ;;  %2187 = vmatprep.mubr.bf16.mxu0 %v11342_v39 }
 0x287   : > { %11347 = vst [vmem:[#allocation34_spill] sm:$0xff] %v8524_v13  ;;  %v8530_v28 = vpop.f32.mrb[23].mxu1  ;;  %v6370_v7 = vpop.eup %6369  ;;  %6389 = vrcp.f32 %v3491_v40  ;;  %v3492_v2 = vadd.f32 1.0, %v6368_v23  ;;  %v5710_v20 = vmul.f32 -1.442695, %v8520_v54  ;;  %v8543_v0 = vrot.slane %v8244_v51, %v11348_v25  ;;  %2300 = vmatprep.mubr.bf16.mxu1 %v11342_v39 }
 0x288   : > { %v8534_v59 = vpop.eup %6371  ;;  %6391 = vrcp.f32 %v3432_v15  ;;  %v3441_v63 = vadd.f32 1.0, %v6370_v7  ;;  %v5552_v18 = vmul.f32 -1.442695, %v8528_v19  ;;  %v8550_v23 = vpop.f32.mrb[64].mxu0  ;;  %v8559_v13 = vadd.f32 %v8413_v10, %v8257_v42 }
 0x289   : > { %v6374_v62 = vpop.eup %6373  ;;  %6393 = vrcp.f32 %v3492_v2  ;;  %11349 = vst [vmem:[#allocation35_spill] sm:$0xff] %v8550_v23  ;;  %v8552_v2 = vpop.f32.mrb[24].mxu1  ;;  %v8575_v10 = vadd.f32 %v8421_v46, %v8252_v37 }
 0x28a   : > { %v8546_v40 = vpop.eup %6375  ;;  %v4382_v15 = vmul.f32 %v6374_v62, %v8359_v58  ;;  %6395 = vrcp.f32 %v3441_v63  ;;  %v8554_v60 = vpop.f32.mrb[65].mxu0 }
 0x28b   : > { %v6378_v7 = vpop.eup %6377  ;;  %6397 = vpow2.f32 %v5641_v16  ;;  %11350 = vst [vmem:[#allocation36_spill] sm:$0xff] %v8554_v60  ;;  %v8561_v58 = vpop.f32.mrb[25].mxu1  ;;  %v8567_v16 = vadd.f32 %v8407_v45, %v8543_v0  ;;  %v8581_v45 = vadd.f32 %v8415_v56, %v8495_v26 }
 0x28c   : > { %v6380_v30 = vpop.eup %6379  ;;  %v4685_v51 = vadd.f32 %v4684_v50, %v4382_v15  ;;  %v4391_v25 = vmul.f32 %v6378_v7, %v8371_v9  ;;  %6399 = vpow2.f32 %v5701_v61  ;;  %v8563_v63 = vpop.f32.mrb[66].mxu0 }
 0x28d   : > { %11351 = vst [vmem:[#allocation37_spill] sm:$0xff] %v8563_v63  ;;  %v6382_v62 = vpop.eup %6381  ;;  %v3501_v23 = vadd.f32 1.0, %v6380_v30  ;;  %6401 = vpow2.f32 %v5710_v20  ;;  %v8569_v60 = vpop.f32.mrb[26].mxu1  ;;  %2188 = vmatmul.mubr.bf16.gmra.mrb[172].mxu0 %v8161_v32 }
 0x28e   : > { %11352 = vst [vmem:[#allocation38_spill] sm:$0xff] %v8569_v60  ;;  %v8571_v50 = vpop.f32.mrb[67].mxu0  ;;  %v6384_v9 = vpop.eup %6383  ;;  %v4649_v61 = vadd.f32 %v4648_v49, %v4391_v25  ;;  %v3442_v15 = vadd.f32 1.0, %v6382_v62  ;;  %6403 = vpow2.f32 %v5552_v18  ;;  %v5711_v18 = vmul.f32 -1.442695, %v8559_v13  ;;  %2301 = vmatmul.mubr.bf16.gmra.mrb[132].mxu1 %v8102_v38  ;;  %2197 = vmatprep.mubr.bf16.mxu0 %v11342_v39 }
 0x28f   : > { %11353 = vst [vmem:[#allocation39_spill] sm:$0xff] %v8571_v50  ;;  %v8577_v7 = vpop.f32.mrb[27].mxu1  ;;  %v6386_v30 = vpop.eup %6385  ;;  %6405 = vrcp.f32 %v3501_v23  ;;  %v3502_v20 = vadd.f32 1.0, %v6384_v9  ;;  %v5553_v25 = vmul.f32 -1.442695, %v8567_v16  ;;  %2310 = vmatprep.mubr.bf16.mxu1 %v11342_v39 }
 0x290   : > { %11354 = vst [vmem:[#allocation40_spill] sm:$0xff] %v8577_v7  ;;  %v6388_v50 = vpop.eup %6387  ;;  %6407 = vrcp.f32 %v3442_v15  ;;  %v3451_v49 = vadd.f32 1.0, %v6386_v30  ;;  %v5720_v62 = vmul.f32 -1.442695, %v8575_v10  ;;  %v8592_v9 = vpop.f32.mrb[68].mxu0 }
 0x291   : > { %v8587_v46 = vpop.eup %6389  ;;  %6409 = vrcp.f32 %v3502_v20  ;;  %v3511_v23 = vadd.f32 1.0, %v6388_v50  ;;  %11355 = vst [vmem:[#allocation41_spill] sm:$0xff] %v8592_v9  ;;  %v5562_v30 = vmul.f32 -1.442695, %v8581_v45  ;;  %v8598_v32 = vpop.f32.mrb[28].mxu1 }
 0x292   : > { %v6392_v56 = vpop.eup %6391  ;;  %6411 = vrcp.f32 %v3451_v49  ;;  %v8600_v50 = vpop.f32.mrb[69].mxu0  ;;  %v8604_v49 = vadd.f32 %v8426_v41, %v8257_v42 }
 0x293   : > { %v8594_v15 = vpop.eup %6393  ;;  %v4392_v38 = vmul.f32 %v6392_v56, %v8403_v1  ;;  %6413 = vrcp.f32 %v3511_v23  ;;  %11356 = vst [vmem:[#allocation42_spill] sm:$0xff] %v8600_v50  ;;  %v8606_v7 = vpop.f32.mrb[29].mxu1  ;;  %v8613_v23 = vadd.f32 %v8423_v12, %v8543_v0  ;;  %v8627_v12 = vadd.f32 %v8444_v22, %v8495_v26 }
 0x294   : > { %v6396_v20 = vpop.eup %6395  ;;  %6415 = vpow2.f32 %v5711_v18  ;;  %11357 = vst [vmem:[#allocation43_spill] sm:$0xff] %v8606_v7  ;;  %v8608_v9 = vpop.f32.mrb[70].mxu0  ;;  %v8621_v7 = vadd.f32 %v8451_v36, %v8252_v37  ;;  %v8633_v36 = vadd.f32 %v8460_v33, %v8257_v42  ;;  %v8645_v33 = vadd.f32 %v8453_v14, %v8543_v0 }
 0x295   : > { %11358 = vst [vmem:[#allocation44_spill] sm:$0xff] %v8608_v9  ;;  %v6398_v63 = vpop.eup %6397  ;;  %v4686_v60 = vadd.f32 %v4685_v51, %v4392_v38  ;;  %v4401_v1 = vmul.f32 %v6396_v20, %v8419_v52  ;;  %6417 = vpow2.f32 %v5553_v25  ;;  %v8615_v56 = vpop.f32.mrb[30].mxu1  ;;  %2198 = vmatmul.mubr.bf16.gmra.mrb[176].mxu0 %v8158_v5  ;;  %v5563_v22 = vmul.f32 -1.442695, %v8613_v23 }
 0x296   : > { %11359 = vst [vmem:[#allocation45_spill] sm:$0xff] %v8615_v56  ;;  %v8617_v18 = vpop.f32.mrb[71].mxu0  ;;  %v6400_v50 = vpop.eup %6399  ;;  %v3452_v41 = vadd.f32 1.0, %v6398_v63  ;;  %6419 = vpow2.f32 %v5720_v62  ;;  %v5721_v62 = vmul.f32 -1.442695, %v8604_v49  ;;  %2311 = vmatmul.mubr.bf16.gmra.mrb[136].mxu1 %v8097_v3  ;;  %v4421_v20 = vmul.f32 %v8428_v11, %v8302_v4 }
 0x297   : > { %11360 = vst [vmem:[#allocation46_spill] sm:$0xff] %v8617_v18  ;;  %v8623_v9 = vpop.f32.mrb[31].mxu1  ;;  %v6402_v51 = vpop.eup %6401  ;;  %v4650_v52 = vadd.f32 %v4649_v61, %v4401_v1  ;;  %v3512_v25 = vadd.f32 1.0, %v6400_v50  ;;  %6421 = vpow2.f32 %v5562_v30  ;;  %2320 = vmatprep.mubr.bf16.mxu1 %v11342_v39  ;;  %v5730_v1 = vmul.f32 -1.442695, %v8621_v7  ;;  %v11380_v18 = vld [vmem:[#allocation25_spill] sm:$0xff] }
 0x298   : > { %11361 = vst [vmem:[#allocation47_spill] sm:$0xff] %v8623_v9  ;;  %v6404_v38 = vpop.eup %6403  ;;  %6423 = vrcp.f32 %v3452_v41  ;;  %v3521_v63 = vadd.f32 1.0, %v6402_v51  ;;  %v8647_v3 = vpop.f32.mrb[72].mxu0  ;;  %v8663_v14 = vmul.f32 %v8435_v24, %v8308_v35  ;;  %v8677_v35 = vadd.f32 %v8468_v31, %v8495_v26  ;;  %v11381_v9 = vld [vmem:[#allocation28_spill] sm:$0xff] }
 0x299   : > { %v8636_v61 = vpop.eup %6405  ;;  %6425 = vrcp.f32 %v3512_v25  ;;  %v3363_v30 = vadd.f32 1.0, %v6404_v38  ;;  %11362 = vst [vmem:[#allocation48_spill] sm:$0xff] %v8647_v3  ;;  %v5572_v25 = vmul.f32 -1.442695, %v8627_v12  ;;  %v8655_v38 = vadd.f32 %v8466_v53, %v8252_v37  ;;  %v8657_v4 = vpop.f32.mrb[32].mxu1 }
 0x29a   : > { %v6408_v50 = vpop.eup %6407  ;;  %6427 = vrcp.f32 %v3521_v63  ;;  %11363 = vst [vmem:[#allocation49_spill] sm:$0xff] %v8657_v4  ;;  %v8659_v11 = vpop.f32.mrb[73].mxu0  ;;  %v4431_v3 = vmul.f32 %v8479_v43, %v8319_v6  ;;  %v8730_v4 = vadd.f32 %v8514_v44, %v8257_v42  ;;  %v4442_v44 = vmul.f32 %v8546_v40, %v11380_v18  ;;  %v11383_v40 = vld [vmem:[#allocation32_spill] sm:$0xff]  ;;  %v11384_v18 = vld [vmem:[#allocation13_spill] sm:$0xff] }
 0x29b   : > { %v8649_v41 = vpop.eup %6409  ;;  %v4402_v51 = vmul.f32 %v6408_v50, %v8449_v8  ;;  %6429 = vrcp.f32 %v3363_v30  ;;  %11364 = vst [vmem:[#allocation50_spill] sm:$0xff] %v8659_v11  ;;  %v5731_v8 = vmul.f32 -1.442695, %v8633_v36  ;;  %v8668_v30 = vpop.f32.mrb[33].mxu1 }
 0x29c   : > { %v6412_v63 = vpop.eup %6411  ;;  %6431 = vpow2.f32 %v5721_v62  ;;  %11365 = vst [vmem:[#allocation51_spill] sm:$0xff] %v8668_v30  ;;  %v8670_v50 = vpop.f32.mrb[74].mxu0  ;;  %v8685_v62 = vmul.f32 %v8486_v55, %v8328_v47  ;;  %v8697_v47 = vadd.f32 %v8477_v21, %v8543_v0  ;;  %v8701_v55 = vadd.f32 %v8504_v34, %v8252_v37 }
 0x29d   : > { %11366 = vst [vmem:[#allocation52_spill] sm:$0xff] %v8670_v50  ;;  %v8672_v53 = vpop.eup %6413  ;;  %v4687_v5 = vadd.f32 %v4686_v60, %v4402_v51  ;;  %v4411_v11 = vmul.f32 %v6412_v63, %v8464_v29  ;;  %6433 = vpow2.f32 %v5563_v22  ;;  %v8679_v24 = vpop.f32.mrb[34].mxu1  ;;  %v5573_v50 = vmul.f32 -1.442695, %v8645_v33 }
 0x29e   : > { %11367 = vst [vmem:[#allocation53_spill] sm:$0xff] %v8679_v24  ;;  %v8681_v6 = vpop.f32.mrb[75].mxu0  ;;  %v6416_v43 = vpop.eup %6415  ;;  %6435 = vpow2.f32 %v5730_v1  ;;  %v8690_v60 = vadd.f32 %v8475_v27, %v8257_v42  ;;  %v5740_v63 = vmul.f32 -1.442695, %v8655_v38  ;;  %v11370_v27 = vld [vmem:[#allocation14_spill] sm:$0xff] }
 0x29f   : > { %11368 = vst [vmem:[#allocation54_spill] sm:$0xff] %v8681_v6  ;;  %v8692_v29 = vpop.f32.mrb[35].mxu1  ;;  %v6418_v31 = vpop.eup %6417  ;;  %v4651_v22 = vadd.f32 %v4650_v52, %v4411_v11  ;;  %v3522_v51 = vadd.f32 1.0, %v6416_v43  ;;  %6437 = vpow2.f32 %v5572_v25  ;;  %2321 = vmatmul.mubr.bf16.gmra.mrb[140].mxu1 %v11370_v27  ;;  %v5582_v25 = vmul.f32 -1.442695, %v8677_v35  ;;  %v11371_v43 = vld [vmem:[#allocation31_spill] sm:$0xff] }
 0x2a0   : > { %11369 = vst [vmem:[#allocation55_spill] sm:$0xff] %v8692_v29  ;;  %v6420_v6 = vpop.eup %6419  ;;  %v3364_v24 = vadd.f32 1.0, %v6418_v31  ;;  %6439 = vpow2.f32 %v5731_v8  ;;  %2330 = vmatprep.mubr.bf16.mxu1 %v11342_v39  ;;  %v5741_v21 = vmul.f32 -1.442695, %v8690_v60  ;;  %v8709_v31 = vadd.f32 %v11371_v43, %v8495_v26  ;;  %v8711_v34 = vpop.f32.mrb[76].mxu0 }
 0x2a1   : > { %v6422_v1 = vpop.eup %6421  ;;  %v4652_v29 = vadd.f32 %v4651_v22, %v4421_v20  ;;  %6441 = vrcp.f32 %v3522_v51  ;;  %v3531_v52 = vadd.f32 1.0, %v6420_v6  ;;  %11372 = vst [vmem:[#allocation14_spill] sm:$0xff] %v8711_v34  ;;  %v11373_v20 = vld [vmem:[#allocation24_spill] sm:$0xff]  ;;  %v8718_v30 = vpop.f32.mrb[36].mxu1  ;;  %v8723_v43 = vmul.f32 -1.442695, %v8697_v47 }
 0x2a2   : > { %v6424_v11 = vpop.eup %6423  ;;  %6443 = vrcp.f32 %v3364_v24  ;;  %v3373_v8 = vadd.f32 1.0, %v6422_v1  ;;  %v4441_v6 = vmul.f32 %v8534_v59, %v11373_v20  ;;  %11374 = vst [vmem:[#allocation31_spill] sm:$0xff] %v8718_v30  ;;  %v8720_v24 = vpop.f32.mrb[77].mxu0  ;;  %v8726_v34 = vmul.f32 -1.442695, %v8701_v55 }
 0x2a3   : > { %v8713_v27 = vpop.eup %6425  ;;  %v4653_v22 = vadd.f32 %v4652_v29, %v4431_v3  ;;  %v4412_v51 = vmul.f32 %v6424_v11, %v8502_v57  ;;  %6445 = vrcp.f32 %v3531_v52  ;;  %11375 = vst [vmem:[#allocation24_spill] sm:$0xff] %v8720_v24  ;;  %v8732_v59 = vpop.f32.mrb[37].mxu1  ;;  %v11378_v29 = vld [vmem:[#allocation26_spill] sm:$0xff] }
 0x2a4   : > { %v6428_v1 = vpop.eup %6427  ;;  %6447 = vrcp.f32 %v3373_v8  ;;  %11376 = vst [vmem:[#allocation56_spill] sm:$0xff] %v8732_v59  ;;  %v8734_v57 = vpop.f32.mrb[78].mxu0  ;;  %v4451_v52 = vmul.f32 %v8587_v46, %v11378_v29  ;;  %v4461_v59 = vmul.f32 %v8636_v61, %v11381_v9  ;;  %v8756_v9 = vadd.f32 %v11383_v40, %v8543_v0 }
 0x2a5   : > { %11377 = vst [vmem:[#allocation57_spill] sm:$0xff] %v8734_v57  ;;  %v8736_v3 = vpop.eup %6429  ;;  %v4654_v11 = vadd.f32 %v4653_v22, %v4441_v6  ;;  %v4688_v8 = vadd.f32 %v4687_v5, %v4412_v51  ;;  %6449 = vpow2.f32 %v5573_v50  ;;  %v8740_v20 = vpop.f32.mrb[38].mxu1  ;;  %v5592_v57 = vmul.f32 -1.442695, %v8709_v31  ;;  %v11382_v51 = vld [vmem:[#allocation30_spill] sm:$0xff] }
 0x2a6   : > { %v8742_v24 = vpop.f32.mrb[79].mxu0  ;;  %v6432_v30 = vpop.eup %6431  ;;  %6451 = vpow2.f32 %v5740_v63  ;;  %v4471_v29 = vmul.f32 %v8672_v53, %v11382_v51 }
 0x2a7   : > { %11379 = vst [vmem:[#allocation26_spill] sm:$0xff] %v8742_v24  ;;  %v8749_v56 = vpop.f32.mrb[39].mxu1  ;;  %v6434_v46 = vpop.eup %6433  ;;  %v4655_v6 = vadd.f32 %v4654_v11, %v4451_v52  ;;  %v4689_v5 = vadd.f32 %v4688_v8, %v8663_v14  ;;  %v3532_v50 = vadd.f32 1.0, %v6432_v30  ;;  %6453 = vpow2.f32 %v5582_v25  ;;  %2331 = vmatmul.mubr.bf16.gmra.mrb[144].mxu1 %v11384_v18  ;;  %v11385_v25 = vld [vmem:[#allocation27_spill] sm:$0xff] }
 0x2a8   : > { %v6436_v22 = vpop.eup %6435  ;;  %v3374_v24 = vadd.f32 1.0, %v6434_v46  ;;  %6455 = vpow2.f32 %v5741_v21  ;;  %2340 = vmatprep.mubr.bf16.mxu1 %v11342_v39  ;;  %v4452_v53 = vmul.f32 %v8594_v15, %v11385_v25  ;;  %v4481_v21 = vmul.f32 %v6428_v1, %v8520_v54  ;;  %v8764_v8 = vpop.f32.mrb[80].mxu0  ;;  %v11386_v15 = vld [vmem:[#allocation33_spill] sm:$0xff] }
 0x2a9   : > { %v6438_v61 = vpop.eup %6437  ;;  %v4656_v63 = vadd.f32 %v4655_v6, %v4461_v59  ;;  %v4690_v52 = vadd.f32 %v4689_v5, %v8685_v62  ;;  %6457 = vrcp.f32 %v3532_v50  ;;  %v3541_v14 = vadd.f32 1.0, %v6436_v22  ;;  %v8766_v62 = vpop.f32.mrb[40].mxu1 }
 0x2aa   : > { %v6440_v30 = vpop.eup %6439  ;;  %6459 = vrcp.f32 %v3374_v24  ;;  %v3383_v11 = vadd.f32 1.0, %v6438_v61  ;;  %v8768_v6 = vpop.f32.mrb[81].mxu0  ;;  %v5751_v50 = vmul.f32 -1.442695, %v8730_v4  ;;  %v8773_v54 = vadd.f32 %v8522_v17, %v8252_v37 }
 0x2ab   : > { %v6442_v46 = vpop.eup %6441  ;;  %v4657_v51 = vadd.f32 %v4656_v63, %v4471_v29  ;;  %v4691_v40 = vadd.f32 %v4690_v52, %v4442_v44  ;;  %6461 = vrcp.f32 %v3541_v14  ;;  %v3542_v59 = vadd.f32 1.0, %v6440_v30  ;;  %v8779_v1 = vpop.f32.mrb[41].mxu1  ;;  %v11387_v29 = vld [vmem:[#allocation29_spill] sm:$0xff] }
 0x2ac   : > { %v6444_v5 = vpop.eup %6443  ;;  %6463 = vrcp.f32 %v3383_v11  ;;  %v8777_v24 = vadd.f32 %v11386_v15, %v8495_v26  ;;  %v8781_v44 = vpop.f32.mrb[82].mxu0  ;;  %v4462_v18 = vmul.f32 %v8649_v41, %v11387_v29  ;;  %v4472_v30 = vmul.f32 %v8713_v27, %v8511_v48 }
 0x2ad   : > { %v6446_v22 = vpop.eup %6445  ;;  %v4692_v61 = vadd.f32 %v4691_v40, %v4452_v53  ;;  %v4658_v63 = vadd.f32 %v4657_v51, %v4481_v21  ;;  %6465 = vrcp.f32 %v3542_v59  ;;  %v8785_v52 = vpop.f32.mrb[42].mxu1  ;;  %v8795_v11 = vadd.f32 %v8530_v28, %v8257_v42  ;;  %v11388_v59 = vld [vmem:[#allocation16_spill] sm:$0xff] }
 0x2ae   : > { %v8787_v14 = vpop.f32.mrb[83].mxu0  ;;  %v6448_v17 = vpop.eup %6447  ;;  %v4491_v25 = vmul.f32 %v6446_v22, %v8575_v10  ;;  %6467 = vpow2.f32 %v8723_v43  ;;  %v4323_v51 = vmul.f32 %v8736_v3, %v8528_v19  ;;  %v4482_v10 = vmul.f32 %v6442_v46, %v8559_v13  ;;  %v11389_v3 = vld [vmem:[#allocation34_spill] sm:$0xff] }
 0x2af   : > { %v8797_v41 = vpop.f32.mrb[43].mxu1  ;;  %v6450_v53 = vpop.eup %6449  ;;  %v4693_v21 = vadd.f32 %v4692_v61, %v4462_v18  ;;  %v4333_v40 = vmul.f32 %v6448_v17, %v8581_v45  ;;  %6469 = vpow2.f32 %v8726_v34  ;;  %2341 = vmatmul.mubr.bf16.gmra.mrb[148].mxu1 %v11388_v59  ;;  %v5593_v34 = vmul.f32 -1.442695, %v8756_v9 }
 0x2b0   : > { %v6452_v48 = vpop.eup %6451  ;;  %v4659_v27 = vadd.f32 %v4658_v63, %v4491_v25  ;;  %v3384_v43 = vadd.f32 1.0, %v6450_v53  ;;  %6471 = vpow2.f32 %v5592_v57  ;;  %2350 = vmatprep.mubr.bf16.mxu1 %v11342_v39  ;;  %v8809_v13 = vadd.f32 %v11389_v3, %v8543_v0  ;;  %v8811_v46 = vpop.f32.mrb[84].mxu0 }
 0x2b1   : > { %v6454_v28 = vpop.eup %6453  ;;  %v4694_v15 = vadd.f32 %v4693_v21, %v4472_v30  ;;  %v4717_v22 = vadd.f32 %v4333_v40, %v4323_v51  ;;  %v3551_v29 = vadd.f32 1.0, %v6452_v48  ;;  %6473 = vpow2.f32 %v5751_v50  ;;  %v8814_v50 = vpop.f32.mrb[44].mxu1 }
 0x2b2   : > { %v6456_v19 = vpop.eup %6455  ;;  %6475 = vrcp.f32 %v3384_v43  ;;  %v3393_v45 = vadd.f32 1.0, %v6454_v28  ;;  %v5760_v63 = vmul.f32 -1.442695, %v8773_v54  ;;  %v8816_v17 = vpop.f32.mrb[85].mxu0  ;;  %v5602_v53 = vmul.f32 -1.442695, %v8777_v24 }
 0x2b3   : > { %v6458_v57 = vpop.eup %6457  ;;  %v4695_v18 = vadd.f32 %v4694_v15, %v4482_v10  ;;  %6477 = vrcp.f32 %v3551_v29  ;;  %v3552_v61 = vadd.f32 1.0, %v6456_v19  ;;  %v8820_v21 = vpop.f32.mrb[45].mxu1  ;;  %v4324_v48 = vmul.f32 %v6444_v5, %v8567_v16 }
 0x2b4   : > { %v6460_v30 = vpop.eup %6459  ;;  %v4492_v25 = vmul.f32 %v6458_v57, %v8604_v49  ;;  %6479 = vrcp.f32 %v3393_v45  ;;  %v8822_v51 = vpop.f32.mrb[86].mxu0  ;;  %v5761_v43 = vmul.f32 -1.442695, %v8795_v11  ;;  %v5603_v19 = vmul.f32 -1.442695, %v8809_v13 }
 0x2b5   : > { %v6462_v40 = vpop.eup %6461  ;;  %v4334_v10 = vmul.f32 %v6460_v30, %v8613_v23  ;;  %6481 = vrcp.f32 %v3552_v61  ;;  %v8827_v59 = vpop.f32.mrb[46].mxu1  ;;  %v8838_v5 = vadd.f32 %v8552_v2, %v8252_v37  ;;  %v11391_v30 = vld [vmem:[#allocation15_spill] sm:$0xff] }
 0x2b6   : > { %v8829_v28 = vpop.f32.mrb[87].mxu0  ;;  %v6464_v49 = vpop.eup %6463  ;;  %v4696_v15 = vadd.f32 %v4695_v18, %v4492_v25  ;;  %v4501_v29 = vmul.f32 %v6462_v40, %v8621_v7  ;;  %6483 = vpow2.f32 %v5593_v34  ;;  %v11390_v7 = vld [vmem:[#allocation35_spill] sm:$0xff] }
 0x2b7   : > { %v8833_v45 = vpop.f32.mrb[47].mxu1  ;;  %v6466_v3 = vpop.eup %6465  ;;  %v4754_v16 = vadd.f32 %v4334_v10, %v4324_v48  ;;  %v4343_v23 = vmul.f32 %v6464_v49, %v8627_v12  ;;  %6485 = vpow2.f32 %v5760_v63  ;;  %v8843_v34 = vadd.f32 %v11390_v7, %v8495_v26  ;;  %2351 = vmatmul.mubr.bf16.gmra.mrb[152].mxu1 %v11391_v30  ;;  %v11392_v63 = vld [vmem:[#allocation36_spill] sm:$0xff] }
 0x2b8   : > { %v6468_v57 = vpop.eup %6467  ;;  %v4660_v61 = vadd.f32 %v4659_v27, %v4501_v29  ;;  %v4502_v18 = vmul.f32 %v6466_v3, %v8633_v36  ;;  %6487 = vpow2.f32 %v5602_v53  ;;  %v8848_v12 = vadd.f32 %v8561_v58, %v8257_v42  ;;  %2360 = vmatprep.mubr.bf16.mxu1 %v11342_v39  ;;  %v8855_v10 = vpop.f32.mrb[88].mxu0 }
 0x2b9   : > { %v6470_v25 = vpop.eup %6469  ;;  %v4718_v40 = vadd.f32 %v4717_v22, %v4343_v23  ;;  %v3394_v48 = vadd.f32 1.0, %v6468_v57  ;;  %6489 = vpow2.f32 %v5761_v43  ;;  %v8853_v53 = vadd.f32 %v11392_v63, %v8543_v0  ;;  %v8858_v29 = vpop.f32.mrb[48].mxu1 }
 0x2ba   : > { %v6472_v2 = vpop.eup %6471  ;;  %v4697_v27 = vadd.f32 %v4696_v15, %v4502_v18  ;;  %v3561_v36 = vadd.f32 1.0, %v6470_v25  ;;  %6491 = vpow2.f32 %v5603_v19  ;;  %v5770_v43 = vmul.f32 -1.442695, %v8838_v5  ;;  %11393 = vst [vmem:[#allocation25_spill] sm:$0xff] %v8858_v29  ;;  %v8860_v58 = vpop.f32.mrb[89].mxu0 }
 0x2bb   : > { %v6474_v49 = vpop.eup %6473  ;;  %6493 = vrcp.f32 %v3394_v48  ;;  %v3403_v22 = vadd.f32 1.0, %v6472_v2  ;;  %11394 = vst [vmem:[#allocation28_spill] sm:$0xff] %v8860_v58  ;;  %v5612_v19 = vmul.f32 -1.442695, %v8843_v34  ;;  %v8863_v23 = vpop.f32.mrb[49].mxu1 }
 0x2bc   : > { %v6476_v3 = vpop.eup %6475  ;;  %6495 = vrcp.f32 %v3561_v36  ;;  %v3562_v15 = vadd.f32 1.0, %v6474_v49  ;;  %11395 = vst [vmem:[#allocation30_spill] sm:$0xff] %v8863_v23  ;;  %v8865_v57 = vpop.f32.mrb[90].mxu0  ;;  %v5771_v30 = vmul.f32 -1.442695, %v8848_v12 }
 0x2bd   : > { %11396 = vst [vmem:[#allocation32_spill] sm:$0xff] %v8865_v57  ;;  %v6478_v18 = vpop.eup %6477  ;;  %v4344_v7 = vmul.f32 %v6476_v3, %v8645_v33  ;;  %6497 = vrcp.f32 %v3403_v22  ;;  %v8869_v25 = vpop.f32.mrb[50].mxu1  ;;  %v5613_v63 = vmul.f32 -1.442695, %v8853_v53 }
 0x2be   : > { %11397 = vst [vmem:[#allocation13_spill] sm:$0xff] %v8869_v25  ;;  %v8871_v48 = vpop.f32.mrb[91].mxu0  ;;  %v6480_v2 = vpop.eup %6479  ;;  %v4511_v36 = vmul.f32 %v6478_v18, %v8655_v38  ;;  %6499 = vrcp.f32 %v3562_v15  ;;  %v11400_v38 = vld [vmem:[#allocation18_spill] sm:$0xff] }
 0x2bf   : > { %11398 = vst [vmem:[#allocation27_spill] sm:$0xff] %v8871_v48  ;;  %v8875_v49 = vpop.f32.mrb[51].mxu1  ;;  %v6482_v23 = vpop.eup %6481  ;;  %v4755_v57 = vadd.f32 %v4754_v16, %v4344_v7  ;;  %v4353_v58 = vmul.f32 %v6480_v2, %v8677_v35  ;;  %6501 = vpow2.f32 %v5770_v43  ;;  %v11399_v48 = vld [vmem:[#allocation38_spill] sm:$0xff]  ;;  %2361 = vmatmul.mubr.bf16.gmra.mrb[156].mxu1 %v11400_v38  ;;  %v11401_v16 = vld [vmem:[#allocation37_spill] sm:$0xff]  ;;  %v11402_v43 = vld [vmem:[#allocation40_spill] sm:$0xff] }
 0x2c0   : > { %v6484_v33 = vpop.eup %6483  ;;  %v4661_v22 = vadd.f32 %v4660_v61, %v4511_v36  ;;  %v4512_v3 = vmul.f32 %v6482_v23, %v8690_v60  ;;  %6503 = vpow2.f32 %v5612_v19  ;;  %v8881_v25 = vadd.f32 %v11399_v48, %v8252_v37  ;;  %2370 = vmatprep.mubr.bf16.mxu1 %v11342_v39  ;;  %v8893_v23 = vpop.f32.mrb[92].mxu0 }
 0x2c1   : > { %v6486_v15 = vpop.eup %6485  ;;  %v4719_v18 = vadd.f32 %v4718_v40, %v4353_v58  ;;  %v3404_v29 = vadd.f32 1.0, %v6484_v33  ;;  %6505 = vpow2.f32 %v5771_v30  ;;  %v8886_v7 = vadd.f32 %v11401_v16, %v8495_v26  ;;  %11403 = vst [vmem:[#allocation33_spill] sm:$0xff] %v8893_v23  ;;  %v11404_v58 = vld [vmem:[#allocation39_spill] sm:$0xff]  ;;  %v8899_v2 = vpop.f32.mrb[52].mxu1  ;;  %v11425_v23 = vld [vmem:[#allocation20_spill] sm:$0xff] }
 0x2c2   : > { %v6488_v35 = vpop.eup %6487  ;;  %v4698_v61 = vadd.f32 %v4697_v27, %v4512_v3  ;;  %v3571_v60 = vadd.f32 1.0, %v6486_v15  ;;  %6507 = vpow2.f32 %v5613_v63  ;;  %v8891_v19 = vadd.f32 %v11402_v43, %v8257_v42  ;;  %11405 = vst [vmem:[#allocation29_spill] sm:$0xff] %v8899_v2  ;;  %v8901_v36 = vpop.f32.mrb[93].mxu0 }
 0x2c3   : > { %v6490_v48 = vpop.eup %6489  ;;  %6509 = vrcp.f32 %v3404_v29  ;;  %v3413_v40 = vadd.f32 1.0, %v6488_v35  ;;  %v8897_v30 = vadd.f32 %v11404_v58, %v8543_v0  ;;  %11406 = vst [vmem:[#allocation16_spill] sm:$0xff] %v8901_v36  ;;  %v5780_v33 = vmul.f32 -1.442695, %v8881_v25  ;;  %v8904_v3 = vpop.f32.mrb[53].mxu1 }
 0x2c4   : > { %v6492_v27 = vpop.eup %6491  ;;  %6511 = vrcp.f32 %v3571_v60  ;;  %v3572_v63 = vadd.f32 1.0, %v6490_v48  ;;  %11407 = vst [vmem:[#allocation34_spill] sm:$0xff] %v8904_v3  ;;  %v8906_v38 = vpop.f32.mrb[94].mxu0  ;;  %v5622_v16 = vmul.f32 -1.442695, %v8886_v7 }
 0x2c5   : > { %11408 = vst [vmem:[#allocation35_spill] sm:$0xff] %v8906_v38  ;;  %v6494_v15 = vpop.eup %6493  ;;  %6513 = vrcp.f32 %v3413_v40  ;;  %v3414_v29 = vadd.f32 1.0, %v6492_v27  ;;  %v8909_v35 = vpop.f32.mrb[54].mxu1  ;;  %v5781_v60 = vmul.f32 -1.442695, %v8891_v19 }
 0x2c6   : > { %11409 = vst [vmem:[#allocation15_spill] sm:$0xff] %v8909_v35  ;;  %v8911_v43 = vpop.f32.mrb[95].mxu0  ;;  %v6496_v58 = vpop.eup %6495  ;;  %v4354_v36 = vmul.f32 %v6494_v15, %v8697_v47  ;;  %6515 = vrcp.f32 %v3572_v63  ;;  %v5623_v40 = vmul.f32 -1.442695, %v8897_v30  ;;  %v11412_v47 = vld [vmem:[#allocation17_spill] sm:$0xff] }
 0x2c7   : > { %11410 = vst [vmem:[#allocation36_spill] sm:$0xff] %v8911_v43  ;;  %v8915_v48 = vpop.f32.mrb[55].mxu1  ;;  %v6498_v3 = vpop.eup %6497  ;;  %v4521_v38 = vmul.f32 %v6496_v58, %v8701_v55  ;;  %6517 = vrcp.f32 %v3414_v29  ;;  %v8922_v43 = vadd.f32 %v8598_v32, %v8252_v37  ;;  %2371 = vmatmul.mubr.bf16.gmra.mrb[160].mxu1 %v11412_v47  ;;  %v11413_v55 = vld [vmem:[#allocation41_spill] sm:$0xff]  ;;  %v11414_v32 = vld [vmem:[#allocation43_spill] sm:$0xff] }
 0x2c8   : > { %11411 = vst [vmem:[#allocation38_spill] sm:$0xff] %v8915_v48  ;;  %v6500_v27 = vpop.eup %6499  ;;  %v4756_v2 = vadd.f32 %v4755_v57, %v4354_v36  ;;  %v4363_v35 = vmul.f32 %v6498_v3, %v8709_v31  ;;  %6519 = vpow2.f32 %v5780_v33  ;;  %v8928_v29 = vadd.f32 %v11413_v55, %v8495_v26  ;;  %2380 = vmatprep.mubr.bf16.mxu1 %v11342_v39  ;;  %v8935_v3 = vpop.f32.mrb[96].mxu0 }
 0x2c9   : > { %v6502_v63 = vpop.eup %6501  ;;  %v4662_v15 = vadd.f32 %v4661_v22, %v4521_v38  ;;  %v4522_v48 = vmul.f32 %v6500_v27, %v8730_v4  ;;  %6521 = vpow2.f32 %v5622_v16  ;;  %v8933_v33 = vadd.f32 %v11414_v32, %v8257_v42  ;;  %11415 = vst [vmem:[#allocation18_spill] sm:$0xff] %v8935_v3  ;;  %v11416_v16 = vld [vmem:[#allocation42_spill] sm:$0xff]  ;;  %v8941_v27 = vpop.f32.mrb[56].mxu1 }
 0x2ca   : > { %v6504_v57 = vpop.eup %6503  ;;  %v4720_v31 = vadd.f32 %v4719_v18, %v4363_v35  ;;  %v3581_v36 = vadd.f32 1.0, %v6502_v63  ;;  %6523 = vpow2.f32 %v5781_v60  ;;  %v8939_v58 = vadd.f32 %v11416_v16, %v8543_v0  ;;  %11417 = vst [vmem:[#allocation37_spill] sm:$0xff] %v8941_v27  ;;  %v8943_v47 = vpop.f32.mrb[97].mxu0  ;;  %v11419_v63 = vld [vmem:[#allocation45_spill] sm:$0xff] }
 0x2cb   : > { %v6506_v22 = vpop.eup %6505  ;;  %v4699_v38 = vadd.f32 %v4698_v61, %v4522_v48  ;;  %v3423_v4 = vadd.f32 1.0, %v6504_v57  ;;  %6525 = vpow2.f32 %v5623_v40  ;;  %11418 = vst [vmem:[#allocation40_spill] sm:$0xff] %v8943_v47  ;;  %v5790_v60 = vmul.f32 -1.442695, %v8922_v43  ;;  %v8950_v61 = vpop.f32.mrb[57].mxu1 }
 0x2cc   : > { %v6508_v18 = vpop.eup %6507  ;;  %6527 = vrcp.f32 %v3581_v36  ;;  %v3582_v35 = vadd.f32 1.0, %v6506_v22  ;;  %v8948_v55 = vadd.f32 %v11419_v63, %v8252_v37  ;;  %11420 = vst [vmem:[#allocation39_spill] sm:$0xff] %v8950_v61  ;;  %v8952_v48 = vpop.f32.mrb[98].mxu0  ;;  %v5632_v32 = vmul.f32 -1.442695, %v8928_v29 }
 0x2cd   : > { %11421 = vst [vmem:[#allocation17_spill] sm:$0xff] %v8952_v48  ;;  %v6510_v40 = vpop.eup %6509  ;;  %6529 = vrcp.f32 %v3423_v4  ;;  %v3424_v57 = vadd.f32 1.0, %v6508_v18  ;;  %v8955_v16 = vpop.f32.mrb[58].mxu1  ;;  %v5791_v63 = vmul.f32 -1.442695, %v8933_v33 }
 0x2ce   : > { %11422 = vst [vmem:[#allocation41_spill] sm:$0xff] %v8955_v16  ;;  %v8957_v47 = vpop.f32.mrb[99].mxu0  ;;  %v6512_v36 = vpop.eup %6511  ;;  %v4364_v22 = vmul.f32 %v6510_v40, %v8756_v9  ;;  %6531 = vrcp.f32 %v3582_v35  ;;  %v5633_v4 = vmul.f32 -1.442695, %v8939_v58 }
 0x2cf   : > { %11423 = vst [vmem:[#allocation43_spill] sm:$0xff] %v8957_v47  ;;  %v8961_v27 = vpop.f32.mrb[59].mxu1  ;;  %v6514_v61 = vpop.eup %6513  ;;  %v4531_v48 = vmul.f32 %v6512_v36, %v8773_v54  ;;  %6533 = vrcp.f32 %v3424_v57  ;;  %v5800_v47 = vmul.f32 -1.442695, %v8948_v55  ;;  %2381 = vmatmul.mubr.bf16.gmra.mrb[164].mxu1 %v11425_v23 }
 0x2d0   : > { %11424 = vst [vmem:[#allocation42_spill] sm:$0xff] %v8961_v27  ;;  %v6516_v18 = vpop.eup %6515  ;;  %v4757_v3 = vadd.f32 %v4756_v2, %v4364_v22  ;;  %v4373_v16 = vmul.f32 %v6514_v61, %v8777_v24  ;;  %6535 = vpow2.f32 %v5790_v60  ;;  %v11426_v27 = vld [vmem:[#allocation44_spill] sm:$0xff]  ;;  %2390 = vmatprep.mubr.bf16.mxu1 %v11342_v39  ;;  %v11427_v60 = vld [vmem:[#allocation47_spill] sm:$0xff]  ;;  %v8979_v23 = vpop.f32.mrb[100].mxu0  ;;  %v11431_v22 = vld [vmem:[#allocation49_spill] sm:$0xff] }
 0x2d1   : > { %v6518_v9 = vpop.eup %6517  ;;  %v4663_v35 = vadd.f32 %v4662_v15, %v4531_v48  ;;  %v4532_v40 = vmul.f32 %v6516_v18, %v8795_v11  ;;  %6537 = vpow2.f32 %v5632_v32  ;;  %v8971_v54 = vadd.f32 %v11426_v27, %v8495_v26  ;;  %v11428_v27 = vld [vmem:[#allocation46_spill] sm:$0xff]  ;;  %v8985_v39 = vpop.f32.mrb[60].mxu1 }
 0x2d2   : > { %v6520_v57 = vpop.eup %6519  ;;  %v4721_v2 = vadd.f32 %v4720_v31, %v4373_v16  ;;  %v4374_v24 = vmul.f32 %v6518_v9, %v8809_v13  ;;  %6539 = vpow2.f32 %v5791_v63  ;;  %v8977_v61 = vadd.f32 %v11427_v60, %v8257_v42  ;;  %11429 = vst [vmem:[#allocation45_spill] sm:$0xff] %v8985_v39  ;;  %v8987_v31 = vpop.f32.mrb[101].mxu0 }
 0x2d3   : > { %v6522_v15 = vpop.eup %6521  ;;  %v4700_v11 = vadd.f32 %v4699_v38, %v4532_v40  ;;  %v3591_v48 = vadd.f32 1.0, %v6520_v57  ;;  %6541 = vpow2.f32 %v5633_v4  ;;  %v8983_v32 = vadd.f32 %v11428_v27, %v8543_v0  ;;  %11430 = vst [vmem:[#allocation20_spill] sm:$0xff] %v8987_v31  ;;  %v8993_v18 = vpop.f32.mrb[61].mxu1 }
 0x2d4   : > { %v6524_v13 = vpop.eup %6523  ;;  %v4758_v16 = vadd.f32 %v4757_v3, %v4374_v24  ;;  %v3433_v36 = vadd.f32 1.0, %v6522_v15  ;;  %6543 = vpow2.f32 %v5800_v47  ;;  %v8991_v63 = vadd.f32 %v11431_v22, %v8252_v37  ;;  %11432 = vst [vmem:[#allocation44_spill] sm:$0xff] %v8993_v18  ;;  %v8995_v38 = vpop.f32.mrb[102].mxu0 }
 0x2d5   : > { %11433 = vst [vmem:[#allocation47_spill] sm:$0xff] %v8995_v38  ;;  %v6526_v4 = vpop.eup %6525  ;;  %6545 = vrcp.f32 %v3591_v48  ;;  %v3592_v9 = vadd.f32 1.0, %v6524_v13  ;;  %v5642_v40 = vmul.f32 -1.442695, %v8971_v54  ;;  %v8998_v57 = vpop.f32.mrb[62].mxu1 }
 0x2d6   : > { %11434 = vst [vmem:[#allocation46_spill] sm:$0xff] %v8998_v57  ;;  %v9000_v60 = vpop.f32.mrb[103].mxu0  ;;  %v6528_v3 = vpop.eup %6527  ;;  %6547 = vrcp.f32 %v3433_v36  ;;  %v3434_v47 = vadd.f32 1.0, %v6526_v4  ;;  %v5801_v24 = vmul.f32 -1.442695, %v8977_v61 }
 0x2d7   : > { %11435 = vst [vmem:[#allocation49_spill] sm:$0xff] %v9000_v60  ;;  %v9003_v15 = vpop.f32.mrb[63].mxu1  ;;  %v6530_v27 = vpop.eup %6529  ;;  %v4541_v22 = vmul.f32 %v6528_v3, %v8838_v5  ;;  %6549 = vrcp.f32 %v3592_v9  ;;  %v5643_v48 = vmul.f32 -1.442695, %v8983_v32  ;;  %v5810_v57 = vmul.f32 -1.442695, %v8991_v63 }
 0x2d8   : > { %11436 = vst [vmem:[#allocation58_spill] sm:$0xff] %v9003_v15  ;;  %v6532_v13 = vpop.eup %6531  ;;  %v4383_v38 = vmul.f32 %v6530_v27, %v8843_v34  ;;  %6551 = vrcp.f32 %v3434_v47  ;;  %v11437_v60 = vld [vmem:[#allocation19_spill] sm:$0xff]  ;;  %v11438_v9 = vld [vmem:[#allocation48_spill] sm:$0xff] }
 0x2d9   : > { %2391 = vmatmul.mubr.bf16.gmra.mrb[168].mxu1 %v11437_v60  ;;  %v6534_v36 = vpop.eup %6533  ;;  %v4664_v4 = vadd.f32 %v4663_v35, %v4541_v22  ;;  %v4542_v18 = vmul.f32 %v6532_v13, %v8848_v12  ;;  %6553 = vpow2.f32 %v5642_v40  ;;  %v9014_v3 = vadd.f32 %v11438_v9, %v8495_v26  ;;  %v11439_v60 = vld [vmem:[#allocation51_spill] sm:$0xff]  ;;  %v11441_v22 = vld [vmem:[#allocation53_spill] sm:$0xff] }
 0x2da   : > { %v6536_v15 = vpop.eup %6535  ;;  %v4722_v31 = vadd.f32 %v4721_v2, %v4383_v38  ;;  %v4384_v5 = vmul.f32 %v6534_v36, %v8853_v53  ;;  %6555 = vpow2.f32 %v5801_v24  ;;  %v9018_v39 = vadd.f32 %v11439_v60, %v8257_v42  ;;  %v11440_v2 = vld [vmem:[#allocation50_spill] sm:$0xff] }
 0x2db   : > { %v6538_v34 = vpop.eup %6537  ;;  %v4701_v47 = vadd.f32 %v4700_v11, %v4542_v18  ;;  %v3601_v27 = vadd.f32 1.0, %v6536_v15  ;;  %6557 = vpow2.f32 %v5643_v48  ;;  %v9022_v53 = vadd.f32 %v11440_v2, %v8543_v0  ;;  %v9028_v18 = vpop.f32.mrb[104].mxu0 }
 0x2dc   : > { %v6540_v35 = vpop.eup %6539  ;;  %v4759_v12 = vadd.f32 %v4758_v16, %v4384_v5  ;;  %v3443_v40 = vadd.f32 1.0, %v6538_v34  ;;  %6559 = vpow2.f32 %v5810_v57  ;;  %v9026_v11 = vadd.f32 %v11441_v22, %v8252_v37  ;;  %11442 = vst [vmem:[#allocation19_spill] sm:$0xff] %v9028_v18  ;;  %v9032_v5 = vpop.f32.mrb[64].mxu1 }
 0x2dd   : > { %v6542_v38 = vpop.eup %6541  ;;  %6561 = vrcp.f32 %v3601_v27  ;;  %v3602_v24 = vadd.f32 1.0, %v6540_v35  ;;  %v5652_v16 = vmul.f32 -1.442695, %v9014_v3  ;;  %v5811_v36 = vmul.f32 -1.442695, %v9018_v39  ;;  %11443 = vst [vmem:[#allocation48_spill] sm:$0xff] %v9032_v5 }
 0x2de   : > { %v6544_v15 = vpop.eup %6543  ;;  %6563 = vrcp.f32 %v3443_v40  ;;  %v3444_v48 = vadd.f32 1.0, %v6542_v38  ;;  %v5653_v27 = vmul.f32 -1.442695, %v9022_v53  ;;  %v5820_v40 = vmul.f32 -1.442695, %v9026_v11  ;;  %v9038_v2 = vpop.f32.mrb[105].mxu0 }
 0x2df   : > { %v6546_v13 = vpop.eup %6545  ;;  %6565 = vrcp.f32 %v3602_v24  ;;  %v3611_v57 = vadd.f32 1.0, %v6544_v15  ;;  %11444 = vst [vmem:[#allocation51_spill] sm:$0xff] %v9038_v2  ;;  %v9040_v38 = vpop.f32.mrb[65].mxu1 }
 0x2e0   : > { %v6548_v9 = vpop.eup %6547  ;;  %v4551_v34 = vmul.f32 %v6546_v13, %v8881_v25  ;;  %6567 = vrcp.f32 %v3444_v48  ;;  %11445 = vst [vmem:[#allocation50_spill] sm:$0xff] %v9040_v38  ;;  %v11446_v25 = vld [vmem:[#allocation52_spill] sm:$0xff]  ;;  %v9052_v2 = vpop.f32.mrb[106].mxu0 }
 0x2e1   : > { %v6550_v60 = vpop.eup %6549  ;;  %v4393_v35 = vmul.f32 %v6548_v9, %v8886_v7  ;;  %6569 = vrcp.f32 %v3611_v57  ;;  %v9045_v48 = vadd.f32 %v11446_v25, %v8495_v26  ;;  %v11447_v57 = vld [vmem:[#allocation55_spill] sm:$0xff]  ;;  %11448 = vst [vmem:[#allocation53_spill] sm:$0xff] %v9052_v2 }
 0x2e2   : > { %v6552_v24 = vpop.eup %6551  ;;  %v4665_v22 = vadd.f32 %v4664_v4, %v4551_v34  ;;  %v4552_v15 = vmul.f32 %v6550_v60, %v8891_v19  ;;  %6571 = vpow2.f32 %v5652_v16  ;;  %v9050_v9 = vadd.f32 %v11447_v57, %v8257_v42  ;;  %v11449_v19 = vld [vmem:[#allocation54_spill] sm:$0xff]  ;;  %v9058_v60 = vpop.f32.mrb[66].mxu1 }
 0x2e3   : > { %v6554_v13 = vpop.eup %6553  ;;  %v4723_v5 = vadd.f32 %v4722_v31, %v4393_v35  ;;  %v4394_v7 = vmul.f32 %v6552_v24, %v8897_v30  ;;  %6573 = vpow2.f32 %v5811_v36  ;;  %v9056_v16 = vadd.f32 %v11449_v19, %v8543_v0  ;;  %11450 = vst [vmem:[#allocation52_spill] sm:$0xff] %v9058_v60  ;;  %v11451_v36 = vld [vmem:[#allocation31_spill] sm:$0xff] }
 0x2e4   : > { %v6556_v38 = vpop.eup %6555  ;;  %v4702_v4 = vadd.f32 %v4701_v47, %v4552_v15  ;;  %v3453_v34 = vadd.f32 1.0, %v6554_v13  ;;  %6575 = vpow2.f32 %v5653_v27  ;;  %v9062_v24 = vadd.f32 %v11451_v36, %v8252_v37  ;;  %v11452_v27 = vld [vmem:[#allocation14_spill] sm:$0xff] }
 0x2e5   : > { %v6558_v31 = vpop.eup %6557  ;;  %v4760_v35 = vadd.f32 %v4759_v12, %v4394_v7  ;;  %v3612_v30 = vadd.f32 1.0, %v6556_v38  ;;  %6577 = vpow2.f32 %v5820_v40  ;;  %v5662_v47 = vmul.f32 -1.442695, %v9045_v48  ;;  %v9070_v38 = vpop.f32.mrb[107].mxu0 }
 0x2e6   : > { %v6560_v25 = vpop.eup %6559  ;;  %6579 = vrcp.f32 %v3453_v34  ;;  %v3454_v57 = vadd.f32 1.0, %v6558_v31  ;;  %v9067_v15 = vadd.f32 %v11452_v27, %v8495_v26  ;;  %v5821_v12 = vmul.f32 -1.442695, %v9050_v9  ;;  %11453 = vst [vmem:[#allocation55_spill] sm:$0xff] %v9070_v38  ;;  %v9072_v40 = vpop.f32.mrb[67].mxu1 }
 0x2e7   : > { %v6562_v13 = vpop.eup %6561  ;;  %6581 = vrcp.f32 %v3612_v30  ;;  %v3621_v19 = vadd.f32 1.0, %v6560_v25  ;;  %11454 = vst [vmem:[#allocation54_spill] sm:$0xff] %v9072_v40  ;;  %v5663_v34 = vmul.f32 -1.442695, %v9056_v16  ;;  %v5830_v27 = vmul.f32 -1.442695, %v9062_v24 }
 0x2e8   : > { %v6564_v7 = vpop.eup %6563  ;;  %v4561_v36 = vmul.f32 %v6562_v13, %v8922_v43  ;;  %6583 = vrcp.f32 %v3454_v57  ;;  %v5672_v38 = vmul.f32 -1.442695, %v9067_v15  ;;  %v11455_v57 = vld [vmem:[#allocation56_spill] sm:$0xff] }
 0x2e9   : > { %v6566_v31 = vpop.eup %6565  ;;  %v4403_v60 = vmul.f32 %v6564_v7, %v8928_v29  ;;  %6585 = vrcp.f32 %v3621_v19  ;;  %v9083_v13 = vadd.f32 %v11455_v57, %v8257_v42 }
 0x2ea   : > { %v6568_v30 = vpop.eup %6567  ;;  %v4666_v25 = vadd.f32 %v4665_v22, %v4561_v36  ;;  %v4562_v2 = vmul.f32 %v6566_v31, %v8933_v33  ;;  %6587 = vpow2.f32 %v5662_v47  ;;  %v11456_v22 = vld [vmem:[#allocation24_spill] sm:$0xff] }
 0x2eb   : > { %v6570_v40 = vpop.eup %6569  ;;  %v4724_v18 = vadd.f32 %v4723_v5, %v4403_v60  ;;  %v4404_v43 = vmul.f32 %v6568_v30, %v8939_v58  ;;  %6589 = vpow2.f32 %v5821_v12  ;;  %v9088_v33 = vadd.f32 %v11456_v22, %v8543_v0  ;;  %v9094_v5 = vpop.f32.mrb[108].mxu0  ;;  %v11457_v12 = vld [vmem:[#allocation57_spill] sm:$0xff] }
 0x2ec   : > { %v6572_v29 = vpop.eup %6571  ;;  %v4703_v19 = vadd.f32 %v4702_v4, %v4562_v2  ;;  %v4571_v7 = vmul.f32 %v6570_v40, %v8948_v55  ;;  %6591 = vpow2.f32 %v5663_v34  ;;  %v9092_v58 = vadd.f32 %v8740_v20, %v8252_v37  ;;  %v9096_v60 = vpop.f32.mrb[68].mxu1 }
 0x2ed   : > { %v6574_v47 = vpop.eup %6573  ;;  %v4761_v36 = vadd.f32 %v4760_v35, %v4404_v43  ;;  %v3463_v31 = vadd.f32 1.0, %v6572_v29  ;;  %6593 = vpow2.f32 %v5830_v27  ;;  %v9100_v40 = vadd.f32 %v11457_v12, %v8495_v26  ;;  %v9102_v34 = vpop.f32.mrb[109].mxu0 }
 0x2ee   : > { %v6576_v2 = vpop.eup %6575  ;;  %v4667_v4 = vadd.f32 %v4666_v25, %v4571_v7  ;;  %v3622_v55 = vadd.f32 1.0, %v6574_v47  ;;  %6595 = vpow2.f32 %v5672_v38  ;;  %11458 = vst [vmem:[#allocation31_spill] sm:$0xff] %v9102_v34  ;;  %v9104_v35 = vpop.f32.mrb[69].mxu1  ;;  %v5831_v30 = vmul.f32 -1.442695, %v9083_v13 }
 0x2ef   : > { %11459 = vst [vmem:[#allocation14_spill] sm:$0xff] %v9104_v35  ;;  %v6578_v27 = vpop.eup %6577  ;;  %6597 = vrcp.f32 %v3463_v31  ;;  %v3464_v20 = vadd.f32 1.0, %v6576_v2  ;;  %v5673_v25 = vmul.f32 -1.442695, %v9088_v33  ;;  %v5840_v7 = vmul.f32 -1.442695, %v9092_v58 }
 0x2f0   : > { %v6580_v43 = vpop.eup %6579  ;;  %6599 = vrcp.f32 %v3622_v55  ;;  %v3631_v57 = vadd.f32 1.0, %v6578_v27  ;;  %v9110_v22 = vpop.f32.mrb[110].mxu0  ;;  %v5682_v31 = vmul.f32 -1.442695, %v9100_v40 }
 0x2f1   : > { %v6582_v29 = vpop.eup %6581  ;;  %v4413_v38 = vmul.f32 %v6580_v43, %v8971_v54  ;;  %6601 = vrcp.f32 %v3464_v20  ;;  %11460 = vst [vmem:[#allocation56_spill] sm:$0xff] %v9110_v22  ;;  %v9114_v2 = vpop.f32.mrb[70].mxu1  ;;  %v9120_v43 = vadd.f32 %v8749_v56, %v8257_v42 }
 0x2f2   : > { %v6584_v47 = vpop.eup %6583  ;;  %v4572_v12 = vmul.f32 %v6582_v29, %v8977_v61  ;;  %6603 = vrcp.f32 %v3631_v57  ;;  %11461 = vst [vmem:[#allocation24_spill] sm:$0xff] %v9114_v2  ;;  %v11462_v2 = vld [vmem:[#allocation26_spill] sm:$0xff] }
 0x2f3   : > { %v6586_v55 = vpop.eup %6585  ;;  %v4725_v27 = vadd.f32 %v4724_v18, %v4413_v38  ;;  %v4414_v35 = vmul.f32 %v6584_v47, %v8983_v32  ;;  %6605 = vpow2.f32 %v5831_v30  ;;  %v9124_v22 = vadd.f32 %v11462_v2, %v8543_v0  ;;  %v9144_v2 = vpop.f32.mrb[71].mxu1 }
 0x2f4   : > { %v6588_v34 = vpop.eup %6587  ;;  %v4704_v54 = vadd.f32 %v4703_v19, %v4572_v12  ;;  %v4581_v20 = vmul.f32 %v6586_v55, %v8991_v63  ;;  %6607 = vpow2.f32 %v5673_v25  ;;  %v9128_v63 = vadd.f32 %v8766_v62, %v8252_v37 }
 0x2f5   : > { %v6590_v61 = vpop.eup %6589  ;;  %v4762_v57 = vadd.f32 %v4761_v36, %v4414_v35  ;;  %v3473_v29 = vadd.f32 1.0, %v6588_v34  ;;  %6609 = vpow2.f32 %v5840_v7  ;;  %v9132_v36 = vadd.f32 %v8764_v8, %v8495_v26 }
 0x2f6   : > { %v6592_v18 = vpop.eup %6591  ;;  %v4668_v32 = vadd.f32 %v4667_v4, %v4581_v20  ;;  %v3632_v30 = vadd.f32 1.0, %v6590_v61  ;;  %6611 = vpow2.f32 %v5682_v31  ;;  %v5841_v25 = vmul.f32 -1.442695, %v9120_v43  ;;  %v9142_v31 = vpop.f32.mrb[111].mxu0 }
 0x2f7   : > { %v6594_v19 = vpop.eup %6593  ;;  %6613 = vrcp.f32 %v3473_v29  ;;  %v3474_v56 = vadd.f32 1.0, %v6592_v18  ;;  %v5683_v7 = vmul.f32 -1.442695, %v9124_v22  ;;  %v5850_v12 = vmul.f32 -1.442695, %v9128_v63 }
 0x2f8   : > { %v6596_v34 = vpop.eup %6595  ;;  %6615 = vrcp.f32 %v3632_v30  ;;  %v3641_v35 = vadd.f32 1.0, %v6594_v19  ;;  %v9140_v8 = vadd.f32 %v8779_v1, %v8257_v42  ;;  %v5692_v61 = vmul.f32 -1.442695, %v9132_v36 }
 0x2f9   : > { %v6598_v38 = vpop.eup %6597  ;;  %6617 = vrcp.f32 %v3474_v56  ;;  %v3483_v4 = vadd.f32 1.0, %v6596_v34  ;;  %v9155_v1 = vadd.f32 %v8785_v52, %v8252_v37  ;;  %v9160_v34 = vadd.f32 %v8781_v44, %v8495_v26 }
 0x2fa   : > { %v6600_v47 = vpop.eup %6599  ;;  %v4423_v62 = vmul.f32 %v6598_v38, %v9014_v3  ;;  %6619 = vrcp.f32 %v3641_v35  ;;  %v9150_v3 = vadd.f32 %v8768_v6, %v8543_v0  ;;  %v5851_v44 = vmul.f32 -1.442695, %v9140_v8 }
 0x2fb   : > { %v6602_v55 = vpop.eup %6601  ;;  %v4582_v20 = vmul.f32 %v6600_v47, %v9018_v39  ;;  %6621 = vrcp.f32 %v3483_v4 }
 0x2fc   : > { %v6604_v29 = vpop.eup %6603  ;;  %v4726_v18 = vadd.f32 %v4725_v27, %v4423_v62  ;;  %v4424_v30 = vmul.f32 %v6602_v55, %v9022_v53  ;;  %6623 = vpow2.f32 %v5841_v25  ;;  %v9164_v53 = vadd.f32 %v8797_v41, %v8257_v42 }
 0x2fd   : > { %v6606_v19 = vpop.eup %6605  ;;  %v4705_v56 = vadd.f32 %v4704_v54, %v4582_v20  ;;  %v4591_v39 = vmul.f32 %v6604_v29, %v9026_v11  ;;  %6625 = vpow2.f32 %v5683_v7  ;;  %v11463_v54 = vld [vmem:[#allocation21_spill] sm:$0xff]  ;;  %v9168_v7 = vpop.f32.mrb[112].mxu0  ;;  %v5693_v42 = vmul.f32 -1.442695, %v9150_v3 }
 0x2fe   : > { %v6608_v6 = vpop.eup %6607  ;;  %v4763_v35 = vadd.f32 %v4762_v57, %v4424_v30  ;;  %v3642_v38 = vadd.f32 1.0, %v6606_v19  ;;  %6627 = vpow2.f32 %v5850_v12  ;;  %v11303_v25 = vsub.s32 4, %v11463_v54  ;;  %v9170_v57 = vpop.f32.mrb[72].mxu1 }
 0x2ff   : > { %v6610_v27 = vpop.eup %6609  ;;  %v4669_v37 = vadd.f32 %v4668_v32, %v4591_v39  ;;  %v3484_v52 = vadd.f32 1.0, %v6608_v6  ;;  %6629 = vpow2.f32 %v5692_v61  ;;  %v9173_v41 = vpop.f32.mrb[113].mxu0  ;;  %v5860_v20 = vmul.f32 -1.442695, %v9155_v1 }
 0x300   : > { %v6612_v11 = vpop.eup %6611  ;;  %6631 = vrcp.f32 %v3642_v38  ;;  %v3651_v4 = vadd.f32 1.0, %v6610_v27  ;;  %v9175_v32 = vpop.f32.mrb[73].mxu1  ;;  %v5702_v61 = vmul.f32 -1.442695, %v9160_v34  ;;  %v5861_v6 = vmul.f32 -1.442695, %v9164_v53 }
 0x301   : > { %v6614_v47 = vpop.eup %6613  ;;  %6633 = vrcp.f32 %v3484_v52  ;;  %v3493_v62 = vadd.f32 1.0, %v6612_v11  ;;  %v9180_v29 = vpop.f32.mrb[114].mxu0  ;;  %v7567_v38 = vld [vmem:[#allocation8] sm:$0xff] }
 0x302   : > { %v6616_v12 = vpop.eup %6615  ;;  %v4433_v55 = vmul.f32 %v6614_v47, %v9045_v48  ;;  %6635 = vrcp.f32 %v3651_v4  ;;  %v9182_v30 = vpop.f32.mrb[74].mxu1  ;;  %v9188_v27 = vrot.slane %v7567_v38, %v11303_v25  ;;  %v9193_v4 = vadd.f32 %v8787_v14, %v8543_v0 }
 0x303   : > { %11464 = vst [vmem:[#allocation57_spill] sm:$0xff] %v9182_v30  ;;  %v6618_v19 = vpop.eup %6617  ;;  %v4592_v39 = vmul.f32 %v6616_v12, %v9050_v9  ;;  %6637 = vrcp.f32 %v3493_v62  ;;  %v9195_v47 = vpop.f32.mrb[115].mxu0  ;;  %v9202_v25 = vadd.f32 %v8811_v46, %v8495_v26  ;;  %v11304_v14 = vsub.s32 5, %v11463_v54 }
 0x304   : > { %v6620_v48 = vpop.eup %6619  ;;  %v4727_v52 = vadd.f32 %v4726_v18, %v4433_v55  ;;  %v4434_v11 = vmul.f32 %v6618_v19, %v9056_v16  ;;  %6639 = vpow2.f32 %v5851_v44  ;;  %11465 = vst [vmem:[#allocation26_spill] sm:$0xff] %v9195_v47  ;;  %v9197_v9 = vpop.f32.mrb[75].mxu1  ;;  %v9212_v46 = vadd.f32 %v8816_v17, %v8543_v0 }
 0x305   : > { %v6622_v62 = vpop.eup %6621  ;;  %v4706_v12 = vadd.f32 %v4705_v56, %v4592_v39  ;;  %v4601_v30 = vmul.f32 %v6620_v48, %v9062_v24  ;;  %6641 = vpow2.f32 %v5693_v42  ;;  %v9208_v56 = vadd.f32 %v8814_v50, %v9188_v27  ;;  %v9220_v48 = vpop.f32.mrb[76].mxu1 }
 0x306   : > { %v6624_v18 = vpop.eup %6623  ;;  %v4764_v16 = vadd.f32 %v4763_v35, %v4434_v11  ;;  %v4443_v44 = vmul.f32 %v6622_v62, %v9067_v15  ;;  %6643 = vpow2.f32 %v5860_v20  ;;  %v5703_v20 = vmul.f32 -1.442695, %v9193_v4 }
 0x307   : > { %v6626_v55 = vpop.eup %6625  ;;  %v4670_v19 = vadd.f32 %v4669_v37, %v4601_v30  ;;  %v3652_v47 = vadd.f32 1.0, %v6624_v18  ;;  %6645 = vpow2.f32 %v5702_v61  ;;  %v5712_v30 = vmul.f32 -1.442695, %v9202_v25 }
 0x308   : > { %v6628_v24 = vpop.eup %6627  ;;  %v4728_v42 = vadd.f32 %v4727_v52, %v4443_v44  ;;  %v3494_v39 = vadd.f32 1.0, %v6626_v55  ;;  %6647 = vpow2.f32 %v5861_v6  ;;  %v9218_v50 = vrot.slane %v7567_v38, %v11304_v14  ;;  %v9222_v6 = vpop.f32.mrb[116].mxu0 }
 0x309   : > { %v6630_v15 = vpop.eup %6629  ;;  %6649 = vrcp.f32 %v3652_v47  ;;  %v3661_v35 = vadd.f32 1.0, %v6628_v24  ;;  %v5554_v11 = vmul.f32 -1.442695, %v9208_v56  ;;  %v5713_v18 = vmul.f32 -1.442695, %v9212_v46  ;;  %v9229_v24 = vpop.f32.mrb[77].mxu1 }
 0x30a   : > { %v6632_v37 = vpop.eup %6631  ;;  %6651 = vrcp.f32 %v3494_v39  ;;  %v3503_v61 = vadd.f32 1.0, %v6630_v15 }
 0x30b   : > { %v6634_v17 = vpop.eup %6633  ;;  %v4602_v52 = vmul.f32 %v6632_v37, %v9083_v13  ;;  %6653 = vrcp.f32 %v3661_v35  ;;  %v9234_v35 = vadd.f32 %v8820_v21, %v9218_v50 }
 0x30c   : > { %v6636_v47 = vpop.eup %6635  ;;  %v4444_v62 = vmul.f32 %v6634_v17, %v9088_v33  ;;  %6655 = vrcp.f32 %v3503_v61 }
 0x30d   : > { %v6638_v44 = vpop.eup %6637  ;;  %v4707_v55 = vadd.f32 %v4706_v12, %v4602_v52  ;;  %v4611_v38 = vmul.f32 %v6636_v47, %v9092_v58  ;;  %6657 = vpow2.f32 %v5703_v20  ;;  %v9238_v12 = vadd.f32 %v8822_v51, %v8495_v26 }
 0x30e   : > { %v6640_v39 = vpop.eup %6639  ;;  %v4765_v15 = vadd.f32 %v4764_v16, %v4444_v62  ;;  %v4453_v13 = vmul.f32 %v6638_v44, %v9100_v40  ;;  %6659 = vpow2.f32 %v5712_v30  ;;  %v9242_v40 = vadd.f32 %v8827_v59, %v9188_v27  ;;  %v9250_v62 = vpop.f32.mrb[117].mxu0 }
 0x30f   : > { %v6642_v33 = vpop.eup %6641  ;;  %v4671_v37 = vadd.f32 %v4670_v19, %v4611_v38  ;;  %v3662_v61 = vadd.f32 1.0, %v6640_v39  ;;  %6661 = vpow2.f32 %v5554_v11  ;;  %v9246_v19 = vadd.f32 %v8829_v28, %v8543_v0 }
 0x310   : > { %v6644_v58 = vpop.eup %6643  ;;  %v4729_v20 = vadd.f32 %v4728_v42, %v4453_v13  ;;  %v3504_v17 = vadd.f32 1.0, %v6642_v33  ;;  %6663 = vpow2.f32 %v5713_v18  ;;  %v5555_v51 = vmul.f32 -1.442695, %v9234_v35  ;;  %v9256_v13 = vpop.f32.mrb[78].mxu1 }
 0x311   : > { %v6646_v16 = vpop.eup %6645  ;;  %6665 = vrcp.f32 %v3662_v61  ;;  %v3671_v21 = vadd.f32 1.0, %v6644_v58  ;;  %v5722_v47 = vmul.f32 -1.442695, %v9238_v12  ;;  %v5564_v44 = vmul.f32 -1.442695, %v9242_v40  ;;  %v9258_v33 = vpop.f32.mrb[118].mxu0 }
 0x312   : > { %v6648_v30 = vpop.eup %6647  ;;  %6667 = vrcp.f32 %v3504_v17  ;;  %v3513_v52 = vadd.f32 1.0, %v6646_v16  ;;  %v5723_v39 = vmul.f32 -1.442695, %v9246_v19  ;;  %11466 = vst [vmem:[#allocation59_spill] sm:$0xff] %v9258_v33  ;;  %v11489_v33 = vld [vmem:[#allocation36_spill] sm:$0xff] }
 0x313   : > { %v6650_v11 = vpop.eup %6649  ;;  %6669 = vrcp.f32 %v3671_v21  ;;  %v3672_v42 = vadd.f32 1.0, %v6648_v30  ;;  %v9268_v30 = vadd.f32 %v8855_v10, %v8495_v26 }
 0x314   : > { %v6652_v59 = vpop.eup %6651  ;;  %v4612_v18 = vmul.f32 %v6650_v11, %v9120_v43  ;;  %6671 = vrcp.f32 %v3513_v52  ;;  %v9263_v43 = vadd.f32 %v8833_v45, %v9218_v50  ;;  %v9270_v52 = vpop.f32.mrb[79].mxu1 }
 0x315   : > { %v6654_v28 = vpop.eup %6653  ;;  %v4454_v38 = vmul.f32 %v6652_v59, %v9124_v22  ;;  %6673 = vrcp.f32 %v3672_v42  ;;  %11467 = vst [vmem:[#allocation60_spill] sm:$0xff] %v9270_v52  ;;  %v9276_v45 = vpop.f32.mrb[119].mxu0 }
 0x316   : > { %v6656_v61 = vpop.eup %6655  ;;  %v4708_v58 = vadd.f32 %v4707_v55, %v4612_v18  ;;  %v4621_v17 = vmul.f32 %v6654_v28, %v9128_v63  ;;  %6675 = vpow2.f32 %v5555_v51  ;;  %v11468_v63 = vld [vmem:[#allocation25_spill] sm:$0xff] }
 0x317   : > { %v6658_v16 = vpop.eup %6657  ;;  %v4766_v21 = vadd.f32 %v4765_v15, %v4454_v38  ;;  %v4463_v22 = vmul.f32 %v6656_v61, %v9132_v36  ;;  %6677 = vpow2.f32 %v5722_v47  ;;  %v9274_v51 = vadd.f32 %v11468_v63, %v9188_v27  ;;  %11469 = vst [vmem:[#allocation25_spill] sm:$0xff] %v9276_v45  ;;  %v11470_v47 = vld [vmem:[#allocation28_spill] sm:$0xff] }
 0x318   : > { %v6660_v11 = vpop.eup %6659  ;;  %v4672_v55 = vadd.f32 %v4671_v37, %v4621_v17  ;;  %v3514_v42 = vadd.f32 1.0, %v6658_v16  ;;  %6679 = vpow2.f32 %v5564_v44  ;;  %v9280_v10 = vadd.f32 %v11470_v47, %v8543_v0  ;;  %v11471_v44 = vld [vmem:[#allocation30_spill] sm:$0xff] }
 0x319   : > { %v6662_v15 = vpop.eup %6661  ;;  %v4730_v59 = vadd.f32 %v4729_v20, %v4463_v22  ;;  %v3523_v36 = vadd.f32 1.0, %v6660_v11  ;;  %6681 = vpow2.f32 %v5723_v39  ;;  %v5565_v37 = vmul.f32 -1.442695, %v9263_v43 }
 0x31a   : > { %v6664_v18 = vpop.eup %6663  ;;  %6683 = vrcp.f32 %v3514_v42  ;;  %v3365_v28 = vadd.f32 1.0, %v6662_v15  ;;  %v9285_v38 = vadd.f32 %v11471_v44, %v9218_v50  ;;  %v5732_v20 = vmul.f32 -1.442695, %v9268_v30 }
 0x31b   : > { %v6666_v61 = vpop.eup %6665  ;;  %6685 = vrcp.f32 %v3523_v36  ;;  %v3524_v17 = vadd.f32 1.0, %v6664_v18  ;;  %v5574_v22 = vmul.f32 -1.442695, %v9274_v51  ;;  %v5733_v63 = vmul.f32 -1.442695, %v9280_v10 }
 0x31c   : > { %v6668_v16 = vpop.eup %6667  ;;  %v4622_v39 = vmul.f32 %v6666_v61, %v9140_v8  ;;  %6687 = vrcp.f32 %v3365_v28  ;;  %v5575_v36 = vmul.f32 -1.442695, %v9285_v38  ;;  %v11472_v28 = vld [vmem:[#allocation32_spill] sm:$0xff] }
 0x31d   : > { %v6670_v11 = vpop.eup %6669  ;;  %v4464_v42 = vmul.f32 %v6668_v16, %v9150_v3  ;;  %6689 = vrcp.f32 %v3524_v17  ;;  %v9297_v61 = vadd.f32 %v11472_v28, %v8495_v26  ;;  %v9299_v3 = vpop.f32.mrb[80].mxu1 }
 0x31e   : > { %v6672_v15 = vpop.eup %6671  ;;  %v4709_v47 = vadd.f32 %v4708_v58, %v4622_v39  ;;  %v4631_v44 = vmul.f32 %v6670_v11, %v9155_v1  ;;  %6691 = vpow2.f32 %v5565_v37  ;;  %11473 = vst [vmem:[#allocation28_spill] sm:$0xff] %v9299_v3  ;;  %v9301_v17 = vpop.f32.mrb[120].mxu0  ;;  %v11477_v11 = vld [vmem:[#allocation13_spill] sm:$0xff] }
 0x31f   : > { %v6674_v18 = vpop.eup %6673  ;;  %v4767_v14 = vadd.f32 %v4766_v21, %v4464_v42  ;;  %v4473_v8 = vmul.f32 %v6672_v15, %v9160_v34  ;;  %6693 = vpow2.f32 %v5732_v20  ;;  %11474 = vst [vmem:[#allocation30_spill] sm:$0xff] %v9301_v17  ;;  %v9304_v37 = vpop.f32.mrb[81].mxu1  ;;  %v9310_v42 = vadd.f32 %v11477_v11, %v9188_v27 }
 0x320   : > { %v6676_v16 = vpop.eup %6675  ;;  %v4673_v58 = vadd.f32 %v4672_v55, %v4631_v44  ;;  %v4632_v1 = vmul.f32 %v6674_v18, %v9164_v53  ;;  %6695 = vpow2.f32 %v5574_v22  ;;  %11475 = vst [vmem:[#allocation32_spill] sm:$0xff] %v9304_v37  ;;  %v9306_v39 = vpop.f32.mrb[121].mxu0 }
 0x321   : > { %11476 = vst [vmem:[#allocation61_spill] sm:$0xff] %v9306_v39  ;;  %v6678_v21 = vpop.eup %6677  ;;  %v4731_v34 = vadd.f32 %v4730_v59, %v4473_v8  ;;  %v3366_v20 = vadd.f32 1.0, %v6676_v16  ;;  %6697 = vpow2.f32 %v5733_v63  ;;  %v9312_v15 = vpop.f32.mrb[82].mxu1  ;;  %v5742_v59 = vmul.f32 -1.442695, %v9297_v61 }
 0x322   : > { %11478 = vst [vmem:[#allocation13_spill] sm:$0xff] %v9312_v15  ;;  %v9314_v28 = vpop.f32.mrb[122].mxu0  ;;  %v6680_v55 = vpop.eup %6679  ;;  %v4674_v44 = vrot.slane %v4673_v58, 4  ;;  %v4710_v53 = vadd.f32 %v4709_v47, %v4632_v1  ;;  %v3533_v22 = vadd.f32 1.0, %v6678_v21  ;;  %6699 = vpow2.f32 %v5575_v36 }
 0x323   : > { %11479 = vst [vmem:[#allocation62_spill] sm:$0xff] %v9314_v28  ;;  %v6682_v18 = vpop.eup %6681  ;;  %6701 = vrcp.f32 %v3366_v20  ;;  %v3375_v39 = vadd.f32 1.0, %v6680_v55  ;;  %v5584_v28 = vmul.f32 -1.442695, %v9310_v42 }
 0x324   : > { %v6684_v8 = vpop.eup %6683  ;;  %v4675_v63 = vadd.f32 %v4674_v44, %v4673_v58  ;;  %v4711_v16 = vrot.slane %v4710_v53, 4  ;;  %6703 = vrcp.f32 %v3533_v22  ;;  %v3534_v11 = vadd.f32 1.0, %v6682_v18  ;;  %v11480_v58 = vld [vmem:[#allocation27_spill] sm:$0xff] }
 0x325   : > { %v6686_v37 = vpop.eup %6685  ;;  %v4474_v15 = vmul.f32 %v6684_v8, %v9193_v4  ;;  %6705 = vrcp.f32 %v3375_v39  ;;  %v9322_v55 = vadd.f32 %v11480_v58, %v8543_v0  ;;  %v9326_v44 = vadd.f32 %v8875_v49, %v9218_v50  ;;  %v9328_v4 = vpop.f32.mrb[83].mxu1 }
 0x326   : > { %v6688_v17 = vpop.eup %6687  ;;  %v4676_v47 = vrot.slane %v4675_v63, 2  ;;  %v4712_v1 = vadd.f32 %v4711_v16, %v4710_v53  ;;  %v4483_v36 = vmul.f32 %v6686_v37, %v9202_v25  ;;  %6707 = vrcp.f32 %v3534_v11  ;;  %11481 = vst [vmem:[#allocation27_spill] sm:$0xff] %v9328_v4 }
 0x327   : > { %v6690_v21 = vpop.eup %6689  ;;  %v4768_v20 = vadd.f32 %v4767_v14, %v4474_v15  ;;  %6709 = vpow2.f32 %v5742_v59  ;;  %v11482_v14 = vld [vmem:[#allocation33_spill] sm:$0xff] }
 0x328   : > { %v6692_v39 = vpop.eup %6691  ;;  %v4677_v22 = vadd.f32 %v4676_v47, %v4675_v63  ;;  %v4713_v18 = vrot.slane %v4712_v1, 2  ;;  %v4732_v53 = vadd.f32 %v4731_v34, %v4483_v36  ;;  %v4484_v25 = vmul.f32 %v6690_v21, %v9212_v46  ;;  %v11483_v59 = vld [vmem:[#allocation29_spill] sm:$0xff] }
 0x329   : > { %v6694_v37 = vpop.eup %6693  ;;  %v3376_v8 = vadd.f32 1.0, %v6692_v39  ;;  %6711 = vpow2.f32 %v5584_v28  ;;  %v9333_v15 = vadd.f32 %v11482_v14, %v8495_v26  ;;  %v9337_v16 = vadd.f32 %v11483_v59, %v9188_v27  ;;  %v11484_v28 = vld [vmem:[#allocation16_spill] sm:$0xff] }
 0x32a   : > { %v6696_v49 = vpop.eup %6695  ;;  %v4678_v11 = vrot.slane %v4677_v22, 1  ;;  %v4714_v58 = vadd.f32 %v4713_v18, %v4712_v1  ;;  %v4769_v4 = vadd.f32 %v4768_v20, %v4484_v25  ;;  %v3543_v63 = vadd.f32 1.0, %v6694_v37  ;;  %v9348_v25 = vpop.f32.mrb[123].mxu0 }
 0x32b   : > { %v6698_v47 = vpop.eup %6697  ;;  %6713 = vrcp.f32 %v3376_v8  ;;  %v3385_v34 = vadd.f32 1.0, %v6696_v49  ;;  %v5743_v46 = vmul.f32 -1.442695, %v9322_v55  ;;  %v9342_v36 = vadd.f32 %v11484_v28, %v8543_v0  ;;  %11485 = vst [vmem:[#allocation33_spill] sm:$0xff] %v9348_v25  ;;  %v11487_v28 = vld [vmem:[#allocation35_spill] sm:$0xff] }
 0x32c   : > { %v6700_v21 = vpop.eup %6699  ;;  %v9344_v39 = vadd.f32 %v4678_v11, %v4677_v22  ;;  %v4715_v14 = vrot.slane %v4714_v58, 1  ;;  %6715 = vrcp.f32 %v3543_v63  ;;  %v3544_v59 = vadd.f32 1.0, %v6698_v47  ;;  %v11486_v22 = vld [vmem:[#allocation34_spill] sm:$0xff] }
 0x32d   : > { %v6702_v3 = vpop.eup %6701  ;;  %6717 = vrcp.f32 %v3385_v34  ;;  %v3386_v1 = vadd.f32 1.0, %v6700_v21  ;;  %v5585_v20 = vmul.f32 -1.442695, %v9326_v44  ;;  %v5752_v18 = vmul.f32 -1.442695, %v9333_v15 }
 0x32e   : > { %v6704_v37 = vpop.eup %6703  ;;  %v9350_v8 = vadd.f32 %v4715_v14, %v4714_v58  ;;  %6719 = vrcp.f32 %v3544_v59  ;;  %v5594_v49 = vmul.f32 -1.442695, %v9337_v16  ;;  %v9355_v11 = vadd.f32 %v11486_v22, %v9218_v50 }
 0x32f   : > { %v6706_v63 = vpop.eup %6705  ;;  %v4493_v47 = vmul.f32 %v6704_v37, %v9238_v12  ;;  %6721 = vrcp.f32 %v3386_v1  ;;  %v5753_v34 = vmul.f32 -1.442695, %v9342_v36  ;;  %v9361_v21 = vadd.f32 %v11487_v28, %v8495_v26  ;;  %v11488_v1 = vld [vmem:[#allocation15_spill] sm:$0xff] }
 0x330   : > { %v6708_v25 = vpop.eup %6707  ;;  %v4325_v14 = vmul.f32 %v6688_v17, %v9208_v56  ;;  %v4335_v59 = vmul.f32 %v6706_v63, %v9242_v40  ;;  %6723 = vpow2.f32 %v5743_v46  ;;  %v9370_v37 = vadd.f32 %v11488_v1, %v9188_v27  ;;  %v9381_v46 = vpop.f32.mrb[84].mxu1 }
 0x331   : > { %v6710_v22 = vpop.eup %6709  ;;  %v4733_v45 = vadd.f32 %v4732_v53, %v4493_v47  ;;  %v4494_v12 = vmul.f32 %v6708_v25, %v9246_v19  ;;  %6725 = vpow2.f32 %v5585_v20  ;;  %v9374_v58 = vadd.f32 %v11489_v33, %v8543_v0  ;;  %v11490_v53 = vld [vmem:[#allocation38_spill] sm:$0xff]  ;;  %11491 = vst [vmem:[#allocation29_spill] sm:$0xff] %v9381_v46  ;;  %v9383_v20 = vpop.f32.mrb[124].mxu0 }
 0x332   : > { %v4791_v28 = vadd.f32 %v4335_v59, %v4325_v14  ;;  %v3553_v52 = vadd.f32 1.0, %v6710_v22  ;;  %6727 = vpow2.f32 %v5752_v18  ;;  %v5595_v40 = vmul.f32 -1.442695, %v9355_v11  ;;  %11492 = vst [vmem:[#allocation16_spill] sm:$0xff] %v9383_v20  ;;  %v11493_v33 = vld [vmem:[#allocation18_spill] sm:$0xff] }
 0x333   : > { %v6712_v56 = vpop.eup %6711  ;;  %v4770_v17 = vadd.f32 %v4769_v4, %v4494_v12  ;;  %6729 = vpow2.f32 %v5594_v49  ;;  %v9379_v19 = vadd.f32 %v11490_v53, %v9218_v50  ;;  %v5762_v18 = vmul.f32 -1.442695, %v9361_v21  ;;  %v9390_v4 = vpop.f32.mrb[85].mxu1 }
 0x334   : > { %6731 = vrcp.f32 %v3553_v52  ;;  %v3395_v25 = vadd.f32 1.0, %v6712_v56  ;;  %v9388_v63 = vadd.f32 %v11493_v33, %v8495_v26  ;;  %11494 = vst [vmem:[#allocation34_spill] sm:$0xff] %v9390_v4  ;;  %v9392_v49 = vpop.f32.mrb[125].mxu0  ;;  %v5604_v14 = vmul.f32 -1.442695, %v9370_v37  ;;  %v9395_v59 = vpop.f32.mrb[86].mxu1 }
 0x335   : > { %11495 = vst [vmem:[#allocation35_spill] sm:$0xff] %v9392_v49  ;;  %v6714_v47 = vpop.eup %6713  ;;  %6733 = vpow2.f32 %v5753_v34  ;;  %11496 = vst [vmem:[#allocation15_spill] sm:$0xff] %v9395_v59  ;;  %v9397_v22 = vpop.f32.mrb[126].mxu0  ;;  %v4326_v12 = vmul.f32 %v6702_v3, %v9234_v35  ;;  %v5763_v56 = vmul.f32 -1.442695, %v9374_v58 }
 0x336   : > { %11497 = vst [vmem:[#allocation36_spill] sm:$0xff] %v9397_v22  ;;  %v6716_v52 = vpop.eup %6715  ;;  %v4336_v1 = vmul.f32 %v6714_v47, %v9263_v43  ;;  %6735 = vrcp.f32 %v3395_v25  ;;  %v9402_v53 = vpop.f32.mrb[87].mxu1  ;;  %v5605_v59 = vmul.f32 -1.442695, %v9379_v19  ;;  %v5772_v35 = vmul.f32 -1.442695, %v9388_v63 }
 0x337   : > { %11498 = vst [vmem:[#allocation38_spill] sm:$0xff] %v9402_v53  ;;  %v9404_v33 = vpop.f32.mrb[127].mxu0  ;;  %v6718_v49 = vpop.eup %6717  ;;  %v4503_v34 = vmul.f32 %v6716_v52, %v9268_v30  ;;  %6737 = vpow2.f32 %v5595_v40  ;;  %v11500_v47 = vld [vmem:[#allocation37_spill] sm:$0xff] }
 0x338   : > { %11499 = vst [vmem:[#allocation18_spill] sm:$0xff] %v9404_v33  ;;  %v6720_v4 = vpop.eup %6719  ;;  %v4828_v22 = vadd.f32 %v4336_v1, %v4326_v12  ;;  %v4345_v20 = vmul.f32 %v6718_v49, %v9274_v51  ;;  %6739 = vpow2.f32 %v5762_v18  ;;  %v9413_v33 = vadd.f32 %v11500_v47, %v9188_v27  ;;  %v11501_v18 = vld [vmem:[#allocation40_spill] sm:$0xff] }
 0x339   : > { %v6722_v43 = vpop.eup %6721  ;;  %v4734_v3 = vadd.f32 %v4733_v45, %v4503_v34  ;;  %v4504_v25 = vmul.f32 %v6720_v4, %v9280_v10  ;;  %6741 = vpow2.f32 %v5604_v14  ;;  %v9420_v45 = vadd.f32 %v11501_v18, %v8543_v0  ;;  %v9424_v14 = vpop.f32.mrb[88].mxu1 }
 0x33a   : > { %v6724_v30 = vpop.eup %6723  ;;  %v4792_v40 = vadd.f32 %v4791_v28, %v4345_v20  ;;  %v4346_v52 = vmul.f32 %v6722_v43, %v9285_v38  ;;  %6743 = vpow2.f32 %v5763_v56  ;;  %11502 = vst [vmem:[#allocation37_spill] sm:$0xff] %v9424_v14  ;;  %v9426_v28 = vpop.f32.mrb[128].mxu0 }
 0x33b   : > { %v6726_v12 = vpop.eup %6725  ;;  %v9416_v1 = vadd.f32 %v4770_v17, %v4504_v25  ;;  %v3554_v51 = vadd.f32 1.0, %v6724_v30  ;;  %6745 = vpow2.f32 %v5605_v59  ;;  %11503 = vst [vmem:[#allocation40_spill] sm:$0xff] %v9426_v28  ;;  %v5614_v17 = vmul.f32 -1.442695, %v9413_v33  ;;  %v9429_v56 = vpop.f32.mrb[89].mxu1 }
 0x33c   : > { %v6728_v10 = vpop.eup %6727  ;;  %v9422_v4 = vadd.f32 %v4828_v22, %v4346_v52  ;;  %v3396_v49 = vadd.f32 1.0, %v6726_v12  ;;  %6747 = vpow2.f32 %v5772_v35  ;;  %11504 = vst [vmem:[#allocation63_spill] sm:$0xff] %v9429_v56  ;;  %v5773_v35 = vmul.f32 -1.442695, %v9420_v45  ;;  %v9433_v30 = vpop.f32.mrb[129].mxu0 }
 0x33d   : > { %v6730_v38 = vpop.eup %6729  ;;  %6749 = vrcp.f32 %v3554_v51  ;;  %v3563_v20 = vadd.f32 1.0, %v6728_v10  ;;  %11505 = vst [vmem:[#allocation64_spill] sm:$0xff] %v9433_v30 }
 0x33e   : > { %v6732_v59 = vpop.eup %6731  ;;  %6751 = vrcp.f32 %v3396_v49  ;;  %v3405_v34 = vadd.f32 1.0, %v6730_v38  ;;  %v11506_v49 = vld [vmem:[#allocation39_spill] sm:$0xff] }
 0x33f   : > { %v6734_v43 = vpop.eup %6733  ;;  %v4513_v22 = vmul.f32 %v6732_v59, %v9297_v61  ;;  %6753 = vrcp.f32 %v3563_v20  ;;  %v9438_v38 = vadd.f32 %v11506_v49, %v9218_v50  ;;  %v9459_v49 = vadd.f32 %v8979_v23, %v8495_v26 }
 0x340   : > { %v6736_v25 = vpop.eup %6735  ;;  %6755 = vrcp.f32 %v3405_v34  ;;  %v3564_v47 = vadd.f32 1.0, %v6734_v43  ;;  %v11507_v34 = vld [vmem:[#allocation17_spill] sm:$0xff] }
 0x341   : > { %v6738_v52 = vpop.eup %6737  ;;  %v4735_v12 = vadd.f32 %v4734_v3, %v4513_v22  ;;  %v4355_v51 = vmul.f32 %v6736_v25, %v9310_v42  ;;  %6757 = vpow2.f32 %v5614_v17  ;;  %v9442_v43 = vadd.f32 %v11507_v34, %v8495_v26  ;;  %v11508_v42 = vld [vmem:[#allocation41_spill] sm:$0xff]  ;;  %v11509_v22 = vld [vmem:[#allocation43_spill] sm:$0xff] }
 0x342   : > { %v6740_v18 = vpop.eup %6739  ;;  %6759 = vrcp.f32 %v3564_v47  ;;  %v3406_v10 = vadd.f32 1.0, %v6738_v52  ;;  %v9446_v17 = vadd.f32 %v11508_v42, %v9188_v27  ;;  %v9450_v25 = vadd.f32 %v11509_v22, %v8543_v0 }
 0x343   : > { %v6742_v61 = vpop.eup %6741  ;;  %v4793_v20 = vadd.f32 %v4792_v40, %v4355_v51  ;;  %v3573_v59 = vadd.f32 1.0, %v6740_v18  ;;  %6761 = vpow2.f32 %v5773_v35  ;;  %v11510_v35 = vld [vmem:[#allocation42_spill] sm:$0xff]  ;;  %v5782_v42 = vmul.f32 -1.442695, %v9442_v43 }
 0x344   : > { %v6744_v30 = vpop.eup %6743  ;;  %6763 = vrcp.f32 %v3406_v10  ;;  %v3415_v3 = vadd.f32 1.0, %v6742_v61  ;;  %v9454_v52 = vadd.f32 %v11510_v35, %v9218_v50  ;;  %v5615_v10 = vmul.f32 -1.442695, %v9438_v38  ;;  %v9467_v35 = vpop.f32.mrb[130].mxu0 }
 0x345   : > { %v6746_v47 = vpop.eup %6745  ;;  %6765 = vrcp.f32 %v3573_v59  ;;  %v3574_v40 = vadd.f32 1.0, %v6744_v30  ;;  %v5624_v22 = vmul.f32 -1.442695, %v9446_v17  ;;  %11512 = vst [vmem:[#allocation17_spill] sm:$0xff] %v9467_v35  ;;  %v9480_v35 = vpop.f32.mrb[131].mxu0 }
 0x346   : > { %v6748_v51 = vpop.eup %6747  ;;  %6767 = vrcp.f32 %v3415_v3  ;;  %v3416_v18 = vadd.f32 1.0, %v6746_v47  ;;  %v5783_v3 = vmul.f32 -1.442695, %v9450_v25  ;;  %v9465_v47 = vpop.f32.mrb[90].mxu1  ;;  %11515 = vst [vmem:[#allocation43_spill] sm:$0xff] %v9480_v35 }
 0x347   : > { %v6750_v61 = vpop.eup %6749  ;;  %6769 = vrcp.f32 %v3574_v40  ;;  %v3583_v34 = vadd.f32 1.0, %v6748_v51  ;;  %11511 = vst [vmem:[#allocation39_spill] sm:$0xff] %v9465_v47  ;;  %v5625_v40 = vmul.f32 -1.442695, %v9454_v52  ;;  %v11513_v51 = vld [vmem:[#allocation45_spill] sm:$0xff]  ;;  %v9478_v14 = vpop.f32.mrb[91].mxu1 }
 0x348   : > { %v6752_v59 = vpop.eup %6751  ;;  %v4514_v30 = vmul.f32 %v6750_v61, %v9322_v55  ;;  %6771 = vrcp.f32 %v3416_v18  ;;  %v9473_v28 = vadd.f32 %v11513_v51, %v9188_v27  ;;  %v5792_v47 = vmul.f32 -1.442695, %v9459_v49  ;;  %11514 = vst [vmem:[#allocation41_spill] sm:$0xff] %v9478_v14  ;;  %v11516_v51 = vld [vmem:[#allocation20_spill] sm:$0xff] }
 0x349   : > { %v6754_v56 = vpop.eup %6753  ;;  %v4356_v23 = vmul.f32 %v6752_v59, %v9326_v44  ;;  %6773 = vrcp.f32 %v3583_v34  ;;  %v9486_v53 = vadd.f32 %v11516_v51, %v8543_v0 }
 0x34a   : > { %v6756_v55 = vpop.eup %6755  ;;  %v4772_v18 = vadd.f32 %v9416_v1, %v4514_v30  ;;  %v4523_v61 = vmul.f32 %v6754_v56, %v9333_v15  ;;  %6775 = vpow2.f32 %v5615_v10  ;;  %v11517_v56 = vld [vmem:[#allocation44_spill] sm:$0xff] }
 0x34b   : > { %v6758_v44 = vpop.eup %6757  ;;  %v4830_v34 = vadd.f32 %v9422_v4, %v4356_v23  ;;  %v4365_v59 = vmul.f32 %v6756_v55, %v9337_v16  ;;  %6777 = vpow2.f32 %v5782_v42  ;;  %v9490_v10 = vadd.f32 %v11517_v56, %v9218_v50  ;;  %v11518_v16 = vld [vmem:[#allocation47_spill] sm:$0xff] }
 0x34c   : > { %v6760_v1 = vpop.eup %6759  ;;  %v4736_v30 = vadd.f32 %v4735_v12, %v4523_v61  ;;  %v3425_v15 = vadd.f32 1.0, %v6758_v44  ;;  %6779 = vpow2.f32 %v5624_v22  ;;  %v9495_v4 = vadd.f32 %v11518_v16, %v8495_v26  ;;  %v11519_v22 = vld [vmem:[#allocation46_spill] sm:$0xff] }
 0x34d   : > { %v6762_v14 = vpop.eup %6761  ;;  %v4794_v35 = vadd.f32 %v4793_v20, %v4365_v59  ;;  %v4524_v46 = vmul.f32 %v6760_v1, %v9342_v36  ;;  %6781 = vpow2.f32 %v5783_v3  ;;  %v5634_v12 = vmul.f32 -1.442695, %v9473_v28  ;;  %v9508_v1 = vpop.f32.mrb[132].mxu0 }
 0x34e   : > { %v6764_v42 = vpop.eup %6763  ;;  %6783 = vrcp.f32 %v3425_v15  ;;  %v3584_v23 = vadd.f32 1.0, %v6762_v14  ;;  %v9500_v55 = vadd.f32 %v11519_v22, %v9188_v27  ;;  %v5793_v36 = vmul.f32 -1.442695, %v9486_v53  ;;  %v9506_v14 = vpop.f32.mrb[92].mxu1  ;;  %11520 = vst [vmem:[#allocation42_spill] sm:$0xff] %v9508_v1 }
 0x34f   : > { %v6766_v61 = vpop.eup %6765  ;;  %v4773_v44 = vadd.f32 %v4772_v18, %v4524_v46  ;;  %v4366_v20 = vmul.f32 %v6764_v42, %v9355_v11  ;;  %6785 = vpow2.f32 %v5625_v40  ;;  %v5635_v51 = vmul.f32 -1.442695, %v9490_v10  ;;  %v9512_v46 = vpop.f32.mrb[93].mxu1 }
 0x350   : > { %v6768_v3 = vpop.eup %6767  ;;  %v4533_v59 = vmul.f32 %v6766_v61, %v9361_v21  ;;  %6787 = vrcp.f32 %v3584_v23  ;;  %v5802_v11 = vmul.f32 -1.442695, %v9495_v4  ;;  %11521 = vst [vmem:[#allocation45_spill] sm:$0xff] %v9512_v46  ;;  %v9514_v40 = vpop.f32.mrb[133].mxu0  ;;  %v5644_v23 = vmul.f32 -1.442695, %v9500_v55 }
 0x351   : > { %v6770_v15 = vpop.eup %6769  ;;  %v4831_v56 = vadd.f32 %v4830_v34, %v4366_v20  ;;  %v4375_v16 = vmul.f32 %v6768_v3, %v9370_v37  ;;  %6789 = vpow2.f32 %v5792_v47  ;;  %11522 = vst [vmem:[#allocation20_spill] sm:$0xff] %v9514_v40  ;;  %v9518_v22 = vpop.f32.mrb[94].mxu1  ;;  %v11525_v20 = vld [vmem:[#allocation49_spill] sm:$0xff] }
 0x352   : > { %v6772_v18 = vpop.eup %6771  ;;  %v4737_v21 = vadd.f32 %v4736_v30, %v4533_v59  ;;  %v4534_v42 = vmul.f32 %v6770_v15, %v9374_v58  ;;  %6791 = vpow2.f32 %v5634_v12  ;;  %11523 = vst [vmem:[#allocation44_spill] sm:$0xff] %v9518_v22  ;;  %v9520_v61 = vpop.f32.mrb[134].mxu0  ;;  %v9525_v3 = vadd.f32 %v11525_v20, %v8543_v0 }
 0x353   : > { %11524 = vst [vmem:[#allocation47_spill] sm:$0xff] %v9520_v61  ;;  %v6774_v34 = vpop.eup %6773  ;;  %v4795_v37 = vadd.f32 %v4794_v35, %v4375_v16  ;;  %v4376_v47 = vmul.f32 %v6772_v18, %v9379_v19  ;;  %6793 = vpow2.f32 %v5793_v36  ;;  %v9527_v40 = vpop.f32.mrb[95].mxu1  ;;  %v11528_v19 = vld [vmem:[#allocation58_spill] sm:$0xff] }
 0x354   : > { %11526 = vst [vmem:[#allocation46_spill] sm:$0xff] %v9527_v40  ;;  %v9529_v30 = vpop.f32.mrb[135].mxu0  ;;  %v6776_v58 = vpop.eup %6775  ;;  %v4774_v12 = vadd.f32 %v4773_v44, %v4534_v42  ;;  %v4543_v59 = vmul.f32 %v6774_v34, %v9388_v63  ;;  %6795 = vpow2.f32 %v5635_v51  ;;  %v9536_v36 = vadd.f32 %v11528_v19, %v9218_v50  ;;  %v11529_v19 = vld [vmem:[#allocation19_spill] sm:$0xff] }
 0x355   : > { %11527 = vst [vmem:[#allocation49_spill] sm:$0xff] %v9529_v30  ;;  %v6778_v15 = vpop.eup %6777  ;;  %v9532_v61 = vadd.f32 %v4831_v56, %v4376_v47  ;;  %v3426_v35 = vadd.f32 1.0, %v6776_v58  ;;  %6797 = vpow2.f32 %v5802_v11  ;;  %v5803_v63 = vmul.f32 -1.442695, %v9525_v3 }
 0x356   : > { %v6780_v16 = vpop.eup %6779  ;;  %v9538_v18 = vadd.f32 %v4737_v21, %v4543_v59  ;;  %v3593_v20 = vadd.f32 1.0, %v6778_v15  ;;  %6799 = vpow2.f32 %v5644_v23  ;;  %v5645_v34 = vmul.f32 -1.442695, %v9536_v36 }
 0x357   : > { %v6782_v30 = vpop.eup %6781  ;;  %6801 = vrcp.f32 %v3426_v35  ;;  %v3435_v44 = vadd.f32 1.0, %v6780_v16 }
 0x358   : > { %v6784_v51 = vpop.eup %6783  ;;  %6803 = vrcp.f32 %v3593_v20  ;;  %v3594_v56 = vadd.f32 1.0, %v6782_v30  ;;  %v9546_v30 = vadd.f32 %v11529_v19, %v8495_v26  ;;  %v11535_v19 = vld [vmem:[#allocation52_spill] sm:$0xff] }
 0x359   : > { %v6786_v42 = vpop.eup %6785  ;;  %v4385_v11 = vmul.f32 %v6784_v51, %v9413_v33  ;;  %6805 = vrcp.f32 %v3435_v44  ;;  %v11530_v44 = vld [vmem:[#allocation48_spill] sm:$0xff] }
 0x35a   : > { %v6788_v47 = vpop.eup %6787  ;;  %6807 = vrcp.f32 %v3594_v56  ;;  %v3436_v21 = vadd.f32 1.0, %v6786_v42  ;;  %v9550_v51 = vadd.f32 %v11530_v44, %v9188_v27  ;;  %v11532_v42 = vld [vmem:[#allocation50_spill] sm:$0xff] }
 0x35b   : > { %v6790_v58 = vpop.eup %6789  ;;  %v4796_v59 = vadd.f32 %v4795_v37, %v4385_v11  ;;  %v4544_v23 = vmul.f32 %v6788_v47, %v9420_v45  ;;  %6809 = vpow2.f32 %v5803_v63  ;;  %v11531_v45 = vld [vmem:[#allocation51_spill] sm:$0xff]  ;;  %v9558_v11 = vadd.f32 %v11532_v42, %v9218_v50 }
 0x35c   : > { %v6792_v15 = vpop.eup %6791  ;;  %6811 = vrcp.f32 %v3436_v21  ;;  %v3603_v35 = vadd.f32 1.0, %v6790_v58  ;;  %v9554_v63 = vadd.f32 %v11531_v45, %v8543_v0  ;;  %v9564_v58 = vpop.f32.mrb[96].mxu1 }
 0x35d   : > { %v6794_v16 = vpop.eup %6793  ;;  %v4775_v33 = vadd.f32 %v4774_v12, %v4544_v23  ;;  %v3445_v20 = vadd.f32 1.0, %v6792_v15  ;;  %6813 = vpow2.f32 %v5645_v34  ;;  %v11533_v34 = vld [vmem:[#allocation53_spill] sm:$0xff]  ;;  %11534 = vst [vmem:[#allocation58_spill] sm:$0xff] %v9564_v58  ;;  %v9583_v22 = vpop.f32.mrb[97].mxu1 }
 0x35e   : > { %v6796_v56 = vpop.eup %6795  ;;  %6815 = vrcp.f32 %v3603_v35  ;;  %v3604_v37 = vadd.f32 1.0, %v6794_v16  ;;  %v9562_v21 = vadd.f32 %v11533_v34, %v8495_v26  ;;  %v5812_v35 = vmul.f32 -1.442695, %v9546_v30  ;;  %11538 = vst [vmem:[#allocation48_spill] sm:$0xff] %v9583_v22  ;;  %v9596_v22 = vpop.f32.mrb[98].mxu1 }
 0x35f   : > { %v6798_v47 = vpop.eup %6797  ;;  %6817 = vrcp.f32 %v3445_v20  ;;  %v3446_v12 = vadd.f32 1.0, %v6796_v56  ;;  %v9569_v16 = vadd.f32 %v11535_v19, %v9188_v27  ;;  %v5654_v20 = vmul.f32 -1.442695, %v9550_v51  ;;  %v9572_v56 = vpop.f32.mrb[136].mxu0 }
 0x360   : > { %v6800_v23 = vpop.eup %6799  ;;  %6819 = vrcp.f32 %v3604_v37  ;;  %v3613_v15 = vadd.f32 1.0, %v6798_v47  ;;  %11536 = vst [vmem:[#allocation19_spill] sm:$0xff] %v9572_v56  ;;  %v5813_v37 = vmul.f32 -1.442695, %v9554_v63  ;;  %v5655_v47 = vmul.f32 -1.442695, %v9558_v11 }
 0x361   : > { %v6802_v44 = vpop.eup %6801  ;;  %6821 = vrcp.f32 %v3446_v12  ;;  %v3455_v45 = vadd.f32 1.0, %v6800_v23  ;;  %v5822_v19 = vmul.f32 -1.442695, %v9562_v21  ;;  %v11537_v12 = vld [vmem:[#allocation55_spill] sm:$0xff]  ;;  %v9585_v56 = vpop.f32.mrb[137].mxu0 }
 0x362   : > { %v6804_v42 = vpop.eup %6803  ;;  %v4386_v34 = vmul.f32 %v6802_v44, %v9438_v38  ;;  %6823 = vrcp.f32 %v3613_v15  ;;  %v9581_v23 = vadd.f32 %v11537_v12, %v8543_v0  ;;  %11539 = vst [vmem:[#allocation51_spill] sm:$0xff] %v9585_v56  ;;  %v5664_v46 = vmul.f32 -1.442695, %v9569_v16  ;;  %v11540_v12 = vld [vmem:[#allocation54_spill] sm:$0xff]  ;;  %v9598_v56 = vpop.f32.mrb[138].mxu0 }
 0x363   : > { %v6806_v58 = vpop.eup %6805  ;;  %v4553_v40 = vmul.f32 %v6804_v42, %v9442_v43  ;;  %6825 = vrcp.f32 %v3455_v45  ;;  %v9594_v1 = vadd.f32 %v11540_v12, %v9218_v50 }
 0x364   : > { %v6808_v38 = vpop.eup %6807  ;;  %v4833_v15 = vadd.f32 %v9532_v61, %v4386_v34  ;;  %v4395_v44 = vmul.f32 %v6806_v58, %v9446_v17  ;;  %6827 = vpow2.f32 %v5812_v35  ;;  %v9602_v58 = vadd.f32 %v9094_v5, %v8495_v26 }
 0x365   : > { %v6810_v43 = vpop.eup %6809  ;;  %v4739_v45 = vadd.f32 %v9538_v18, %v4553_v40  ;;  %v4554_v42 = vmul.f32 %v6808_v38, %v9450_v25  ;;  %6829 = vpow2.f32 %v5654_v20  ;;  %v9607_v35 = vadd.f32 %v9096_v60, %v9188_v27  ;;  %v9609_v20 = vpop.f32.mrb[99].mxu1 }
 0x366   : > { %v6812_v61 = vpop.eup %6811  ;;  %v4797_v34 = vadd.f32 %v4796_v59, %v4395_v44  ;;  %v3614_v17 = vadd.f32 1.0, %v6810_v43  ;;  %6831 = vpow2.f32 %v5813_v37  ;;  %11541 = vst [vmem:[#allocation50_spill] sm:$0xff] %v9609_v20  ;;  %v5823_v37 = vmul.f32 -1.442695, %v9581_v23  ;;  %v11542_v44 = vld [vmem:[#allocation31_spill] sm:$0xff]  ;;  %v9616_v43 = vpop.f32.mrb[139].mxu0 }
 0x367   : > { %v6814_v40 = vpop.eup %6813  ;;  %v4776_v18 = vadd.f32 %v4775_v33, %v4554_v42  ;;  %v4396_v25 = vmul.f32 %v6812_v61, %v9454_v52  ;;  %6833 = vpow2.f32 %v5655_v47  ;;  %v9614_v5 = vadd.f32 %v11542_v44, %v8543_v0  ;;  %11543 = vst [vmem:[#allocation53_spill] sm:$0xff] %v9616_v43 }
 0x368   : > { %v6816_v38 = vpop.eup %6815  ;;  %6835 = vrcp.f32 %v3614_v17  ;;  %v3456_v59 = vadd.f32 1.0, %v6814_v40  ;;  %v5665_v60 = vmul.f32 -1.442695, %v9594_v1  ;;  %v5832_v61 = vmul.f32 -1.442695, %v9602_v58 }
 0x369   : > { %v6818_v33 = vpop.eup %6817  ;;  %v4834_v52 = vadd.f32 %v4833_v15, %v4396_v25  ;;  %v4563_v47 = vmul.f32 %v6816_v38, %v9459_v49  ;;  %6837 = vpow2.f32 %v5822_v19  ;;  %v5674_v43 = vmul.f32 -1.442695, %v9607_v35 }
 0x36a   : > { %v6820_v42 = vpop.eup %6819  ;;  %v4405_v12 = vmul.f32 %v6818_v33, %v9473_v28  ;;  %6839 = vrcp.f32 %v3456_v59  ;;  %v5833_v19 = vmul.f32 -1.442695, %v9614_v5  ;;  %v11544_v59 = vld [vmem:[#allocation14_spill] sm:$0xff] }
 0x36b   : > { %v6822_v17 = vpop.eup %6821  ;;  %v4740_v40 = vadd.f32 %v4739_v45, %v4563_v47  ;;  %v4564_v44 = vmul.f32 %v6820_v42, %v9486_v53  ;;  %6841 = vpow2.f32 %v5664_v46  ;;  %v9629_v45 = vadd.f32 %v11544_v59, %v9218_v50 }
 0x36c   : > { %v6824_v20 = vpop.eup %6823  ;;  %v4798_v15 = vadd.f32 %v4797_v34, %v4405_v12  ;;  %v4406_v49 = vmul.f32 %v6822_v17, %v9490_v10  ;;  %6843 = vpow2.f32 %v5823_v37  ;;  %v9632_v34 = vpop.f32.mrb[100].mxu1 }
 0x36d   : > { %v6826_v25 = vpop.eup %6825  ;;  %v4777_v38 = vadd.f32 %v4776_v18, %v4564_v44  ;;  %v4573_v28 = vmul.f32 %v6824_v20, %v9495_v4  ;;  %6845 = vpow2.f32 %v5665_v60  ;;  %v9634_v10 = vpop.f32.mrb[140].mxu0  ;;  %v11545_v4 = vld [vmem:[#allocation56_spill] sm:$0xff] }
 0x36e   : > { %v6828_v53 = vpop.eup %6827  ;;  %v4835_v46 = vadd.f32 %v4834_v52, %v4406_v49  ;;  %v4415_v33 = vmul.f32 %v6826_v25, %v9500_v55  ;;  %6847 = vpow2.f32 %v5832_v61  ;;  %v9640_v20 = vadd.f32 %v11545_v4, %v8495_v26  ;;  %v9642_v60 = vpop.f32.mrb[101].mxu1 }
 0x36f   : > { %v6830_v37 = vpop.eup %6829  ;;  %v9636_v47 = vadd.f32 %v4740_v40, %v4573_v28  ;;  %v3623_v18 = vadd.f32 1.0, %v6828_v53  ;;  %6849 = vpow2.f32 %v5674_v43  ;;  %v9644_v42 = vpop.f32.mrb[141].mxu0  ;;  %v5675_v43 = vmul.f32 -1.442695, %v9629_v45 }
 0x370   : > { %v6832_v52 = vpop.eup %6831  ;;  %v9646_v55 = vadd.f32 %v4798_v15, %v4415_v33  ;;  %v3465_v12 = vadd.f32 1.0, %v6830_v37  ;;  %6851 = vpow2.f32 %v5833_v19  ;;  %v9648_v61 = vpop.f32.mrb[102].mxu1  ;;  %v5842_v59 = vmul.f32 -1.442695, %v9640_v20 }
 0x371   : > { %v6834_v17 = vpop.eup %6833  ;;  %6853 = vrcp.f32 %v3623_v18  ;;  %v3624_v40 = vadd.f32 1.0, %v6832_v52  ;;  %v9653_v19 = vpop.f32.mrb[142].mxu0 }
 0x372   : > { %v6836_v44 = vpop.eup %6835  ;;  %6855 = vrcp.f32 %v3465_v12  ;;  %v3466_v49 = vadd.f32 1.0, %v6834_v17  ;;  %11546 = vst [vmem:[#allocation52_spill] sm:$0xff] %v9653_v19  ;;  %v11547_v12 = vld [vmem:[#allocation24_spill] sm:$0xff] }
 0x373   : > { %v6838_v25 = vpop.eup %6837  ;;  %v4574_v28 = vmul.f32 %v6836_v44, %v9525_v3  ;;  %6857 = vrcp.f32 %v3624_v40  ;;  %v9658_v17 = vadd.f32 %v11547_v12, %v9188_v27  ;;  %v9662_v3 = vadd.f32 %v9142_v31, %v8543_v0 }
 0x374   : > { %v6840_v15 = vpop.eup %6839  ;;  %6859 = vrcp.f32 %v3466_v49  ;;  %v3633_v53 = vadd.f32 1.0, %v6838_v25  ;;  %v9670_v25 = vadd.f32 %v9168_v7, %v8495_v26 }
 0x375   : > { %v6842_v33 = vpop.eup %6841  ;;  %v4778_v37 = vadd.f32 %v4777_v38, %v4574_v28  ;;  %v4416_v18 = vmul.f32 %v6840_v15, %v9536_v36  ;;  %6861 = vpow2.f32 %v5675_v43  ;;  %v9666_v38 = vadd.f32 %v9144_v2, %v9218_v50 }
 0x376   : > { %v6844_v4 = vpop.eup %6843  ;;  %6863 = vrcp.f32 %v3633_v53  ;;  %v3475_v52 = vadd.f32 1.0, %v6842_v33  ;;  %v9674_v28 = vadd.f32 %v9170_v57, %v9188_v27  ;;  %v5684_v53 = vmul.f32 -1.442695, %v9658_v17 }
 0x377   : > { %v6846_v40 = vpop.eup %6845  ;;  %v4836_v44 = vadd.f32 %v4835_v46, %v4416_v18  ;;  %v3634_v49 = vadd.f32 1.0, %v6844_v4  ;;  %6865 = vpow2.f32 %v5842_v59  ;;  %v9678_v59 = vadd.f32 %v9173_v41, %v8543_v0 }
 0x378   : > { %v6848_v36 = vpop.eup %6847  ;;  %6867 = vrcp.f32 %v3475_v52  ;;  %v3476_v43 = vadd.f32 1.0, %v6846_v40  ;;  %v5843_v18 = vmul.f32 -1.442695, %v9662_v3  ;;  %v5685_v57 = vmul.f32 -1.442695, %v9666_v38  ;;  %v9686_v40 = vpop.f32.mrb[103].mxu1 }
 0x379   : > { %v6850_v31 = vpop.eup %6849  ;;  %6869 = vrcp.f32 %v3634_v49  ;;  %v3643_v46 = vadd.f32 1.0, %v6848_v36  ;;  %v5852_v12 = vmul.f32 -1.442695, %v9670_v25  ;;  %v5694_v41 = vmul.f32 -1.442695, %v9674_v28  ;;  %11548 = vst [vmem:[#allocation55_spill] sm:$0xff] %v9686_v40 }
 0x37a   : > { %v6852_v2 = vpop.eup %6851  ;;  %6871 = vrcp.f32 %v3476_v43  ;;  %v3485_v15 = vadd.f32 1.0, %v6850_v31  ;;  %v9688_v49 = vpop.f32.mrb[143].mxu0  ;;  %v5853_v31 = vmul.f32 -1.442695, %v9678_v59 }
 0x37b   : > { %v6854_v33 = vpop.eup %6853  ;;  %6873 = vrcp.f32 %v3643_v46  ;;  %v3644_v7 = vadd.f32 1.0, %v6852_v2  ;;  %11549 = vst [vmem:[#allocation54_spill] sm:$0xff] %v9688_v49  ;;  %v9694_v46 = vadd.f32 %v9175_v32, %v9218_v50 }
 0x37c   : > { %v6856_v4 = vpop.eup %6855  ;;  %v4583_v52 = vmul.f32 %v6854_v33, %v9546_v30  ;;  %6875 = vrcp.f32 %v3485_v15  ;;  %v9700_v33 = vadd.f32 %v9180_v29, %v8495_v26  ;;  %v11551_v29 = vld [vmem:[#allocation26_spill] sm:$0xff] }
 0x37d   : > { %v6858_v36 = vpop.eup %6857  ;;  %v4425_v43 = vmul.f32 %v6856_v4, %v9550_v51  ;;  %6877 = vrcp.f32 %v3644_v7  ;;  %v11550_v4 = vld [vmem:[#allocation57_spill] sm:$0xff] }
 0x37e   : > { %v6860_v30 = vpop.eup %6859  ;;  %v4742_v2 = vadd.f32 %v9636_v47, %v4583_v52  ;;  %v4584_v15 = vmul.f32 %v6858_v36, %v9554_v63  ;;  %6879 = vpow2.f32 %v5684_v53  ;;  %v9706_v32 = vadd.f32 %v11550_v4, %v9188_v27 }
 0x37f   : > { %v6862_v49 = vpop.eup %6861  ;;  %v4800_v51 = vadd.f32 %v9646_v55, %v4425_v43  ;;  %v4426_v7 = vmul.f32 %v6860_v30, %v9558_v11  ;;  %6881 = vpow2.f32 %v5843_v18  ;;  %v11305_v63 = vsub.s32 6, %v11463_v54 }
 0x380   : > { %v6864_v40 = vpop.eup %6863  ;;  %v4779_v19 = vadd.f32 %v4778_v37, %v4584_v15  ;;  %v3486_v47 = vadd.f32 1.0, %v6862_v49  ;;  %6883 = vpow2.f32 %v5685_v57  ;;  %v9712_v55 = vadd.f32 %v11551_v29, %v8543_v0  ;;  %v9719_v57 = vpop.f32.mrb[104].mxu1 }
 0x381   : > { %v6866_v53 = vpop.eup %6865  ;;  %v4837_v52 = vadd.f32 %v4836_v44, %v4426_v7  ;;  %v4593_v26 = vmul.f32 %v6864_v40, %v9562_v21  ;;  %6885 = vpow2.f32 %v5852_v12  ;;  %v5695_v36 = vmul.f32 -1.442695, %v9694_v46  ;;  %v9721_v49 = vpop.f32.mrb[144].mxu0  ;;  %v7568_v7 = vld [vmem:[#allocation8] sm:$0xff] }
 0x382   : > { %v6868_v11 = vpop.eup %6867  ;;  %6887 = vrcp.f32 %v3486_v47  ;;  %v3653_v18 = vadd.f32 1.0, %v6866_v53  ;;  %v9717_v37 = vadd.f32 %v9197_v9, %v9218_v50  ;;  %v5862_v0 = vmul.f32 -1.442695, %v9700_v33  ;;  %v9725_v40 = vpop.f32.mrb[105].mxu1 }
 0x383   : > { %v6870_v44 = vpop.eup %6869  ;;  %v4743_v21 = vadd.f32 %v4742_v2, %v4593_v26  ;;  %v4435_v12 = vmul.f32 %v6868_v11, %v9569_v16  ;;  %6889 = vpow2.f32 %v5694_v41  ;;  %v9727_v43 = vpop.f32.mrb[145].mxu0  ;;  %v5704_v9 = vmul.f32 -1.442695, %v9706_v32 }
 0x384   : > { %v6872_v30 = vpop.eup %6871  ;;  %v4594_v15 = vmul.f32 %v6870_v44, %v9581_v23  ;;  %6891 = vrcp.f32 %v3653_v18  ;;  %v9733_v4 = vrot.slane %v7568_v7, %v11305_v63  ;;  %v9735_v2 = vpop.f32.mrb[106].mxu1  ;;  %v5863_v26 = vmul.f32 -1.442695, %v9712_v55 }
 0x385   : > { %11552 = vst [vmem:[#allocation31_spill] sm:$0xff] %v9735_v2  ;;  %v9737_v16 = vpop.f32.mrb[146].mxu0  ;;  %v6874_v41 = vpop.eup %6873  ;;  %v4801_v47 = vadd.f32 %v4800_v51, %v4435_v12  ;;  %v4436_v53 = vmul.f32 %v6872_v30, %v9594_v1  ;;  %6893 = vpow2.f32 %v5853_v31  ;;  %v5705_v63 = vmul.f32 -1.442695, %v9717_v37 }
 0x386   : > { %11553 = vst [vmem:[#allocation14_spill] sm:$0xff] %v9737_v16  ;;  %v9741_v23 = vpop.f32.mrb[107].mxu1  ;;  %v9743_v29 = vpop.f32.mrb[147].mxu0  ;;  %v4780_v18 = vadd.f32 %v4779_v19, %v4594_v15  ;;  %v4603_v44 = vmul.f32 %v6874_v41, %v9602_v58  ;;  %6895 = vpow2.f32 %v5695_v36  ;;  %v9750_v1 = vadd.f32 %v9220_v48, %v9188_v27 }
 0x387   : > { %11554 = vst [vmem:[#allocation56_spill] sm:$0xff] %v9743_v29  ;;  %v6876_v11 = vpop.eup %6875  ;;  %v4838_v16 = vadd.f32 %v4837_v52, %v4436_v53  ;;  %6897 = vpow2.f32 %v5862_v0  ;;  %v9755_v58 = vadd.f32 %v9222_v6, %v9733_v4  ;;  %v9765_v6 = vpop.f32.mrb[108].mxu1 }
 0x388   : > { %v6878_v2 = vpop.eup %6877  ;;  %v4445_v51 = vmul.f32 %v6876_v11, %v9607_v35  ;;  %v4744_v12 = vadd.f32 %v4743_v21, %v4603_v44  ;;  %6899 = vpow2.f32 %v5704_v9  ;;  %v11306_v35 = vsub.s32 7, %v11463_v54  ;;  %11556 = vst [vmem:[#allocation57_spill] sm:$0xff] %v9765_v6 }
 0x389   : > { %v6880_v31 = vpop.eup %6879  ;;  %v4604_v30 = vmul.f32 %v6878_v2, %v9614_v5  ;;  %6901 = vpow2.f32 %v5863_v26  ;;  %v5714_v9 = vmul.f32 -1.442695, %v9750_v1  ;;  %v9763_v2 = vpop.f32.mrb[148].mxu0 }
 0x38a   : > { %v6882_v19 = vpop.eup %6881  ;;  %v9757_v36 = vadd.f32 %v4801_v47, %v4445_v51  ;;  %v3495_v52 = vadd.f32 1.0, %v6880_v31  ;;  %6903 = vpow2.f32 %v5705_v63  ;;  %11555 = vst [vmem:[#allocation24_spill] sm:$0xff] %v9763_v2  ;;  %v7726_v47 = vmov 1966171168  }
 0x38b   : > { %v6884_v0 = vpop.eup %6883  ;;  %v9760_v15 = vadd.f32 %v4780_v18, %v4604_v30  ;;  %v3654_v48 = vadd.f32 1.0, %v6882_v19  ;;  %v5028_v53 = vunpack.c.l.s4 %v7726_v47  ;;  %v5556_v63 = vmul.f32 -1.442695, %v9755_v58 }
 0x38c   : > { %v6886_v21 = vpop.eup %6885  ;;  %6905 = vrcp.f32 %v3495_v52  ;;  %v3496_v5 = vadd.f32 1.0, %v6884_v0  ;;  %v9771_v44 = vrot.slane %v7568_v7, %v11306_v35  ;;  %v9774_v0 = vpop.f32.mrb[149].mxu0 }
 0x38d   : > { %v6888_v41 = vpop.eup %6887  ;;  %6907 = vrcp.f32 %v3654_v48  ;;  %v3663_v26 = vadd.f32 1.0, %v6886_v21  ;;  %11557 = vst [vmem:[#allocation26_spill] sm:$0xff] %v9774_v0  ;;  %v5029_v21 = vunpack.c.0.s8 %v5028_v53  ;;  %v9786_v53 = vadd.f32 %v9256_v13, %v9188_v27  ;;  %v9816_v35 = vpop.f32.mrb[150].mxu0 }
 0x38e   : > { %v6890_v11 = vpop.eup %6889  ;;  %v4446_v18 = vmul.f32 %v6888_v41, %v9629_v45  ;;  %6909 = vrcp.f32 %v3496_v5  ;;  %v9778_v5 = vadd.f32 %v9229_v24, %v9218_v50  ;;  %v11558_v24 = vld [vmem:[#allocation59_spill] sm:$0xff] }
 0x38f   : > { %v6892_v51 = vpop.eup %6891  ;;  %6911 = vrcp.f32 %v3663_v26  ;;  %v3505_v31 = vadd.f32 1.0, %v6890_v11 }
 0x390   : > { %v6894_v30 = vpop.eup %6893  ;;  %v4839_v19 = vadd.f32 %v4838_v16, %v4446_v18  ;;  %v4613_v52 = vmul.f32 %v6892_v51, %v9640_v20  ;;  %6913 = vpow2.f32 %v5714_v9  ;;  %v9782_v16 = vadd.f32 %v9250_v62, %v9771_v44 }
 0x391   : > { %v6896_v48 = vpop.eup %6895  ;;  %6915 = vrcp.f32 %v3505_v31  ;;  %v3664_v45 = vadd.f32 1.0, %v6894_v30  ;;  %v9790_v18 = vadd.f32 %v11558_v24, %v9733_v4  ;;  %v5715_v31 = vmul.f32 -1.442695, %v9778_v5  ;;  %v11560_v30 = vld [vmem:[#allocation25_spill] sm:$0xff]  ;;  %v11563_v24 = vld [vmem:[#allocation28_spill] sm:$0xff] }
 0x392   : > { %v6898_v7 = vpop.eup %6897  ;;  %v4745_v41 = vadd.f32 %v4744_v12, %v4613_v52  ;;  %v3506_v47 = vadd.f32 1.0, %v6896_v48  ;;  %6917 = vpow2.f32 %v5556_v63  ;;  %v11559_v12 = vld [vmem:[#allocation60_spill] sm:$0xff]  ;;  %v9799_v13 = vadd.f32 %v11560_v30, %v9771_v44  ;;  %11564 = vst [vmem:[#allocation25_spill] sm:$0xff] %v9816_v35  ;;  %v9829_v35 = vpop.f32.mrb[151].mxu0 }
 0x393   : > { %v6900_v20 = vpop.eup %6899  ;;  %6919 = vrcp.f32 %v3664_v45  ;;  %v3673_v9 = vadd.f32 1.0, %v6898_v7  ;;  %v9794_v63 = vadd.f32 %v11559_v12, %v9218_v50  ;;  %v9802_v48 = vsub.s32 %v5029_v21, %v11463_v54 }
 0x394   : > { %v6902_v26 = vpop.eup %6901  ;;  %6921 = vrcp.f32 %v3506_v47  ;;  %v3515_v11 = vadd.f32 1.0, %v6900_v20  ;;  %v5557_v7 = vmul.f32 -1.442695, %v9782_v16  ;;  %v9805_v47 = vpop.f32.mrb[109].mxu1  ;;  %v9811_v12 = vadd.f32 %v11563_v24, %v9188_v27 }
 0x395   : > { %v6904_v62 = vpop.eup %6903  ;;  %6923 = vrcp.f32 %v3673_v9  ;;  %v3674_v51 = vadd.f32 1.0, %v6902_v26  ;;  %11561 = vst [vmem:[#allocation59_spill] sm:$0xff] %v9802_v48  ;;  %11562 = vst [vmem:[#allocation60_spill] sm:$0xff] %v9805_v47  ;;  %v5724_v26 = vmul.f32 -1.442695, %v9786_v53  ;;  %v9818_v54 = vpop.f32.mrb[110].mxu1 }
 0x396   : > { %v6906_v52 = vpop.eup %6905  ;;  %6925 = vrcp.f32 %v3515_v11  ;;  %v3516_v45 = vadd.f32 1.0, %v6904_v62  ;;  %v5566_v11 = vmul.f32 -1.442695, %v9790_v18  ;;  %v5725_v62 = vmul.f32 -1.442695, %v9794_v63  ;;  %11565 = vst [vmem:[#allocation28_spill] sm:$0xff] %v9818_v54 }
 0x397   : > { %v6908_v20 = vpop.eup %6907  ;;  %v4455_v9 = vmul.f32 %v6906_v52, %v9658_v17  ;;  %6927 = vrcp.f32 %v3674_v51  ;;  %v5567_v24 = vmul.f32 -1.442695, %v9799_v13  ;;  %v9831_v54 = vpop.f32.mrb[111].mxu1 }
 0x398   : > { %v6910_v30 = vpop.eup %6909  ;;  %v4614_v21 = vmul.f32 %v6908_v20, %v9662_v3  ;;  %6929 = vrcp.f32 %v3516_v45  ;;  %v11566_v20 = vld [vmem:[#allocation30_spill] sm:$0xff]  ;;  %11568 = vst [vmem:[#allocation65_spill] sm:$0xff] %v9831_v54  ;;  %v5734_v54 = vmul.f32 -1.442695, %v9811_v12 }
 0x399   : > { %v6912_v17 = vpop.eup %6911  ;;  %v4803_v51 = vadd.f32 %v9757_v36, %v4455_v9  ;;  %v4456_v52 = vmul.f32 %v6910_v30, %v9666_v38  ;;  %6931 = vpow2.f32 %v5715_v31  ;;  %v9827_v0 = vadd.f32 %v11566_v20, %v9733_v4  ;;  %11567 = vst [vmem:[#allocation30_spill] sm:$0xff] %v9829_v35  ;;  %v11569_v31 = vld [vmem:[#allocation32_spill] sm:$0xff] }
 0x39a   : > { %v6914_v47 = vpop.eup %6913  ;;  %v4782_v3 = vadd.f32 %v9760_v15, %v4614_v21  ;;  %v4623_v45 = vmul.f32 %v6912_v17, %v9670_v25  ;;  %6933 = vpow2.f32 %v5557_v7  ;;  %v9835_v30 = vadd.f32 %v11569_v31, %v9218_v50  ;;  %v11570_v7 = vld [vmem:[#allocation61_spill] sm:$0xff] }
 0x39b   : > { %v6916_v36 = vpop.eup %6915  ;;  %v4840_v9 = vadd.f32 %v4839_v19, %v4456_v52  ;;  %v3525_v38 = vadd.f32 1.0, %v6914_v47  ;;  %6935 = vpow2.f32 %v5724_v26  ;;  %v9840_v17 = vadd.f32 %v11570_v7, %v9771_v44  ;;  %v11571_v19 = vld [vmem:[#allocation13_spill] sm:$0xff]  ;;  %v11574_v7 = vld [vmem:[#allocation62_spill] sm:$0xff] }
 0x39c   : > { %v6918_v15 = vpop.eup %6917  ;;  %v4746_v21 = vadd.f32 %v4745_v41, %v4623_v45  ;;  %v4465_v25 = vmul.f32 %v6916_v36, %v9674_v28  ;;  %6937 = vpow2.f32 %v5566_v11  ;;  %v9845_v47 = vadd.f32 %v11571_v19, %v9188_v27 }
 0x39d   : > { %v6920_v20 = vpop.eup %6919  ;;  %6939 = vrcp.f32 %v3525_v38  ;;  %v5576_v28 = vmul.f32 -1.442695, %v9827_v0  ;;  %v11572_v11 = vcombine.low %v9344_v39, %v9350_v8  ;;  %v5735_v38 = vmul.f32 -1.442695, %v9835_v30  ;;  %v9865_v39 = vpop.f32.mrb[112].mxu1 }
 0x39e   : > { %v6922_v26 = vpop.eup %6921  ;;  %v4804_v52 = vadd.f32 %v4803_v51, %v4465_v25  ;;  %v4624_v31 = vmul.f32 %v6920_v20, %v9678_v59  ;;  %6941 = vpow2.f32 %v5725_v62  ;;  %v9859_v19 = vadd.f32 %v11574_v7, %v9733_v4  ;;  %v9863_v20 = vpop.f32.mrb[152].mxu0  ;;  %11576 = vst [vmem:[#allocation13_spill] sm:$0xff] %v9865_v39 }
 0x39f   : > { %v6924_v41 = vpop.eup %6923  ;;  %v9853_v45 = vrot.slane %v11572_v11, %v9802_v48  ;;  %v4466_v36 = vmul.f32 %v6922_v26, %v9694_v46  ;;  %6943 = vpow2.f32 %v5567_v24  ;;  %v5577_v25 = vmul.f32 -1.442695, %v9840_v17  ;;  %11575 = vst [vmem:[#allocation61_spill] sm:$0xff] %v9863_v20  ;;  %v9869_v7 = vpop.f32.mrb[153].mxu0 }
 0x3a0   : > { %v6926_v51 = vpop.eup %6925  ;;  %v4783_v59 = vadd.f32 %v4782_v3, %v4624_v31  ;;  %v4633_v62 = vmul.f32 %v6924_v41, %v9700_v33  ;;  %6945 = vpow2.f32 %v5734_v54  ;;  %v5744_v26 = vmul.f32 -1.442695, %v9845_v47  ;;  %11577 = vst [vmem:[#allocation62_spill] sm:$0xff] %v9869_v7  ;;  %v9871_v35 = vpop.f32.mrb[113].mxu1  ;;  %v11579_v31 = vld [vmem:[#allocation27_spill] sm:$0xff] }
 0x3a1   : > { %11573 = vst [vmem:[#allocation32_spill] sm:$0xff] %v9853_v45  ;;  %v6928_v8 = vpop.eup %6927  ;;  %v4841_v11 = vadd.f32 %v4840_v9, %v4466_v36  ;;  %v4475_v46 = vmul.f32 %v6926_v51, %v9706_v32  ;;  %11578 = vst [vmem:[#allocation66_spill] sm:$0xff] %v9871_v35  ;;  %6947 = vpow2.f32 %v5576_v28  ;;  %v9876_v41 = vadd.f32 %v11579_v31, %v9218_v50  ;;  %v9878_v39 = vpop.f32.mrb[154].mxu0 }
 0x3a2   : > { %v6930_v3 = vpop.eup %6929  ;;  %v4747_v33 = vadd.f32 %v4746_v21, %v4633_v62  ;;  %v4634_v24 = vmul.f32 %v6928_v8, %v9712_v55  ;;  %11580 = vst [vmem:[#allocation27_spill] sm:$0xff] %v9878_v39  ;;  %v9880_v9 = vpop.f32.mrb[114].mxu1  ;;  %v3367_v51 = vadd.f32 1.0, %v6918_v15  ;;  %6949 = vpow2.f32 %v5735_v38 }
 0x3a3   : > { %11581 = vst [vmem:[#allocation67_spill] sm:$0xff] %v9880_v9  ;;  %v6932_v54 = vpop.eup %6931  ;;  %v4805_v32 = vadd.f32 %v4804_v52, %v4475_v46  ;;  %v4476_v36 = vmul.f32 %v6930_v3, %v9717_v37  ;;  %6951 = vpow2.f32 %v5577_v25  ;;  %v5586_v31 = vmul.f32 -1.442695, %v9859_v19  ;;  %v11583_v3 = vld [vmem:[#allocation29_spill] sm:$0xff] }
 0x3a4   : > { %v6934_v35 = vpop.eup %6933  ;;  %v4748_v7 = vrot.slane %v4747_v33, 4  ;;  %v4784_v21 = vadd.f32 %v4783_v59, %v4634_v24  ;;  %v3526_v62 = vadd.f32 1.0, %v6932_v54  ;;  %6953 = vpow2.f32 %v5744_v26  ;;  %v11582_v59 = vld [vmem:[#allocation33_spill] sm:$0xff] }
 0x3a5   : > { %v6936_v55 = vpop.eup %6935  ;;  %v9883_v28 = vadd.f32 %v4841_v11, %v4476_v36  ;;  %v3368_v8 = vadd.f32 1.0, %v6934_v35  ;;  %v5745_v38 = vmul.f32 -1.442695, %v9876_v41  ;;  %v9889_v25 = vadd.f32 %v11582_v59, %v9771_v44 }
 0x3a6   : > { %v6938_v39 = vpop.eup %6937  ;;  %v4749_v9 = vadd.f32 %v4748_v7, %v4747_v33  ;;  %v4785_v20 = vrot.slane %v4784_v21, 4  ;;  %6955 = vrcp.f32 %v3526_v62  ;;  %v3535_v52 = vadd.f32 1.0, %v6936_v55  ;;  %v9900_v55 = vpop.f32.mrb[155].mxu0 }
 0x3a7   : > { %v6940_v37 = vpop.eup %6939  ;;  %6957 = vrcp.f32 %v3367_v51  ;;  %v3377_v15 = vadd.f32 1.0, %v6938_v39  ;;  %v9894_v33 = vadd.f32 %v11583_v3, %v9188_v27  ;;  %v11584_v39 = vld [vmem:[#allocation16_spill] sm:$0xff]  ;;  %11585 = vst [vmem:[#allocation33_spill] sm:$0xff] %v9900_v55 }
 0x3a8   : > { %v6942_v11 = vpop.eup %6941  ;;  %v4750_v46 = vrot.slane %v4749_v9, 2  ;;  %v4786_v35 = vadd.f32 %v4785_v20, %v4784_v21  ;;  %v4485_v26 = vmul.f32 %v6940_v37, %v9750_v1  ;;  %6959 = vrcp.f32 %v3535_v52  ;;  %v11586_v21 = vld [vmem:[#allocation34_spill] sm:$0xff]  ;;  %v11587_v37 = vld [vmem:[#allocation35_spill] sm:$0xff] }
 0x3a9   : > { %6961 = vrcp.f32 %v3377_v15  ;;  %v3536_v7 = vadd.f32 1.0, %v6942_v11  ;;  %v9898_v24 = vadd.f32 %v11584_v39, %v9733_v4  ;;  %v6944_v54 = vpop.eup %6943  ;;  %v9904_v52 = vadd.f32 %v11586_v21, %v9218_v50 }
 0x3aa   : > { %v4751_v36 = vadd.f32 %v4750_v46, %v4749_v9  ;;  %v4787_v51 = vrot.slane %v4786_v35, 2  ;;  %v4806_v62 = vadd.f32 %v4805_v32, %v4485_v26  ;;  %6963 = vrcp.f32 %v3368_v8  ;;  %v6946_v20 = vpop.eup %6945  ;;  %v11588_v46 = vld [vmem:[#allocation15_spill] sm:$0xff] }
 0x3ab   : > { %6965 = vrcp.f32 %v3536_v7  ;;  %v3378_v1 = vadd.f32 1.0, %v6944_v54  ;;  %v9908_v15 = vadd.f32 %v11587_v37, %v9771_v44  ;;  %v6948_v59 = vpop.eup %6947  ;;  %v3545_v9 = vadd.f32 1.0, %v6946_v20  ;;  %v11589_v7 = vld [vmem:[#allocation36_spill] sm:$0xff]  ;;  %v9920_v20 = vpop.f32.mrb[115].mxu1 }
 0x3ac   : > { %v4752_v11 = vrot.slane %v4751_v36, 1  ;;  %v4788_v3 = vadd.f32 %v4787_v51, %v4786_v35  ;;  %6967 = vpow2.f32 %v5586_v31  ;;  %v6950_v32 = vpop.eup %6949  ;;  %v3387_v8 = vadd.f32 1.0, %v6948_v59  ;;  %11590 = vst [vmem:[#allocation29_spill] sm:$0xff] %v9920_v20 }
 0x3ad   : > { %6969 = vrcp.f32 %v3378_v1  ;;  %v9912_v26 = vadd.f32 %v11588_v46, %v9188_v27  ;;  %v9916_v39 = vadd.f32 %v11589_v7, %v9733_v4  ;;  %v6952_v54 = vpop.eup %6951  ;;  %v3546_v55 = vadd.f32 1.0, %v6950_v32 }
 0x3ae   : > { %v4753_v21 = vadd.f32 %v4752_v11, %v4751_v36  ;;  %v4789_v37 = vrot.slane %v4788_v3, 1  ;;  %6971 = vrcp.f32 %v3545_v9  ;;  %v6954_v6 = vpop.eup %6953  ;;  %v3388_v35 = vadd.f32 1.0, %v6952_v54 }
 0x3af   : > { %6973 = vrcp.f32 %v3387_v8  ;;  %v5587_v31 = vmul.f32 -1.442695, %v9889_v25  ;;  %v5754_v51 = vmul.f32 -1.442695, %v9894_v33  ;;  %v3555_v46 = vadd.f32 1.0, %v6954_v6 }
 0x3b0   : > { %v6956_v1 = vpop.eup %6955  ;;  %v4790_v59 = vadd.f32 %v4789_v37, %v4788_v3  ;;  %6975 = vrcp.f32 %v3546_v55  ;;  %v5596_v7 = vmul.f32 -1.442695, %v9898_v24  ;;  %v5755_v11 = vmul.f32 -1.442695, %v9904_v52 }
 0x3b1   : > { %v6958_v2 = vpop.eup %6957  ;;  %v4486_v36 = vmul.f32 %v6956_v1, %v9778_v5  ;;  %6977 = vrcp.f32 %v3388_v35  ;;  %v5597_v9 = vmul.f32 -1.442695, %v9908_v15  ;;  %v5764_v54 = vmul.f32 -1.442695, %v9912_v26  ;;  %v11591_v5 = vld [vmem:[#allocation38_spill] sm:$0xff] }
 0x3b2   : > { %v6960_v32 = vpop.eup %6959  ;;  %v5024_v8 = vcombine.low %v4753_v21, %v4790_v59  ;;  %6979 = vrcp.f32 %v3555_v46  ;;  %v5606_v20 = vmul.f32 -1.442695, %v9916_v39  ;;  %v9932_v37 = vadd.f32 %v11591_v5, %v9218_v50 }
 0x3b3   : > { %v6962_v3 = vpop.eup %6961  ;;  %v4843_v6 = vadd.f32 %v9883_v28, %v4486_v36  ;;  %v4495_v55 = vmul.f32 %v6960_v32, %v9786_v53  ;;  %6981 = vpow2.f32 %v5745_v38  ;;  %v4327_v21 = vmul.f32 %v6958_v2, %v9755_v58  ;;  %v11593_v28 = vld [vmem:[#allocation18_spill] sm:$0xff]  ;;  %v11594_v38 = vld [vmem:[#allocation37_spill] sm:$0xff]  ;;  %v9947_v32 = vpop.f32.mrb[156].mxu0 }
 0x3b4   : > { %v6964_v35 = vpop.eup %6963  ;;  %v9935_v1 = vrot.slane %v5024_v8, %v9802_v48  ;;  %v4337_v59 = vmul.f32 %v6962_v3, %v9790_v18  ;;  %6983 = vpow2.f32 %v5587_v31  ;;  %v9941_v53 = vadd.f32 %v11593_v28, %v9771_v44  ;;  %v9949_v8 = vpop.f32.mrb[116].mxu1  ;;  %v11595_v28 = vld [vmem:[#allocation40_spill] sm:$0xff] }
 0x3b5   : > { %v6966_v46 = vpop.eup %6965  ;;  %v4807_v29 = vadd.f32 %v4806_v62, %v4495_v55  ;;  %6985 = vpow2.f32 %v5754_v51  ;;  %v9945_v36 = vadd.f32 %v11594_v38, %v9188_v27  ;;  %v9954_v62 = vpop.f32.mrb[157].mxu0  ;;  %v5765_v55 = vmul.f32 -1.442695, %v9932_v37 }
 0x3b6   : > { %11592 = vst [vmem:[#allocation16_spill] sm:$0xff] %v9935_v1  ;;  %v6968_v5 = vpop.eup %6967  ;;  %v4865_v2 = vadd.f32 %v4337_v59, %v4327_v21  ;;  %v4496_v18 = vmul.f32 %v6966_v46, %v9794_v63  ;;  %6987 = vpow2.f32 %v5596_v7  ;;  %v9956_v31 = vpop.f32.mrb[117].mxu1  ;;  %v9961_v38 = vadd.f32 %v11595_v28, %v9733_v4 }
 0x3b7   : > { %v6970_v51 = vpop.eup %6969  ;;  %v3397_v3 = vadd.f32 1.0, %v6968_v5  ;;  %6989 = vpow2.f32 %v5755_v11  ;;  %v9963_v48 = vpop.f32.mrb[158].mxu0  ;;  %v4328_v63 = vmul.f32 %v6964_v35, %v9782_v16  ;;  %v5607_v28 = vmul.f32 -1.442695, %v9941_v53 }
 0x3b8   : > { %11596 = vst [vmem:[#allocation34_spill] sm:$0xff] %v9963_v48  ;;  %v9965_v58 = vpop.f32.mrb[118].mxu1  ;;  %v6972_v21 = vpop.eup %6971  ;;  %v4844_v7 = vadd.f32 %v4843_v6, %v4496_v18  ;;  %v4338_v59 = vmul.f32 %v6970_v51, %v9799_v13  ;;  %6991 = vpow2.f32 %v5597_v9  ;;  %v5774_v16 = vmul.f32 -1.442695, %v9945_v36 }
 0x3b9   : > { %11597 = vst [vmem:[#allocation35_spill] sm:$0xff] %v9965_v58  ;;  %v9969_v46 = vpop.f32.mrb[159].mxu0  ;;  %v9971_v11 = vpop.f32.mrb[119].mxu1  ;;  %v4505_v1 = vmul.f32 %v6972_v21, %v9811_v12  ;;  %6993 = vrcp.f32 %v3397_v3  ;;  %v5616_v35 = vmul.f32 -1.442695, %v9961_v38 }
 0x3ba   : > { %11598 = vst [vmem:[#allocation15_spill] sm:$0xff] %v9969_v46  ;;  %11599 = vst [vmem:[#allocation36_spill] sm:$0xff] %v9971_v11  ;;  %v6974_v5 = vpop.eup %6973  ;;  %v4902_v48 = vadd.f32 %v4338_v59, %v4328_v63  ;;  %6995 = vpow2.f32 %v5764_v54 }
 0x3bb   : > { %v6976_v45 = vpop.eup %6975  ;;  %v4347_v58 = vmul.f32 %v6974_v5, %v9827_v0  ;;  %v4808_v13 = vadd.f32 %v4807_v29, %v4505_v1  ;;  %6997 = vpow2.f32 %v5606_v20  ;;  %v9989_v20 = vpop.f32.mrb[160].mxu0 }
 0x3bc   : > { %v6978_v6 = vpop.eup %6977  ;;  %v4506_v9 = vmul.f32 %v6976_v45, %v9835_v30  ;;  %6999 = vpow2.f32 %v5765_v55  ;;  %v11600_v30 = vld [vmem:[#allocation63_spill] sm:$0xff]  ;;  %11601 = vst [vmem:[#allocation38_spill] sm:$0xff] %v9989_v20  ;;  %v9991_v1 = vpop.f32.mrb[120].mxu1 }
 0x3bd   : > { %v6980_v18 = vpop.eup %6979  ;;  %v4866_v51 = vadd.f32 %v4865_v2, %v4347_v58  ;;  %v4348_v12 = vmul.f32 %v6978_v6, %v9840_v17  ;;  %7001 = vpow2.f32 %v5607_v28  ;;  %v9987_v45 = vadd.f32 %v11600_v30, %v9218_v50  ;;  %11602 = vst [vmem:[#allocation18_spill] sm:$0xff] %v9991_v1 }
 0x3be   : > { %v6982_v3 = vpop.eup %6981  ;;  %v9980_v21 = vadd.f32 %v4844_v7, %v4506_v9  ;;  %v4515_v0 = vmul.f32 %v6980_v18, %v9845_v47  ;;  %7003 = vpow2.f32 %v5774_v16  ;;  %v9995_v47 = vpop.f32.mrb[161].mxu0 }
 0x3bf   : > { %v6984_v54 = vpop.eup %6983  ;;  %v9983_v63 = vadd.f32 %v4902_v48, %v4348_v12  ;;  %v3556_v29 = vadd.f32 1.0, %v6982_v3  ;;  %7005 = vpow2.f32 %v5616_v35  ;;  %11603 = vst [vmem:[#allocation37_spill] sm:$0xff] %v9995_v47  ;;  %v5775_v16 = vmul.f32 -1.442695, %v9987_v45 }
 0x3c0   : > { %v6986_v17 = vpop.eup %6985  ;;  %v9993_v58 = vadd.f32 %v4808_v13, %v4515_v0  ;;  %v3398_v2 = vadd.f32 1.0, %v6984_v54  ;;  %v9998_v13 = vpop.f32.mrb[121].mxu1  ;;  %v11605_v0 = vld [vmem:[#allocation64_spill] sm:$0xff] }
 0x3c1   : > { %v6988_v55 = vpop.eup %6987  ;;  %7007 = vrcp.f32 %v3556_v29  ;;  %v3565_v48 = vadd.f32 1.0, %v6986_v17  ;;  %11604 = vst [vmem:[#allocation40_spill] sm:$0xff] %v9998_v13  ;;  %v10003_v54 = vadd.f32 %v11605_v0, %v9771_v44  ;;  %v11606_v29 = vld [vmem:[#allocation39_spill] sm:$0xff] }
 0x3c2   : > { %v6990_v7 = vpop.eup %6989  ;;  %7009 = vrcp.f32 %v3398_v2  ;;  %v3407_v59 = vadd.f32 1.0, %v6988_v55  ;;  %v10007_v30 = vadd.f32 %v11606_v29, %v9188_v27 }
 0x3c3   : > { %v6992_v5 = vpop.eup %6991  ;;  %7011 = vrcp.f32 %v3565_v48  ;;  %v3566_v28 = vadd.f32 1.0, %v6990_v7  ;;  %v11607_v48 = vld [vmem:[#allocation17_spill] sm:$0xff]  ;;  %v5617_v29 = vmul.f32 -1.442695, %v10003_v54 }
 0x3c4   : > { %v6994_v6 = vpop.eup %6993  ;;  %7013 = vrcp.f32 %v3407_v59  ;;  %v3408_v9 = vadd.f32 1.0, %v6992_v5  ;;  %v10011_v7 = vadd.f32 %v11607_v48, %v9733_v4  ;;  %v11608_v5 = vld [vmem:[#allocation41_spill] sm:$0xff] }
 0x3c5   : > { %v6996_v18 = vpop.eup %6995  ;;  %v4357_v35 = vmul.f32 %v6994_v6, %v9859_v19  ;;  %7015 = vrcp.f32 %v3566_v28  ;;  %v10015_v28 = vadd.f32 %v11608_v5, %v9218_v50  ;;  %v11609_v6 = vld [vmem:[#allocation43_spill] sm:$0xff] }
 0x3c6   : > { %v6998_v12 = vpop.eup %6997  ;;  %7017 = vrcp.f32 %v3408_v9  ;;  %v3575_v3 = vadd.f32 1.0, %v6996_v18  ;;  %v10019_v9 = vadd.f32 %v11609_v6, %v9771_v44  ;;  %v10036_v6 = vpop.f32.mrb[162].mxu0 }
 0x3c7   : > { %v7000_v17 = vpop.eup %6999  ;;  %v4867_v2 = vadd.f32 %v4866_v51, %v4357_v35  ;;  %v3417_v55 = vadd.f32 1.0, %v6998_v12  ;;  %7019 = vpow2.f32 %v5775_v16  ;;  %v10023_v16 = vadd.f32 %v9506_v14, %v9188_v27  ;;  %v11610_v35 = vld [vmem:[#allocation42_spill] sm:$0xff]  ;;  %11612 = vst [vmem:[#allocation63_spill] sm:$0xff] %v10036_v6  ;;  %v10046_v20 = vpop.f32.mrb[163].mxu0 }
 0x3c8   : > { %v7002_v19 = vpop.eup %7001  ;;  %7021 = vrcp.f32 %v3575_v3  ;;  %v3576_v59 = vadd.f32 1.0, %v7000_v17  ;;  %v10027_v12 = vadd.f32 %v11610_v35, %v9733_v4  ;;  %v5784_v17 = vmul.f32 -1.442695, %v10007_v30  ;;  %v10038_v35 = vpop.f32.mrb[122].mxu1  ;;  %11614 = vst [vmem:[#allocation39_spill] sm:$0xff] %v10046_v20 }
 0x3c9   : > { %v7004_v18 = vpop.eup %7003  ;;  %7023 = vrcp.f32 %v3417_v55  ;;  %v3418_v51 = vadd.f32 1.0, %v7002_v19  ;;  %v5626_v55 = vmul.f32 -1.442695, %v10011_v7  ;;  %v11611_v19 = vld [vmem:[#allocation45_spill] sm:$0xff]  ;;  %11613 = vst [vmem:[#allocation64_spill] sm:$0xff] %v10038_v35  ;;  %v10048_v6 = vpop.f32.mrb[123].mxu1 }
 0x3ca   : > { %v7006_v3 = vpop.eup %7005  ;;  %7025 = vrcp.f32 %v3576_v59  ;;  %v3585_v0 = vadd.f32 1.0, %v7004_v18  ;;  %v10034_v14 = vadd.f32 %v11611_v19, %v9218_v50  ;;  %v5785_v18 = vmul.f32 -1.442695, %v10015_v28  ;;  %11615 = vst [vmem:[#allocation17_spill] sm:$0xff] %v10048_v6 }
 0x3cb   : > { %v7008_v48 = vpop.eup %7007  ;;  %7027 = vrcp.f32 %v3418_v51  ;;  %v3427_v5 = vadd.f32 1.0, %v7006_v3  ;;  %v5627_v47 = vmul.f32 -1.442695, %v10019_v9  ;;  %v5794_v1 = vmul.f32 -1.442695, %v10023_v16 }
 0x3cc   : > { %v7010_v13 = vpop.eup %7009  ;;  %v4516_v59 = vmul.f32 %v7008_v48, %v9876_v41  ;;  %7029 = vrcp.f32 %v3585_v0  ;;  %v5636_v19 = vmul.f32 -1.442695, %v10027_v12  ;;  %v11616_v48 = vld [vmem:[#allocation20_spill] sm:$0xff]  ;;  %v5795_v20 = vmul.f32 -1.442695, %v10034_v14 }
 0x3cd   : > { %v7012_v51 = vpop.eup %7011  ;;  %v4358_v3 = vmul.f32 %v7010_v13, %v9889_v25  ;;  %7031 = vrcp.f32 %v3427_v5  ;;  %v10054_v11 = vadd.f32 %v11616_v48, %v9771_v44 }
 0x3ce   : > { %v7014_v35 = vpop.eup %7013  ;;  %v4846_v41 = vadd.f32 %v9980_v21, %v4516_v59  ;;  %v4525_v0 = vmul.f32 %v7012_v51, %v9894_v33  ;;  %7033 = vpow2.f32 %v5617_v29  ;;  %v11617_v33 = vld [vmem:[#allocation44_spill] sm:$0xff] }
 0x3cf   : > { %v7016_v25 = vpop.eup %7015  ;;  %v4904_v13 = vadd.f32 %v9983_v63, %v4358_v3  ;;  %v4367_v5 = vmul.f32 %v7014_v35, %v9898_v24  ;;  %7035 = vpow2.f32 %v5784_v17  ;;  %v10063_v29 = vadd.f32 %v11617_v33, %v9188_v27  ;;  %v11618_v24 = vld [vmem:[#allocation47_spill] sm:$0xff] }
 0x3d0   : > { %v7018_v46 = vpop.eup %7017  ;;  %v4810_v6 = vadd.f32 %v9993_v58, %v4525_v0  ;;  %v4526_v21 = vmul.f32 %v7016_v25, %v9904_v52  ;;  %7037 = vpow2.f32 %v5626_v55  ;;  %v10068_v63 = vadd.f32 %v11618_v24, %v9733_v4  ;;  %v11619_v52 = vld [vmem:[#allocation46_spill] sm:$0xff] }
 0x3d1   : > { %v7020_v59 = vpop.eup %7019  ;;  %v4868_v51 = vadd.f32 %v4867_v2, %v4367_v5  ;;  %v4368_v48 = vmul.f32 %v7018_v46, %v9908_v15  ;;  %7039 = vpow2.f32 %v5785_v18  ;;  %v10072_v58 = vadd.f32 %v11619_v52, %v9218_v50  ;;  %v10076_v46 = vpop.f32.mrb[164].mxu0 }
 0x3d2   : > { %v7022_v17 = vpop.eup %7021  ;;  %v4847_v35 = vadd.f32 %v4846_v41, %v4526_v21  ;;  %v3586_v3 = vadd.f32 1.0, %v7020_v59  ;;  %7041 = vpow2.f32 %v5627_v47  ;;  %v5637_v15 = vmul.f32 -1.442695, %v10054_v11  ;;  %v10078_v2 = vpop.f32.mrb[124].mxu1 }
 0x3d3   : > { %v7024_v55 = vpop.eup %7023  ;;  %v4905_v0 = vadd.f32 %v4904_v13, %v4368_v48  ;;  %v4535_v25 = vmul.f32 %v7022_v17, %v9912_v26  ;;  %7043 = vpow2.f32 %v5794_v1  ;;  %v5804_v47 = vmul.f32 -1.442695, %v10063_v29  ;;  %v10082_v5 = vpop.f32.mrb[165].mxu0 }
 0x3d4   : > { %v7026_v18 = vpop.eup %7025  ;;  %v4377_v41 = vmul.f32 %v7024_v55, %v9916_v39  ;;  %7045 = vrcp.f32 %v3586_v3  ;;  %v10084_v21 = vpop.f32.mrb[125].mxu1  ;;  %v5646_v1 = vmul.f32 -1.442695, %v10068_v63  ;;  %v5805_v3 = vmul.f32 -1.442695, %v10072_v58 }
 0x3d5   : > { %11620 = vst [vmem:[#allocation41_spill] sm:$0xff] %v10084_v21  ;;  %v7028_v13 = vpop.eup %7027  ;;  %v4811_v33 = vadd.f32 %v4810_v6, %v4535_v25  ;;  %v4536_v26 = vmul.f32 %v7026_v18, %v9932_v37  ;;  %7047 = vpow2.f32 %v5636_v19  ;;  %v10088_v59 = vpop.f32.mrb[166].mxu0 }
 0x3d6   : > { %11621 = vst [vmem:[#allocation43_spill] sm:$0xff] %v10088_v59  ;;  %v10090_v48 = vpop.f32.mrb[126].mxu1  ;;  %v7030_v24 = vpop.eup %7029  ;;  %v4869_v39 = vadd.f32 %v4868_v51, %v4377_v41  ;;  %v4378_v17 = vmul.f32 %v7028_v13, %v9941_v53  ;;  %7049 = vpow2.f32 %v5795_v20  ;;  %v11625_v41 = vld [vmem:[#allocation49_spill] sm:$0xff] }
 0x3d7   : > { %11622 = vst [vmem:[#allocation42_spill] sm:$0xff] %v10090_v48  ;;  %v10094_v52 = vpop.f32.mrb[167].mxu0  ;;  %v10096_v55 = vpop.f32.mrb[127].mxu1  ;;  %v4848_v37 = vadd.f32 %v4847_v35, %v4536_v26  ;;  %v4545_v19 = vmul.f32 %v7030_v24, %v9945_v36  ;;  %7051 = vpow2.f32 %v5637_v15  ;;  %v10106_v13 = vadd.f32 %v11625_v41, %v9771_v44 }
 0x3d8   : > { %11623 = vst [vmem:[#allocation45_spill] sm:$0xff] %v10094_v52  ;;  %11624 = vst [vmem:[#allocation20_spill] sm:$0xff] %v10096_v55  ;;  %v7032_v6 = vpop.eup %7031  ;;  %v10099_v18 = vadd.f32 %v4905_v0, %v4378_v17  ;;  %7053 = vpow2.f32 %v5804_v47 }
 0x3d9   : > { %v7034_v25 = vpop.eup %7033  ;;  %v4387_v48 = vmul.f32 %v7032_v6, %v9961_v38  ;;  %v10102_v53 = vadd.f32 %v4811_v33, %v4545_v19  ;;  %7055 = vpow2.f32 %v5646_v1  ;;  %v5647_v1 = vmul.f32 -1.442695, %v10106_v13 }
 0x3da   : > { %v7036_v51 = vpop.eup %7035  ;;  %v3428_v20 = vadd.f32 1.0, %v7034_v25  ;;  %7057 = vpow2.f32 %v5805_v3  ;;  %v11627_v25 = vld [vmem:[#allocation19_spill] sm:$0xff] }
 0x3db   : > { %v7038_v55 = vpop.eup %7037  ;;  %v10108_v35 = vadd.f32 %v4869_v39, %v4387_v48  ;;  %v3595_v36 = vadd.f32 1.0, %v7036_v51  ;;  %v10118_v51 = vadd.f32 %v11627_v25, %v9733_v4 }
 0x3dc   : > { %v7040_v15 = vpop.eup %7039  ;;  %7059 = vrcp.f32 %v3428_v20  ;;  %v3437_v0 = vadd.f32 1.0, %v7038_v55  ;;  %v11626_v55 = vld [vmem:[#allocation58_spill] sm:$0xff] }
 0x3dd   : > { %v7042_v26 = vpop.eup %7041  ;;  %7061 = vrcp.f32 %v3595_v36  ;;  %v3596_v38 = vadd.f32 1.0, %v7040_v15  ;;  %v10114_v19 = vadd.f32 %v11626_v55, %v9188_v27  ;;  %v11628_v15 = vld [vmem:[#allocation48_spill] sm:$0xff] }
 0x3de   : > { %v7044_v47 = vpop.eup %7043  ;;  %7063 = vrcp.f32 %v3437_v0  ;;  %v3438_v33 = vadd.f32 1.0, %v7042_v26  ;;  %v10122_v0 = vadd.f32 %v11628_v15, %v9218_v50  ;;  %v5656_v15 = vmul.f32 -1.442695, %v10118_v51 }
 0x3df   : > { %v7046_v24 = vpop.eup %7045  ;;  %7065 = vrcp.f32 %v3596_v38  ;;  %v3605_v17 = vadd.f32 1.0, %v7044_v47  ;;  %v11629_v38 = vld [vmem:[#allocation51_spill] sm:$0xff]  ;;  %v5814_v55 = vmul.f32 -1.442695, %v10114_v19 }
 0x3e0   : > { %v7048_v6 = vpop.eup %7047  ;;  %v4546_v48 = vmul.f32 %v7046_v24, %v9987_v45  ;;  %7067 = vrcp.f32 %v3438_v33  ;;  %v10126_v47 = vadd.f32 %v11629_v38, %v9771_v44  ;;  %v10130_v33 = vadd.f32 %v9596_v22, %v9188_v27  ;;  %v11632_v22 = vld [vmem:[#allocation53_spill] sm:$0xff] }
 0x3e1   : > { %v7050_v39 = vpop.eup %7049  ;;  %7069 = vrcp.f32 %v3605_v17  ;;  %v3447_v3 = vadd.f32 1.0, %v7048_v6  ;;  %v11630_v17 = vld [vmem:[#allocation50_spill] sm:$0xff]  ;;  %v10145_v25 = vadd.f32 %v11632_v22, %v9771_v44 }
 0x3e2   : > { %v7052_v20 = vpop.eup %7051  ;;  %v4849_v41 = vadd.f32 %v4848_v37, %v4546_v48  ;;  %v3606_v36 = vadd.f32 1.0, %v7050_v39  ;;  %7071 = vpow2.f32 %v5647_v1  ;;  %v10134_v1 = vadd.f32 %v9598_v56, %v9733_v4  ;;  %v10140_v48 = vpop.f32.mrb[168].mxu0 }
 0x3e3   : > { %v7054_v45 = vpop.eup %7053  ;;  %7073 = vrcp.f32 %v3447_v3  ;;  %v3448_v26 = vadd.f32 1.0, %v7052_v20  ;;  %v10138_v6 = vadd.f32 %v11630_v17, %v9218_v50  ;;  %11631 = vst [vmem:[#allocation44_spill] sm:$0xff] %v10140_v48  ;;  %v10147_v20 = vpop.f32.mrb[128].mxu1 }
 0x3e4   : > { %v7056_v24 = vpop.eup %7055  ;;  %7075 = vrcp.f32 %v3606_v36  ;;  %v3615_v37 = vadd.f32 1.0, %v7054_v45  ;;  %11633 = vst [vmem:[#allocation47_spill] sm:$0xff] %v10147_v20  ;;  %v5815_v45 = vmul.f32 -1.442695, %v10122_v0  ;;  %v10154_v48 = vpop.f32.mrb[169].mxu0 }
 0x3e5   : > { %v7058_v39 = vpop.eup %7057  ;;  %7077 = vrcp.f32 %v3448_v26  ;;  %v3457_v3 = vadd.f32 1.0, %v7056_v24  ;;  %v5657_v26 = vmul.f32 -1.442695, %v10126_v47  ;;  %v5824_v24 = vmul.f32 -1.442695, %v10130_v33  ;;  %11634 = vst [vmem:[#allocation46_spill] sm:$0xff] %v10154_v48 }
 0x3e6   : > { %v7060_v36 = vpop.eup %7059  ;;  %7079 = vrcp.f32 %v3615_v37  ;;  %v3616_v56 = vadd.f32 1.0, %v7058_v39  ;;  %v10156_v22 = vpop.f32.mrb[129].mxu1  ;;  %v5666_v39 = vmul.f32 -1.442695, %v10134_v1  ;;  %v5825_v52 = vmul.f32 -1.442695, %v10138_v6 }
 0x3e7   : > { %v7062_v38 = vpop.eup %7061  ;;  %v4388_v17 = vmul.f32 %v7060_v36, %v10003_v54  ;;  %7081 = vrcp.f32 %v3457_v3  ;;  %11635 = vst [vmem:[#allocation49_spill] sm:$0xff] %v10156_v22  ;;  %v5667_v36 = vmul.f32 -1.442695, %v10145_v25  ;;  %v10164_v21 = vpop.f32.mrb[170].mxu0 }
 0x3e8   : > { %v7064_v20 = vpop.eup %7063  ;;  %v4555_v37 = vmul.f32 %v7062_v38, %v10007_v30  ;;  %7083 = vrcp.f32 %v3616_v56  ;;  %v10166_v48 = vpop.f32.mrb[130].mxu1  ;;  %v10172_v38 = vadd.f32 %v9632_v34, %v9188_v27  ;;  %v10187_v34 = vadd.f32 %v9642_v60, %v9218_v50 }
 0x3e9   : > { %v7066_v59 = vpop.eup %7065  ;;  %v4907_v54 = vadd.f32 %v10099_v18, %v4388_v17  ;;  %v4397_v3 = vmul.f32 %v7064_v20, %v10011_v7  ;;  %7085 = vpow2.f32 %v5814_v55  ;;  %v10178_v20 = vadd.f32 %v9634_v10, %v9733_v4  ;;  %v10180_v17 = vpop.f32.mrb[171].mxu0 }
 0x3ea   : > { %v7068_v22 = vpop.eup %7067  ;;  %v4813_v30 = vadd.f32 %v10102_v53, %v4555_v37  ;;  %v4556_v56 = vmul.f32 %v7066_v59, %v10015_v28  ;;  %7087 = vpow2.f32 %v5656_v15  ;;  %v10182_v53 = vpop.f32.mrb[131].mxu1  ;;  %v10191_v10 = vadd.f32 %v9644_v42, %v9771_v44 }
 0x3eb   : > { %v7070_v18 = vpop.eup %7069  ;;  %v4871_v7 = vadd.f32 %v10108_v35, %v4397_v3  ;;  %v4398_v55 = vmul.f32 %v7068_v22, %v10019_v9  ;;  %7089 = vpow2.f32 %v5815_v45  ;;  %v5676_v60 = vmul.f32 -1.442695, %v10178_v20 }
 0x3ec   : > { %v7072_v28 = vpop.eup %7071  ;;  %v4850_v59 = vadd.f32 %v4849_v41, %v4556_v56  ;;  %v4565_v15 = vmul.f32 %v7070_v18, %v10023_v16  ;;  %7091 = vpow2.f32 %v5657_v26  ;;  %v5834_v16 = vmul.f32 -1.442695, %v10172_v38 }
 0x3ed   : > { %v7074_v35 = vpop.eup %7073  ;;  %v4908_v9 = vadd.f32 %v4907_v54, %v4398_v55  ;;  %v3458_v45 = vadd.f32 1.0, %v7072_v28  ;;  %7093 = vpow2.f32 %v5824_v24  ;;  %v5835_v42 = vmul.f32 -1.442695, %v10187_v34 }
 0x3ee   : > { %v7076_v22 = vpop.eup %7075  ;;  %v4814_v37 = vadd.f32 %v4813_v30, %v4565_v15  ;;  %v4407_v3 = vmul.f32 %v7074_v35, %v10027_v12  ;;  %7095 = vpow2.f32 %v5666_v39  ;;  %v5677_v39 = vmul.f32 -1.442695, %v10191_v10  ;;  %v10202_v15 = vpop.f32.mrb[172].mxu0 }
 0x3ef   : > { %v7078_v41 = vpop.eup %7077  ;;  %v4566_v26 = vmul.f32 %v7076_v22, %v10034_v14  ;;  %7097 = vrcp.f32 %v3458_v45 }
 0x3f0   : > { %v7080_v54 = vpop.eup %7079  ;;  %v4872_v56 = vadd.f32 %v4871_v7, %v4407_v3  ;;  %v4408_v24 = vmul.f32 %v7078_v41, %v10054_v11  ;;  %7099 = vpow2.f32 %v5825_v52  ;;  %v10204_v7 = vpop.f32.mrb[132].mxu1 }
 0x3f1   : > { %v7082_v18 = vpop.eup %7081  ;;  %v4851_v30 = vadd.f32 %v4850_v59, %v4566_v26  ;;  %v4575_v12 = vmul.f32 %v7080_v54, %v10063_v29  ;;  %7101 = vpow2.f32 %v5667_v36  ;;  %v10209_v59 = vpop.f32.mrb[173].mxu0 }
 0x3f2   : > { %v7084_v55 = vpop.eup %7083  ;;  %v4909_v28 = vadd.f32 %v4908_v9, %v4408_v24  ;;  %v4417_v14 = vmul.f32 %v7082_v18, %v10068_v63  ;;  %7103 = vpow2.f32 %v5834_v16  ;;  %v10211_v29 = vpop.f32.mrb[133].mxu1  ;;  %v10217_v63 = vadd.f32 %v9648_v61, %v9188_v27 }
 0x3f3   : > { %v7086_v11 = vpop.eup %7085  ;;  %v10206_v52 = vadd.f32 %v4814_v37, %v4575_v12  ;;  %v4576_v35 = vmul.f32 %v7084_v55, %v10072_v58  ;;  %7105 = vpow2.f32 %v5676_v60  ;;  %v10219_v22 = vpop.f32.mrb[174].mxu0 }
 0x3f4   : > { %v7088_v36 = vpop.eup %7087  ;;  %v10213_v45 = vadd.f32 %v4872_v56, %v4417_v14  ;;  %v3625_v9 = vadd.f32 1.0, %v7086_v11  ;;  %7107 = vpow2.f32 %v5835_v42  ;;  %v5844_v24 = vmul.f32 -1.442695, %v10217_v63  ;;  %v10224_v18 = vpop.f32.mrb[134].mxu1 }
 0x3f5   : > { %v7090_v37 = vpop.eup %7089  ;;  %v10221_v3 = vadd.f32 %v4851_v30, %v4576_v35  ;;  %v3467_v58 = vadd.f32 1.0, %v7088_v36  ;;  %7109 = vpow2.f32 %v5677_v39  ;;  %11636 = vst [vmem:[#allocation58_spill] sm:$0xff] %v10224_v18  ;;  %v11637_v39 = vld [vmem:[#allocation52_spill] sm:$0xff]  ;;  %v11638_v35 = vld [vmem:[#allocation55_spill] sm:$0xff] }
 0x3f6   : > { %v7092_v16 = vpop.eup %7091  ;;  %7111 = vrcp.f32 %v3625_v9  ;;  %v3626_v41 = vadd.f32 1.0, %v7090_v37  ;;  %v10229_v55 = vadd.f32 %v11637_v39, %v9733_v4  ;;  %v10233_v36 = vadd.f32 %v11638_v35, %v9218_v50  ;;  %v11639_v9 = vld [vmem:[#allocation54_spill] sm:$0xff]  ;;  %v10261_v35 = vpop.f32.mrb[135].mxu1 }
 0x3f7   : > { %v7094_v26 = vpop.eup %7093  ;;  %7113 = vrcp.f32 %v3467_v58  ;;  %v3468_v60 = vadd.f32 1.0, %v7092_v16  ;;  %v10237_v37 = vadd.f32 %v11639_v9, %v9771_v44  ;;  %11641 = vst [vmem:[#allocation48_spill] sm:$0xff] %v10261_v35 }
 0x3f8   : > { %v7096_v54 = vpop.eup %7095  ;;  %7115 = vrcp.f32 %v3626_v41  ;;  %v3635_v56 = vadd.f32 1.0, %v7094_v26 }
 0x3f9   : > { %v7098_v61 = vpop.eup %7097  ;;  %7117 = vrcp.f32 %v3468_v60  ;;  %v3477_v42 = vadd.f32 1.0, %v7096_v54  ;;  %v10245_v54 = vadd.f32 %v9721_v49, %v9733_v4  ;;  %v5687_v49 = vmul.f32 -1.442695, %v10237_v37 }
 0x3fa   : > { %v7100_v30 = vpop.eup %7099  ;;  %v4418_v12 = vmul.f32 %v7098_v61, %v10106_v13  ;;  %7119 = vrcp.f32 %v3635_v56  ;;  %v10241_v13 = vadd.f32 %v9719_v57, %v9188_v27  ;;  %v10249_v56 = vadd.f32 %v9725_v40, %v9218_v50 }
 0x3fb   : > { %v7102_v14 = vpop.eup %7101  ;;  %7121 = vrcp.f32 %v3477_v42  ;;  %v3636_v11 = vadd.f32 1.0, %v7100_v30  ;;  %v10254_v57 = vadd.f32 %v9727_v43, %v9771_v44 }
 0x3fc   : > { %v7104_v58 = vpop.eup %7103  ;;  %v4910_v16 = vadd.f32 %v4909_v28, %v4418_v12  ;;  %v3478_v41 = vadd.f32 1.0, %v7102_v14  ;;  %7123 = vpow2.f32 %v5844_v24  ;;  %v5686_v24 = vmul.f32 -1.442695, %v10229_v55 }
 0x3fd   : > { %v7106_v26 = vpop.eup %7105  ;;  %7125 = vrcp.f32 %v3636_v11  ;;  %v3645_v60 = vadd.f32 1.0, %v7104_v58  ;;  %v5845_v12 = vmul.f32 -1.442695, %v10233_v36  ;;  %v5854_v14 = vmul.f32 -1.442695, %v10241_v13  ;;  %v10259_v11 = vpop.f32.mrb[175].mxu0 }
 0x3fe   : > { %v7108_v61 = vpop.eup %7107  ;;  %7127 = vrcp.f32 %v3478_v41  ;;  %v3487_v28 = vadd.f32 1.0, %v7106_v26  ;;  %11640 = vst [vmem:[#allocation19_spill] sm:$0xff] %v10259_v11  ;;  %v5696_v58 = vmul.f32 -1.442695, %v10245_v54  ;;  %v5855_v41 = vmul.f32 -1.442695, %v10249_v56 }
 0x3ff   : > { %v7110_v42 = vpop.eup %7109  ;;  %7129 = vrcp.f32 %v3645_v60  ;;  %v3646_v30 = vadd.f32 1.0, %v7108_v61  ;;  %v5697_v61 = vmul.f32 -1.442695, %v10254_v57 }
 0x400   : > { %v7112_v39 = vpop.eup %7111  ;;  %7131 = vrcp.f32 %v3487_v28  ;;  %v3488_v40 = vadd.f32 1.0, %v7110_v42  ;;  %v11642_v28 = vld [vmem:[#allocation31_spill] sm:$0xff] }
 0x401   : > { %v7114_v9 = vpop.eup %7113  ;;  %v4585_v43 = vmul.f32 %v7112_v39, %v10114_v19  ;;  %7133 = vrcp.f32 %v3646_v30  ;;  %v10270_v42 = vadd.f32 %v11642_v28, %v9188_v27  ;;  %v11643_v30 = vld [vmem:[#allocation14_spill] sm:$0xff]  ;;  %v10282_v27 = vadd.f32 %v9741_v23, %v9218_v50  ;;  %v10294_v50 = vpop.f32.mrb[136].mxu1 }
 0x402   : > { %v7116_v26 = vpop.eup %7115  ;;  %v4427_v60 = vmul.f32 %v7114_v9, %v10118_v51  ;;  %7135 = vrcp.f32 %v3488_v40  ;;  %v10276_v39 = vadd.f32 %v11643_v30, %v9733_v4  ;;  %11645 = vst [vmem:[#allocation51_spill] sm:$0xff] %v10294_v50 }
 0x403   : > { %v7118_v11 = vpop.eup %7117  ;;  %v4816_v35 = vadd.f32 %v10206_v52, %v4585_v43  ;;  %v4586_v19 = vmul.f32 %v7116_v26, %v10122_v0  ;;  %7137 = vpow2.f32 %v5686_v24  ;;  %v11644_v24 = vld [vmem:[#allocation56_spill] sm:$0xff] }
 0x404   : > { %v7120_v18 = vpop.eup %7119  ;;  %v4874_v51 = vadd.f32 %v10213_v45, %v4427_v60  ;;  %v4428_v40 = vmul.f32 %v7118_v11, %v10126_v47  ;;  %7139 = vpow2.f32 %v5845_v12  ;;  %v10288_v43 = vadd.f32 %v11644_v24, %v9771_v44  ;;  %v10292_v12 = vpop.f32.mrb[176].mxu0 }
 0x405   : > { %v7122_v9 = vpop.eup %7121  ;;  %v4853_v52 = vadd.f32 %v10221_v3, %v4586_v19  ;;  %v4595_v0 = vmul.f32 %v7120_v18, %v10130_v33  ;;  %7141 = vpow2.f32 %v5687_v49  ;;  %v5864_v47 = vmul.f32 -1.442695, %v10270_v42  ;;  %v11646_v33 = vld [vmem:[#allocation24_spill] sm:$0xff]  ;;  %v10300_v60 = vpop.f32.mrb[177].mxu0 }
 0x406   : > { %v7124_v26 = vpop.eup %7123  ;;  %v4911_v28 = vadd.f32 %v4910_v16, %v4428_v40  ;;  %v4437_v45 = vmul.f32 %v7122_v9, %v10134_v1  ;;  %7143 = vpow2.f32 %v5854_v14  ;;  %v10298_v18 = vadd.f32 %v11646_v33, %v9733_v4  ;;  %v983_v49 = vld [vmem:[#allocation8 + $0x8] sm:$0x3]  ;;  %11647 = vst [vmem:[#allocation50_spill] sm:$0xff] %v10300_v60  ;;  %v10302_v16 = vpop.f32.mrb[137].mxu1 }
 0x407   : > { %v7126_v23 = vpop.eup %7125  ;;  %v4817_v3 = vadd.f32 %v4816_v35, %v4595_v0  ;;  %v3655_v11 = vadd.f32 1.0, %v7124_v26  ;;  %7145 = vpow2.f32 %v5696_v58  ;;  %11648 = vst [vmem:[#allocation53_spill] sm:$0xff] %v10302_v16  ;;  %v5706_v30 = vmul.f32 -1.442695, %v10276_v39  ;;  %v10306_v40 = vpop.f32.mrb[178].mxu0 }
 0x408   : > { %v7128_v1 = vpop.eup %7127  ;;  %v4875_v14 = vadd.f32 %v4874_v51, %v4437_v45  ;;  %v4596_v19 = vmul.f32 %v7126_v23, %v10138_v6  ;;  %7147 = vpow2.f32 %v5855_v41  ;;  %11649 = vst [vmem:[#allocation52_spill] sm:$0xff] %v10306_v40  ;;  %v10308_v35 = vpop.f32.mrb[138].mxu1  ;;  %v5865_v0 = vmul.f32 -1.442695, %v10282_v27  ;;  %v11652_v41 = vld [vmem:[#allocation22_spill] sm:$0xff] }
 0x409   : > { %11650 = vst [vmem:[#allocation55_spill] sm:$0xff] %v10308_v35  ;;  %v7130_v58 = vpop.eup %7129  ;;  %v4438_v9 = vmul.f32 %v7128_v1, %v10145_v25  ;;  %7149 = vrcp.f32 %v3655_v11  ;;  %v5707_v24 = vmul.f32 -1.442695, %v10288_v43  ;;  %v10313_v26 = vpop.f32.mrb[179].mxu0  ;;  %v10317_v23 = vrot.slane %v983_v49, %v11652_v41 }
 0x40a   : > { %11651 = vst [vmem:[#allocation54_spill] sm:$0xff] %v10313_v26  ;;  %v7132_v51 = vpop.eup %7131  ;;  %v4854_v45 = vadd.f32 %v4853_v52, %v4596_v19  ;;  %v4605_v6 = vmul.f32 %v7130_v58, %v10172_v38  ;;  %7151 = vpow2.f32 %v5697_v61  ;;  %v10319_v33 = vpop.f32.mrb[139].mxu1  ;;  %v5716_v11 = vmul.f32 -1.442695, %v10298_v18 }
 0x40b   : > { %11653 = vst [vmem:[#allocation31_spill] sm:$0xff] %v10319_v33  ;;  %v7134_v35 = vpop.eup %7133  ;;  %v4912_v40 = vadd.f32 %v4911_v28, %v4438_v9  ;;  %v4447_v25 = vmul.f32 %v7132_v51, %v10178_v20  ;;  %7153 = vpow2.f32 %v5864_v47  ;;  %v11654_v20 = vld [vmem:[#allocation57_spill] sm:$0xff] }
 0x40c   : > { %v7136_v1 = vpop.eup %7135  ;;  %v4818_v16 = vadd.f32 %v4817_v3, %v4605_v6  ;;  %v4606_v26 = vmul.f32 %v7134_v35, %v10187_v34  ;;  %7155 = vpow2.f32 %v5706_v30  ;;  %v10331_v47 = vadd.f32 %v11654_v20, %v10317_v23  ;;  %v10335_v30 = vpop.f32.mrb[140].mxu1 }
 0x40d   : > { %v7138_v52 = vpop.eup %7137  ;;  %v10324_v38 = vadd.f32 %v4875_v14, %v4447_v25  ;;  %v4448_v61 = vmul.f32 %v7136_v1, %v10191_v10  ;;  %7157 = vpow2.f32 %v5865_v0  ;;  %11655 = vst [vmem:[#allocation14_spill] sm:$0xff] %v10335_v30  ;;  %v10337_v35 = vpop.f32.mrb[141].mxu1 }
 0x40e   : > { %v7140_v19 = vpop.eup %7139  ;;  %v10327_v58 = vadd.f32 %v4854_v45, %v4606_v26  ;;  %v3497_v28 = vadd.f32 1.0, %v7138_v52  ;;  %7159 = vpow2.f32 %v5707_v24  ;;  %11656 = vst [vmem:[#allocation56_spill] sm:$0xff] %v10337_v35  ;;  %v11657_v24 = vld [vmem:[#allocation23_spill] sm:$0xff] }
 0x40f   : > { %v7142_v9 = vpop.eup %7141  ;;  %v10333_v3 = vadd.f32 %v4912_v40, %v4448_v61  ;;  %v3656_v34 = vadd.f32 1.0, %v7140_v19  ;;  %7161 = vpow2.f32 %v5716_v11  ;;  %v10340_v51 = vrot.slane %v983_v49, %v11657_v24  ;;  %v10344_v61 = vpop.f32.mrb[142].mxu1  ;;  %v11659_v49 = vld [vmem:[#allocation26_spill] sm:$0xff] }
 0x410   : > { %v7144_v14 = vpop.eup %7143  ;;  %7163 = vrcp.f32 %v3497_v28  ;;  %v3498_v10 = vadd.f32 1.0, %v7142_v9  ;;  %v5558_v40 = vmul.f32 -1.442695, %v10331_v47  ;;  %11658 = vst [vmem:[#allocation24_spill] sm:$0xff] %v10344_v61  ;;  %v10348_v20 = vadd.f32 %v11659_v49, %v9771_v44  ;;  %v11660_v9 = vld [vmem:[#allocation60_spill] sm:$0xff] }
 0x411   : > { %v7146_v0 = vpop.eup %7145  ;;  %7165 = vrcp.f32 %v3656_v34  ;;  %v3665_v26 = vadd.f32 1.0, %v7144_v14  ;;  %v10352_v34 = vadd.f32 %v11660_v9, %v10340_v51 }
 0x412   : > { %v7148_v45 = vpop.eup %7147  ;;  %7167 = vrcp.f32 %v3498_v10  ;;  %v3507_v6 = vadd.f32 1.0, %v7146_v0 }
 0x413   : > { %v7150_v25 = vpop.eup %7149  ;;  %7169 = vrcp.f32 %v3665_v26  ;;  %v3666_v11 = vadd.f32 1.0, %v7148_v45  ;;  %v5559_v41 = vmul.f32 -1.442695, %v10352_v34 }
 0x414   : > { %v7152_v1 = vpop.eup %7151  ;;  %v4615_v52 = vmul.f32 %v7150_v25, %v10217_v63  ;;  %7171 = vrcp.f32 %v3507_v6  ;;  %v11661_v63 = vld [vmem:[#allocation25_spill] sm:$0xff]  ;;  %v11662_v25 = vld [vmem:[#allocation28_spill] sm:$0xff] }
 0x415   : > { %v7154_v19 = vpop.eup %7153  ;;  %7173 = vrcp.f32 %v3666_v11  ;;  %v3508_v28 = vadd.f32 1.0, %v7152_v1  ;;  %v10356_v26 = vadd.f32 %v11661_v63, %v9733_v4  ;;  %v10360_v11 = vadd.f32 %v11662_v25, %v10317_v23  ;;  %v11663_v1 = vld [vmem:[#allocation30_spill] sm:$0xff] }
 0x416   : > { %v7156_v14 = vpop.eup %7155  ;;  %v4819_v10 = vadd.f32 %v4818_v16, %v4615_v52  ;;  %v3675_v0 = vadd.f32 1.0, %v7154_v19  ;;  %7175 = vpow2.f32 %v5558_v40  ;;  %v10364_v49 = vadd.f32 %v11663_v1, %v9771_v44  ;;  %v11664_v40 = vld [vmem:[#allocation65_spill] sm:$0xff] }
 0x417   : > { %v7158_v45 = vpop.eup %7157  ;;  %7177 = vrcp.f32 %v3508_v28  ;;  %v3517_v6 = vadd.f32 1.0, %v7156_v14  ;;  %v10368_v52 = vadd.f32 %v11664_v40, %v10340_v51  ;;  %v5717_v28 = vmul.f32 -1.442695, %v10348_v20  ;;  %v11665_v14 = vld [vmem:[#allocation61_spill] sm:$0xff] }
 0x418   : > { %v7160_v9 = vpop.eup %7159  ;;  %7179 = vrcp.f32 %v3675_v0  ;;  %v3676_v16 = vadd.f32 1.0, %v7158_v45  ;;  %v10373_v25 = vadd.f32 %v11665_v14, %v9733_v4  ;;  %v5726_v0 = vmul.f32 -1.442695, %v10356_v26  ;;  %v10377_v45 = vpop.f32.mrb[143].mxu1 }
 0x419   : > { %v7162_v19 = vpop.eup %7161  ;;  %7181 = vrcp.f32 %v3517_v6  ;;  %v3518_v63 = vadd.f32 1.0, %v7160_v9  ;;  %11666 = vst [vmem:[#allocation57_spill] sm:$0xff] %v10377_v45  ;;  %v5568_v6 = vmul.f32 -1.442695, %v10360_v11  ;;  %v5727_v9 = vmul.f32 -1.442695, %v10364_v49 }
 0x41a   : > { %v7164_v24 = vpop.eup %7163  ;;  %7183 = vrcp.f32 %v3676_v16  ;;  %v3527_v1 = vadd.f32 1.0, %v7162_v19  ;;  %v5569_v16 = vmul.f32 -1.442695, %v10368_v52  ;;  %v11667_v19 = vld [vmem:[#allocation13_spill] sm:$0xff] }
 0x41b   : > { %v7166_v40 = vpop.eup %7165  ;;  %v4457_v61 = vmul.f32 %v7164_v24, %v10229_v55  ;;  %7185 = vrcp.f32 %v3518_v63  ;;  %v10386_v30 = vadd.f32 %v11667_v19, %v10317_v23  ;;  %v5736_v24 = vmul.f32 -1.442695, %v10373_v25 }
 0x41c   : > { %v7168_v35 = vpop.eup %7167  ;;  %v4616_v14 = vmul.f32 %v7166_v40, %v10233_v36  ;;  %7187 = vrcp.f32 %v3527_v1  ;;  %v11668_v1 = vld [vmem:[#allocation62_spill] sm:$0xff] }
 0x41d   : > { %v7170_v33 = vpop.eup %7169  ;;  %v4877_v45 = vadd.f32 %v10324_v38, %v4457_v61  ;;  %v4458_v55 = vmul.f32 %v7168_v35, %v10237_v37  ;;  %7189 = vpow2.f32 %v5717_v28  ;;  %v10395_v40 = vadd.f32 %v11668_v1, %v9771_v44  ;;  %v11669_v37 = vld [vmem:[#allocation66_spill] sm:$0xff]  ;;  %v10403_v61 = vpop.f32.mrb[144].mxu1 }
 0x41e   : > { %v7172_v63 = vpop.eup %7171  ;;  %v4856_v60 = vadd.f32 %v10327_v58, %v4616_v14  ;;  %v4625_v36 = vmul.f32 %v7170_v33, %v10241_v13  ;;  %7191 = vpow2.f32 %v5559_v41  ;;  %v10401_v35 = vadd.f32 %v11669_v37, %v10340_v51  ;;  %v11670_v41 = vld [vmem:[#allocation27_spill] sm:$0xff]  ;;  %v10410_v14 = vpop.f32.mrb[145].mxu1 }
 0x41f   : > { %v7174_v19 = vpop.eup %7173  ;;  %v4914_v50 = vadd.f32 %v10333_v3, %v4458_v55  ;;  %v4467_v38 = vmul.f32 %v7172_v63, %v10245_v54  ;;  %7193 = vpow2.f32 %v5726_v0  ;;  %v10408_v33 = vadd.f32 %v11670_v41, %v9733_v4  ;;  %v10413_v63 = vpop.f32.mrb[146].mxu1 }
 0x420   : > { %v7176_v58 = vpop.eup %7175  ;;  %v4820_v28 = vadd.f32 %v4819_v10, %v4625_v36  ;;  %v4626_v13 = vmul.f32 %v7174_v19, %v10249_v56  ;;  %7195 = vpow2.f32 %v5568_v6  ;;  %v5578_v55 = vmul.f32 -1.442695, %v10386_v30  ;;  %11671 = vst [vmem:[#allocation26_spill] sm:$0xff] %v10413_v63  ;;  %v10417_v6 = vpop.f32.mrb[147].mxu1 }
 0x421   : > { %v7178_v3 = vpop.eup %7177  ;;  %v4878_v54 = vadd.f32 %v4877_v45, %v4467_v38  ;;  %v3369_v0 = vadd.f32 1.0, %v7176_v58  ;;  %7197 = vpow2.f32 %v5727_v9  ;;  %v5737_v56 = vmul.f32 -1.442695, %v10395_v40  ;;  %11672 = vst [vmem:[#allocation60_spill] sm:$0xff] %v10417_v6 }
 0x422   : > { %v7180_v1 = vpop.eup %7179  ;;  %v4857_v37 = vadd.f32 %v4856_v60, %v4626_v13  ;;  %v4468_v10 = vmul.f32 %v7178_v3, %v10254_v57  ;;  %7199 = vpow2.f32 %v5569_v16  ;;  %v5579_v45 = vmul.f32 -1.442695, %v10401_v35 }
 0x423   : > { %v7182_v36 = vpop.eup %7181  ;;  %v4635_v19 = vmul.f32 %v7180_v1, %v10270_v42  ;;  %7201 = vrcp.f32 %v3369_v0  ;;  %v5746_v60 = vmul.f32 -1.442695, %v10408_v33 }
 0x424   : > { %v7184_v9 = vpop.eup %7183  ;;  %v4915_v38 = vadd.f32 %v4914_v50, %v4468_v10  ;;  %v4477_v58 = vmul.f32 %v7182_v36, %v10276_v39  ;;  %7203 = vpow2.f32 %v5736_v24  ;;  %v10426_v39 = vpop.f32.mrb[148].mxu1 }
 0x425   : > { %v7186_v13 = vpop.eup %7185  ;;  %v4821_v57 = vadd.f32 %v4820_v28, %v4635_v19  ;;  %v4636_v16 = vmul.f32 %v7184_v9, %v10282_v27  ;;  %7205 = vpow2.f32 %v5578_v55  ;;  %11673 = vst [vmem:[#allocation25_spill] sm:$0xff] %v10426_v39  ;;  %v11674_v27 = vld [vmem:[#allocation67_spill] sm:$0xff]  ;;  %v11677_v9 = vld [vmem:[#allocation33_spill] sm:$0xff] }
 0x426   : > { %v7188_v41 = vpop.eup %7187  ;;  %v4879_v3 = vadd.f32 %v4878_v54, %v4477_v58  ;;  %v4478_v6 = vmul.f32 %v7186_v13, %v10288_v43  ;;  %7207 = vpow2.f32 %v5737_v56  ;;  %v10432_v55 = vadd.f32 %v11674_v27, %v10317_v23  ;;  %v10434_v54 = vpop.f32.mrb[149].mxu1 }
 0x427   : > { %v7190_v42 = vpop.eup %7189  ;;  %v4822_v0 = vrot.slane %v4821_v57, 4  ;;  %v4858_v1 = vadd.f32 %v4857_v37, %v4636_v16  ;;  %v4487_v50 = vmul.f32 %v7188_v41, %v10298_v18  ;;  %7209 = vpow2.f32 %v5579_v45  ;;  %11675 = vst [vmem:[#allocation28_spill] sm:$0xff] %v10434_v54  ;;  %v10438_v19 = vpop.f32.mrb[150].mxu1 }
 0x428   : > { %v7192_v24 = vpop.eup %7191  ;;  %v10428_v10 = vadd.f32 %v4915_v38, %v4478_v6  ;;  %v3528_v28 = vadd.f32 1.0, %v7190_v42  ;;  %7211 = vpow2.f32 %v5746_v60  ;;  %11676 = vst [vmem:[#allocation30_spill] sm:$0xff] %v10438_v19  ;;  %v10442_v38 = vadd.f32 %v11677_v9, %v9771_v44  ;;  %v10444_v58 = vpop.f32.mrb[151].mxu1  ;;  %v11687_v19 = vld [vmem:[#allocation15_spill] sm:$0xff] }
 0x429   : > { %v7194_v43 = vpop.eup %7193  ;;  %v4823_v56 = vadd.f32 %v4822_v0, %v4821_v57  ;;  %v4859_v36 = vrot.slane %v4858_v1, 4  ;;  %v10436_v37 = vadd.f32 %v4879_v3, %v4487_v50  ;;  %v3370_v18 = vadd.f32 1.0, %v7192_v24  ;;  %11678 = vst [vmem:[#allocation65_spill] sm:$0xff] %v10444_v58  ;;  %v11679_v0 = vld [vmem:[#allocation29_spill] sm:$0xff] }
 0x42a   : > { %v7196_v45 = vpop.eup %7195  ;;  %7213 = vrcp.f32 %v3528_v28  ;;  %v3537_v6 = vadd.f32 1.0, %v7194_v43  ;;  %v5588_v42 = vmul.f32 -1.442695, %v10432_v55  ;;  %v10449_v50 = vadd.f32 %v11679_v0, %v10340_v51 }
 0x42b   : > { %v7198_v60 = vpop.eup %7197  ;;  %v4824_v13 = vrot.slane %v4823_v56, 2  ;;  %v4860_v16 = vadd.f32 %v4859_v36, %v4858_v1  ;;  %7215 = vrcp.f32 %v3370_v18  ;;  %v3379_v57 = vadd.f32 1.0, %v7196_v45 }
 0x42c   : > { %v7200_v41 = vpop.eup %7199  ;;  %7217 = vrcp.f32 %v3537_v6  ;;  %v3538_v3 = vadd.f32 1.0, %v7198_v60  ;;  %v5747_v1 = vmul.f32 -1.442695, %v10442_v38  ;;  %v10454_v36 = vadd.f32 %v9947_v32, %v9733_v4 }
 0x42d   : > { %v7202_v24 = vpop.eup %7201  ;;  %v4825_v28 = vadd.f32 %v4824_v13, %v4823_v56  ;;  %v4861_v27 = vrot.slane %v4860_v16, 2  ;;  %7219 = vrcp.f32 %v3379_v57  ;;  %v3380_v43 = vadd.f32 1.0, %v7200_v41  ;;  %v10460_v13 = vpop.f32.mrb[152].mxu1 }
 0x42e   : > { %v7204_v9 = vpop.eup %7203  ;;  %7221 = vrcp.f32 %v3538_v3  ;;  %v10458_v18 = vadd.f32 %v9949_v8, %v10317_v23  ;;  %11680 = vst [vmem:[#allocation61_spill] sm:$0xff] %v10460_v13  ;;  %v10464_v3 = vadd.f32 %v9954_v62, %v9771_v44  ;;  %v10468_v32 = vadd.f32 %v9956_v31, %v10340_v51  ;;  %v10470_v8 = vpop.f32.mrb[153].mxu1  ;;  %v11684_v62 = vld [vmem:[#allocation35_spill] sm:$0xff] }
 0x42f   : > { %v7206_v45 = vpop.eup %7205  ;;  %v4826_v6 = vrot.slane %v4825_v28, 1  ;;  %v4862_v60 = vadd.f32 %v4861_v27, %v4860_v16  ;;  %7223 = vrcp.f32 %v3380_v43  ;;  %v3547_v56 = vadd.f32 1.0, %v7204_v9  ;;  %11681 = vst [vmem:[#allocation13_spill] sm:$0xff] %v10470_v8 }
 0x430   : > { %v7208_v57 = vpop.eup %7207  ;;  %v3389_v41 = vadd.f32 1.0, %v7206_v45  ;;  %7225 = vpow2.f32 %v5588_v42  ;;  %v11683_v42 = vld [vmem:[#allocation34_spill] sm:$0xff]  ;;  %v10480_v13 = vadd.f32 %v11684_v62, %v10317_v23  ;;  %v10498_v54 = vadd.f32 %v11687_v19, %v9771_v44 }
 0x431   : > { %v7210_v0 = vpop.eup %7209  ;;  %v10472_v58 = vadd.f32 %v4826_v6, %v4825_v28  ;;  %v4863_v16 = vrot.slane %v4862_v60, 1  ;;  %7227 = vrcp.f32 %v3547_v56  ;;  %v3548_v27 = vadd.f32 1.0, %v7208_v57  ;;  %v11690_v19 = vld [vmem:[#allocation38_spill] sm:$0xff] }
 0x432   : > { %v7212_v43 = vpop.eup %7211  ;;  %7229 = vrcp.f32 %v3389_v41  ;;  %v3390_v9 = vadd.f32 1.0, %v7210_v0  ;;  %v10476_v45 = vadd.f32 %v11683_v42, %v9733_v4  ;;  %v5589_v28 = vmul.f32 -1.442695, %v10449_v50 }
 0x433   : > { %11682 = vst [vmem:[#allocation62_spill] sm:$0xff] %v10472_v58  ;;  %v10482_v31 = vadd.f32 %v4863_v16, %v4862_v60  ;;  %7231 = vrcp.f32 %v3548_v27  ;;  %v3557_v8 = vadd.f32 1.0, %v7212_v43  ;;  %v5756_v56 = vmul.f32 -1.442695, %v10454_v36  ;;  %v10492_v16 = vpop.f32.mrb[154].mxu1 }
 0x434   : > { %v7214_v6 = vpop.eup %7213  ;;  %7233 = vrcp.f32 %v3390_v9  ;;  %v5598_v57 = vmul.f32 -1.442695, %v10458_v18  ;;  %v5757_v41 = vmul.f32 -1.442695, %v10464_v3  ;;  %v5599_v60 = vmul.f32 -1.442695, %v10468_v32 }
 0x435   : > { %11685 = vst [vmem:[#allocation66_spill] sm:$0xff] %v10482_v31  ;;  %v7216_v0 = vpop.eup %7215  ;;  %v4488_v62 = vmul.f32 %v7214_v6, %v10348_v20  ;;  %7235 = vrcp.f32 %v3557_v8  ;;  %11686 = vst [vmem:[#allocation27_spill] sm:$0xff] %v10492_v16  ;;  %v5766_v43 = vmul.f32 -1.442695, %v10476_v45  ;;  %v5608_v9 = vmul.f32 -1.442695, %v10480_v13 }
 0x436   : > { %v7218_v27 = vpop.eup %7217  ;;  %7237 = vpow2.f32 %v5747_v1  ;;  %v10500_v39 = vpop.f32.mrb[155].mxu1  ;;  %v11689_v6 = vld [vmem:[#allocation36_spill] sm:$0xff]  ;;  %v4329_v58 = vmul.f32 %v7202_v24, %v10331_v47  ;;  %v10512_v63 = vadd.f32 %v11690_v19, %v9733_v4  ;;  %v4330_v47 = vmul.f32 %v7216_v0, %v10352_v34 }
 0x437   : > { %11688 = vst [vmem:[#allocation67_spill] sm:$0xff] %v10500_v39  ;;  %v7220_v42 = vpop.eup %7219  ;;  %v4917_v20 = vadd.f32 %v10428_v10, %v4488_v62  ;;  %v4497_v8 = vmul.f32 %v7218_v27, %v10356_v26  ;;  %7239 = vpow2.f32 %v5589_v28  ;;  %v10506_v31 = vadd.f32 %v11689_v6, %v10340_v51  ;;  %v11691_v28 = vld [vmem:[#allocation18_spill] sm:$0xff] }
 0x438   : > { %v7222_v1 = vpop.eup %7221  ;;  %v4339_v16 = vmul.f32 %v7220_v42, %v10360_v11  ;;  %7241 = vpow2.f32 %v5756_v56  ;;  %v10518_v62 = vadd.f32 %v11691_v28, %v10317_v23 }
 0x439   : > { %v7224_v39 = vpop.eup %7223  ;;  %v4881_v10 = vadd.f32 %v10436_v37, %v4497_v8  ;;  %v4498_v26 = vmul.f32 %v7222_v1, %v10364_v49  ;;  %7243 = vpow2.f32 %v5598_v57  ;;  %v5767_v37 = vmul.f32 -1.442695, %v10498_v54  ;;  %v10523_v8 = vpop.f32.mrb[156].mxu1 }
 0x43a   : > { %v7226_v27 = vpop.eup %7225  ;;  %v4939_v24 = vadd.f32 %v4339_v16, %v4329_v58  ;;  %v4340_v11 = vmul.f32 %v7224_v39, %v10368_v52  ;;  %7245 = vpow2.f32 %v5757_v41  ;;  %v5609_v19 = vmul.f32 -1.442695, %v10506_v31  ;;  %v10527_v34 = vpop.f32.mrb[157].mxu1 }
 0x43b   : > { %v7228_v56 = vpop.eup %7227  ;;  %v4918_v42 = vadd.f32 %v4917_v20, %v4498_v26  ;;  %v3399_v6 = vadd.f32 1.0, %v7226_v27  ;;  %7247 = vpow2.f32 %v5599_v60  ;;  %v5776_v39 = vmul.f32 -1.442695, %v10512_v63  ;;  %v10531_v41 = vpop.f32.mrb[158].mxu1 }
 0x43c   : > { %v7230_v49 = vpop.eup %7229  ;;  %v4976_v57 = vadd.f32 %v4340_v11, %v4330_v47  ;;  %v4507_v1 = vmul.f32 %v7228_v56, %v10373_v25  ;;  %7249 = vpow2.f32 %v5766_v43  ;;  %v5618_v25 = vmul.f32 -1.442695, %v10518_v62  ;;  %v10535_v43 = vpop.f32.mrb[159].mxu1 }
 0x43d   : > { %v7232_v58 = vpop.eup %7231  ;;  %v4349_v52 = vmul.f32 %v7230_v49, %v10386_v30  ;;  %7251 = vrcp.f32 %v3399_v6  ;;  %v10549_v49 = vpop.f32.mrb[160].mxu1 }
 0x43e   : > { %v7234_v0 = vpop.eup %7233  ;;  %v4882_v60 = vadd.f32 %v4881_v10, %v4507_v1  ;;  %v4508_v16 = vmul.f32 %v7232_v58, %v10395_v40  ;;  %7253 = vpow2.f32 %v5608_v9  ;;  %11693 = vst [vmem:[#allocation33_spill] sm:$0xff] %v10549_v49  ;;  %v10551_v1 = vpop.f32.mrb[161].mxu1 }
 0x43f   : > { %v7236_v20 = vpop.eup %7235  ;;  %v4940_v26 = vadd.f32 %v4939_v24, %v4349_v52  ;;  %v4350_v28 = vmul.f32 %v7234_v0, %v10401_v35  ;;  %7255 = vpow2.f32 %v5767_v37  ;;  %v11692_v24 = vld [vmem:[#allocation37_spill] sm:$0xff]  ;;  %11694 = vst [vmem:[#allocation29_spill] sm:$0xff] %v10551_v1  ;;  %v10553_v52 = vpop.f32.mrb[162].mxu1 }
 0x440   : > { %v7238_v30 = vpop.eup %7237  ;;  %v10538_v27 = vadd.f32 %v4918_v42, %v4508_v16  ;;  %v4517_v47 = vmul.f32 %v7236_v20, %v10408_v33  ;;  %7257 = vpow2.f32 %v5609_v19  ;;  %v10547_v35 = vadd.f32 %v11692_v24, %v9771_v44  ;;  %11695 = vst [vmem:[#allocation34_spill] sm:$0xff] %v10553_v52  ;;  %v10556_v16 = vpop.f32.mrb[163].mxu1 }
 0x441   : > { %v7240_v11 = vpop.eup %7239  ;;  %v10541_v10 = vadd.f32 %v4976_v57, %v4350_v28  ;;  %v3558_v40 = vadd.f32 1.0, %v7238_v30  ;;  %7259 = vpow2.f32 %v5776_v39  ;;  %11696 = vst [vmem:[#allocation35_spill] sm:$0xff] %v10556_v16 }
 0x442   : > { %v7242_v9 = vpop.eup %7241  ;;  %v10543_v56 = vadd.f32 %v4882_v60, %v4517_v47  ;;  %v3400_v6 = vadd.f32 1.0, %v7240_v11  ;;  %7261 = vpow2.f32 %v5618_v25  ;;  %v5777_v60 = vmul.f32 -1.442695, %v10547_v35  ;;  %v11697_v47 = vld [vmem:[#allocation40_spill] sm:$0xff] }
 0x443   : > { %v7244_v37 = vpop.eup %7243  ;;  %7263 = vrcp.f32 %v3558_v40  ;;  %v3567_v42 = vadd.f32 1.0, %v7242_v9  ;;  %v10561_v11 = vadd.f32 %v11697_v47, %v10340_v51  ;;  %v11698_v40 = vld [vmem:[#allocation63_spill] sm:$0xff]  ;;  %v10585_v47 = vadd.f32 %v10078_v2, %v10317_v23 }
 0x444   : > { %v7246_v33 = vpop.eup %7245  ;;  %7265 = vrcp.f32 %v3400_v6  ;;  %v3409_v57 = vadd.f32 1.0, %v7244_v37  ;;  %v10565_v9 = vadd.f32 %v11698_v40, %v9733_v4  ;;  %v11699_v37 = vld [vmem:[#allocation64_spill] sm:$0xff]  ;;  %v10587_v40 = vpop.f32.mrb[164].mxu1 }
 0x445   : > { %v7248_v19 = vpop.eup %7247  ;;  %7267 = vrcp.f32 %v3567_v42  ;;  %v3568_v58 = vadd.f32 1.0, %v7246_v33  ;;  %v10569_v42 = vadd.f32 %v11699_v37, %v10317_v23  ;;  %v11700_v33 = vld [vmem:[#allocation39_spill] sm:$0xff]  ;;  %11702 = vst [vmem:[#allocation15_spill] sm:$0xff] %v10587_v40 }
 0x446   : > { %v7250_v39 = vpop.eup %7249  ;;  %7269 = vrcp.f32 %v3409_v57  ;;  %v3410_v0 = vadd.f32 1.0, %v7248_v19  ;;  %v10573_v57 = vadd.f32 %v11700_v33, %v9771_v44  ;;  %v5786_v33 = vmul.f32 -1.442695, %v10565_v9 }
 0x447   : > { %v7252_v25 = vpop.eup %7251  ;;  %7271 = vrcp.f32 %v3568_v58  ;;  %v3577_v20 = vadd.f32 1.0, %v7250_v39  ;;  %v11701_v39 = vld [vmem:[#allocation17_spill] sm:$0xff]  ;;  %v5628_v2 = vmul.f32 -1.442695, %v10569_v42 }
 0x448   : > { %v7254_v28 = vpop.eup %7253  ;;  %v4359_v30 = vmul.f32 %v7252_v25, %v10432_v55  ;;  %7273 = vrcp.f32 %v3410_v0  ;;  %v10577_v0 = vadd.f32 %v11701_v39, %v10340_v51 }
 0x449   : > { %v7256_v6 = vpop.eup %7255  ;;  %7275 = vrcp.f32 %v3577_v20  ;;  %v3419_v24 = vadd.f32 1.0, %v7254_v28  ;;  %v10581_v28 = vadd.f32 %v10076_v46, %v9733_v4 }
 0x44a   : > { %v7258_v55 = vpop.eup %7257  ;;  %v4941_v19 = vadd.f32 %v4940_v26, %v4359_v30  ;;  %v3578_v58 = vadd.f32 1.0, %v7256_v6  ;;  %7277 = vpow2.f32 %v5777_v60  ;;  %v5619_v30 = vmul.f32 -1.442695, %v10561_v11 }
 0x44b   : > { %v7260_v25 = vpop.eup %7259  ;;  %7279 = vrcp.f32 %v3419_v24  ;;  %v3420_v20 = vadd.f32 1.0, %v7258_v55  ;;  %v10592_v6 = vadd.f32 %v10082_v5, %v9771_v44  ;;  %v10594_v24 = vpop.f32.mrb[165].mxu1  ;;  %v5629_v5 = vmul.f32 -1.442695, %v10577_v0 }
 0x44c   : > { %v7262_v26 = vpop.eup %7261  ;;  %7281 = vrcp.f32 %v3578_v58  ;;  %v3587_v60 = vadd.f32 1.0, %v7260_v25  ;;  %11703 = vst [vmem:[#allocation36_spill] sm:$0xff] %v10594_v24  ;;  %v10598_v55 = vpop.f32.mrb[166].mxu1  ;;  %v5787_v25 = vmul.f32 -1.442695, %v10573_v57 }
 0x44d   : > { %v7264_v37 = vpop.eup %7263  ;;  %7283 = vrcp.f32 %v3420_v20  ;;  %v3429_v46 = vadd.f32 1.0, %v7262_v26  ;;  %11704 = vst [vmem:[#allocation38_spill] sm:$0xff] %v10598_v55  ;;  %v5796_v20 = vmul.f32 -1.442695, %v10581_v28  ;;  %v5638_v26 = vmul.f32 -1.442695, %v10585_v47 }
 0x44e   : > { %v7266_v39 = vpop.eup %7265  ;;  %v4518_v58 = vmul.f32 %v7264_v37, %v10442_v38  ;;  %7285 = vrcp.f32 %v3587_v60  ;;  %v10606_v16 = vpop.f32.mrb[167].mxu1  ;;  %v5797_v60 = vmul.f32 -1.442695, %v10592_v6 }
 0x44f   : > { %v7268_v40 = vpop.eup %7267  ;;  %v4360_v24 = vmul.f32 %v7266_v39, %v10449_v50  ;;  %7287 = vrcp.f32 %v3429_v46  ;;  %11705 = vst [vmem:[#allocation18_spill] sm:$0xff] %v10606_v16  ;;  %v11706_v46 = vld [vmem:[#allocation41_spill] sm:$0xff] }
 0x450   : > { %v7270_v52 = vpop.eup %7269  ;;  %v4920_v55 = vadd.f32 %v10538_v27, %v4518_v58  ;;  %v4527_v38 = vmul.f32 %v7268_v40, %v10454_v36  ;;  %7289 = vpow2.f32 %v5619_v30  ;;  %v10615_v39 = vadd.f32 %v11706_v46, %v10340_v51  ;;  %v11707_v36 = vld [vmem:[#allocation43_spill] sm:$0xff] }
 0x451   : > { %v7272_v37 = vpop.eup %7271  ;;  %v4978_v1 = vadd.f32 %v10541_v10, %v4360_v24  ;;  %v4369_v50 = vmul.f32 %v7270_v52, %v10458_v18  ;;  %7291 = vpow2.f32 %v5786_v33  ;;  %v10621_v40 = vadd.f32 %v11707_v36, %v9733_v4  ;;  %v11708_v18 = vld [vmem:[#allocation42_spill] sm:$0xff] }
 0x452   : > { %v7274_v49 = vpop.eup %7273  ;;  %v4884_v16 = vadd.f32 %v10543_v56, %v4527_v38  ;;  %v4528_v27 = vmul.f32 %v7272_v37, %v10464_v3  ;;  %7293 = vpow2.f32 %v5628_v2  ;;  %v10626_v52 = vadd.f32 %v11708_v18, %v10317_v23  ;;  %v11709_v3 = vld [vmem:[#allocation45_spill] sm:$0xff]  ;;  %v10633_v38 = vpop.f32.mrb[168].mxu1 }
 0x453   : > { %v7276_v30 = vpop.eup %7275  ;;  %v4942_v58 = vadd.f32 %v4941_v19, %v4369_v50  ;;  %v4370_v10 = vmul.f32 %v7274_v49, %v10468_v32  ;;  %7295 = vpow2.f32 %v5787_v25  ;;  %v10631_v2 = vadd.f32 %v11709_v3, %v9771_v44  ;;  %11710 = vst [vmem:[#allocation37_spill] sm:$0xff] %v10633_v38  ;;  %v10636_v49 = vpop.f32.mrb[169].mxu1 }
 0x454   : > { %v7278_v24 = vpop.eup %7277  ;;  %v4921_v33 = vadd.f32 %v4920_v55, %v4528_v27  ;;  %v4537_v56 = vmul.f32 %v7276_v30, %v10476_v45  ;;  %7297 = vpow2.f32 %v5629_v5  ;;  %v5639_v32 = vmul.f32 -1.442695, %v10615_v39  ;;  %11711 = vst [vmem:[#allocation40_spill] sm:$0xff] %v10636_v49  ;;  %v10640_v5 = vpop.f32.mrb[170].mxu1 }
 0x455   : > { %v7280_v37 = vpop.eup %7279  ;;  %v4979_v19 = vadd.f32 %v4978_v1, %v4370_v10  ;;  %v3588_v50 = vadd.f32 1.0, %v7278_v24  ;;  %7299 = vpow2.f32 %v5796_v20  ;;  %v5806_v45 = vmul.f32 -1.442695, %v10621_v40  ;;  %11712 = vst [vmem:[#allocation63_spill] sm:$0xff] %v10640_v5  ;;  %v10644_v20 = vpop.f32.mrb[171].mxu1 }
 0x456   : > { %v7282_v25 = vpop.eup %7281  ;;  %v4885_v46 = vadd.f32 %v4884_v16, %v4537_v56  ;;  %v4379_v55 = vmul.f32 %v7280_v37, %v10480_v13  ;;  %7301 = vpow2.f32 %v5638_v26  ;;  %v5648_v1 = vmul.f32 -1.442695, %v10626_v52  ;;  %11713 = vst [vmem:[#allocation64_spill] sm:$0xff] %v10644_v20 }
 0x457   : > { %v7284_v27 = vpop.eup %7283  ;;  %v4538_v36 = vmul.f32 %v7282_v25, %v10498_v54  ;;  %7303 = vrcp.f32 %v3588_v50  ;;  %v5807_v13 = vmul.f32 -1.442695, %v10631_v2 }
 0x458   : > { %v7286_v30 = vpop.eup %7285  ;;  %v4943_v10 = vadd.f32 %v4942_v58, %v4379_v55  ;;  %v4380_v18 = vmul.f32 %v7284_v27, %v10506_v31  ;;  %7305 = vpow2.f32 %v5797_v60 }
 0x459   : > { %v7288_v16 = vpop.eup %7287  ;;  %v4922_v26 = vadd.f32 %v4921_v33, %v4538_v36  ;;  %v4547_v24 = vmul.f32 %v7286_v30, %v10512_v63  ;;  %7307 = vpow2.f32 %v5639_v32  ;;  %v11714_v33 = vld [vmem:[#allocation20_spill] sm:$0xff] }
 0x45a   : > { %v7290_v56 = vpop.eup %7289  ;;  %v10649_v3 = vadd.f32 %v4979_v19, %v4380_v18  ;;  %v4389_v54 = vmul.f32 %v7288_v16, %v10518_v62  ;;  %7309 = vpow2.f32 %v5806_v45  ;;  %v10658_v63 = vadd.f32 %v11714_v33, %v10340_v51  ;;  %v11715_v16 = vld [vmem:[#allocation44_spill] sm:$0xff]  ;;  %v11718_v33 = vld [vmem:[#allocation49_spill] sm:$0xff] }
 0x45b   : > { %v7292_v37 = vpop.eup %7291  ;;  %v10652_v50 = vadd.f32 %v4885_v46, %v4547_v24  ;;  %v3430_v58 = vadd.f32 1.0, %v7290_v56  ;;  %7311 = vpow2.f32 %v5648_v1  ;;  %v10664_v24 = vadd.f32 %v11715_v16, %v9733_v4  ;;  %v11716_v56 = vld [vmem:[#allocation47_spill] sm:$0xff] }
 0x45c   : > { %v7294_v31 = vpop.eup %7293  ;;  %v10654_v60 = vadd.f32 %v4943_v10, %v4389_v54  ;;  %v3597_v25 = vadd.f32 1.0, %v7292_v37  ;;  %7313 = vpow2.f32 %v5807_v13  ;;  %v5649_v1 = vmul.f32 -1.442695, %v10658_v63 }
 0x45d   : > { %v7296_v32 = vpop.eup %7295  ;;  %7315 = vrcp.f32 %v3430_v58  ;;  %v3439_v19 = vadd.f32 1.0, %v7294_v31  ;;  %v10668_v54 = vadd.f32 %v11716_v56, %v10317_v23  ;;  %v11717_v31 = vld [vmem:[#allocation46_spill] sm:$0xff] }
 0x45e   : > { %v7298_v55 = vpop.eup %7297  ;;  %7317 = vrcp.f32 %v3597_v25  ;;  %v3598_v62 = vadd.f32 1.0, %v7296_v32  ;;  %v10672_v25 = vadd.f32 %v11717_v31, %v9771_v44  ;;  %v10676_v32 = vadd.f32 %v11718_v33, %v10340_v51 }
 0x45f   : > { %v7300_v45 = vpop.eup %7299  ;;  %7319 = vrcp.f32 %v3439_v19  ;;  %v3440_v46 = vadd.f32 1.0, %v7298_v55 }
 0x460   : > { %v7302_v27 = vpop.eup %7301  ;;  %7321 = vrcp.f32 %v3598_v62  ;;  %v3607_v36 = vadd.f32 1.0, %v7300_v45  ;;  %v10680_v62 = vadd.f32 %v10164_v21, %v9733_v4  ;;  %v10693_v21 = vadd.f32 %v10182_v53, %v10340_v51 }
 0x461   : > { %v7304_v30 = vpop.eup %7303  ;;  %7323 = vrcp.f32 %v3440_v46  ;;  %v3449_v10 = vadd.f32 1.0, %v7302_v27  ;;  %v10684_v27 = vadd.f32 %v10166_v48, %v10317_v23  ;;  %v5817_v48 = vmul.f32 -1.442695, %v10672_v25 }
 0x462   : > { %v7306_v18 = vpop.eup %7305  ;;  %v4548_v13 = vmul.f32 %v7304_v30, %v10547_v35  ;;  %7325 = vrcp.f32 %v3607_v36  ;;  %v10688_v36 = vadd.f32 %v10180_v17, %v9771_v44  ;;  %v5659_v56 = vmul.f32 -1.442695, %v10676_v32 }
 0x463   : > { %v7308_v37 = vpop.eup %7307  ;;  %7327 = vrcp.f32 %v3449_v10  ;;  %v3608_v58 = vadd.f32 1.0, %v7306_v18  ;;  %v5668_v53 = vmul.f32 -1.442695, %v10684_v27 }
 0x464   : > { %v7310_v35 = vpop.eup %7309  ;;  %v4923_v19 = vadd.f32 %v4922_v26, %v4548_v13  ;;  %v3450_v55 = vadd.f32 1.0, %v7308_v37  ;;  %7329 = vpow2.f32 %v5649_v1  ;;  %v5816_v1 = vmul.f32 -1.442695, %v10664_v24 }
 0x465   : > { %v7312_v45 = vpop.eup %7311  ;;  %7331 = vrcp.f32 %v3608_v58  ;;  %v3617_v46 = vadd.f32 1.0, %v7310_v35  ;;  %v5658_v13 = vmul.f32 -1.442695, %v10668_v54  ;;  %v5826_v37 = vmul.f32 -1.442695, %v10680_v62 }
 0x466   : > { %v7314_v30 = vpop.eup %7313  ;;  %7333 = vrcp.f32 %v3450_v55  ;;  %v3459_v26 = vadd.f32 1.0, %v7312_v45  ;;  %v5827_v33 = vmul.f32 -1.442695, %v10688_v36 }
 0x467   : > { %v7316_v10 = vpop.eup %7315  ;;  %7335 = vrcp.f32 %v3617_v46  ;;  %v3618_v18 = vadd.f32 1.0, %v7314_v30 }
 0x468   : > { %v7318_v16 = vpop.eup %7317  ;;  %v4390_v17 = vmul.f32 %v7316_v10, %v10561_v11  ;;  %7337 = vrcp.f32 %v3459_v26  ;;  %v5669_v11 = vmul.f32 -1.442695, %v10693_v21 }
 0x469   : > { %v7320_v58 = vpop.eup %7319  ;;  %v4557_v31 = vmul.f32 %v7318_v16, %v10565_v9  ;;  %7339 = vrcp.f32 %v3618_v18  ;;  %v10710_v9 = vadd.f32 %v10202_v15, %v9733_v4 }
 0x46a   : > { %v7322_v35 = vpop.eup %7321  ;;  %v4981_v55 = vadd.f32 %v10649_v3, %v4390_v17  ;;  %v4399_v45 = vmul.f32 %v7320_v58, %v10569_v42  ;;  %7341 = vpow2.f32 %v5816_v1  ;;  %v10716_v42 = vadd.f32 %v10204_v7, %v10317_v23 }
 0x46b   : > { %v7324_v46 = vpop.eup %7323  ;;  %v4887_v30 = vadd.f32 %v10652_v50, %v4557_v31  ;;  %v4558_v26 = vmul.f32 %v7322_v35, %v10573_v57  ;;  %7343 = vpow2.f32 %v5658_v13  ;;  %v10721_v57 = vadd.f32 %v10209_v59, %v9771_v44 }
 0x46c   : > { %v7326_v10 = vpop.eup %7325  ;;  %v4945_v18 = vadd.f32 %v10654_v60, %v4399_v45  ;;  %v4400_v3 = vmul.f32 %v7324_v46, %v10577_v0  ;;  %7345 = vpow2.f32 %v5817_v48  ;;  %v10726_v0 = vadd.f32 %v10211_v29, %v10340_v51 }
 0x46d   : > { %v7328_v1 = vpop.eup %7327  ;;  %v4924_v16 = vadd.f32 %v4923_v19, %v4558_v26  ;;  %v4567_v50 = vmul.f32 %v7326_v10, %v10581_v28  ;;  %7347 = vpow2.f32 %v5659_v56  ;;  %v5836_v28 = vmul.f32 -1.442695, %v10710_v9 }
 0x46e   : > { %v7330_v15 = vpop.eup %7329  ;;  %v4982_v13 = vadd.f32 %v4981_v55, %v4400_v3  ;;  %v4409_v60 = vmul.f32 %v7328_v1, %v10585_v47  ;;  %7349 = vpow2.f32 %v5826_v37  ;;  %v5678_v58 = vmul.f32 -1.442695, %v10716_v42 }
 0x46f   : > { %v7332_v7 = vpop.eup %7331  ;;  %v4888_v48 = vadd.f32 %v4887_v30, %v4567_v50  ;;  %v3460_v17 = vadd.f32 1.0, %v7330_v15  ;;  %7351 = vpow2.f32 %v5668_v53  ;;  %v5837_v29 = vmul.f32 -1.442695, %v10721_v57 }
 0x470   : > { %v7334_v19 = vpop.eup %7333  ;;  %v4946_v56 = vadd.f32 %v4945_v18, %v4409_v60  ;;  %v4568_v59 = vmul.f32 %v7332_v7, %v10592_v6  ;;  %7353 = vpow2.f32 %v5827_v33  ;;  %v5679_v53 = vmul.f32 -1.442695, %v10726_v0 }
 0x471   : > { %v7336_v31 = vpop.eup %7335  ;;  %v4410_v47 = vmul.f32 %v7334_v19, %v10615_v39  ;;  %7355 = vrcp.f32 %v3460_v17  ;;  %v11719_v17 = vld [vmem:[#allocation58_spill] sm:$0xff] }
 0x472   : > { %v7338_v37 = vpop.eup %7337  ;;  %v4925_v35 = vadd.f32 %v4924_v16, %v4568_v59  ;;  %v4577_v55 = vmul.f32 %v7336_v31, %v10621_v40  ;;  %7357 = vpow2.f32 %v5669_v11 }
 0x473   : > { %v7340_v45 = vpop.eup %7339  ;;  %v4983_v46 = vadd.f32 %v4982_v13, %v4410_v47  ;;  %v4419_v6 = vmul.f32 %v7338_v37, %v10626_v52  ;;  %7359 = vpow2.f32 %v5836_v28  ;;  %v10745_v52 = vadd.f32 %v10219_v22, %v9733_v4 }
 0x474   : > { %v7342_v33 = vpop.eup %7341  ;;  %v10736_v30 = vadd.f32 %v4888_v48, %v4577_v55  ;;  %v4578_v39 = vmul.f32 %v7340_v45, %v10631_v2  ;;  %7361 = vpow2.f32 %v5678_v58  ;;  %v10750_v28 = vadd.f32 %v11719_v17, %v10317_v23  ;;  %v11721_v58 = vld [vmem:[#allocation48_spill] sm:$0xff] }
 0x475   : > { %v7344_v26 = vpop.eup %7343  ;;  %v10739_v10 = vadd.f32 %v4946_v56, %v4419_v6  ;;  %v3627_v18 = vadd.f32 1.0, %v7342_v33  ;;  %7363 = vpow2.f32 %v5837_v29  ;;  %v5846_v48 = vmul.f32 -1.442695, %v10745_v52  ;;  %v11720_v56 = vld [vmem:[#allocation19_spill] sm:$0xff] }
 0x476   : > { %v7346_v40 = vpop.eup %7345  ;;  %v10741_v11 = vadd.f32 %v4925_v35, %v4578_v39  ;;  %v3469_v3 = vadd.f32 1.0, %v7344_v26  ;;  %7365 = vpow2.f32 %v5679_v53  ;;  %v10754_v59 = vadd.f32 %v11720_v56, %v9771_v44  ;;  %v11722_v35 = vld [vmem:[#allocation51_spill] sm:$0xff] }
 0x477   : > { %v7348_v1 = vpop.eup %7347  ;;  %7367 = vrcp.f32 %v3627_v18  ;;  %v3628_v16 = vadd.f32 1.0, %v7346_v40  ;;  %v10758_v31 = vadd.f32 %v11721_v58, %v10340_v51  ;;  %v10763_v37 = vadd.f32 %v10292_v12, %v9733_v4  ;;  %v11727_v18 = vld [vmem:[#allocation50_spill] sm:$0xff] }
 0x478   : > { %v7350_v50 = vpop.eup %7349  ;;  %7369 = vrcp.f32 %v3469_v3  ;;  %v3470_v2 = vadd.f32 1.0, %v7348_v1  ;;  %v10767_v55 = vadd.f32 %v11722_v35, %v10317_v23  ;;  %v11723_v6 = vlaneseq }
 0x479   : > { %v7352_v15 = vpop.eup %7351  ;;  %7371 = vrcp.f32 %v3628_v16  ;;  %v3637_v13 = vadd.f32 1.0, %v7350_v50  ;;  %v11724_v33 = vmov 0  ;;  %v10776_v12 = vadd.f32 %v11727_v18, %v9771_v44  ;;  %v11728_v16 = vld [vmem:[#allocation53_spill] sm:$0xff] }
 0x47a   : > { %v7354_v60 = vpop.eup %7353  ;;  %7373 = vrcp.f32 %v3470_v2  ;;  %v3479_v7 = vadd.f32 1.0, %v7352_v15  ;;  %vm10770_vm1 = vcmp.lt.s32.totalorder %v11723_v6, 256  ;;  %v7727_v40 = vmov 0.0   ;;  %v11729_v2 = vld [vmem:[#allocation52_spill] sm:$0xff] }
 0x47b   : > { %v7356_v22 = vpop.eup %7355  ;;  %7375 = vrcp.f32 %v3637_v13  ;;  %v3638_v19 = vadd.f32 1.0, %v7354_v60  ;;  %v11725_v33 = vsel %vm10770_vm1, 4294967295, %v11724_v33  ;;  %316 = vst.msk [vmem:[#allocation2 + $0x8] sm:$0x3] %vm10770_vm1, %v7727_v40  ;;  %v10782_v50 = vadd.f32 %v11728_v16, %v10340_v51 }
 0x47c   : > { %v7358_v47 = vpop.eup %7357  ;;  %v4420_v29 = vmul.f32 %v7356_v22, %v10658_v63  ;;  %7377 = vrcp.f32 %v3479_v7  ;;  %11726 = vst [vmem:[#allocation39_spill] sm:$0xff] %v11725_v33  ;;  %v5688_v60 = vmul.f32 -1.442695, %v10750_v28  ;;  %v5847_v7 = vmul.f32 -1.442695, %v10754_v59  ;;  %v11752_v33 = vld [vmem:[#allocation62_spill] sm:$0xff] }
 0x47d   : > { %v7360_v53 = vpop.eup %7359  ;;  %7379 = vrcp.f32 %v3638_v19  ;;  %v3480_v45 = vadd.f32 1.0, %v7358_v47  ;;  %v5689_v22 = vmul.f32 -1.442695, %v10758_v31  ;;  %v5856_v19 = vmul.f32 -1.442695, %v10763_v37 }
 0x47e   : > { %v7362_v39 = vpop.eup %7361  ;;  %v4984_v26 = vadd.f32 %v4983_v46, %v4420_v29  ;;  %v3647_v63 = vadd.f32 1.0, %v7360_v53  ;;  %7381 = vpow2.f32 %v5846_v48  ;;  %v10786_v46 = vadd.f32 %v11729_v2, %v9733_v4 }
 0x47f   : > { %v7364_v3 = vpop.eup %7363  ;;  %7383 = vrcp.f32 %v3480_v45  ;;  %v3489_v1 = vadd.f32 1.0, %v7362_v39  ;;  %v5698_v4 = vmul.f32 -1.442695, %v10767_v55  ;;  %v5857_v47 = vmul.f32 -1.442695, %v10776_v12 }
 0x480   : > { %v7366_v15 = vpop.eup %7365  ;;  %7385 = vrcp.f32 %v3647_v63  ;;  %v3648_v13 = vadd.f32 1.0, %v7364_v3  ;;  %v5699_v53 = vmul.f32 -1.442695, %v10782_v50  ;;  %v5866_v45 = vmul.f32 -1.442695, %v10786_v46 }
 0x481   : > { %v7368_v48 = vpop.eup %7367  ;;  %7387 = vrcp.f32 %v3489_v1  ;;  %v3490_v17 = vadd.f32 1.0, %v7366_v15  ;;  %v11731_v1 = vld [vmem:[#allocation54_spill] sm:$0xff]  ;;  %v11732_v15 = vld [vmem:[#allocation31_spill] sm:$0xff] }
 0x482   : > { %v7370_v56 = vpop.eup %7369  ;;  %v4587_v58 = vmul.f32 %v7368_v48, %v10664_v24  ;;  %7389 = vrcp.f32 %v3648_v13  ;;  %v11730_v24 = vld [vmem:[#allocation55_spill] sm:$0xff]  ;;  %v10808_v16 = vadd.f32 %v11731_v1, %v9771_v44  ;;  %v10814_v13 = vadd.f32 %v11732_v15, %v10340_v51  ;;  %v11736_v1 = vld [vmem:[#allocation57_spill] sm:$0xff] }
 0x483   : > { %v7372_v29 = vpop.eup %7371  ;;  %v4429_v35 = vmul.f32 %v7370_v56, %v10668_v54  ;;  %7391 = vrcp.f32 %v3490_v17  ;;  %v10802_v18 = vadd.f32 %v11730_v24, %v10317_v23 }
 0x484   : > { %v7374_v6 = vpop.eup %7373  ;;  %v4890_v39 = vadd.f32 %v10736_v30, %v4587_v58  ;;  %v4588_v63 = vmul.f32 %v7372_v29, %v10672_v25  ;;  %7393 = vpow2.f32 %v5688_v60 }
 0x485   : > { %v7376_v40 = vpop.eup %7375  ;;  %v4948_v3 = vadd.f32 %v10739_v10, %v4429_v35  ;;  %v4430_v54 = vmul.f32 %v7374_v6, %v10676_v32  ;;  %7395 = vpow2.f32 %v5847_v7  ;;  %v11733_v32 = vld [vmem:[#allocation14_spill] sm:$0xff]  ;;  %v5709_v35 = vmul.f32 -1.442695, %v10814_v13 }
 0x486   : > { %v7378_v2 = vpop.eup %7377  ;;  %v4927_v30 = vadd.f32 %v10741_v11, %v4588_v63  ;;  %v4597_v25 = vmul.f32 %v7376_v40, %v10680_v62  ;;  %7397 = vpow2.f32 %v5689_v22  ;;  %v10819_v7 = vadd.f32 %v11733_v32, %v10317_v23 }
 0x487   : > { %v7380_v60 = vpop.eup %7379  ;;  %v4985_v48 = vadd.f32 %v4984_v26, %v4430_v54  ;;  %v4439_v10 = vmul.f32 %v7378_v2, %v10684_v27  ;;  %7399 = vpow2.f32 %v5856_v19  ;;  %v5708_v62 = vmul.f32 -1.442695, %v10802_v18 }
 0x488   : > { %v7382_v44 = vpop.eup %7381  ;;  %v4891_v17 = vadd.f32 %v4890_v39, %v4597_v25  ;;  %v4598_v11 = vmul.f32 %v7380_v60, %v10688_v36  ;;  %7401 = vpow2.f32 %v5698_v4  ;;  %v5867_v26 = vmul.f32 -1.442695, %v10808_v16  ;;  %v11734_v4 = vld [vmem:[#allocation56_spill] sm:$0xff] }
 0x489   : > { %v7384_v22 = vpop.eup %7383  ;;  %v4949_v56 = vadd.f32 %v4948_v3, %v4439_v10  ;;  %v3657_v58 = vadd.f32 1.0, %v7382_v44  ;;  %7403 = vpow2.f32 %v5857_v47  ;;  %v5718_v36 = vmul.f32 -1.442695, %v10819_v7 }
 0x48a   : > { %v7386_v29 = vpop.eup %7385  ;;  %v4928_v27 = vadd.f32 %v4927_v30, %v4598_v11  ;;  %v4440_v19 = vmul.f32 %v7384_v22, %v10693_v21  ;;  %7405 = vpow2.f32 %v5699_v53  ;;  %v10830_v63 = vadd.f32 %v11734_v4, %v10340_v51  ;;  %v11735_v21 = vld [vmem:[#allocation24_spill] sm:$0xff]  ;;  %v11738_v11 = vld [vmem:[#allocation59_spill] sm:$0xff] }
 0x48b   : > { %v7388_v6 = vpop.eup %7387  ;;  %v4607_v39 = vmul.f32 %v7386_v29, %v10710_v9  ;;  %7407 = vrcp.f32 %v3657_v58  ;;  %v10835_v53 = vadd.f32 %v11735_v21, %v10317_v23  ;;  %v10840_v2 = vadd.f32 %v11736_v1, %v10340_v51  ;;  %v11740_v22 = vld [vmem:[#allocation16_spill] sm:$0xff] }
 0x48c   : > { %v7390_v47 = vpop.eup %7389  ;;  %v4986_v24 = vadd.f32 %v4985_v48, %v4440_v19  ;;  %v4449_v40 = vmul.f32 %v7388_v6, %v10716_v42  ;;  %7409 = vpow2.f32 %v5866_v45  ;;  %v10847_v42 = vadd.f32 %v10403_v61, %v10317_v23 }
 0x48d   : > { %v7392_v3 = vpop.eup %7391  ;;  %v4892_v54 = vadd.f32 %v4891_v17, %v4607_v39  ;;  %v4608_v9 = vmul.f32 %v7390_v47, %v10721_v57  ;;  %7411 = vpow2.f32 %v5708_v62  ;;  %v10853_v57 = vadd.f32 %v10410_v14, %v10340_v51  ;;  %v11739_v62 = vld [vmem:[#allocation32_spill] sm:$0xff] }
 0x48e   : > { %v7394_v30 = vpop.eup %7393  ;;  %v10842_v25 = vadd.f32 %v4949_v56, %v4449_v40  ;;  %v4450_v15 = vmul.f32 %v7392_v3, %v10726_v0  ;;  %7413 = vpow2.f32 %v5867_v26  ;;  %v11737_v0 = vld [vmem:[#allocation26_spill] sm:$0xff]  ;;  %v11741_v56 = vcombine.low %v11739_v62, %v11740_v22  ;;  %v11742_v14 = vld [vmem:[#allocation60_spill] sm:$0xff] }
 0x48f   : > { %v7396_v45 = vpop.eup %7395  ;;  %v10849_v60 = vadd.f32 %v4928_v27, %v4608_v9  ;;  %v3499_v48 = vadd.f32 1.0, %v7394_v30  ;;  %7415 = vpow2.f32 %v5709_v35  ;;  %v10859_v17 = vadd.f32 %v11737_v0, %v10317_v23 }
 0x490   : > { %v7398_v10 = vpop.eup %7397  ;;  %v10855_v32 = vadd.f32 %v4986_v24, %v4450_v15  ;;  %v3658_v44 = vadd.f32 1.0, %v7396_v45  ;;  %7417 = vpow2.f32 %v5718_v36  ;;  %v10865_v58 = vrot.slane %v11741_v56, %v11738_v11  ;;  %v11743_v15 = vld [vmem:[#allocation25_spill] sm:$0xff] }
 0x491   : > { %v7400_v61 = vpop.eup %7399  ;;  %7419 = vrcp.f32 %v3499_v48  ;;  %v3500_v26 = vadd.f32 1.0, %v7398_v10  ;;  %v10869_v29 = vadd.f32 %v11742_v14, %v10340_v51  ;;  %v5719_v35 = vmul.f32 -1.442695, %v10830_v63 }
 0x492   : > { %v7402_v27 = vpop.eup %7401  ;;  %7421 = vrcp.f32 %v3658_v44  ;;  %v3667_v19 = vadd.f32 1.0, %v7400_v61  ;;  %v5728_v6 = vmul.f32 -1.442695, %v10835_v53  ;;  %v5729_v4 = vmul.f32 -1.442695, %v10840_v2  ;;  %v11744_v44 = vld [vmem:[#allocation28_spill] sm:$0xff] }
 0x493   : > { %v7404_v39 = vpop.eup %7403  ;;  %7423 = vrcp.f32 %v3500_v26  ;;  %v3509_v36 = vadd.f32 1.0, %v7402_v27  ;;  %v10875_v47 = vmul.f32 -1.442695, %v10847_v42  ;;  %v10878_v21 = vmul.f32 -1.442695, %v10853_v57  ;;  %v11745_v61 = vld [vmem:[#allocation30_spill] sm:$0xff] }
 0x494   : > { %v7406_v24 = vpop.eup %7405  ;;  %7425 = vrcp.f32 %v3667_v19  ;;  %v3668_v40 = vadd.f32 1.0, %v7404_v39  ;;  %v10881_v3 = vmul.f32 -1.442695, %v10859_v17  ;;  %v10884_v30 = vmul.f32 -1.442695, %v10869_v29  ;;  %v11746_v26 = vld [vmem:[#allocation65_spill] sm:$0xff] }
 0x495   : > { %v7408_v9 = vpop.eup %7407  ;;  %7427 = vrcp.f32 %v3509_v36  ;;  %v3510_v1 = vadd.f32 1.0, %v7406_v24  ;;  %v10888_v45 = vadd.f32 %v11743_v15, %v10317_v23  ;;  %v10893_v0 = vadd.f32 %v11744_v44, %v10340_v51  ;;  %v11747_v27 = vld [vmem:[#allocation61_spill] sm:$0xff] }
 0x496   : > { %v7410_v48 = vpop.eup %7409  ;;  %v4617_v10 = vmul.f32 %v7408_v9, %v10745_v52  ;;  %7429 = vrcp.f32 %v3668_v40  ;;  %v10897_v62 = vadd.f32 %v11745_v61, %v10317_v23  ;;  %v10901_v14 = vadd.f32 %v11746_v26, %v10340_v51  ;;  %v11748_v24 = vld [vmem:[#allocation13_spill] sm:$0xff] }
 0x497   : > { %v7412_v22 = vpop.eup %7411  ;;  %7431 = vrcp.f32 %v3510_v1  ;;  %v3677_v56 = vadd.f32 1.0, %v7410_v48  ;;  %v10905_v19 = vadd.f32 %v11747_v27, %v10317_v23  ;;  %v10909_v40 = vadd.f32 %v11748_v24, %v10340_v51  ;;  %v11750_v48 = vld [vmem:[#allocation27_spill] sm:$0xff] }
 0x498   : > { %v7414_v52 = vpop.eup %7413  ;;  %v4893_v39 = vadd.f32 %v4892_v54, %v4617_v10  ;;  %v3519_v36 = vadd.f32 1.0, %v7412_v22  ;;  %7433 = vpow2.f32 %v5719_v35  ;;  %v5758_v15 = vmul.f32 -1.442695, %v10888_v45  ;;  %v11751_v35 = vld [vmem:[#allocation67_spill] sm:$0xff] }
 0x499   : > { %11749 = vst [vmem:[#allocation17_spill] sm:$0xff] %v10909_v40  ;;  %v7416_v9 = vpop.eup %7415  ;;  %7435 = vrcp.f32 %v3677_v56  ;;  %v3678_v1 = vadd.f32 1.0, %v7414_v52  ;;  %v10914_v44 = vadd.f32 %v11750_v48, %v10317_v23  ;;  %v5759_v54 = vmul.f32 -1.442695, %v10893_v0 }
 0x49a   : > { %v7418_v61 = vpop.eup %7417  ;;  %7437 = vrcp.f32 %v3519_v36  ;;  %v3520_v26 = vadd.f32 1.0, %v7416_v9  ;;  %v10919_v10 = vadd.f32 %v11751_v35, %v10340_v51  ;;  %v5768_v56 = vmul.f32 -1.442695, %v10897_v62 }
 0x49b   : > { %v7420_v22 = vpop.eup %7419  ;;  %7439 = vrcp.f32 %v3678_v1  ;;  %v3529_v27 = vadd.f32 1.0, %v7418_v61  ;;  %v10923_v52 = vmul.f32 -1.442695, %v10901_v14  ;;  %v10927_v36 = vmul.f32 -1.442695, %v10905_v19  ;;  %v11753_v1 = vld [vmem:[#allocation66_spill] sm:$0xff] }
 0x49c   : > { %v7422_v24 = vpop.eup %7421  ;;  %v4459_v48 = vmul.f32 %v7420_v22, %v10750_v28  ;;  %7441 = vrcp.f32 %v3520_v26  ;;  %v10930_v9 = vmul.f32 -1.442695, %v10909_v40  ;;  %v11754_v61 = vcombine.low %v11752_v33, %v11753_v1 }
 0x49d   : > { %v7424_v35 = vpop.eup %7423  ;;  %v4618_v5 = vmul.f32 %v7422_v24, %v10754_v59  ;;  %7443 = vrcp.f32 %v3529_v27  ;;  %v10940_v49 = vmul.f32 -1.442695, %v10914_v44  ;;  %v10945_v40 = vmul.f32 -1.442695, %v10919_v10 }
 0x49e   : > { %v10936_v20 = vrot.slane %v11754_v61, %v11738_v11  ;;  %v7426_v28 = vpop.eup %7425  ;;  %v4951_v26 = vadd.f32 %v10842_v25, %v4459_v48  ;;  %v4460_v22 = vmul.f32 %v7424_v35, %v10758_v31  ;;  %7445 = vpow2.f32 %v5728_v6 }
 0x49f   : > { %v7428_v38 = vpop.eup %7427  ;;  %v4930_v33 = vadd.f32 %v10849_v60, %v4618_v5  ;;  %v4627_v1 = vmul.f32 %v7426_v28, %v10763_v37  ;;  %7447 = vpow2.f32 %v5729_v4  ;;  %v10951_v59 = vadd.f32 %v10523_v8, %v10317_v23 }
 0x4a0   : > { %v7430_v27 = vpop.eup %7429  ;;  %v4988_v24 = vadd.f32 %v10855_v32, %v4460_v22  ;;  %v4469_v25 = vmul.f32 %v7428_v38, %v10767_v55  ;;  %7449 = vpow2.f32 %v10875_v47  ;;  %v10958_v31 = vadd.f32 %v10527_v34, %v10340_v51 }
 0x4a1   : > { %v7432_v6 = vpop.eup %7431  ;;  %v4894_v5 = vadd.f32 %v4893_v39, %v4627_v1  ;;  %v4628_v37 = vmul.f32 %v7430_v27, %v10776_v12  ;;  %7451 = vpow2.f32 %v10878_v21  ;;  %v10964_v8 = vadd.f32 %v10531_v41, %v10317_v23 }
 0x4a2   : > { %v7434_v60 = vpop.eup %7433  ;;  %v4952_v32 = vadd.f32 %v4951_v26, %v4469_v25  ;;  %v4470_v38 = vmul.f32 %v7432_v6, %v10782_v50  ;;  %7453 = vpow2.f32 %v10881_v3  ;;  %v10970_v34 = vadd.f32 %v10535_v43, %v10340_v51 }
 0x4a3   : > { %v7436_v55 = vpop.eup %7435  ;;  %v4931_v4 = vadd.f32 %v4930_v33, %v4628_v37  ;;  %v3530_v47 = vadd.f32 1.0, %v7434_v60  ;;  %7455 = vpow2.f32 %v10884_v30  ;;  %v10974_v12 = vmul.f32 -1.442695, %v10951_v59  ;;  %v11755_v30 = vld [vmem:[#allocation33_spill] sm:$0xff] }
 0x4a4   : > { %v7438_v41 = vpop.eup %7437  ;;  %v4989_v21 = vadd.f32 %v4988_v24, %v4470_v38  ;;  %v4637_v39 = vmul.f32 %v7436_v55, %v10786_v46  ;;  %7457 = vpow2.f32 %v5758_v15  ;;  %v10978_v50 = vmul.f32 -1.442695, %v10958_v31  ;;  %v11756_v33 = vld [vmem:[#allocation29_spill] sm:$0xff] }
 0x4a5   : > { %v7440_v3 = vpop.eup %7439  ;;  %v4479_v43 = vmul.f32 %v7438_v41, %v10802_v18  ;;  %7459 = vrcp.f32 %v3530_v47  ;;  %v10982_v48 = vmul.f32 -1.442695, %v10964_v8  ;;  %v10986_v35 = vadd.f32 %v11755_v30, %v10317_v23  ;;  %v11758_v47 = vld [vmem:[#allocation35_spill] sm:$0xff] }
 0x4a6   : > { %v7442_v61 = vpop.eup %7441  ;;  %v4895_v28 = vadd.f32 %v4894_v5, %v4637_v39  ;;  %v4638_v26 = vmul.f32 %v7440_v3, %v10808_v16  ;;  %7461 = vpow2.f32 %v5759_v54  ;;  %v10990_v46 = vmul.f32 -1.442695, %v10970_v34 }
 0x4a7   : > { %v7444_v15 = vpop.eup %7443  ;;  %v4953_v22 = vadd.f32 %v4952_v32, %v4479_v43  ;;  %v4480_v18 = vmul.f32 %v7442_v61, %v10814_v13  ;;  %7463 = vpow2.f32 %v5768_v56  ;;  %v10995_v1 = vadd.f32 %v11756_v33, %v10340_v51  ;;  %v11759_v61 = vld [vmem:[#allocation15_spill] sm:$0xff] }
 0x4a8   : > { %v7446_v27 = vpop.eup %7445  ;;  %v4896_v24 = vrot.slane %v4895_v28, 4  ;;  %v4932_v25 = vadd.f32 %v4931_v4, %v4638_v26  ;;  %v4489_v6 = vmul.f32 %v7444_v15, %v10819_v7  ;;  %7465 = vpow2.f32 %v10923_v52  ;;  %v11757_v7 = vld [vmem:[#allocation34_spill] sm:$0xff]  ;;  %v11760_v26 = vld [vmem:[#allocation36_spill] sm:$0xff] }
 0x4a9   : > { %v7448_v16 = vpop.eup %7447  ;;  %v4990_v54 = vadd.f32 %v4989_v21, %v4480_v18  ;;  %v3539_v5 = vadd.f32 1.0, %v7446_v27  ;;  %7467 = vpow2.f32 %v10927_v36  ;;  %v11001_v37 = vmul.f32 -1.442695, %v10986_v35 }
 0x4aa   : > { %v7450_v13 = vpop.eup %7449  ;;  %v4897_v56 = vadd.f32 %v4896_v24, %v4895_v28  ;;  %v4933_v60 = vrot.slane %v4932_v25, 4  ;;  %v11003_v32 = vadd.f32 %v4953_v22, %v4489_v6  ;;  %v3540_v38 = vadd.f32 1.0, %v7448_v16 }
 0x4ab   : > { %v7452_v55 = vpop.eup %7451  ;;  %7469 = vrcp.f32 %v3539_v5  ;;  %v3549_v4 = vadd.f32 1.0, %v7450_v13  ;;  %v11007_v52 = vadd.f32 %v11757_v7, %v10317_v23  ;;  %v11011_v41 = vadd.f32 %v11758_v47, %v10340_v51 }
 0x4ac   : > { %v7454_v36 = vpop.eup %7453  ;;  %v4898_v21 = vrot.slane %v4897_v56, 2  ;;  %v4934_v39 = vadd.f32 %v4933_v60, %v4932_v25  ;;  %7471 = vrcp.f32 %v3540_v38  ;;  %v3550_v3 = vadd.f32 1.0, %v7452_v55 }
 0x4ad   : > { %v7456_v43 = vpop.eup %7455  ;;  %7473 = vrcp.f32 %v3549_v4  ;;  %v3559_v30 = vadd.f32 1.0, %v7454_v36  ;;  %v11015_v28 = vadd.f32 %v11759_v61, %v10317_v23  ;;  %v11019_v15 = vadd.f32 %v11760_v26, %v10340_v51 }
 0x4ae   : > { %v7458_v22 = vpop.eup %7457  ;;  %v4899_v18 = vadd.f32 %v4898_v21, %v4897_v56  ;;  %v4935_v33 = vrot.slane %v4934_v39, 2  ;;  %7475 = vrcp.f32 %v3550_v3  ;;  %v3560_v27 = vadd.f32 1.0, %v7456_v43 }
 0x4af   : > { %v7460_v24 = vpop.eup %7459  ;;  %7477 = vrcp.f32 %v3559_v30  ;;  %v3569_v25 = vadd.f32 1.0, %v7458_v22  ;;  %v11023_v3 = vmul.f32 -1.442695, %v10995_v1  ;;  %v11044_v22 = vmul.f32 -1.442695, %v11015_v28 }
 0x4b0   : > { %v7462_v6 = vpop.eup %7461  ;;  %v4900_v16 = vrot.slane %v4899_v18, 1  ;;  %v4936_v5 = vadd.f32 %v4935_v33, %v4934_v39  ;;  %v4490_v13 = vmul.f32 %v7460_v24, %v10830_v63  ;;  %7479 = vrcp.f32 %v3560_v27 }
 0x4b1   : > { %v7464_v60 = vpop.eup %7463  ;;  %7481 = vrcp.f32 %v3569_v25  ;;  %v3570_v38 = vadd.f32 1.0, %v7462_v6  ;;  %v11026_v39 = vmul.f32 -1.442695, %v11007_v52  ;;  %v11048_v24 = vmul.f32 -1.442695, %v11019_v15 }
 0x4b2   : > { %v7466_v56 = vpop.eup %7465  ;;  %v4901_v55 = vadd.f32 %v4900_v16, %v4899_v18  ;;  %v4937_v4 = vrot.slane %v4936_v5, 1  ;;  %v4991_v7 = vadd.f32 %v4990_v54, %v4490_v13  ;;  %v3579_v47 = vadd.f32 1.0, %v7464_v60 }
 0x4b3   : > { %v7468_v36 = vpop.eup %7467  ;;  %7483 = vrcp.f32 %v3570_v38  ;;  %v3580_v21 = vadd.f32 1.0, %v7466_v56  ;;  %v11035_v54 = vmul.f32 -1.442695, %v11011_v41 }
 0x4b4   : > { %v4938_v43 = vadd.f32 %v4937_v4, %v4936_v5  ;;  %7485 = vrcp.f32 %v3579_v47  ;;  %v3589_v30 = vadd.f32 1.0, %v7468_v36 }
 0x4b5   : > { %v7470_v26 = vpop.eup %7469  ;;  %7487 = vrcp.f32 %v3580_v21 }
 0x4b6   : > { %v7472_v18 = vpop.eup %7471  ;;  %v5026_v33 = vcombine.low %v4901_v55, %v4938_v43  ;;  %v4499_v27 = vmul.f32 %v7470_v26, %v10835_v53  ;;  %7489 = vrcp.f32 %v3589_v30 }
 0x4b7   : > { %v7474_v25 = vpop.eup %7473  ;;  %v4500_v6 = vmul.f32 %v7472_v18, %v10840_v2  ;;  %7491 = vpow2.f32 %v10930_v9 }
 0x4b8   : > { %v7476_v16 = vpop.eup %7475  ;;  %v5054_v5 = vrot.slane %v5026_v33, %v11738_v11  ;;  %v4955_v53 = vadd.f32 %v11003_v32, %v4499_v27  ;;  %v4509_v13 = vmul.f32 %v7474_v25, %v10847_v42  ;;  %7493 = vpow2.f32 %v10940_v49 }
 0x4b9   : > { %v7478_v9 = vpop.eup %7477  ;;  %v4992_v60 = vadd.f32 %v4991_v7, %v4500_v6  ;;  %v4510_v38 = vmul.f32 %v7476_v16, %v10853_v57  ;;  %7495 = vpow2.f32 %v10945_v40  ;;  %v11776_v16 = vld [vmem:[#allocation23_spill] sm:$0xff] }
 0x4ba   : > { %v7480_v56 = vpop.eup %7479  ;;  %v5056_v32 = vcombine.low %v10936_v20, %v5054_v5  ;;  %v4956_v55 = vadd.f32 %v4955_v53, %v4509_v13  ;;  %v4519_v42 = vmul.f32 %v7478_v9, %v10859_v17  ;;  %7497 = vpow2.f32 %v10974_v12  ;;  %v11777_v53 = vld [vmem:[#allocation21_spill] sm:$0xff] }
 0x4bb   : > { %v7482_v49 = vpop.eup %7481  ;;  %v4993_v4 = vadd.f32 %v4992_v60, %v4510_v38  ;;  %v4520_v47 = vmul.f32 %v7480_v56, %v10869_v29  ;;  %7499 = vpow2.f32 %v10978_v50  ;;  %v11778_v13 = vsub.s32 2, %v11777_v53 }
 0x4bc   : > { %v5070_v57 = vrot.slane %v5056_v32, %v11738_v11  ;;  %v4957_v17 = vadd.f32 %v4956_v55, %v4519_v42  ;;  %v4529_v40 = vmul.f32 %v7482_v49, %v10888_v45  ;;  %7501 = vpow2.f32 %v10982_v48 }
 0x4bd   : > { %v7484_v12 = vpop.eup %7483  ;;  %v4994_v50 = vadd.f32 %v4993_v4, %v4520_v47  ;;  %7503 = vpow2.f32 %v10990_v46  ;;  %v11779_v2 = vsub.s32 3, %v11777_v53  ;;  %v11782_v56 = vsub.s32 4, %v11777_v53 }
 0x4be   : > { %v7486_v7 = vpop.eup %7485  ;;  %v5071_v36 = vcombine.low %v10865_v58, %v5070_v57  ;;  %v4958_v21 = vadd.f32 %v4957_v17, %v4529_v40  ;;  %v4530_v45 = vmul.f32 %v7484_v12, %v10893_v0  ;;  %7505 = vpow2.f32 %v11001_v37 }
 0x4bf   : > { %v7488_v48 = vpop.eup %7487  ;;  %v4539_v43 = vmul.f32 %v7486_v7, %v10897_v62  ;;  %7507 = vpow2.f32 %v11023_v3  ;;  %v11783_v55 = vsub.s32 5, %v11777_v53  ;;  %v11784_v49 = vsub.s32 6, %v11777_v53 }
 0x4c0   : > { %v7490_v46 = vpop.eup %7489  ;;  %v4995_v30 = vadd.f32 %v4994_v50, %v4530_v45  ;;  %v4540_v58 = vmul.f32 %v7488_v48, %v10901_v14  ;;  %7509 = vpow2.f32 %v11026_v39  ;;  %v5102_v18 = vmul.f32 0.00390625, %v5071_v36 }
 0x4c1   : > { %v7492_v62 = vpop.eup %7491  ;;  %v4959_v37 = vadd.f32 %v4958_v21, %v4539_v43  ;;  %v4549_v3 = vmul.f32 %v7490_v46, %v10905_v19  ;;  %7511 = vpow2.f32 %v11035_v54  ;;  %v11785_v47 = vsub.s32 7, %v11777_v53 }
 0x4c2   : > { %v7494_v26 = vpop.eup %7493  ;;  %v11113_v33 = vadd.f32 %v4995_v30, %v4540_v58  ;;  %v3590_v14 = vadd.f32 1.0, %v7492_v62  ;;  %7513 = vpow2.f32 %v11044_v22  ;;  %v11775_v22 = vld [vmem:[#allocation22_spill] sm:$0xff]  ;;  %v5113_v5 = vrot.slane %v5102_v18, %v11776_v16 }
 0x4c3   : > { %v7496_v39 = vpop.eup %7495  ;;  %v11116_v27 = vadd.f32 %v4959_v37, %v4549_v3  ;;  %v3599_v25 = vadd.f32 1.0, %v7494_v26  ;;  %7515 = vpow2.f32 %v11048_v24  ;;  %v5109_v6 = vrot.slane %v5102_v18, %v11775_v22 }
 0x4c4   : > { %v7498_v54 = vpop.eup %7497  ;;  %v5117_v24 = vrot.slane %v5102_v18, %v11778_v13  ;;  %v5121_v9 = vrot.slane %v5102_v18, %v11779_v2  ;;  %v5125_v32 = vrot.slane %v5102_v18, %v11782_v56  ;;  %v5129_v42 = vrot.slane %v5102_v18, %v11783_v55  ;;  %v11794_v56 = vld [vmem:[#allocation37_spill] sm:$0xff] }
 0x4c5   : > { %v7500_v38 = vpop.eup %7499  ;;  %v5133_v4 = vrot.slane %v5102_v18, %v11784_v49  ;;  %v5137_v20 = vrot.slane %v5102_v18, %v11785_v47  ;;  %7517 = vrcp.f32 %v3590_v14  ;;  %v3600_v17 = vadd.f32 1.0, %v7496_v39  ;;  %v11795_v49 = vld [vmem:[#allocation40_spill] sm:$0xff] }
 0x4c6   : > { %v7502_v57 = vpop.eup %7501  ;;  %v3609_v40 = vadd.f32 1.0, %v7498_v54  ;;  %v3610_v29 = vadd.f32 1.0, %v7500_v38  ;;  %7519 = vrcp.f32 %v3599_v25  ;;  %v5870_v7 = vpack.c.bf16 %v5113_v5, %v5109_v6  ;;  %v11788_v25 = vld [vmem:[#allocation38_spill] sm:$0xff] }
 0x4c7   : > { %v7504_v12 = vpop.eup %7503  ;;  %v3619_v50 = vadd.f32 1.0, %v7502_v57  ;;  %v5871_v36 = vpack.c.bf16 %v5121_v9, %v5117_v24  ;;  %7521 = vrcp.f32 %v3600_v17  ;;  %v5872_v48 = vpack.c.bf16 %v5129_v42, %v5125_v32  ;;  %v11791_v24 = vld [vmem:[#allocation18_spill] sm:$0xff]  ;;  %v11796_v57 = vld [vmem:[#allocation63_spill] sm:$0xff] }
 0x4c8   : > { %v7506_v21 = vpop.eup %7505  ;;  %v3620_v45 = vadd.f32 1.0, %v7504_v12  ;;  %v5873_v43 = vpack.c.bf16 %v5137_v20, %v5133_v4  ;;  %7523 = vrcp.f32 %v3609_v40  ;;  %v5186_v0 = vrot.slane %v5870_v7, %v11738_v11  ;;  %v5273_v40 = vld [vmem:[%s11187_s9] sm:$0xff] }
 0x4c9   : > { %v7508_v30 = vpop.eup %7507  ;;  %v3629_v58 = vadd.f32 1.0, %v7506_v21  ;;  %v5193_v62 = vrot.slane %v5871_v36, %v11738_v11  ;;  %7525 = vrcp.f32 %v3610_v29  ;;  %v5200_v26 = vrot.slane %v5872_v48, %v11738_v11 }
 0x4ca   : > { %v7510_v37 = vpop.eup %7509  ;;  %v3630_v3 = vadd.f32 1.0, %v7508_v30  ;;  %v5207_v18 = vrot.slane %v5873_v43, %v11738_v11  ;;  %7527 = vrcp.f32 %v3619_v50  ;;  %v11167_v54 = vadd.f32 %v11788_v25, %v10317_v23  ;;  %v11797_v50 = vld [vmem:[#allocation64_spill] sm:$0xff] }
 0x4cb   : > { %v7512_v14 = vpop.eup %7511  ;;  %v3639_v39 = vadd.f32 1.0, %v7510_v37  ;;  %v5208_v6 = vcombine.low %v5186_v0, %v5193_v62  ;;  %7529 = vrcp.f32 %v3620_v45  ;;  %v11182_v2 = vadd.f32 %v11791_v24, %v10340_v51  ;;  %v11798_v45 = vld [vmem:[#allocation17_spill] sm:$0xff] }
 0x4cc   : > { %v7514_v53 = vpop.eup %7513  ;;  %v3640_v13 = vadd.f32 1.0, %v7512_v14  ;;  %v5209_v19 = vcombine.low %v5200_v26, %v5207_v18  ;;  %7531 = vrcp.f32 %v3629_v58  ;;  %v11197_v32 = vadd.f32 %v11794_v56, %v10317_v23 }
 0x4cd   : > { %v7516_v60 = vpop.eup %7515  ;;  %v3649_v38 = vadd.f32 1.0, %v7514_v53  ;;  %v5216_v55 = vrot.slane %v5208_v6, %v11738_v11  ;;  %7533 = vrcp.f32 %v3630_v3  ;;  %v11202_v4 = vadd.f32 %v11795_v49, %v10340_v51 }
 0x4ce   : > { %v3650_v42 = vadd.f32 1.0, %v7516_v60  ;;  %v5223_v47 = vrot.slane %v5209_v19, %v11738_v11  ;;  %7535 = vrcp.f32 %v3639_v39  ;;  %v5848_v20 = vmul.f32 -1.442695, %v11167_v54 }
 0x4cf   : > { %v11208_v17 = vadd.f32 %v11796_v57, %v10317_v23  ;;  %v7518_v29 = vpop.eup %7517  ;;  %7537 = vrcp.f32 %v3640_v13  ;;  %v5849_v12 = vmul.f32 -1.442695, %v11182_v2  ;;  %v11218_v7 = vadd.f32 %v11797_v50, %v10340_v51 }
 0x4d0   : > { %v5224_v36 = vcombine.low %v5216_v55, %v5223_v47  ;;  %v7520_v21 = vpop.eup %7519  ;;  %v4550_v23 = vmul.f32 %v7518_v29, %v11798_v45  ;;  %7539 = vrcp.f32 %v3649_v38  ;;  %v5858_v48 = vmul.f32 -1.442695, %v11197_v32 }
 0x4d1   : > { %v7522_v43 = vpop.eup %7521  ;;  %v4559_v46 = vmul.f32 %v7520_v21, %v10914_v44  ;;  %7541 = vrcp.f32 %v3650_v42  ;;  %v5859_v30 = vmul.f32 -1.442695, %v11202_v4  ;;  %v5868_v37 = vmul.f32 -1.442695, %v11208_v17 }
 0x4d2   : > { %v5274_v58 = vsel %vm5272_vm5, %v5224_v36, %v5273_v40  ;;  %v7524_v0 = vpop.eup %7523  ;;  %v4997_v62 = vadd.f32 %v11113_v33, %v4550_v23  ;;  %v4560_v51 = vmul.f32 %v7522_v43, %v10919_v10  ;;  %7543 = vpow2.f32 %v5848_v20 }
 0x4d3   : > { %5275 = vst [vmem:[%s11187_s9] sm:$0xff] %v5274_v58  ;;  %v7526_v3 = vpop.eup %7525  ;;  %v4961_v26 = vadd.f32 %v11116_v27, %v4559_v46  ;;  %v4569_v18 = vmul.f32 %v7524_v0, %v10951_v59  ;;  %7545 = vpow2.f32 %v5849_v12  ;;  %v5869_v44 = vmul.f32 -1.442695, %v11218_v7 }
 0x4d4   : > { %v7528_v14 = vpop.eup %7527  ;;  %v4998_v39 = vadd.f32 %v4997_v62, %v4560_v51  ;;  %v4570_v25 = vmul.f32 %v7526_v3, %v10958_v31  ;;  %7547 = vpow2.f32 %v5858_v48 }
 0x4d5   : > { %v7530_v33 = vpop.eup %7529  ;;  %v4962_v6 = vadd.f32 %v4961_v26, %v4569_v18  ;;  %v4579_v10 = vmul.f32 %v7528_v14, %v10964_v8  ;;  %7549 = vpow2.f32 %v5859_v30 }
 0x4d6   : > { %v7532_v5 = vpop.eup %7531  ;;  %v4999_v53 = vadd.f32 %v4998_v39, %v4570_v25  ;;  %v4580_v13 = vmul.f32 %v7530_v33, %v10970_v34  ;;  %7551 = vpow2.f32 %v5868_v37 }
 0x4d7   : > { %v7534_v27 = vpop.eup %7533  ;;  %v4963_v59 = vadd.f32 %v4962_v6, %v4579_v10  ;;  %v4589_v24 = vmul.f32 %v7532_v5, %v10986_v35  ;;  %7553 = vpow2.f32 %v5869_v44 }
 0x4d8   : > { %v7536_v19 = vpop.eup %7535  ;;  %v5000_v9 = vadd.f32 %v4999_v53, %v4580_v13  ;;  %v4590_v31 = vmul.f32 %v7534_v27, %v10995_v1 }
 0x4d9   : > { %v7538_v60 = vpop.eup %7537  ;;  %v4964_v38 = vadd.f32 %v4963_v59, %v4589_v24  ;;  %v4599_v56 = vmul.f32 %v7536_v19, %v11007_v52 }
 0x4da   : > { %v7540_v8 = vpop.eup %7539  ;;  %v5001_v55 = vadd.f32 %v5000_v9, %v4590_v31  ;;  %v4600_v42 = vmul.f32 %v7538_v60, %v11011_v41 }
 0x4db   : > { %v7542_v49 = vpop.eup %7541  ;;  %v4965_v34 = vadd.f32 %v4964_v38, %v4599_v56  ;;  %v4609_v47 = vmul.f32 %v7540_v8, %v11015_v28 }
 0x4dc   : > { %v7544_v20 = vpop.eup %7543  ;;  %v5002_v57 = vadd.f32 %v5001_v55, %v4600_v42  ;;  %v4610_v35 = vmul.f32 %v7542_v49, %v11019_v15 }
 0x4dd   : > { %v7546_v40 = vpop.eup %7545  ;;  %v4966_v29 = vadd.f32 %v4965_v34, %v4609_v47  ;;  %v3659_v12 = vadd.f32 1.0, %v7544_v20  ;;  %v5276_v47 = vld [vmem:[%s11187_s9 + $0x8] sm:$0x3] }
 0x4de   : > { %v7548_v1 = vpop.eup %7547  ;;  %v5003_v50 = vadd.f32 %v5002_v57, %v4610_v35  ;;  %v3660_v36 = vadd.f32 1.0, %v7546_v40 }
 0x4df   : > { %v7550_v21 = vpop.eup %7549  ;;  %7555 = vrcp.f32 %v3659_v12  ;;  %v3669_v52 = vadd.f32 1.0, %v7548_v1 }
 0x4e0   : > { %v7552_v45 = vpop.eup %7551  ;;  %7557 = vrcp.f32 %v3660_v36  ;;  %v3670_v41 = vadd.f32 1.0, %v7550_v21 }
 0x4e1   : > { %v7554_v23 = vpop.eup %7553  ;;  %7559 = vrcp.f32 %v3669_v52  ;;  %v3679_v48 = vadd.f32 1.0, %v7552_v45 }
 0x4e2   : > { %7561 = vrcp.f32 %v3670_v41  ;;  %v3680_v28 = vadd.f32 1.0, %v7554_v23 }
 0x4e3   : > { %7563 = vrcp.f32 %v3679_v48 }
 0x4e4   : > { %7565 = vrcp.f32 %v3680_v28 }
 0x4e9   : > { %v7556_v15 = vpop.eup %7555 }
 0x4ea   : > { %v7558_v43 = vpop.eup %7557  ;;  %v4619_v46 = vmul.f32 %v7556_v15, %v11167_v54 }
 0x4eb   : > { %v7560_v30 = vpop.eup %7559  ;;  %v4620_v58 = vmul.f32 %v7558_v43, %v11182_v2 }
 0x4ec   : > { %v7562_v0 = vpop.eup %7561  ;;  %v4967_v62 = vadd.f32 %v4966_v29, %v4619_v46  ;;  %v4629_v51 = vmul.f32 %v7560_v30, %v11197_v32 }
 0x4ed   : > { %v7564_v37 = vpop.eup %7563  ;;  %v5004_v3 = vadd.f32 %v5003_v50, %v4620_v58  ;;  %v4630_v26 = vmul.f32 %v7562_v0, %v11202_v4 }
 0x4ee   : > { %v7566_v18 = vpop.eup %7565  ;;  %v4968_v44 = vadd.f32 %v4967_v62, %v4629_v51  ;;  %v4639_v14 = vmul.f32 %v7564_v37, %v11208_v17 }
 0x4ef   : > { %v5005_v39 = vadd.f32 %v5004_v3, %v4630_v26  ;;  %v4640_v25 = vmul.f32 %v7566_v18, %v11218_v7  ;;  %v4642_v7 = vld [vmem:[#allocation2 + $0x8] sm:$0x3] }
 0x4f0   : > { %v4969_v33 = vadd.f32 %v4968_v44, %v4639_v14 }
 0x4f1   : > { %v5006_v54 = vadd.f32 %v5005_v39, %v4640_v25 }
 0x4f2   : > { %v4970_v6 = vrot.slane %v4969_v33, 4 }
 0x4f3   : > { %v5007_v10 = vrot.slane %v5006_v54, 4 }
 0x4f4   : > { %v4971_v2 = vadd.f32 %v4970_v6, %v4969_v33 }
 0x4f5   : > { %v5008_v5 = vadd.f32 %v5007_v10, %v5006_v54 }
 0x4f6   : > { %v4972_v53 = vrot.slane %v4971_v2, 2 }
 0x4f7   : > { %v5009_v13 = vrot.slane %v5008_v5, 2 }
 0x4f8   : > { %v4973_v32 = vadd.f32 %v4972_v53, %v4971_v2 }
 0x4f9   : > { %v5010_v27 = vadd.f32 %v5009_v13, %v5008_v5 }
 0x4fa   : > { %v4974_v59 = vrot.slane %v4973_v32, 1 }
 0x4fb   : > { %v5011_v4 = vrot.slane %v5010_v27, 1 }
 0x4fc   : > { %v4975_v24 = vadd.f32 %v4974_v59, %v4973_v32 }
 0x4fd   : > { %v5012_v19 = vadd.f32 %v5011_v4, %v5010_v27 }
 0x4ff   : > { %v5072_v17 = vcombine.low %v4975_v24, %v5012_v19 }
 0x501   : > { %v5079_v9 = vrot.slane %v5072_v17, %v11738_v11 }
 0x503   : > { %v5086_v31 = vrot.slane %v5079_v9, %v11738_v11 }
 0x505   : > { %v5090_v60 = vadd.f32 %v5086_v31, %v4642_v7 }
 0x507   : > { %5096 = vst.msk [vmem:[#allocation2 + $0x8] sm:$0x3] %vm10770_vm1, %v5090_v60 }
 0x50e   : > { %v5101_v56 = vld [vmem:[#allocation2 + $0x8] sm:$0x3] }
 0x50f   : > { %v5103_v8 = vmul.f32 0.00390625, %v5101_v56 }
 0x511   : > { %v5141_v55 = vrot.slane %v5103_v8, %v11775_v22  ;;  %v5145_v42 = vrot.slane %v5103_v8, %v11776_v16 }
 0x513   : > { %v5874_v49 = vpack.c.bf16 %v5145_v42, %v5141_v55 }
 0x515   : > { %v5232_v34 = vrot.slane %v5874_v49, %v11738_v11 }
 0x517   : > { %v5239_v20 = vrot.slane %v5232_v34, %v11738_v11 }
 0x519   : > { %v5277_v57 = vsel %vm5248_vm10, %v5239_v20, %v5276_v47 }
 0x51a   : > { %5278 = vst [vmem:[%s11187_s9 + $0x8] sm:$0x3] %v5277_v57 }
 0x51b PF: > { %s18_s20 = sadd.s32 1, %s7715_s20   ;;  %s11800_s18 = smov %s7711_s19 }
 0x51c   : > { %p15_p8 = scmp.ge.s32.totalorder %s18_s20, 4   ;;  %s11801_s19 = smov %s11803_s26 }
 0x51e   :  { %17 = sbr.rel (!%p15_p8) target bundleno = 4 (0x4), region = 95 }
 0x525   :  { %5298 = vsyncpa [#allocation4], 1 }
 0x526   :  { %5300 = vsyncpa [#allocation4 + $0x1], 1 }
 0x527   :  { %5301 = vsyncpa [#allocation6], 1 }
 0x528   :  { %5302 = vsyncpa [#allocation9], 1 }

</bundles_post_ra>
